<compile_context>
chip_gen: v7x
topology: tpu7x:2x2x1
jax: 0.10.0
libtpu: 0.0.40
codegen_flags: <defaults>
</compile_context>

<pallas_src>
import numpy as np
import jax
import jax.numpy as jnp
from jax import lax
from jax.experimental import pallas as pl
from jax.experimental.pallas import tpu as pltpu

# ---- model hyper-params (small but consistent with the module: nhead=8, ffn=2048, 2 layers, out=1)
D_MODEL = 128
N_HEADS = 8
HEAD_DIM = D_MODEL // N_HEADS
D_FF = 2048
N_LAYERS = 2
OUT_DIM = 1
LN_EPS = 1e-5
MM_DTYPE = jnp.bfloat16            # MXU operand dtype (f32 accumulation)

WKEYS = ("w_in", "b_in", "wo", "bo", "ln1w", "ln1b",
         "w1", "b1", "w2", "b2", "ln2w", "ln2b")


# ----------------------------- in-kernel helpers ------------------------------
def _layer_norm(x, w, b):
    mu = jnp.mean(x, axis=-1, keepdims=True)
    xc = x - mu
    var = jnp.mean(xc * xc, axis=-1, keepdims=True)
    return xc * lax.rsqrt(var + LN_EPS) * w + b


def _mm(a_f32, w_ref_slice):
    """bf16 x bf16 matmul with f32 accumulation."""
    return jnp.dot(a_f32.astype(MM_DTYPE), w_ref_slice,
                   preferred_element_type=jnp.float32)


# ------------------------------ fused kernel ----------------------------------
def fused_encoder_kernel(x_ref, mask_ref,
                         w_in_ref, b_in_ref, wo_ref, bo_ref,
                         ln1w_ref, ln1b_ref, w1_ref, b1_ref, w2_ref, b2_ref,
                         ln2w_ref, ln2b_ref, wc_ref, bc_ref,
                         out_ref):
    x = x_ref[0]            # (S, D) f32, one batch element
    mask = mask_ref[0]      # (1, S) additive key-padding mask (0 valid / -1e30 pad)
    scale = 1.0 / (HEAD_DIM ** 0.5)

    for l in range(N_LAYERS):                     # static unroll over layers (weights VMEM-resident)
        # fused QKV projection
        qkv = _mm(x, w_in_ref[l]) + b_in_ref[l]   # (S, 3D) f32
        q = qkv[:, 0:D_MODEL] * scale             # scale queries once (not per-head scores)
        k = qkv[:, D_MODEL:2 * D_MODEL]
        v = qkv[:, 2 * D_MODEL:3 * D_MODEL]

        heads = []                                # head outputs stay in registers; single concat below
        for h in range(N_HEADS):                  # static unrolled head loop
            sl = slice(h * HEAD_DIM, (h + 1) * HEAD_DIM)
            qh = q[:, sl].astype(MM_DTYPE)
            kh = k[:, sl].astype(MM_DTYPE)
            vh = v[:, sl].astype(MM_DTYPE)
            # q @ k^T via dot_general (contract last dims; no explicit transpose)
            s = lax.dot_general(qh, kh, (((1,), (1,)), ((), ())),
                                preferred_element_type=jnp.float32)
            s = s + mask
            m = jnp.max(s, axis=-1, keepdims=True)
            e = jnp.exp(s - m)
            p = e * pl.reciprocal(jnp.sum(e, axis=-1, keepdims=True), approx=True)
            heads.append(jnp.dot(p.astype(MM_DTYPE), vh,
                                 preferred_element_type=jnp.float32))
        attn = jnp.concatenate(heads, axis=-1)    # (S, D) f32
        attn = _mm(attn, wo_ref[l]) + bo_ref[l]

        x1 = _layer_norm(x + attn, ln1w_ref[l], ln1b_ref[l])
        h1 = jnp.maximum(_mm(x1, w1_ref[l]) + b1_ref[l], 0.0)
        ff = _mm(h1, w2_ref[l]) + b2_ref[l]
        x = _layer_norm(x1 + ff, ln2w_ref[l], ln2b_ref[l])

    # classifier: wc (1, D) contracted against x (S, D) -> lane-dense (1, S) logits
    logits = lax.dot_general(wc_ref[...], x.astype(MM_DTYPE),
                             (((1,), (1,)), ((), ())),
                             preferred_element_type=jnp.float32) + bc_ref[...]
    out_ref[0] = 1.0 / (1.0 + jnp.exp(-logits))   # Sigmoid (tiny; exact divide)


# ------------------------------ full forward ----------------------------------
def transformer_encoder_forward(x_padded, key_padding_mask, params):
    """x_padded: (B,S,D) with -inf at padded rows; key_padding_mask: (B,S) bool (True=pad)."""
    B, S, _ = x_padded.shape
    add_mask = jnp.where(key_padding_mask, -1e30, 0.0).astype(jnp.float32)[:, None, :]  # (B,1,S)
    # Replace -inf padded rows with zeros; excluded via key-padding mask, outputs don't-care.
    x = jnp.where(key_padding_mask[:, :, None], 0.0, x_padded).astype(jnp.float32)

    def const_spec(a):                             # constant block index -> no re-DMA across grid
        nd = a.ndim
        return pl.BlockSpec(a.shape, lambda b, nd=nd: (0,) * nd)

    weight_args = [params[k] for k in WKEYS] + [params["wc"], params["bc"]]
    in_specs = ([pl.BlockSpec((1, S, D_MODEL), lambda b: (b, 0, 0)),   # x
                 pl.BlockSpec((1, 1, S), lambda b: (b, 0, 0))]         # additive mask
                + [const_spec(a) for a in weight_args])

    out = pl.pallas_call(
        fused_encoder_kernel,
        out_shape=jax.ShapeDtypeStruct((B, 1, S), jnp.float32),        # lane-dense logits slab
        grid=(B,),
        in_specs=in_specs,
        out_specs=pl.BlockSpec((1, 1, S), lambda b: (b, 0, 0)),
        compiler_params=pltpu.CompilerParams(
            dimension_semantics=("parallel",),
            vmem_limit_bytes=32 * 1024 * 1024),
    )(x, add_mask, *weight_args)
    # present PyTorch-shaped (B, S, 1) output; transpose is cheap layout plumbing outside the kernel
    return jnp.transpose(out, (0, 2, 1))


# ------------------------------ pure-JAX reference ----------------------------
def forward_ref(x_padded, key_padding_mask, params):
    add_mask = jnp.where(key_padding_mask, -1e30, 0.0).astype(jnp.float32)[:, None, :]
    x = jnp.where(key_padding_mask[:, :, None], 0.0, x_padded).astype(jnp.float32)
    B, S, D = x.shape
    f32 = lambda a: a.astype(jnp.float32)

    def ln(z, w, b):
        mu = jnp.mean(z, -1, keepdims=True)
        zc = z - mu
        return zc * lax.rsqrt(jnp.mean(zc * zc, -1, keepdims=True) + LN_EPS) * w + b

    for l in range(N_LAYERS):
        qkv = x @ f32(params["w_in"][l]) + params["b_in"][l]
        q, k, v = jnp.split(qkv, 3, axis=-1)
        sh = lambda t: t.reshape(B, S, N_HEADS, HEAD_DIM).transpose(0, 2, 1, 3)
        qh, kh, vh = sh(q), sh(k), sh(v)
        s = jnp.einsum("bhqd,bhkd->bhqk", qh, kh) / (HEAD_DIM ** 0.5)
        s = s + add_mask[:, :, None, :]
        o = jnp.einsum("bhqk,bhkd->bhqd", jax.nn.softmax(s, axis=-1), vh)
        o = o.transpose(0, 2, 1, 3).reshape(B, S, D)
        attn = o @ f32(params["wo"][l]) + params["bo"][l]
        x1 = ln(x + attn, params["ln1w"][l], params["ln1b"][l])
        ff = jax.nn.relu(x1 @ f32(params["w1"][l]) + params["b1"][l]) @ f32(params["w2"][l]) + params["b2"][l]
        x = ln(x1 + ff, params["ln2w"][l], params["ln2b"][l])
    logits = x @ f32(params["wc"]).T + params["bc"][0]
    return jax.nn.sigmoid(logits)


# ------------------------------ parameter init --------------------------------
def init_params(key):
    def n(k, shape, scale=0.02):
        return (scale * jax.random.normal(k, shape)).astype(jnp.float32)

    per_layer = {k: [] for k in WKEYS}
    for _ in range(N_LAYERS):
        key, *ks = jax.random.split(key, 9)
        per_layer["w_in"].append(n(ks[0], (D_MODEL, 3 * D_MODEL)))
        per_layer["b_in"].append(n(ks[1], (1, 3 * D_MODEL)))
        per_layer["wo"].append(n(ks[2], (D_MODEL, D_MODEL)))
        per_layer["bo"].append(n(ks[3], (1, D_MODEL)))
        per_layer["ln1w"].append(jnp.ones((1, D_MODEL), jnp.float32))
        per_layer["ln1b"].append(jnp.zeros((1, D_MODEL), jnp.float32))
        per_layer["w1"].append(n(ks[4], (D_MODEL, D_FF)))
        per_layer["b1"].append(n(ks[5], (1, D_FF)))
        per_layer["w2"].append(n(ks[6], (D_FF, D_MODEL)))
        per_layer["b2"].append(n(ks[7], (1, D_MODEL)))
        per_layer["ln2w"].append(jnp.ones((1, D_MODEL), jnp.float32))
        per_layer["ln2b"].append(jnp.zeros((1, D_MODEL), jnp.float32))
    params = {k: jnp.stack(v, axis=0) for k, v in per_layer.items()}
    # MXU operand weights stored as bf16 (halves weight DMA); biases/LN stay f32.
    for k in ("w_in", "wo", "w1", "w2"):
        params[k] = params[k].astype(MM_DTYPE)
    key, k1 = jax.random.split(key)
    params["wc"] = (0.02 * jax.random.normal(k1, (OUT_DIM, D_MODEL))).astype(MM_DTYPE)  # nn.Linear weight layout
    params["bc"] = jnp.zeros((1, 1), jnp.float32)
    return params
    # TODO(synk): get_loss (weighted BCE) and the unused unknown_mask/position_enc
    # embeddings / put_masked_values are not part of the inference forward path.


# ------------------------------ main -------------------------------------------
if __name__ == "__main__":
    key = jax.random.PRNGKey(0)
    key, kx, kp = jax.random.split(key, 3)

    B, S = 2, 16
    seq_lens = [16, 11]                                    # variable-length "x_unbatched"
    x_full = jax.random.normal(kx, (B, S, D_MODEL), jnp.float32)
    pos = jnp.arange(S)[None, :]
    pad_mask = pos >= jnp.asarray(seq_lens)[:, None]       # (B, S) True at padding
    x_padded = jnp.where(pad_mask[:, :, None], -jnp.inf, x_full)   # pad_sequence(padding_value=-inf)
    key_padding_mask = (x_padded == -jnp.inf)[:, :, 0]

    params = init_params(kp)

    out = transformer_encoder_forward(x_padded, key_padding_mask, params)
    out = jax.block_until_ready(out)

    ref = forward_ref(x_padded, key_padding_mask, params)
    # tolerance accounts for bf16 MXU operands + approx softmax reciprocal (f32 accumulation)
    np.testing.assert_allclose(np.asarray(out), np.asarray(ref), rtol=5e-3, atol=5e-3)

    print("KERNEL_OK")
</pallas_src>

<mosaic_0001>
module attributes {stable_mosaic.version = 11 : i64} {
  func.func @fused_encoder_kernel(%arg0: i32, %arg1: memref<1x16x128xf32, #tpu.memory_space<vmem>>, %arg2: memref<1x1x16xf32, #tpu.memory_space<vmem>>, %arg3: memref<2x128x384xbf16, #tpu.memory_space<vmem>>, %arg4: memref<2x1x384xf32, #tpu.memory_space<vmem>>, %arg5: memref<2x128x128xbf16, #tpu.memory_space<vmem>>, %arg6: memref<2x1x128xf32, #tpu.memory_space<vmem>>, %arg7: memref<2x1x128xf32, #tpu.memory_space<vmem>>, %arg8: memref<2x1x128xf32, #tpu.memory_space<vmem>>, %arg9: memref<2x128x2048xbf16, #tpu.memory_space<vmem>>, %arg10: memref<2x1x2048xf32, #tpu.memory_space<vmem>>, %arg11: memref<2x2048x128xbf16, #tpu.memory_space<vmem>>, %arg12: memref<2x1x128xf32, #tpu.memory_space<vmem>>, %arg13: memref<2x1x128xf32, #tpu.memory_space<vmem>>, %arg14: memref<2x1x128xf32, #tpu.memory_space<vmem>>, %arg15: memref<1x128xbf16, #tpu.memory_space<vmem>>, %arg16: memref<1x1xf32, #tpu.memory_space<vmem>>, %arg17: memref<1x1x16xf32, #tpu.memory_space<vmem>>) attributes {dimension_semantics = [#tpu.dimension_semantics<parallel>], iteration_bounds = array<i64: 2>, scalar_prefetch = 0 : i64, scratch_operands = 0 : i64, tpu.core_type = #tpu.core_type<tc>, window_params = [{transform_indices = @transform_0, window_bounds = array<i64: 1, 16, 128>}, {transform_indices = @transform_1, window_bounds = array<i64: 1, 1, 16>}, {pipeline_mode = #tpu.pipeline_mode<synchronous>, transform_indices = @transform_2, window_bounds = array<i64: 2, 128, 384>}, {pipeline_mode = #tpu.pipeline_mode<synchronous>, transform_indices = @transform_3, window_bounds = array<i64: 2, 1, 384>}, {pipeline_mode = #tpu.pipeline_mode<synchronous>, transform_indices = @transform_4, window_bounds = array<i64: 2, 128, 128>}, {pipeline_mode = #tpu.pipeline_mode<synchronous>, transform_indices = @transform_5, window_bounds = array<i64: 2, 1, 128>}, {pipeline_mode = #tpu.pipeline_mode<synchronous>, transform_indices = @transform_6, window_bounds = array<i64: 2, 1, 128>}, {pipeline_mode = #tpu.pipeline_mode<synchronous>, transform_indices = @transform_7, window_bounds = array<i64: 2, 1, 128>}, {pipeline_mode = #tpu.pipeline_mode<synchronous>, transform_indices = @transform_8, window_bounds = array<i64: 2, 128, 2048>}, {pipeline_mode = #tpu.pipeline_mode<synchronous>, transform_indices = @transform_9, window_bounds = array<i64: 2, 1, 2048>}, {pipeline_mode = #tpu.pipeline_mode<synchronous>, transform_indices = @transform_10, window_bounds = array<i64: 2, 2048, 128>}, {pipeline_mode = #tpu.pipeline_mode<synchronous>, transform_indices = @transform_11, window_bounds = array<i64: 2, 1, 128>}, {pipeline_mode = #tpu.pipeline_mode<synchronous>, transform_indices = @transform_12, window_bounds = array<i64: 2, 1, 128>}, {pipeline_mode = #tpu.pipeline_mode<synchronous>, transform_indices = @transform_13, window_bounds = array<i64: 2, 1, 128>}, {pipeline_mode = #tpu.pipeline_mode<synchronous>, transform_indices = @transform_14, window_bounds = array<i64: 1, 128>}, {pipeline_mode = #tpu.pipeline_mode<synchronous>, transform_indices = @transform_15, window_bounds = array<i64: 1, 1>}, {transform_indices = @transform_16, window_bounds = array<i64: 1, 1, 16>}]} {
    %c0 = arith.constant 0 : index
    %c0_0 = arith.constant 0 : index
    %c0_1 = arith.constant 0 : index
    %0 = vector.load %arg1[%c0, %c0_0, %c0_1] : memref<1x16x128xf32, #tpu.memory_space<vmem>>, vector<1x16x128xf32>
    %1 = vector.shape_cast %0 : vector<1x16x128xf32> to vector<16x128xf32>
    %c0_2 = arith.constant 0 : index
    %c0_3 = arith.constant 0 : index
    %c0_4 = arith.constant 0 : index
    %2 = vector.load %arg2[%c0_2, %c0_3, %c0_4] : memref<1x1x16xf32, #tpu.memory_space<vmem>>, vector<1x1x16xf32>
    %3 = vector.shape_cast %2 : vector<1x1x16xf32> to vector<1x16xf32>
    %c0_5 = arith.constant 0 : index
    %c0_6 = arith.constant 0 : index
    %c0_7 = arith.constant 0 : index
    %4 = vector.load %arg3[%c0_5, %c0_6, %c0_7] : memref<2x128x384xbf16, #tpu.memory_space<vmem>>, vector<1x128x384xbf16>
    %5 = vector.shape_cast %4 : vector<1x128x384xbf16> to vector<128x384xbf16>
    %6 = arith.truncf %1 : vector<16x128xf32> to vector<16x128xbf16>
    %cst = arith.constant dense<0.000000e+00> : vector<16x384xf32>
    %7 = tpu.matmul %6, %5, %cst {dimension_numbers = #tpu.dot_dimension_numbers<[1], [0], [0], [1], [0, 0, 1, 1], [], []>} : vector<16x128xbf16>, vector<128x384xbf16>, vector<16x384xf32> -> vector<16x384xf32>
    %c0_8 = arith.constant 0 : index
    %c0_9 = arith.constant 0 : index
    %c0_10 = arith.constant 0 : index
    %8 = vector.load %arg4[%c0_8, %c0_9, %c0_10] : memref<2x1x384xf32, #tpu.memory_space<vmem>>, vector<1x1x384xf32>
    %9 = vector.shape_cast %8 : vector<1x1x384xf32> to vector<1x384xf32>
    %10 = vector.broadcast %9 : vector<1x384xf32> to vector<16x384xf32>
    %11 = arith.addf %7, %10 : vector<16x384xf32>
    %12 = vector.extract_strided_slice %11 {offsets = [0, 0], sizes = [16, 128], strides = [1, 1]} : vector<16x384xf32> to vector<16x128xf32>
    %cst_11 = arith.constant 2.500000e-01 : f32
    %13 = vector.broadcast %cst_11 : f32 to vector<16x128xf32>
    %14 = arith.mulf %12, %13 : vector<16x128xf32>
    %15 = vector.extract_strided_slice %11 {offsets = [0, 128], sizes = [16, 128], strides = [1, 1]} : vector<16x384xf32> to vector<16x128xf32>
    %16 = vector.extract_strided_slice %11 {offsets = [0, 256], sizes = [16, 128], strides = [1, 1]} : vector<16x384xf32> to vector<16x128xf32>
    %17 = vector.extract_strided_slice %14 {offsets = [0, 0], sizes = [16, 16], strides = [1, 1]} : vector<16x128xf32> to vector<16x16xf32>
    %18 = arith.truncf %17 : vector<16x16xf32> to vector<16x16xbf16>
    %19 = vector.extract_strided_slice %15 {offsets = [0, 0], sizes = [16, 16], strides = [1, 1]} : vector<16x128xf32> to vector<16x16xf32>
    %20 = arith.truncf %19 : vector<16x16xf32> to vector<16x16xbf16>
    %21 = vector.extract_strided_slice %16 {offsets = [0, 0], sizes = [16, 16], strides = [1, 1]} : vector<16x128xf32> to vector<16x16xf32>
    %22 = arith.truncf %21 : vector<16x16xf32> to vector<16x16xbf16>
    %cst_12 = arith.constant dense<0.000000e+00> : vector<16x16xf32>
    %23 = tpu.matmul %18, %20, %cst_12 {dimension_numbers = #tpu.dot_dimension_numbers<[1], [1], [0], [0], [0, 0, 1, 0], [], []>} : vector<16x16xbf16>, vector<16x16xbf16>, vector<16x16xf32> -> vector<16x16xf32>
    %24 = vector.broadcast %3 : vector<1x16xf32> to vector<16x16xf32>
    %25 = arith.addf %23, %24 : vector<16x16xf32>
    %cst_13 = arith.constant dense<0xFF800000> : vector<16xf32>
    %26 = vector.multi_reduction <maximumf>, %25, %cst_13 [1] : vector<16x16xf32> to vector<16xf32>
    %27 = vector.shape_cast %26 : vector<16xf32> to vector<16x1xf32>
    %28 = vector.broadcast %27 : vector<16x1xf32> to vector<16x16xf32>
    %29 = arith.subf %25, %28 : vector<16x16xf32>
    %30 = math.exp %29 : vector<16x16xf32>
    %cst_14 = arith.constant dense<0.000000e+00> : vector<16xf32>
    %31 = vector.multi_reduction <add>, %30, %cst_14 [1] : vector<16x16xf32> to vector<16xf32>
    %32 = vector.shape_cast %31 : vector<16xf32> to vector<16x1xf32>
    %33 = tpu.reciprocal %32 {approx = true} : vector<16x1xf32> -> vector<16x1xf32>
    %34 = vector.broadcast %33 : vector<16x1xf32> to vector<16x16xf32>
    %35 = arith.mulf %30, %34 : vector<16x16xf32>
    %36 = arith.truncf %35 : vector<16x16xf32> to vector<16x16xbf16>
    %cst_15 = arith.constant dense<0.000000e+00> : vector<16x16xf32>
    %37 = tpu.matmul %36, %22, %cst_15 {dimension_numbers = #tpu.dot_dimension_numbers<[1], [0], [0], [1], [0, 0, 1, 1], [], []>} : vector<16x16xbf16>, vector<16x16xbf16>, vector<16x16xf32> -> vector<16x16xf32>
    %38 = vector.extract_strided_slice %14 {offsets = [0, 16], sizes = [16, 16], strides = [1, 1]} : vector<16x128xf32> to vector<16x16xf32>
    %39 = arith.truncf %38 : vector<16x16xf32> to vector<16x16xbf16>
    %40 = vector.extract_strided_slice %15 {offsets = [0, 16], sizes = [16, 16], strides = [1, 1]} : vector<16x128xf32> to vector<16x16xf32>
    %41 = arith.truncf %40 : vector<16x16xf32> to vector<16x16xbf16>
    %42 = vector.extract_strided_slice %16 {offsets = [0, 16], sizes = [16, 16], strides = [1, 1]} : vector<16x128xf32> to vector<16x16xf32>
    %43 = arith.truncf %42 : vector<16x16xf32> to vector<16x16xbf16>
    %cst_16 = arith.constant dense<0.000000e+00> : vector<16x16xf32>
    %44 = tpu.matmul %39, %41, %cst_16 {dimension_numbers = #tpu.dot_dimension_numbers<[1], [1], [0], [0], [0, 0, 1, 0], [], []>} : vector<16x16xbf16>, vector<16x16xbf16>, vector<16x16xf32> -> vector<16x16xf32>
    %45 = vector.broadcast %3 : vector<1x16xf32> to vector<16x16xf32>
    %46 = arith.addf %44, %45 : vector<16x16xf32>
    %cst_17 = arith.constant dense<0xFF800000> : vector<16xf32>
    %47 = vector.multi_reduction <maximumf>, %46, %cst_17 [1] : vector<16x16xf32> to vector<16xf32>
    %48 = vector.shape_cast %47 : vector<16xf32> to vector<16x1xf32>
    %49 = vector.broadcast %48 : vector<16x1xf32> to vector<16x16xf32>
    %50 = arith.subf %46, %49 : vector<16x16xf32>
    %51 = math.exp %50 : vector<16x16xf32>
    %cst_18 = arith.constant dense<0.000000e+00> : vector<16xf32>
    %52 = vector.multi_reduction <add>, %51, %cst_18 [1] : vector<16x16xf32> to vector<16xf32>
    %53 = vector.shape_cast %52 : vector<16xf32> to vector<16x1xf32>
    %54 = tpu.reciprocal %53 {approx = true} : vector<16x1xf32> -> vector<16x1xf32>
    %55 = vector.broadcast %54 : vector<16x1xf32> to vector<16x16xf32>
    %56 = arith.mulf %51, %55 : vector<16x16xf32>
    %57 = arith.truncf %56 : vector<16x16xf32> to vector<16x16xbf16>
    %cst_19 = arith.constant dense<0.000000e+00> : vector<16x16xf32>
    %58 = tpu.matmul %57, %43, %cst_19 {dimension_numbers = #tpu.dot_dimension_numbers<[1], [0], [0], [1], [0, 0, 1, 1], [], []>} : vector<16x16xbf16>, vector<16x16xbf16>, vector<16x16xf32> -> vector<16x16xf32>
    %59 = vector.extract_strided_slice %14 {offsets = [0, 32], sizes = [16, 16], strides = [1, 1]} : vector<16x128xf32> to vector<16x16xf32>
    %60 = arith.truncf %59 : vector<16x16xf32> to vector<16x16xbf16>
    %61 = vector.extract_strided_slice %15 {offsets = [0, 32], sizes = [16, 16], strides = [1, 1]} : vector<16x128xf32> to vector<16x16xf32>
    %62 = arith.truncf %61 : vector<16x16xf32> to vector<16x16xbf16>
    %63 = vector.extract_strided_slice %16 {offsets = [0, 32], sizes = [16, 16], strides = [1, 1]} : vector<16x128xf32> to vector<16x16xf32>
    %64 = arith.truncf %63 : vector<16x16xf32> to vector<16x16xbf16>
    %cst_20 = arith.constant dense<0.000000e+00> : vector<16x16xf32>
    %65 = tpu.matmul %60, %62, %cst_20 {dimension_numbers = #tpu.dot_dimension_numbers<[1], [1], [0], [0], [0, 0, 1, 0], [], []>} : vector<16x16xbf16>, vector<16x16xbf16>, vector<16x16xf32> -> vector<16x16xf32>
    %66 = vector.broadcast %3 : vector<1x16xf32> to vector<16x16xf32>
    %67 = arith.addf %65, %66 : vector<16x16xf32>
    %cst_21 = arith.constant dense<0xFF800000> : vector<16xf32>
    %68 = vector.multi_reduction <maximumf>, %67, %cst_21 [1] : vector<16x16xf32> to vector<16xf32>
    %69 = vector.shape_cast %68 : vector<16xf32> to vector<16x1xf32>
    %70 = vector.broadcast %69 : vector<16x1xf32> to vector<16x16xf32>
    %71 = arith.subf %67, %70 : vector<16x16xf32>
    %72 = math.exp %71 : vector<16x16xf32>
    %cst_22 = arith.constant dense<0.000000e+00> : vector<16xf32>
    %73 = vector.multi_reduction <add>, %72, %cst_22 [1] : vector<16x16xf32> to vector<16xf32>
    %74 = vector.shape_cast %73 : vector<16xf32> to vector<16x1xf32>
    %75 = tpu.reciprocal %74 {approx = true} : vector<16x1xf32> -> vector<16x1xf32>
    %76 = vector.broadcast %75 : vector<16x1xf32> to vector<16x16xf32>
    %77 = arith.mulf %72, %76 : vector<16x16xf32>
    %78 = arith.truncf %77 : vector<16x16xf32> to vector<16x16xbf16>
    %cst_23 = arith.constant dense<0.000000e+00> : vector<16x16xf32>
    %79 = tpu.matmul %78, %64, %cst_23 {dimension_numbers = #tpu.dot_dimension_numbers<[1], [0], [0], [1], [0, 0, 1, 1], [], []>} : vector<16x16xbf16>, vector<16x16xbf16>, vector<16x16xf32> -> vector<16x16xf32>
    %80 = vector.extract_strided_slice %14 {offsets = [0, 48], sizes = [16, 16], strides = [1, 1]} : vector<16x128xf32> to vector<16x16xf32>
    %81 = arith.truncf %80 : vector<16x16xf32> to vector<16x16xbf16>
    %82 = vector.extract_strided_slice %15 {offsets = [0, 48], sizes = [16, 16], strides = [1, 1]} : vector<16x128xf32> to vector<16x16xf32>
    %83 = arith.truncf %82 : vector<16x16xf32> to vector<16x16xbf16>
    %84 = vector.extract_strided_slice %16 {offsets = [0, 48], sizes = [16, 16], strides = [1, 1]} : vector<16x128xf32> to vector<16x16xf32>
    %85 = arith.truncf %84 : vector<16x16xf32> to vector<16x16xbf16>
    %cst_24 = arith.constant dense<0.000000e+00> : vector<16x16xf32>
    %86 = tpu.matmul %81, %83, %cst_24 {dimension_numbers = #tpu.dot_dimension_numbers<[1], [1], [0], [0], [0, 0, 1, 0], [], []>} : vector<16x16xbf16>, vector<16x16xbf16>, vector<16x16xf32> -> vector<16x16xf32>
    %87 = vector.broadcast %3 : vector<1x16xf32> to vector<16x16xf32>
    %88 = arith.addf %86, %87 : vector<16x16xf32>
    %cst_25 = arith.constant dense<0xFF800000> : vector<16xf32>
    %89 = vector.multi_reduction <maximumf>, %88, %cst_25 [1] : vector<16x16xf32> to vector<16xf32>
    %90 = vector.shape_cast %89 : vector<16xf32> to vector<16x1xf32>
    %91 = vector.broadcast %90 : vector<16x1xf32> to vector<16x16xf32>
    %92 = arith.subf %88, %91 : vector<16x16xf32>
    %93 = math.exp %92 : vector<16x16xf32>
    %cst_26 = arith.constant dense<0.000000e+00> : vector<16xf32>
    %94 = vector.multi_reduction <add>, %93, %cst_26 [1] : vector<16x16xf32> to vector<16xf32>
    %95 = vector.shape_cast %94 : vector<16xf32> to vector<16x1xf32>
    %96 = tpu.reciprocal %95 {approx = true} : vector<16x1xf32> -> vector<16x1xf32>
    %97 = vector.broadcast %96 : vector<16x1xf32> to vector<16x16xf32>
    %98 = arith.mulf %93, %97 : vector<16x16xf32>
    %99 = arith.truncf %98 : vector<16x16xf32> to vector<16x16xbf16>
    %cst_27 = arith.constant dense<0.000000e+00> : vector<16x16xf32>
    %100 = tpu.matmul %99, %85, %cst_27 {dimension_numbers = #tpu.dot_dimension_numbers<[1], [0], [0], [1], [0, 0, 1, 1], [], []>} : vector<16x16xbf16>, vector<16x16xbf16>, vector<16x16xf32> -> vector<16x16xf32>
    %101 = vector.extract_strided_slice %14 {offsets = [0, 64], sizes = [16, 16], strides = [1, 1]} : vector<16x128xf32> to vector<16x16xf32>
    %102 = arith.truncf %101 : vector<16x16xf32> to vector<16x16xbf16>
    %103 = vector.extract_strided_slice %15 {offsets = [0, 64], sizes = [16, 16], strides = [1, 1]} : vector<16x128xf32> to vector<16x16xf32>
    %104 = arith.truncf %103 : vector<16x16xf32> to vector<16x16xbf16>
    %105 = vector.extract_strided_slice %16 {offsets = [0, 64], sizes = [16, 16], strides = [1, 1]} : vector<16x128xf32> to vector<16x16xf32>
    %106 = arith.truncf %105 : vector<16x16xf32> to vector<16x16xbf16>
    %cst_28 = arith.constant dense<0.000000e+00> : vector<16x16xf32>
    %107 = tpu.matmul %102, %104, %cst_28 {dimension_numbers = #tpu.dot_dimension_numbers<[1], [1], [0], [0], [0, 0, 1, 0], [], []>} : vector<16x16xbf16>, vector<16x16xbf16>, vector<16x16xf32> -> vector<16x16xf32>
    %108 = vector.broadcast %3 : vector<1x16xf32> to vector<16x16xf32>
    %109 = arith.addf %107, %108 : vector<16x16xf32>
    %cst_29 = arith.constant dense<0xFF800000> : vector<16xf32>
    %110 = vector.multi_reduction <maximumf>, %109, %cst_29 [1] : vector<16x16xf32> to vector<16xf32>
    %111 = vector.shape_cast %110 : vector<16xf32> to vector<16x1xf32>
    %112 = vector.broadcast %111 : vector<16x1xf32> to vector<16x16xf32>
    %113 = arith.subf %109, %112 : vector<16x16xf32>
    %114 = math.exp %113 : vector<16x16xf32>
    %cst_30 = arith.constant dense<0.000000e+00> : vector<16xf32>
    %115 = vector.multi_reduction <add>, %114, %cst_30 [1] : vector<16x16xf32> to vector<16xf32>
    %116 = vector.shape_cast %115 : vector<16xf32> to vector<16x1xf32>
    %117 = tpu.reciprocal %116 {approx = true} : vector<16x1xf32> -> vector<16x1xf32>
    %118 = vector.broadcast %117 : vector<16x1xf32> to vector<16x16xf32>
    %119 = arith.mulf %114, %118 : vector<16x16xf32>
    %120 = arith.truncf %119 : vector<16x16xf32> to vector<16x16xbf16>
    %cst_31 = arith.constant dense<0.000000e+00> : vector<16x16xf32>
    %121 = tpu.matmul %120, %106, %cst_31 {dimension_numbers = #tpu.dot_dimension_numbers<[1], [0], [0], [1], [0, 0, 1, 1], [], []>} : vector<16x16xbf16>, vector<16x16xbf16>, vector<16x16xf32> -> vector<16x16xf32>
    %122 = vector.extract_strided_slice %14 {offsets = [0, 80], sizes = [16, 16], strides = [1, 1]} : vector<16x128xf32> to vector<16x16xf32>
    %123 = arith.truncf %122 : vector<16x16xf32> to vector<16x16xbf16>
    %124 = vector.extract_strided_slice %15 {offsets = [0, 80], sizes = [16, 16], strides = [1, 1]} : vector<16x128xf32> to vector<16x16xf32>
    %125 = arith.truncf %124 : vector<16x16xf32> to vector<16x16xbf16>
    %126 = vector.extract_strided_slice %16 {offsets = [0, 80], sizes = [16, 16], strides = [1, 1]} : vector<16x128xf32> to vector<16x16xf32>
    %127 = arith.truncf %126 : vector<16x16xf32> to vector<16x16xbf16>
    %cst_32 = arith.constant dense<0.000000e+00> : vector<16x16xf32>
    %128 = tpu.matmul %123, %125, %cst_32 {dimension_numbers = #tpu.dot_dimension_numbers<[1], [1], [0], [0], [0, 0, 1, 0], [], []>} : vector<16x16xbf16>, vector<16x16xbf16>, vector<16x16xf32> -> vector<16x16xf32>
    %129 = vector.broadcast %3 : vector<1x16xf32> to vector<16x16xf32>
    %130 = arith.addf %128, %129 : vector<16x16xf32>
    %cst_33 = arith.constant dense<0xFF800000> : vector<16xf32>
    %131 = vector.multi_reduction <maximumf>, %130, %cst_33 [1] : vector<16x16xf32> to vector<16xf32>
    %132 = vector.shape_cast %131 : vector<16xf32> to vector<16x1xf32>
    %133 = vector.broadcast %132 : vector<16x1xf32> to vector<16x16xf32>
    %134 = arith.subf %130, %133 : vector<16x16xf32>
    %135 = math.exp %134 : vector<16x16xf32>
    %cst_34 = arith.constant dense<0.000000e+00> : vector<16xf32>
    %136 = vector.multi_reduction <add>, %135, %cst_34 [1] : vector<16x16xf32> to vector<16xf32>
    %137 = vector.shape_cast %136 : vector<16xf32> to vector<16x1xf32>
    %138 = tpu.reciprocal %137 {approx = true} : vector<16x1xf32> -> vector<16x1xf32>
    %139 = vector.broadcast %138 : vector<16x1xf32> to vector<16x16xf32>
    %140 = arith.mulf %135, %139 : vector<16x16xf32>
    %141 = arith.truncf %140 : vector<16x16xf32> to vector<16x16xbf16>
    %cst_35 = arith.constant dense<0.000000e+00> : vector<16x16xf32>
    %142 = tpu.matmul %141, %127, %cst_35 {dimension_numbers = #tpu.dot_dimension_numbers<[1], [0], [0], [1], [0, 0, 1, 1], [], []>} : vector<16x16xbf16>, vector<16x16xbf16>, vector<16x16xf32> -> vector<16x16xf32>
    %143 = vector.extract_strided_slice %14 {offsets = [0, 96], sizes = [16, 16], strides = [1, 1]} : vector<16x128xf32> to vector<16x16xf32>
    %144 = arith.truncf %143 : vector<16x16xf32> to vector<16x16xbf16>
    %145 = vector.extract_strided_slice %15 {offsets = [0, 96], sizes = [16, 16], strides = [1, 1]} : vector<16x128xf32> to vector<16x16xf32>
    %146 = arith.truncf %145 : vector<16x16xf32> to vector<16x16xbf16>
    %147 = vector.extract_strided_slice %16 {offsets = [0, 96], sizes = [16, 16], strides = [1, 1]} : vector<16x128xf32> to vector<16x16xf32>
    %148 = arith.truncf %147 : vector<16x16xf32> to vector<16x16xbf16>
    %cst_36 = arith.constant dense<0.000000e+00> : vector<16x16xf32>
    %149 = tpu.matmul %144, %146, %cst_36 {dimension_numbers = #tpu.dot_dimension_numbers<[1], [1], [0], [0], [0, 0, 1, 0], [], []>} : vector<16x16xbf16>, vector<16x16xbf16>, vector<16x16xf32> -> vector<16x16xf32>
    %150 = vector.broadcast %3 : vector<1x16xf32> to vector<16x16xf32>
    %151 = arith.addf %149, %150 : vector<16x16xf32>
    %cst_37 = arith.constant dense<0xFF800000> : vector<16xf32>
    %152 = vector.multi_reduction <maximumf>, %151, %cst_37 [1] : vector<16x16xf32> to vector<16xf32>
    %153 = vector.shape_cast %152 : vector<16xf32> to vector<16x1xf32>
    %154 = vector.broadcast %153 : vector<16x1xf32> to vector<16x16xf32>
    %155 = arith.subf %151, %154 : vector<16x16xf32>
    %156 = math.exp %155 : vector<16x16xf32>
    %cst_38 = arith.constant dense<0.000000e+00> : vector<16xf32>
    %157 = vector.multi_reduction <add>, %156, %cst_38 [1] : vector<16x16xf32> to vector<16xf32>
    %158 = vector.shape_cast %157 : vector<16xf32> to vector<16x1xf32>
    %159 = tpu.reciprocal %158 {approx = true} : vector<16x1xf32> -> vector<16x1xf32>
    %160 = vector.broadcast %159 : vector<16x1xf32> to vector<16x16xf32>
    %161 = arith.mulf %156, %160 : vector<16x16xf32>
    %162 = arith.truncf %161 : vector<16x16xf32> to vector<16x16xbf16>
    %cst_39 = arith.constant dense<0.000000e+00> : vector<16x16xf32>
    %163 = tpu.matmul %162, %148, %cst_39 {dimension_numbers = #tpu.dot_dimension_numbers<[1], [0], [0], [1], [0, 0, 1, 1], [], []>} : vector<16x16xbf16>, vector<16x16xbf16>, vector<16x16xf32> -> vector<16x16xf32>
    %164 = vector.extract_strided_slice %14 {offsets = [0, 112], sizes = [16, 16], strides = [1, 1]} : vector<16x128xf32> to vector<16x16xf32>
    %165 = arith.truncf %164 : vector<16x16xf32> to vector<16x16xbf16>
    %166 = vector.extract_strided_slice %15 {offsets = [0, 112], sizes = [16, 16], strides = [1, 1]} : vector<16x128xf32> to vector<16x16xf32>
    %167 = arith.truncf %166 : vector<16x16xf32> to vector<16x16xbf16>
    %168 = vector.extract_strided_slice %16 {offsets = [0, 112], sizes = [16, 16], strides = [1, 1]} : vector<16x128xf32> to vector<16x16xf32>
    %169 = arith.truncf %168 : vector<16x16xf32> to vector<16x16xbf16>
    %cst_40 = arith.constant dense<0.000000e+00> : vector<16x16xf32>
    %170 = tpu.matmul %165, %167, %cst_40 {dimension_numbers = #tpu.dot_dimension_numbers<[1], [1], [0], [0], [0, 0, 1, 0], [], []>} : vector<16x16xbf16>, vector<16x16xbf16>, vector<16x16xf32> -> vector<16x16xf32>
    %171 = vector.broadcast %3 : vector<1x16xf32> to vector<16x16xf32>
    %172 = arith.addf %170, %171 : vector<16x16xf32>
    %cst_41 = arith.constant dense<0xFF800000> : vector<16xf32>
    %173 = vector.multi_reduction <maximumf>, %172, %cst_41 [1] : vector<16x16xf32> to vector<16xf32>
    %174 = vector.shape_cast %173 : vector<16xf32> to vector<16x1xf32>
    %175 = vector.broadcast %174 : vector<16x1xf32> to vector<16x16xf32>
    %176 = arith.subf %172, %175 : vector<16x16xf32>
    %177 = math.exp %176 : vector<16x16xf32>
    %cst_42 = arith.constant dense<0.000000e+00> : vector<16xf32>
    %178 = vector.multi_reduction <add>, %177, %cst_42 [1] : vector<16x16xf32> to vector<16xf32>
    %179 = vector.shape_cast %178 : vector<16xf32> to vector<16x1xf32>
    %180 = tpu.reciprocal %179 {approx = true} : vector<16x1xf32> -> vector<16x1xf32>
    %181 = vector.broadcast %180 : vector<16x1xf32> to vector<16x16xf32>
    %182 = arith.mulf %177, %181 : vector<16x16xf32>
    %183 = arith.truncf %182 : vector<16x16xf32> to vector<16x16xbf16>
    %cst_43 = arith.constant dense<0.000000e+00> : vector<16x16xf32>
    %184 = tpu.matmul %183, %169, %cst_43 {dimension_numbers = #tpu.dot_dimension_numbers<[1], [0], [0], [1], [0, 0, 1, 1], [], []>} : vector<16x16xbf16>, vector<16x16xbf16>, vector<16x16xf32> -> vector<16x16xf32>
    %185 = tpu.concatenate %37, %58, %79, %100, %121, %142, %163, %184 in 1 : vector<16x16xf32>, vector<16x16xf32>, vector<16x16xf32>, vector<16x16xf32>, vector<16x16xf32>, vector<16x16xf32>, vector<16x16xf32>, vector<16x16xf32> -> vector<16x128xf32>
    %c0_44 = arith.constant 0 : index
    %c0_45 = arith.constant 0 : index
    %c0_46 = arith.constant 0 : index
    %186 = vector.load %arg5[%c0_44, %c0_45, %c0_46] : memref<2x128x128xbf16, #tpu.memory_space<vmem>>, vector<1x128x128xbf16>
    %187 = vector.shape_cast %186 : vector<1x128x128xbf16> to vector<128x128xbf16>
    %188 = arith.truncf %185 : vector<16x128xf32> to vector<16x128xbf16>
    %cst_47 = arith.constant dense<0.000000e+00> : vector<16x128xf32>
    %189 = tpu.matmul %188, %187, %cst_47 {dimension_numbers = #tpu.dot_dimension_numbers<[1], [0], [0], [1], [0, 0, 1, 1], [], []>} : vector<16x128xbf16>, vector<128x128xbf16>, vector<16x128xf32> -> vector<16x128xf32>
    %c0_48 = arith.constant 0 : index
    %c0_49 = arith.constant 0 : index
    %c0_50 = arith.constant 0 : index
    %190 = vector.load %arg6[%c0_48, %c0_49, %c0_50] : memref<2x1x128xf32, #tpu.memory_space<vmem>>, vector<1x1x128xf32>
    %191 = vector.shape_cast %190 : vector<1x1x128xf32> to vector<1x128xf32>
    %192 = vector.broadcast %191 : vector<1x128xf32> to vector<16x128xf32>
    %193 = arith.addf %189, %192 : vector<16x128xf32>
    %194 = arith.addf %1, %193 : vector<16x128xf32>
    %c0_51 = arith.constant 0 : index
    %c0_52 = arith.constant 0 : index
    %c0_53 = arith.constant 0 : index
    %195 = vector.load %arg7[%c0_51, %c0_52, %c0_53] : memref<2x1x128xf32, #tpu.memory_space<vmem>>, vector<1x1x128xf32>
    %196 = vector.shape_cast %195 : vector<1x1x128xf32> to vector<1x128xf32>
    %c0_54 = arith.constant 0 : index
    %c0_55 = arith.constant 0 : index
    %c0_56 = arith.constant 0 : index
    %197 = vector.load %arg8[%c0_54, %c0_55, %c0_56] : memref<2x1x128xf32, #tpu.memory_space<vmem>>, vector<1x1x128xf32>
    %198 = vector.shape_cast %197 : vector<1x1x128xf32> to vector<1x128xf32>
    %cst_57 = arith.constant dense<0.000000e+00> : vector<16xf32>
    %199 = vector.multi_reduction <add>, %194, %cst_57 [1] : vector<16x128xf32> to vector<16xf32>
    %200 = vector.shape_cast %199 : vector<16xf32> to vector<16x1xf32>
    %cst_58 = arith.constant 1.280000e+02 : f32
    %201 = vector.broadcast %cst_58 : f32 to vector<16x1xf32>
    %202 = arith.divf %200, %201 : vector<16x1xf32>
    %203 = vector.broadcast %202 : vector<16x1xf32> to vector<16x128xf32>
    %204 = arith.subf %194, %203 : vector<16x128xf32>
    %205 = arith.mulf %204, %204 : vector<16x128xf32>
    %cst_59 = arith.constant dense<0.000000e+00> : vector<16xf32>
    %206 = vector.multi_reduction <add>, %205, %cst_59 [1] : vector<16x128xf32> to vector<16xf32>
    %207 = vector.shape_cast %206 : vector<16xf32> to vector<16x1xf32>
    %cst_60 = arith.constant 1.280000e+02 : f32
    %208 = vector.broadcast %cst_60 : f32 to vector<16x1xf32>
    %209 = arith.divf %207, %208 : vector<16x1xf32>
    %cst_61 = arith.constant 9.99999974E-6 : f32
    %210 = vector.broadcast %cst_61 : f32 to vector<16x1xf32>
    %211 = arith.addf %209, %210 : vector<16x1xf32>
    %212 = math.rsqrt %211 : vector<16x1xf32>
    %213 = vector.broadcast %212 : vector<16x1xf32> to vector<16x128xf32>
    %214 = arith.mulf %204, %213 : vector<16x128xf32>
    %215 = vector.broadcast %196 : vector<1x128xf32> to vector<16x128xf32>
    %216 = arith.mulf %214, %215 : vector<16x128xf32>
    %217 = vector.broadcast %198 : vector<1x128xf32> to vector<16x128xf32>
    %218 = arith.addf %216, %217 : vector<16x128xf32>
    %c0_62 = arith.constant 0 : index
    %c0_63 = arith.constant 0 : index
    %c0_64 = arith.constant 0 : index
    %219 = vector.load %arg9[%c0_62, %c0_63, %c0_64] : memref<2x128x2048xbf16, #tpu.memory_space<vmem>>, vector<1x128x2048xbf16>
    %220 = vector.shape_cast %219 : vector<1x128x2048xbf16> to vector<128x2048xbf16>
    %221 = arith.truncf %218 : vector<16x128xf32> to vector<16x128xbf16>
    %cst_65 = arith.constant dense<0.000000e+00> : vector<16x2048xf32>
    %222 = tpu.matmul %221, %220, %cst_65 {dimension_numbers = #tpu.dot_dimension_numbers<[1], [0], [0], [1], [0, 0, 1, 1], [], []>} : vector<16x128xbf16>, vector<128x2048xbf16>, vector<16x2048xf32> -> vector<16x2048xf32>
    %c0_66 = arith.constant 0 : index
    %c0_67 = arith.constant 0 : index
    %c0_68 = arith.constant 0 : index
    %223 = vector.load %arg10[%c0_66, %c0_67, %c0_68] : memref<2x1x2048xf32, #tpu.memory_space<vmem>>, vector<1x1x2048xf32>
    %224 = vector.shape_cast %223 : vector<1x1x2048xf32> to vector<1x2048xf32>
    %225 = vector.broadcast %224 : vector<1x2048xf32> to vector<16x2048xf32>
    %226 = arith.addf %222, %225 : vector<16x2048xf32>
    %cst_69 = arith.constant 0.000000e+00 : f32
    %227 = vector.broadcast %cst_69 : f32 to vector<16x2048xf32>
    %228 = arith.maximumf %226, %227 : vector<16x2048xf32>
    %c0_70 = arith.constant 0 : index
    %c0_71 = arith.constant 0 : index
    %c0_72 = arith.constant 0 : index
    %229 = vector.load %arg11[%c0_70, %c0_71, %c0_72] : memref<2x2048x128xbf16, #tpu.memory_space<vmem>>, vector<1x2048x128xbf16>
    %230 = vector.shape_cast %229 : vector<1x2048x128xbf16> to vector<2048x128xbf16>
    %231 = arith.truncf %228 : vector<16x2048xf32> to vector<16x2048xbf16>
    %cst_73 = arith.constant dense<0.000000e+00> : vector<16x128xf32>
    %232 = tpu.matmul %231, %230, %cst_73 {dimension_numbers = #tpu.dot_dimension_numbers<[1], [0], [0], [1], [0, 0, 1, 1], [], []>} : vector<16x2048xbf16>, vector<2048x128xbf16>, vector<16x128xf32> -> vector<16x128xf32>
    %c0_74 = arith.constant 0 : index
    %c0_75 = arith.constant 0 : index
    %c0_76 = arith.constant 0 : index
    %233 = vector.load %arg12[%c0_74, %c0_75, %c0_76] : memref<2x1x128xf32, #tpu.memory_space<vmem>>, vector<1x1x128xf32>
    %234 = vector.shape_cast %233 : vector<1x1x128xf32> to vector<1x128xf32>
    %235 = vector.broadcast %234 : vector<1x128xf32> to vector<16x128xf32>
    %236 = arith.addf %232, %235 : vector<16x128xf32>
    %237 = arith.addf %218, %236 : vector<16x128xf32>
    %c0_77 = arith.constant 0 : index
    %c0_78 = arith.constant 0 : index
    %c0_79 = arith.constant 0 : index
    %238 = vector.load %arg13[%c0_77, %c0_78, %c0_79] : memref<2x1x128xf32, #tpu.memory_space<vmem>>, vector<1x1x128xf32>
    %239 = vector.shape_cast %238 : vector<1x1x128xf32> to vector<1x128xf32>
    %c0_80 = arith.constant 0 : index
    %c0_81 = arith.constant 0 : index
    %c0_82 = arith.constant 0 : index
    %240 = vector.load %arg14[%c0_80, %c0_81, %c0_82] : memref<2x1x128xf32, #tpu.memory_space<vmem>>, vector<1x1x128xf32>
    %241 = vector.shape_cast %240 : vector<1x1x128xf32> to vector<1x128xf32>
    %cst_83 = arith.constant dense<0.000000e+00> : vector<16xf32>
    %242 = vector.multi_reduction <add>, %237, %cst_83 [1] : vector<16x128xf32> to vector<16xf32>
    %243 = vector.shape_cast %242 : vector<16xf32> to vector<16x1xf32>
    %cst_84 = arith.constant 1.280000e+02 : f32
    %244 = vector.broadcast %cst_84 : f32 to vector<16x1xf32>
    %245 = arith.divf %243, %244 : vector<16x1xf32>
    %246 = vector.broadcast %245 : vector<16x1xf32> to vector<16x128xf32>
    %247 = arith.subf %237, %246 : vector<16x128xf32>
    %248 = arith.mulf %247, %247 : vector<16x128xf32>
    %cst_85 = arith.constant dense<0.000000e+00> : vector<16xf32>
    %249 = vector.multi_reduction <add>, %248, %cst_85 [1] : vector<16x128xf32> to vector<16xf32>
    %250 = vector.shape_cast %249 : vector<16xf32> to vector<16x1xf32>
    %cst_86 = arith.constant 1.280000e+02 : f32
    %251 = vector.broadcast %cst_86 : f32 to vector<16x1xf32>
    %252 = arith.divf %250, %251 : vector<16x1xf32>
    %cst_87 = arith.constant 9.99999974E-6 : f32
    %253 = vector.broadcast %cst_87 : f32 to vector<16x1xf32>
    %254 = arith.addf %252, %253 : vector<16x1xf32>
    %255 = math.rsqrt %254 : vector<16x1xf32>
    %256 = vector.broadcast %255 : vector<16x1xf32> to vector<16x128xf32>
    %257 = arith.mulf %247, %256 : vector<16x128xf32>
    %258 = vector.broadcast %239 : vector<1x128xf32> to vector<16x128xf32>
    %259 = arith.mulf %257, %258 : vector<16x128xf32>
    %260 = vector.broadcast %241 : vector<1x128xf32> to vector<16x128xf32>
    %261 = arith.addf %259, %260 : vector<16x128xf32>
    %c1 = arith.constant 1 : index
    %c0_88 = arith.constant 0 : index
    %c0_89 = arith.constant 0 : index
    %262 = vector.load %arg3[%c1, %c0_88, %c0_89] : memref<2x128x384xbf16, #tpu.memory_space<vmem>>, vector<1x128x384xbf16>
    %263 = vector.shape_cast %262 : vector<1x128x384xbf16> to vector<128x384xbf16>
    %264 = arith.truncf %261 : vector<16x128xf32> to vector<16x128xbf16>
    %cst_90 = arith.constant dense<0.000000e+00> : vector<16x384xf32>
    %265 = tpu.matmul %264, %263, %cst_90 {dimension_numbers = #tpu.dot_dimension_numbers<[1], [0], [0], [1], [0, 0, 1, 1], [], []>} : vector<16x128xbf16>, vector<128x384xbf16>, vector<16x384xf32> -> vector<16x384xf32>
    %c1_91 = arith.constant 1 : index
    %c0_92 = arith.constant 0 : index
    %c0_93 = arith.constant 0 : index
    %266 = vector.load %arg4[%c1_91, %c0_92, %c0_93] : memref<2x1x384xf32, #tpu.memory_space<vmem>>, vector<1x1x384xf32>
    %267 = vector.shape_cast %266 : vector<1x1x384xf32> to vector<1x384xf32>
    %268 = vector.broadcast %267 : vector<1x384xf32> to vector<16x384xf32>
    %269 = arith.addf %265, %268 : vector<16x384xf32>
    %270 = vector.extract_strided_slice %269 {offsets = [0, 0], sizes = [16, 128], strides = [1, 1]} : vector<16x384xf32> to vector<16x128xf32>
    %cst_94 = arith.constant 2.500000e-01 : f32
    %271 = vector.broadcast %cst_94 : f32 to vector<16x128xf32>
    %272 = arith.mulf %270, %271 : vector<16x128xf32>
    %273 = vector.extract_strided_slice %269 {offsets = [0, 128], sizes = [16, 128], strides = [1, 1]} : vector<16x384xf32> to vector<16x128xf32>
    %274 = vector.extract_strided_slice %269 {offsets = [0, 256], sizes = [16, 128], strides = [1, 1]} : vector<16x384xf32> to vector<16x128xf32>
    %275 = vector.extract_strided_slice %272 {offsets = [0, 0], sizes = [16, 16], strides = [1, 1]} : vector<16x128xf32> to vector<16x16xf32>
    %276 = arith.truncf %275 : vector<16x16xf32> to vector<16x16xbf16>
    %277 = vector.extract_strided_slice %273 {offsets = [0, 0], sizes = [16, 16], strides = [1, 1]} : vector<16x128xf32> to vector<16x16xf32>
    %278 = arith.truncf %277 : vector<16x16xf32> to vector<16x16xbf16>
    %279 = vector.extract_strided_slice %274 {offsets = [0, 0], sizes = [16, 16], strides = [1, 1]} : vector<16x128xf32> to vector<16x16xf32>
    %280 = arith.truncf %279 : vector<16x16xf32> to vector<16x16xbf16>
    %cst_95 = arith.constant dense<0.000000e+00> : vector<16x16xf32>
    %281 = tpu.matmul %276, %278, %cst_95 {dimension_numbers = #tpu.dot_dimension_numbers<[1], [1], [0], [0], [0, 0, 1, 0], [], []>} : vector<16x16xbf16>, vector<16x16xbf16>, vector<16x16xf32> -> vector<16x16xf32>
    %282 = vector.broadcast %3 : vector<1x16xf32> to vector<16x16xf32>
    %283 = arith.addf %281, %282 : vector<16x16xf32>
    %cst_96 = arith.constant dense<0xFF800000> : vector<16xf32>
    %284 = vector.multi_reduction <maximumf>, %283, %cst_96 [1] : vector<16x16xf32> to vector<16xf32>
    %285 = vector.shape_cast %284 : vector<16xf32> to vector<16x1xf32>
    %286 = vector.broadcast %285 : vector<16x1xf32> to vector<16x16xf32>
    %287 = arith.subf %283, %286 : vector<16x16xf32>
    %288 = math.exp %287 : vector<16x16xf32>
    %cst_97 = arith.constant dense<0.000000e+00> : vector<16xf32>
    %289 = vector.multi_reduction <add>, %288, %cst_97 [1] : vector<16x16xf32> to vector<16xf32>
    %290 = vector.shape_cast %289 : vector<16xf32> to vector<16x1xf32>
    %291 = tpu.reciprocal %290 {approx = true} : vector<16x1xf32> -> vector<16x1xf32>
    %292 = vector.broadcast %291 : vector<16x1xf32> to vector<16x16xf32>
    %293 = arith.mulf %288, %292 : vector<16x16xf32>
    %294 = arith.truncf %293 : vector<16x16xf32> to vector<16x16xbf16>
    %cst_98 = arith.constant dense<0.000000e+00> : vector<16x16xf32>
    %295 = tpu.matmul %294, %280, %cst_98 {dimension_numbers = #tpu.dot_dimension_numbers<[1], [0], [0], [1], [0, 0, 1, 1], [], []>} : vector<16x16xbf16>, vector<16x16xbf16>, vector<16x16xf32> -> vector<16x16xf32>
    %296 = vector.extract_strided_slice %272 {offsets = [0, 16], sizes = [16, 16], strides = [1, 1]} : vector<16x128xf32> to vector<16x16xf32>
    %297 = arith.truncf %296 : vector<16x16xf32> to vector<16x16xbf16>
    %298 = vector.extract_strided_slice %273 {offsets = [0, 16], sizes = [16, 16], strides = [1, 1]} : vector<16x128xf32> to vector<16x16xf32>
    %299 = arith.truncf %298 : vector<16x16xf32> to vector<16x16xbf16>
    %300 = vector.extract_strided_slice %274 {offsets = [0, 16], sizes = [16, 16], strides = [1, 1]} : vector<16x128xf32> to vector<16x16xf32>
    %301 = arith.truncf %300 : vector<16x16xf32> to vector<16x16xbf16>
    %cst_99 = arith.constant dense<0.000000e+00> : vector<16x16xf32>
    %302 = tpu.matmul %297, %299, %cst_99 {dimension_numbers = #tpu.dot_dimension_numbers<[1], [1], [0], [0], [0, 0, 1, 0], [], []>} : vector<16x16xbf16>, vector<16x16xbf16>, vector<16x16xf32> -> vector<16x16xf32>
    %303 = vector.broadcast %3 : vector<1x16xf32> to vector<16x16xf32>
    %304 = arith.addf %302, %303 : vector<16x16xf32>
    %cst_100 = arith.constant dense<0xFF800000> : vector<16xf32>
    %305 = vector.multi_reduction <maximumf>, %304, %cst_100 [1] : vector<16x16xf32> to vector<16xf32>
    %306 = vector.shape_cast %305 : vector<16xf32> to vector<16x1xf32>
    %307 = vector.broadcast %306 : vector<16x1xf32> to vector<16x16xf32>
    %308 = arith.subf %304, %307 : vector<16x16xf32>
    %309 = math.exp %308 : vector<16x16xf32>
    %cst_101 = arith.constant dense<0.000000e+00> : vector<16xf32>
    %310 = vector.multi_reduction <add>, %309, %cst_101 [1] : vector<16x16xf32> to vector<16xf32>
    %311 = vector.shape_cast %310 : vector<16xf32> to vector<16x1xf32>
    %312 = tpu.reciprocal %311 {approx = true} : vector<16x1xf32> -> vector<16x1xf32>
    %313 = vector.broadcast %312 : vector<16x1xf32> to vector<16x16xf32>
    %314 = arith.mulf %309, %313 : vector<16x16xf32>
    %315 = arith.truncf %314 : vector<16x16xf32> to vector<16x16xbf16>
    %cst_102 = arith.constant dense<0.000000e+00> : vector<16x16xf32>
    %316 = tpu.matmul %315, %301, %cst_102 {dimension_numbers = #tpu.dot_dimension_numbers<[1], [0], [0], [1], [0, 0, 1, 1], [], []>} : vector<16x16xbf16>, vector<16x16xbf16>, vector<16x16xf32> -> vector<16x16xf32>
    %317 = vector.extract_strided_slice %272 {offsets = [0, 32], sizes = [16, 16], strides = [1, 1]} : vector<16x128xf32> to vector<16x16xf32>
    %318 = arith.truncf %317 : vector<16x16xf32> to vector<16x16xbf16>
    %319 = vector.extract_strided_slice %273 {offsets = [0, 32], sizes = [16, 16], strides = [1, 1]} : vector<16x128xf32> to vector<16x16xf32>
    %320 = arith.truncf %319 : vector<16x16xf32> to vector<16x16xbf16>
    %321 = vector.extract_strided_slice %274 {offsets = [0, 32], sizes = [16, 16], strides = [1, 1]} : vector<16x128xf32> to vector<16x16xf32>
    %322 = arith.truncf %321 : vector<16x16xf32> to vector<16x16xbf16>
    %cst_103 = arith.constant dense<0.000000e+00> : vector<16x16xf32>
    %323 = tpu.matmul %318, %320, %cst_103 {dimension_numbers = #tpu.dot_dimension_numbers<[1], [1], [0], [0], [0, 0, 1, 0], [], []>} : vector<16x16xbf16>, vector<16x16xbf16>, vector<16x16xf32> -> vector<16x16xf32>
    %324 = vector.broadcast %3 : vector<1x16xf32> to vector<16x16xf32>
    %325 = arith.addf %323, %324 : vector<16x16xf32>
    %cst_104 = arith.constant dense<0xFF800000> : vector<16xf32>
    %326 = vector.multi_reduction <maximumf>, %325, %cst_104 [1] : vector<16x16xf32> to vector<16xf32>
    %327 = vector.shape_cast %326 : vector<16xf32> to vector<16x1xf32>
    %328 = vector.broadcast %327 : vector<16x1xf32> to vector<16x16xf32>
    %329 = arith.subf %325, %328 : vector<16x16xf32>
    %330 = math.exp %329 : vector<16x16xf32>
    %cst_105 = arith.constant dense<0.000000e+00> : vector<16xf32>
    %331 = vector.multi_reduction <add>, %330, %cst_105 [1] : vector<16x16xf32> to vector<16xf32>
    %332 = vector.shape_cast %331 : vector<16xf32> to vector<16x1xf32>
    %333 = tpu.reciprocal %332 {approx = true} : vector<16x1xf32> -> vector<16x1xf32>
    %334 = vector.broadcast %333 : vector<16x1xf32> to vector<16x16xf32>
    %335 = arith.mulf %330, %334 : vector<16x16xf32>
    %336 = arith.truncf %335 : vector<16x16xf32> to vector<16x16xbf16>
    %cst_106 = arith.constant dense<0.000000e+00> : vector<16x16xf32>
    %337 = tpu.matmul %336, %322, %cst_106 {dimension_numbers = #tpu.dot_dimension_numbers<[1], [0], [0], [1], [0, 0, 1, 1], [], []>} : vector<16x16xbf16>, vector<16x16xbf16>, vector<16x16xf32> -> vector<16x16xf32>
    %338 = vector.extract_strided_slice %272 {offsets = [0, 48], sizes = [16, 16], strides = [1, 1]} : vector<16x128xf32> to vector<16x16xf32>
    %339 = arith.truncf %338 : vector<16x16xf32> to vector<16x16xbf16>
    %340 = vector.extract_strided_slice %273 {offsets = [0, 48], sizes = [16, 16], strides = [1, 1]} : vector<16x128xf32> to vector<16x16xf32>
    %341 = arith.truncf %340 : vector<16x16xf32> to vector<16x16xbf16>
    %342 = vector.extract_strided_slice %274 {offsets = [0, 48], sizes = [16, 16], strides = [1, 1]} : vector<16x128xf32> to vector<16x16xf32>
    %343 = arith.truncf %342 : vector<16x16xf32> to vector<16x16xbf16>
    %cst_107 = arith.constant dense<0.000000e+00> : vector<16x16xf32>
    %344 = tpu.matmul %339, %341, %cst_107 {dimension_numbers = #tpu.dot_dimension_numbers<[1], [1], [0], [0], [0, 0, 1, 0], [], []>} : vector<16x16xbf16>, vector<16x16xbf16>, vector<16x16xf32> -> vector<16x16xf32>
    %345 = vector.broadcast %3 : vector<1x16xf32> to vector<16x16xf32>
    %346 = arith.addf %344, %345 : vector<16x16xf32>
    %cst_108 = arith.constant dense<0xFF800000> : vector<16xf32>
    %347 = vector.multi_reduction <maximumf>, %346, %cst_108 [1] : vector<16x16xf32> to vector<16xf32>
    %348 = vector.shape_cast %347 : vector<16xf32> to vector<16x1xf32>
    %349 = vector.broadcast %348 : vector<16x1xf32> to vector<16x16xf32>
    %350 = arith.subf %346, %349 : vector<16x16xf32>
    %351 = math.exp %350 : vector<16x16xf32>
    %cst_109 = arith.constant dense<0.000000e+00> : vector<16xf32>
    %352 = vector.multi_reduction <add>, %351, %cst_109 [1] : vector<16x16xf32> to vector<16xf32>
    %353 = vector.shape_cast %352 : vector<16xf32> to vector<16x1xf32>
    %354 = tpu.reciprocal %353 {approx = true} : vector<16x1xf32> -> vector<16x1xf32>
    %355 = vector.broadcast %354 : vector<16x1xf32> to vector<16x16xf32>
    %356 = arith.mulf %351, %355 : vector<16x16xf32>
    %357 = arith.truncf %356 : vector<16x16xf32> to vector<16x16xbf16>
    %cst_110 = arith.constant dense<0.000000e+00> : vector<16x16xf32>
    %358 = tpu.matmul %357, %343, %cst_110 {dimension_numbers = #tpu.dot_dimension_numbers<[1], [0], [0], [1], [0, 0, 1, 1], [], []>} : vector<16x16xbf16>, vector<16x16xbf16>, vector<16x16xf32> -> vector<16x16xf32>
    %359 = vector.extract_strided_slice %272 {offsets = [0, 64], sizes = [16, 16], strides = [1, 1]} : vector<16x128xf32> to vector<16x16xf32>
    %360 = arith.truncf %359 : vector<16x16xf32> to vector<16x16xbf16>
    %361 = vector.extract_strided_slice %273 {offsets = [0, 64], sizes = [16, 16], strides = [1, 1]} : vector<16x128xf32> to vector<16x16xf32>
    %362 = arith.truncf %361 : vector<16x16xf32> to vector<16x16xbf16>
    %363 = vector.extract_strided_slice %274 {offsets = [0, 64], sizes = [16, 16], strides = [1, 1]} : vector<16x128xf32> to vector<16x16xf32>
    %364 = arith.truncf %363 : vector<16x16xf32> to vector<16x16xbf16>
    %cst_111 = arith.constant dense<0.000000e+00> : vector<16x16xf32>
    %365 = tpu.matmul %360, %362, %cst_111 {dimension_numbers = #tpu.dot_dimension_numbers<[1], [1], [0], [0], [0, 0, 1, 0], [], []>} : vector<16x16xbf16>, vector<16x16xbf16>, vector<16x16xf32> -> vector<16x16xf32>
    %366 = vector.broadcast %3 : vector<1x16xf32> to vector<16x16xf32>
    %367 = arith.addf %365, %366 : vector<16x16xf32>
    %cst_112 = arith.constant dense<0xFF800000> : vector<16xf32>
    %368 = vector.multi_reduction <maximumf>, %367, %cst_112 [1] : vector<16x16xf32> to vector<16xf32>
    %369 = vector.shape_cast %368 : vector<16xf32> to vector<16x1xf32>
    %370 = vector.broadcast %369 : vector<16x1xf32> to vector<16x16xf32>
    %371 = arith.subf %367, %370 : vector<16x16xf32>
    %372 = math.exp %371 : vector<16x16xf32>
    %cst_113 = arith.constant dense<0.000000e+00> : vector<16xf32>
    %373 = vector.multi_reduction <add>, %372, %cst_113 [1] : vector<16x16xf32> to vector<16xf32>
    %374 = vector.shape_cast %373 : vector<16xf32> to vector<16x1xf32>
    %375 = tpu.reciprocal %374 {approx = true} : vector<16x1xf32> -> vector<16x1xf32>
    %376 = vector.broadcast %375 : vector<16x1xf32> to vector<16x16xf32>
    %377 = arith.mulf %372, %376 : vector<16x16xf32>
    %378 = arith.truncf %377 : vector<16x16xf32> to vector<16x16xbf16>
    %cst_114 = arith.constant dense<0.000000e+00> : vector<16x16xf32>
    %379 = tpu.matmul %378, %364, %cst_114 {dimension_numbers = #tpu.dot_dimension_numbers<[1], [0], [0], [1], [0, 0, 1, 1], [], []>} : vector<16x16xbf16>, vector<16x16xbf16>, vector<16x16xf32> -> vector<16x16xf32>
    %380 = vector.extract_strided_slice %272 {offsets = [0, 80], sizes = [16, 16], strides = [1, 1]} : vector<16x128xf32> to vector<16x16xf32>
    %381 = arith.truncf %380 : vector<16x16xf32> to vector<16x16xbf16>
    %382 = vector.extract_strided_slice %273 {offsets = [0, 80], sizes = [16, 16], strides = [1, 1]} : vector<16x128xf32> to vector<16x16xf32>
    %383 = arith.truncf %382 : vector<16x16xf32> to vector<16x16xbf16>
    %384 = vector.extract_strided_slice %274 {offsets = [0, 80], sizes = [16, 16], strides = [1, 1]} : vector<16x128xf32> to vector<16x16xf32>
    %385 = arith.truncf %384 : vector<16x16xf32> to vector<16x16xbf16>
    %cst_115 = arith.constant dense<0.000000e+00> : vector<16x16xf32>
    %386 = tpu.matmul %381, %383, %cst_115 {dimension_numbers = #tpu.dot_dimension_numbers<[1], [1], [0], [0], [0, 0, 1, 0], [], []>} : vector<16x16xbf16>, vector<16x16xbf16>, vector<16x16xf32> -> vector<16x16xf32>
    %387 = vector.broadcast %3 : vector<1x16xf32> to vector<16x16xf32>
    %388 = arith.addf %386, %387 : vector<16x16xf32>
    %cst_116 = arith.constant dense<0xFF800000> : vector<16xf32>
    %389 = vector.multi_reduction <maximumf>, %388, %cst_116 [1] : vector<16x16xf32> to vector<16xf32>
    %390 = vector.shape_cast %389 : vector<16xf32> to vector<16x1xf32>
    %391 = vector.broadcast %390 : vector<16x1xf32> to vector<16x16xf32>
    %392 = arith.subf %388, %391 : vector<16x16xf32>
    %393 = math.exp %392 : vector<16x16xf32>
    %cst_117 = arith.constant dense<0.000000e+00> : vector<16xf32>
    %394 = vector.multi_reduction <add>, %393, %cst_117 [1] : vector<16x16xf32> to vector<16xf32>
    %395 = vector.shape_cast %394 : vector<16xf32> to vector<16x1xf32>
    %396 = tpu.reciprocal %395 {approx = true} : vector<16x1xf32> -> vector<16x1xf32>
    %397 = vector.broadcast %396 : vector<16x1xf32> to vector<16x16xf32>
    %398 = arith.mulf %393, %397 : vector<16x16xf32>
    %399 = arith.truncf %398 : vector<16x16xf32> to vector<16x16xbf16>
    %cst_118 = arith.constant dense<0.000000e+00> : vector<16x16xf32>
    %400 = tpu.matmul %399, %385, %cst_118 {dimension_numbers = #tpu.dot_dimension_numbers<[1], [0], [0], [1], [0, 0, 1, 1], [], []>} : vector<16x16xbf16>, vector<16x16xbf16>, vector<16x16xf32> -> vector<16x16xf32>
    %401 = vector.extract_strided_slice %272 {offsets = [0, 96], sizes = [16, 16], strides = [1, 1]} : vector<16x128xf32> to vector<16x16xf32>
    %402 = arith.truncf %401 : vector<16x16xf32> to vector<16x16xbf16>
    %403 = vector.extract_strided_slice %273 {offsets = [0, 96], sizes = [16, 16], strides = [1, 1]} : vector<16x128xf32> to vector<16x16xf32>
    %404 = arith.truncf %403 : vector<16x16xf32> to vector<16x16xbf16>
    %405 = vector.extract_strided_slice %274 {offsets = [0, 96], sizes = [16, 16], strides = [1, 1]} : vector<16x128xf32> to vector<16x16xf32>
    %406 = arith.truncf %405 : vector<16x16xf32> to vector<16x16xbf16>
    %cst_119 = arith.constant dense<0.000000e+00> : vector<16x16xf32>
    %407 = tpu.matmul %402, %404, %cst_119 {dimension_numbers = #tpu.dot_dimension_numbers<[1], [1], [0], [0], [0, 0, 1, 0], [], []>} : vector<16x16xbf16>, vector<16x16xbf16>, vector<16x16xf32> -> vector<16x16xf32>
    %408 = vector.broadcast %3 : vector<1x16xf32> to vector<16x16xf32>
    %409 = arith.addf %407, %408 : vector<16x16xf32>
    %cst_120 = arith.constant dense<0xFF800000> : vector<16xf32>
    %410 = vector.multi_reduction <maximumf>, %409, %cst_120 [1] : vector<16x16xf32> to vector<16xf32>
    %411 = vector.shape_cast %410 : vector<16xf32> to vector<16x1xf32>
    %412 = vector.broadcast %411 : vector<16x1xf32> to vector<16x16xf32>
    %413 = arith.subf %409, %412 : vector<16x16xf32>
    %414 = math.exp %413 : vector<16x16xf32>
    %cst_121 = arith.constant dense<0.000000e+00> : vector<16xf32>
    %415 = vector.multi_reduction <add>, %414, %cst_121 [1] : vector<16x16xf32> to vector<16xf32>
    %416 = vector.shape_cast %415 : vector<16xf32> to vector<16x1xf32>
    %417 = tpu.reciprocal %416 {approx = true} : vector<16x1xf32> -> vector<16x1xf32>
    %418 = vector.broadcast %417 : vector<16x1xf32> to vector<16x16xf32>
    %419 = arith.mulf %414, %418 : vector<16x16xf32>
    %420 = arith.truncf %419 : vector<16x16xf32> to vector<16x16xbf16>
    %cst_122 = arith.constant dense<0.000000e+00> : vector<16x16xf32>
    %421 = tpu.matmul %420, %406, %cst_122 {dimension_numbers = #tpu.dot_dimension_numbers<[1], [0], [0], [1], [0, 0, 1, 1], [], []>} : vector<16x16xbf16>, vector<16x16xbf16>, vector<16x16xf32> -> vector<16x16xf32>
    %422 = vector.extract_strided_slice %272 {offsets = [0, 112], sizes = [16, 16], strides = [1, 1]} : vector<16x128xf32> to vector<16x16xf32>
    %423 = arith.truncf %422 : vector<16x16xf32> to vector<16x16xbf16>
    %424 = vector.extract_strided_slice %273 {offsets = [0, 112], sizes = [16, 16], strides = [1, 1]} : vector<16x128xf32> to vector<16x16xf32>
    %425 = arith.truncf %424 : vector<16x16xf32> to vector<16x16xbf16>
    %426 = vector.extract_strided_slice %274 {offsets = [0, 112], sizes = [16, 16], strides = [1, 1]} : vector<16x128xf32> to vector<16x16xf32>
    %427 = arith.truncf %426 : vector<16x16xf32> to vector<16x16xbf16>
    %cst_123 = arith.constant dense<0.000000e+00> : vector<16x16xf32>
    %428 = tpu.matmul %423, %425, %cst_123 {dimension_numbers = #tpu.dot_dimension_numbers<[1], [1], [0], [0], [0, 0, 1, 0], [], []>} : vector<16x16xbf16>, vector<16x16xbf16>, vector<16x16xf32> -> vector<16x16xf32>
    %429 = vector.broadcast %3 : vector<1x16xf32> to vector<16x16xf32>
    %430 = arith.addf %428, %429 : vector<16x16xf32>
    %cst_124 = arith.constant dense<0xFF800000> : vector<16xf32>
    %431 = vector.multi_reduction <maximumf>, %430, %cst_124 [1] : vector<16x16xf32> to vector<16xf32>
    %432 = vector.shape_cast %431 : vector<16xf32> to vector<16x1xf32>
    %433 = vector.broadcast %432 : vector<16x1xf32> to vector<16x16xf32>
    %434 = arith.subf %430, %433 : vector<16x16xf32>
    %435 = math.exp %434 : vector<16x16xf32>
    %cst_125 = arith.constant dense<0.000000e+00> : vector<16xf32>
    %436 = vector.multi_reduction <add>, %435, %cst_125 [1] : vector<16x16xf32> to vector<16xf32>
    %437 = vector.shape_cast %436 : vector<16xf32> to vector<16x1xf32>
    %438 = tpu.reciprocal %437 {approx = true} : vector<16x1xf32> -> vector<16x1xf32>
    %439 = vector.broadcast %438 : vector<16x1xf32> to vector<16x16xf32>
    %440 = arith.mulf %435, %439 : vector<16x16xf32>
    %441 = arith.truncf %440 : vector<16x16xf32> to vector<16x16xbf16>
    %cst_126 = arith.constant dense<0.000000e+00> : vector<16x16xf32>
    %442 = tpu.matmul %441, %427, %cst_126 {dimension_numbers = #tpu.dot_dimension_numbers<[1], [0], [0], [1], [0, 0, 1, 1], [], []>} : vector<16x16xbf16>, vector<16x16xbf16>, vector<16x16xf32> -> vector<16x16xf32>
    %443 = tpu.concatenate %295, %316, %337, %358, %379, %400, %421, %442 in 1 : vector<16x16xf32>, vector<16x16xf32>, vector<16x16xf32>, vector<16x16xf32>, vector<16x16xf32>, vector<16x16xf32>, vector<16x16xf32>, vector<16x16xf32> -> vector<16x128xf32>
    %c1_127 = arith.constant 1 : index
    %c0_128 = arith.constant 0 : index
    %c0_129 = arith.constant 0 : index
    %444 = vector.load %arg5[%c1_127, %c0_128, %c0_129] : memref<2x128x128xbf16, #tpu.memory_space<vmem>>, vector<1x128x128xbf16>
    %445 = vector.shape_cast %444 : vector<1x128x128xbf16> to vector<128x128xbf16>
    %446 = arith.truncf %443 : vector<16x128xf32> to vector<16x128xbf16>
    %cst_130 = arith.constant dense<0.000000e+00> : vector<16x128xf32>
    %447 = tpu.matmul %446, %445, %cst_130 {dimension_numbers = #tpu.dot_dimension_numbers<[1], [0], [0], [1], [0, 0, 1, 1], [], []>} : vector<16x128xbf16>, vector<128x128xbf16>, vector<16x128xf32> -> vector<16x128xf32>
    %c1_131 = arith.constant 1 : index
    %c0_132 = arith.constant 0 : index
    %c0_133 = arith.constant 0 : index
    %448 = vector.load %arg6[%c1_131, %c0_132, %c0_133] : memref<2x1x128xf32, #tpu.memory_space<vmem>>, vector<1x1x128xf32>
    %449 = vector.shape_cast %448 : vector<1x1x128xf32> to vector<1x128xf32>
    %450 = vector.broadcast %449 : vector<1x128xf32> to vector<16x128xf32>
    %451 = arith.addf %447, %450 : vector<16x128xf32>
    %452 = arith.addf %261, %451 : vector<16x128xf32>
    %c1_134 = arith.constant 1 : index
    %c0_135 = arith.constant 0 : index
    %c0_136 = arith.constant 0 : index
    %453 = vector.load %arg7[%c1_134, %c0_135, %c0_136] : memref<2x1x128xf32, #tpu.memory_space<vmem>>, vector<1x1x128xf32>
    %454 = vector.shape_cast %453 : vector<1x1x128xf32> to vector<1x128xf32>
    %c1_137 = arith.constant 1 : index
    %c0_138 = arith.constant 0 : index
    %c0_139 = arith.constant 0 : index
    %455 = vector.load %arg8[%c1_137, %c0_138, %c0_139] : memref<2x1x128xf32, #tpu.memory_space<vmem>>, vector<1x1x128xf32>
    %456 = vector.shape_cast %455 : vector<1x1x128xf32> to vector<1x128xf32>
    %cst_140 = arith.constant dense<0.000000e+00> : vector<16xf32>
    %457 = vector.multi_reduction <add>, %452, %cst_140 [1] : vector<16x128xf32> to vector<16xf32>
    %458 = vector.shape_cast %457 : vector<16xf32> to vector<16x1xf32>
    %cst_141 = arith.constant 1.280000e+02 : f32
    %459 = vector.broadcast %cst_141 : f32 to vector<16x1xf32>
    %460 = arith.divf %458, %459 : vector<16x1xf32>
    %461 = vector.broadcast %460 : vector<16x1xf32> to vector<16x128xf32>
    %462 = arith.subf %452, %461 : vector<16x128xf32>
    %463 = arith.mulf %462, %462 : vector<16x128xf32>
    %cst_142 = arith.constant dense<0.000000e+00> : vector<16xf32>
    %464 = vector.multi_reduction <add>, %463, %cst_142 [1] : vector<16x128xf32> to vector<16xf32>
    %465 = vector.shape_cast %464 : vector<16xf32> to vector<16x1xf32>
    %cst_143 = arith.constant 1.280000e+02 : f32
    %466 = vector.broadcast %cst_143 : f32 to vector<16x1xf32>
    %467 = arith.divf %465, %466 : vector<16x1xf32>
    %cst_144 = arith.constant 9.99999974E-6 : f32
    %468 = vector.broadcast %cst_144 : f32 to vector<16x1xf32>
    %469 = arith.addf %467, %468 : vector<16x1xf32>
    %470 = math.rsqrt %469 : vector<16x1xf32>
    %471 = vector.broadcast %470 : vector<16x1xf32> to vector<16x128xf32>
    %472 = arith.mulf %462, %471 : vector<16x128xf32>
    %473 = vector.broadcast %454 : vector<1x128xf32> to vector<16x128xf32>
    %474 = arith.mulf %472, %473 : vector<16x128xf32>
    %475 = vector.broadcast %456 : vector<1x128xf32> to vector<16x128xf32>
    %476 = arith.addf %474, %475 : vector<16x128xf32>
    %c1_145 = arith.constant 1 : index
    %c0_146 = arith.constant 0 : index
    %c0_147 = arith.constant 0 : index
    %477 = vector.load %arg9[%c1_145, %c0_146, %c0_147] : memref<2x128x2048xbf16, #tpu.memory_space<vmem>>, vector<1x128x2048xbf16>
    %478 = vector.shape_cast %477 : vector<1x128x2048xbf16> to vector<128x2048xbf16>
    %479 = arith.truncf %476 : vector<16x128xf32> to vector<16x128xbf16>
    %cst_148 = arith.constant dense<0.000000e+00> : vector<16x2048xf32>
    %480 = tpu.matmul %479, %478, %cst_148 {dimension_numbers = #tpu.dot_dimension_numbers<[1], [0], [0], [1], [0, 0, 1, 1], [], []>} : vector<16x128xbf16>, vector<128x2048xbf16>, vector<16x2048xf32> -> vector<16x2048xf32>
    %c1_149 = arith.constant 1 : index
    %c0_150 = arith.constant 0 : index
    %c0_151 = arith.constant 0 : index
    %481 = vector.load %arg10[%c1_149, %c0_150, %c0_151] : memref<2x1x2048xf32, #tpu.memory_space<vmem>>, vector<1x1x2048xf32>
    %482 = vector.shape_cast %481 : vector<1x1x2048xf32> to vector<1x2048xf32>
    %483 = vector.broadcast %482 : vector<1x2048xf32> to vector<16x2048xf32>
    %484 = arith.addf %480, %483 : vector<16x2048xf32>
    %cst_152 = arith.constant 0.000000e+00 : f32
    %485 = vector.broadcast %cst_152 : f32 to vector<16x2048xf32>
    %486 = arith.maximumf %484, %485 : vector<16x2048xf32>
    %c1_153 = arith.constant 1 : index
    %c0_154 = arith.constant 0 : index
    %c0_155 = arith.constant 0 : index
    %487 = vector.load %arg11[%c1_153, %c0_154, %c0_155] : memref<2x2048x128xbf16, #tpu.memory_space<vmem>>, vector<1x2048x128xbf16>
    %488 = vector.shape_cast %487 : vector<1x2048x128xbf16> to vector<2048x128xbf16>
    %489 = arith.truncf %486 : vector<16x2048xf32> to vector<16x2048xbf16>
    %cst_156 = arith.constant dense<0.000000e+00> : vector<16x128xf32>
    %490 = tpu.matmul %489, %488, %cst_156 {dimension_numbers = #tpu.dot_dimension_numbers<[1], [0], [0], [1], [0, 0, 1, 1], [], []>} : vector<16x2048xbf16>, vector<2048x128xbf16>, vector<16x128xf32> -> vector<16x128xf32>
    %c1_157 = arith.constant 1 : index
    %c0_158 = arith.constant 0 : index
    %c0_159 = arith.constant 0 : index
    %491 = vector.load %arg12[%c1_157, %c0_158, %c0_159] : memref<2x1x128xf32, #tpu.memory_space<vmem>>, vector<1x1x128xf32>
    %492 = vector.shape_cast %491 : vector<1x1x128xf32> to vector<1x128xf32>
    %493 = vector.broadcast %492 : vector<1x128xf32> to vector<16x128xf32>
    %494 = arith.addf %490, %493 : vector<16x128xf32>
    %495 = arith.addf %476, %494 : vector<16x128xf32>
    %c1_160 = arith.constant 1 : index
    %c0_161 = arith.constant 0 : index
    %c0_162 = arith.constant 0 : index
    %496 = vector.load %arg13[%c1_160, %c0_161, %c0_162] : memref<2x1x128xf32, #tpu.memory_space<vmem>>, vector<1x1x128xf32>
    %497 = vector.shape_cast %496 : vector<1x1x128xf32> to vector<1x128xf32>
    %c1_163 = arith.constant 1 : index
    %c0_164 = arith.constant 0 : index
    %c0_165 = arith.constant 0 : index
    %498 = vector.load %arg14[%c1_163, %c0_164, %c0_165] : memref<2x1x128xf32, #tpu.memory_space<vmem>>, vector<1x1x128xf32>
    %499 = vector.shape_cast %498 : vector<1x1x128xf32> to vector<1x128xf32>
    %cst_166 = arith.constant dense<0.000000e+00> : vector<16xf32>
    %500 = vector.multi_reduction <add>, %495, %cst_166 [1] : vector<16x128xf32> to vector<16xf32>
    %501 = vector.shape_cast %500 : vector<16xf32> to vector<16x1xf32>
    %cst_167 = arith.constant 1.280000e+02 : f32
    %502 = vector.broadcast %cst_167 : f32 to vector<16x1xf32>
    %503 = arith.divf %501, %502 : vector<16x1xf32>
    %504 = vector.broadcast %503 : vector<16x1xf32> to vector<16x128xf32>
    %505 = arith.subf %495, %504 : vector<16x128xf32>
    %506 = arith.mulf %505, %505 : vector<16x128xf32>
    %cst_168 = arith.constant dense<0.000000e+00> : vector<16xf32>
    %507 = vector.multi_reduction <add>, %506, %cst_168 [1] : vector<16x128xf32> to vector<16xf32>
    %508 = vector.shape_cast %507 : vector<16xf32> to vector<16x1xf32>
    %cst_169 = arith.constant 1.280000e+02 : f32
    %509 = vector.broadcast %cst_169 : f32 to vector<16x1xf32>
    %510 = arith.divf %508, %509 : vector<16x1xf32>
    %cst_170 = arith.constant 9.99999974E-6 : f32
    %511 = vector.broadcast %cst_170 : f32 to vector<16x1xf32>
    %512 = arith.addf %510, %511 : vector<16x1xf32>
    %513 = math.rsqrt %512 : vector<16x1xf32>
    %514 = vector.broadcast %513 : vector<16x1xf32> to vector<16x128xf32>
    %515 = arith.mulf %505, %514 : vector<16x128xf32>
    %516 = vector.broadcast %497 : vector<1x128xf32> to vector<16x128xf32>
    %517 = arith.mulf %515, %516 : vector<16x128xf32>
    %518 = vector.broadcast %499 : vector<1x128xf32> to vector<16x128xf32>
    %519 = arith.addf %517, %518 : vector<16x128xf32>
    %c0_171 = arith.constant 0 : index
    %c0_172 = arith.constant 0 : index
    %520 = vector.load %arg15[%c0_171, %c0_172] : memref<1x128xbf16, #tpu.memory_space<vmem>>, vector<1x128xbf16>
    %521 = arith.truncf %519 : vector<16x128xf32> to vector<16x128xbf16>
    %cst_173 = arith.constant dense<0.000000e+00> : vector<1x16xf32>
    %522 = tpu.matmul %520, %521, %cst_173 {dimension_numbers = #tpu.dot_dimension_numbers<[1], [1], [0], [0], [0, 0, 1, 0], [], []>} : vector<1x128xbf16>, vector<16x128xbf16>, vector<1x16xf32> -> vector<1x16xf32>
    %c0_174 = arith.constant 0 : index
    %c0_175 = arith.constant 0 : index
    %523 = vector.load %arg16[%c0_174, %c0_175] : memref<1x1xf32, #tpu.memory_space<vmem>>, vector<1x1xf32>
    %524 = vector.broadcast %523 : vector<1x1xf32> to vector<1x16xf32>
    %525 = arith.addf %522, %524 : vector<1x16xf32>
    %cst_176 = arith.constant 0.000000e+00 : f32
    %526 = vector.broadcast %cst_176 : f32 to vector<1x16xf32>
    %527 = arith.subf %526, %525 : vector<1x16xf32>
    %528 = math.exp %527 : vector<1x16xf32>
    %cst_177 = arith.constant 1.000000e+00 : f32
    %529 = vector.broadcast %cst_177 : f32 to vector<1x16xf32>
    %530 = arith.addf %529, %528 : vector<1x16xf32>
    %cst_178 = arith.constant 1.000000e+00 : f32
    %531 = vector.broadcast %cst_178 : f32 to vector<1x16xf32>
    %532 = arith.divf %531, %530 : vector<1x16xf32>
    %c0_179 = arith.constant 0 : index
    %c0_180 = arith.constant 0 : index
    %c0_181 = arith.constant 0 : index
    %533 = vector.load %arg17[%c0_179, %c0_180, %c0_181] : memref<1x1x16xf32, #tpu.memory_space<vmem>>, vector<1x1x16xf32>
    %534 = vector.shape_cast %533 : vector<1x1x16xf32> to vector<1x16xf32>
    %535 = vector.shape_cast %532 : vector<1x16xf32> to vector<1x1x16xf32>
    tpu.vector_store %arg17[%c0_179, %c0_180, %c0_181], %535 {strides = array<i32>} : memref<1x1x16xf32, #tpu.memory_space<vmem>>, vector<1x1x16xf32>,
    return
  }
  func.func @transform_0(%arg0: i32) -> (i32, i32, i32) {
    %c0_i32 = arith.constant 0 : i32
    %c0_i32_0 = arith.constant 0 : i32
    %c0_i32_1 = arith.constant 0 : i32
    return %arg0, %c0_i32, %c0_i32_0 : i32, i32, i32
  }
  func.func @transform_1(%arg0: i32) -> (i32, i32, i32) {
    %c0_i32 = arith.constant 0 : i32
    %c0_i32_0 = arith.constant 0 : i32
    %c0_i32_1 = arith.constant 0 : i32
    return %arg0, %c0_i32, %c0_i32_0 : i32, i32, i32
  }
  func.func @transform_2(%arg0: i32) -> (i32, i32, i32) {
    %c0_i32 = arith.constant 0 : i32
    %c0_i32_0 = arith.constant 0 : i32
    %c0_i32_1 = arith.constant 0 : i32
    %c0_i32_2 = arith.constant 0 : i32
    return %c0_i32, %c0_i32_0, %c0_i32_1 : i32, i32, i32
  }
  func.func @transform_3(%arg0: i32) -> (i32, i32, i32) {
    %c0_i32 = arith.constant 0 : i32
    %c0_i32_0 = arith.constant 0 : i32
    %c0_i32_1 = arith.constant 0 : i32
    %c0_i32_2 = arith.constant 0 : i32
    return %c0_i32, %c0_i32_0, %c0_i32_1 : i32, i32, i32
  }
  func.func @transform_4(%arg0: i32) -> (i32, i32, i32) {
    %c0_i32 = arith.constant 0 : i32
    %c0_i32_0 = arith.constant 0 : i32
    %c0_i32_1 = arith.constant 0 : i32
    %c0_i32_2 = arith.constant 0 : i32
    return %c0_i32, %c0_i32_0, %c0_i32_1 : i32, i32, i32
  }
  func.func @transform_5(%arg0: i32) -> (i32, i32, i32) {
    %c0_i32 = arith.constant 0 : i32
    %c0_i32_0 = arith.constant 0 : i32
    %c0_i32_1 = arith.constant 0 : i32
    %c0_i32_2 = arith.constant 0 : i32
    return %c0_i32, %c0_i32_0, %c0_i32_1 : i32, i32, i32
  }
  func.func @transform_6(%arg0: i32) -> (i32, i32, i32) {
    %c0_i32 = arith.constant 0 : i32
    %c0_i32_0 = arith.constant 0 : i32
    %c0_i32_1 = arith.constant 0 : i32
    %c0_i32_2 = arith.constant 0 : i32
    return %c0_i32, %c0_i32_0, %c0_i32_1 : i32, i32, i32
  }
  func.func @transform_7(%arg0: i32) -> (i32, i32, i32) {
    %c0_i32 = arith.constant 0 : i32
    %c0_i32_0 = arith.constant 0 : i32
    %c0_i32_1 = arith.constant 0 : i32
    %c0_i32_2 = arith.constant 0 : i32
    return %c0_i32, %c0_i32_0, %c0_i32_1 : i32, i32, i32
  }
  func.func @transform_8(%arg0: i32) -> (i32, i32, i32) {
    %c0_i32 = arith.constant 0 : i32
    %c0_i32_0 = arith.constant 0 : i32
    %c0_i32_1 = arith.constant 0 : i32
    %c0_i32_2 = arith.constant 0 : i32
    return %c0_i32, %c0_i32_0, %c0_i32_1 : i32, i32, i32
  }
  func.func @transform_9(%arg0: i32) -> (i32, i32, i32) {
    %c0_i32 = arith.constant 0 : i32
    %c0_i32_0 = arith.constant 0 : i32
    %c0_i32_1 = arith.constant 0 : i32
    %c0_i32_2 = arith.constant 0 : i32
    return %c0_i32, %c0_i32_0, %c0_i32_1 : i32, i32, i32
  }
  func.func @transform_10(%arg0: i32) -> (i32, i32, i32) {
    %c0_i32 = arith.constant 0 : i32
    %c0_i32_0 = arith.constant 0 : i32
    %c0_i32_1 = arith.constant 0 : i32
    %c0_i32_2 = arith.constant 0 : i32
    return %c0_i32, %c0_i32_0, %c0_i32_1 : i32, i32, i32
  }
  func.func @transform_11(%arg0: i32) -> (i32, i32, i32) {
    %c0_i32 = arith.constant 0 : i32
    %c0_i32_0 = arith.constant 0 : i32
    %c0_i32_1 = arith.constant 0 : i32
    %c0_i32_2 = arith.constant 0 : i32
    return %c0_i32, %c0_i32_0, %c0_i32_1 : i32, i32, i32
  }
  func.func @transform_12(%arg0: i32) -> (i32, i32, i32) {
    %c0_i32 = arith.constant 0 : i32
    %c0_i32_0 = arith.constant 0 : i32
    %c0_i32_1 = arith.constant 0 : i32
    %c0_i32_2 = arith.constant 0 : i32
    return %c0_i32, %c0_i32_0, %c0_i32_1 : i32, i32, i32
  }
  func.func @transform_13(%arg0: i32) -> (i32, i32, i32) {
    %c0_i32 = arith.constant 0 : i32
    %c0_i32_0 = arith.constant 0 : i32
    %c0_i32_1 = arith.constant 0 : i32
    %c0_i32_2 = arith.constant 0 : i32
    return %c0_i32, %c0_i32_0, %c0_i32_1 : i32, i32, i32
  }
  func.func @transform_14(%arg0: i32) -> (i32, i32) {
    %c0_i32 = arith.constant 0 : i32
    %c0_i32_0 = arith.constant 0 : i32
    %c0_i32_1 = arith.constant 0 : i32
    return %c0_i32, %c0_i32_0 : i32, i32
  }
  func.func @transform_15(%arg0: i32) -> (i32, i32) {
    %c0_i32 = arith.constant 0 : i32
    %c0_i32_0 = arith.constant 0 : i32
    %c0_i32_1 = arith.constant 0 : i32
    return %c0_i32, %c0_i32_0 : i32, i32
  }
  func.func @transform_16(%arg0: i32) -> (i32, i32, i32) {
    %c0_i32 = arith.constant 0 : i32
    %c0_i32_0 = arith.constant 0 : i32
    %c0_i32_1 = arith.constant 0 : i32
    return %arg0, %c0_i32, %c0_i32_0 : i32, i32, i32
  }
}

</mosaic_0001>

<bundles_post_ra>
// kernel: tpu_custom_call.1
= control target key start
LH: loop header
LB: loop body
LE: loop exit
PB: predicated region body
PF: predicated region fallthrough
CT: control target
= control target key end

     0   :  { %s12847_s0 = inlined_call_operand.hbm [shape: f32[2,16,128], index: 0, kind: input, shape index: {}]   ;;  %s12848_s1 = inlined_call_operand.vmem [shape: f32[2,1,16], index: 1, kind: input, shape index: {}]   ;;  %s12849_s2 = inlined_call_operand.hbm [shape: bf16[2,128,384], index: 2, kind: input, shape index: {}]   ;;  %s12850_s3 = inlined_call_operand.hbm [shape: f32[2,1,384], index: 3, kind: input, shape index: {}]   ;;  %s12851_s4 = inlined_call_operand.hbm [shape: bf16[2,128,128], index: 4, kind: input, shape index: {}]   ;;  %s12852_s5 = inlined_call_operand.vmem [shape: f32[2,1,128], index: 5, kind: input, shape index: {}]   ;;  %s12853_s6 = inlined_call_operand.hbm [shape: f32[2,1,128], index: 6, kind: input, shape index: {}]   ;;  %s12854_s7 = inlined_call_operand.hbm [shape: f32[2,1,128], index: 7, kind: input, shape index: {}]   ;;  %s12855_s8 = inlined_call_operand.hbm [shape: bf16[2,128,2048], index: 8, kind: input, shape index: {}]   ;;  %s12856_s9 = inlined_call_operand.vmem [shape: f32[2,1,2048], index: 9, kind: input, shape index: {}]   ;;  %s12857_s10 = inlined_call_operand.hbm [shape: bf16[2,2048,128], index: 10, kind: input, shape index: {}]   ;;  %s12858_s11 = inlined_call_operand.vmem [shape: f32[2,1,128], index: 11, kind: input, shape index: {}]   ;;  %s12859_s12 = inlined_call_operand.vmem [shape: f32[2,1,128], index: 12, kind: input, shape index: {}]   ;;  %s12860_s13 = inlined_call_operand.vmem [shape: f32[2,1,128], index: 13, kind: input, shape index: {}]   ;;  %s12861_s14 = inlined_call_operand.vmem [shape: bf16[1,128], index: 14, kind: input, shape index: {}]   ;;  %s12862_s15 = inlined_call_operand.<no memory space> [shape: f32[1,1], index: 15, kind: input, shape index: {}]   ;;  %s12863_s16 = inlined_call_operand.hbm [shape: f32[2,1,16], index: 16, kind: output, shape index: {}]  }
   0x1   :  { %12884 = sst [smem:[#allocation24_spill]] %s12847_s0  ;;  %v21_v0 = vstv %s12862_s15 }
   0x2   :  { %12885 = sst [smem:[#allocation25_spill]] %s12848_s1  ;;  %22 = vst [vmem:[#allocation2] sm:$0x1] %v21_v0 }
   0x3   :  { %12886 = sst [smem:[#allocation26_spill]] %s12849_s2 }
   0x4   :  { %12887 = sst [smem:[#allocation27_spill]] %s12850_s3 }
   0x5   :  { %12888 = sst [smem:[#allocation28_spill]] %s12858_s11 }
   0x6   :  { %12889 = sst [smem:[#allocation29_spill]] %s12859_s12 }
   0x7   :  { %12890 = sst [smem:[#allocation30_spill]] %s12860_s13 }
   0x8   :  { %12891 = sst [smem:[#allocation31_spill]] %s12861_s14 }
   0x9   :  { %12892 = sst [smem:[#allocation32_spill]] %s12863_s16 }
   0xa   :  { %23 = vsyncpa [#allocation4], 0 }
   0xb   :  { %25 = vsyncpa [#allocation4 + $0x1], 0 }
   0xc   :  { %26 = vsyncpa [#allocation7], 0 }
   0xd   :  { %27 = vsyncpa [#allocation10], 0 }
   0xe   :  { %28 = vsyncpa [#allocation13], 0 }
   0xf   :  { %29 = vsyncpa [#allocation16], 0 }
  0x10   :  { %30 = vsyncpa [#allocation5], 0 }
  0x11   :  { %32 = vsyncpa [#allocation5 + $0x1], 0  ;;  %s11616_s23 = smov 0   ;;  %s11618_s24 = smov 0  }
  0x12   :  { %s11620_s25 = smov 0   ;;  %s11622_s26 = smov 0  }
  0x13 LB: > { %s11498_s15 = smov [#allocation6]   ;;  %s11637_s28 = sadd.s32 4294967295, %s11496_s26   ;;  %s11496_s26 = sphi %s11622_s26, %s12933_s26   ;;  %s11492_s25 = sphi %s11620_s25, %s12932_s25   ;;  %s11488_s24 = sphi %s11618_s24, %s12931_s24   ;;  %s11484_s23 = sphi %s11616_s23, %s12930_s23  }
  0x14   : > { %s427_s27 = sshll.u32 %s11498_s15, 4  ;;  %p9107_p0 = scmp.ge.s32.totalorder %s11496_s26, 1  ;;  %s11642_s27 = int_to_ptr.vmem [resolvable:$true] %s427_s27 }
  0x15   : > { %p12869_p1 = scmp.eq.s32.totalorder %s11637_s28, 0  ;;  %p415_p2 = scmp.lt.s32.totalorder %s11496_s26, 3 }
  0x16   : > { %s11499_s30 = smov [#allocation9]   ;;  %s12895_s2 = sld [smem:[#allocation26_spill]] }
  0x17   : > { %p11644_p3 = pnand %p9107_p0, %p415_p2  ;;  %s453_s0 = sshll.u32 %s11499_s30, 4  ;;  %s11657_s0 = int_to_ptr.vmem [resolvable:$true] %s453_s0 }
  0x19   : > { %s12893_s29 = scalar_select %p11644_p3, 1, 0 }
  0x1a   : > { %p10523_p5 = pneg %p11644_p3 }
  0x1c   : > { %p11653_p6 = pnand %p10523_p5, %p12869_p1  ;;  %s11188_s20 = scalar_lea.hbm %s12895_s2, 6144 }
  0x1d   : > { %p11189_p7 = scmp.ne.s32.totalorder %s12895_s2, %s11188_s20  ;;  %p11195_p11 = scmp.lt.u32.totalorder %s11188_s20, %s12895_s2 }
  0x1e   : > { %p11667_p8 = pneg %p11653_p6 }
  0x20   : > { %p11191_p9 = pnand %p11667_p8, %p11189_p7 }
  0x22   : > { %p11192_p10 = pneg %p11191_p9 }
  0x24   : > { %p11197_p12 = pnand %p11195_p11, %p11192_p10 }
  0x26   : > { %11200 = shalt.err (!%p11197_p12)
}
  0x27   : > { %s11201_s18 = scalar_lea.vmem %s11642_s27, 6144  ;;  %p11209_p5 = scmp.lt.s32.totalorder %s11642_s27, %s11642_s27 }
  0x28   : > { %p11202_p13 = scmp.ne.s32.totalorder %s11642_s27, %s11201_s18  ;;  %p11210_p4 = scmp.lt.s32.totalorder %s11201_s18, %s11201_s18 }
  0x2a   : > { %p11204_p0 = pnand %p11202_p13, %p11667_p8  ;;  %p11211_p7 = por %p11210_p4, %p11209_p5 }
  0x2c   : > { %p11205_p2 = pneg %p11204_p0 }
  0x2e   : > { %p11212_p9 = pnand %p11211_p7, %p11205_p2 }
  0x30   : > { %11215 = shalt.err (!%p11212_p9)
}
  0x31   : > { %s11500_s19 = smov 192   ;;  %s11501_s16 = smov 12  }
  0x32   : > { %10526 = dma.hbm_to_vmem [thread:$0]  (!%p11653_p6), %s12895_s2, 6144, %s11642_s27, [#allocation7], %s11500_s19, %s11500_s19, %s11501_s16  }
  0x33   : > { %s11216_s14 = scalar_lea.hbm %s12851_s4, 2048 }
  0x34   : > { %p11217_p4 = scmp.ne.s32.totalorder %s12851_s4, %s11216_s14  ;;  %p11223_p12 = scmp.lt.u32.totalorder %s11216_s14, %s12851_s4 }
  0x36   : > { %p11219_p10 = pnand %p11217_p4, %p11667_p8 }
  0x38   : > { %p11220_p11 = pneg %p11219_p10 }
  0x3a   : > { %p11225_p13 = pnand %p11223_p12, %p11220_p11 }
  0x3c   : > { %11228 = shalt.err (!%p11225_p13)
}
  0x3d   : > { %s11229_s27 = scalar_lea.vmem %s11657_s0, 2048  ;;  %p11237_p7 = scmp.lt.s32.totalorder %s11657_s0, %s11657_s0 }
  0x3e   : > { %p11230_p0 = scmp.ne.s32.totalorder %s11657_s0, %s11229_s27  ;;  %p11238_p9 = scmp.lt.s32.totalorder %s11229_s27, %s11229_s27 }
  0x40   : > { %p11232_p2 = pnand %p11230_p0, %p11667_p8  ;;  %p11239_p4 = por %p11238_p9, %p11237_p7 }
  0x42   : > { %p11233_p5 = pneg %p11232_p2 }
  0x44   : > { %p11240_p10 = pnand %p11239_p4, %p11233_p5 }
  0x46   : > { %11243 = shalt.err (!%p11240_p10)
}
  0x47   : > { %s12872_s12 = smov 64   ;;  %s12871_s11 = smov 4  }
  0x48   : > { %10532 = dma.hbm_to_vmem [thread:$0]  (!%p11653_p6), %s12851_s4, 2048, %s11657_s0, [#allocation10], %s12872_s12, %s12872_s12, %s12871_s11  }
  0x49   : > { %s11504_s19 = smov [#allocation12]   ;;  %s11505_s20 = smov [#allocation8]  }
  0x4a   : > { %s482_s16 = sshll.u32 %s11504_s19, 4  ;;  %s440_s21 = sshll.u32 %s11505_s20, 4  ;;  %s483_s16 = int_to_ptr.vmem [resolvable:$true] %s482_s16  ;;  %s11714_s21 = int_to_ptr.vmem [resolvable:$true] %s440_s21 }
  0x4b   : > { %s11244_s18 = scalar_lea.hbm %s12854_s7, 32 }
  0x4c   : > { %p11245_p11 = scmp.ne.s32.totalorder %s12854_s7, %s11244_s18  ;;  %p11251_p0 = scmp.lt.u32.totalorder %s11244_s18, %s12854_s7 }
  0x4e   : > { %p11247_p12 = pnand %p11245_p11, %p11667_p8 }
  0x50   : > { %p11248_p13 = pneg %p11247_p12 }
  0x52   : > { %p11253_p2 = pnand %p11251_p0, %p11248_p13 }
  0x54   : > { %11256 = shalt.err (!%p11253_p2)
}
  0x55   : > { %s11257_s14 = scalar_lea.vmem %s483_s16, 32  ;;  %p11265_p4 = scmp.lt.s32.totalorder %s483_s16, %s483_s16 }
  0x56   : > { %p11258_p5 = scmp.ne.s32.totalorder %s483_s16, %s11257_s14  ;;  %p11266_p10 = scmp.lt.s32.totalorder %s11257_s14, %s11257_s14 }
  0x58   : > { %p11260_p7 = pnand %p11258_p5, %p11667_p8  ;;  %p11267_p1 = por %p11266_p10, %p11265_p4 }
  0x5a   : > { %p11261_p9 = pneg %p11260_p7 }
  0x5c   : > { %p11268_p3 = pnand %p11267_p1, %p11261_p9 }
  0x5e   : > { %11271 = shalt.err (!%p11268_p3)
}
  0x5f   : > { %s12874_s2 = smov 16   ;;  %s12875_s19 = smov 1  }
  0x60   : > { %10538 = dma.hbm_to_vmem [thread:$0]  (!%p11653_p6), %s12854_s7, 32, %s483_s16, [#allocation13], %s12874_s2, %s12874_s2, %s12875_s19  }
  0x61   : > { %s12897_s3 = sld [smem:[#allocation27_spill]] }
  0x67   : > { %s11272_s27 = scalar_lea.hbm %s12897_s3, 96 }
  0x68   : > { %p11273_p1 = scmp.ne.s32.totalorder %s12897_s3, %s11272_s27  ;;  %p11279_p12 = scmp.lt.u32.totalorder %s11272_s27, %s12897_s3 }
  0x6a   : > { %p11275_p3 = pnand %p11273_p1, %p11667_p8 }
  0x6c   : > { %p11276_p11 = pneg %p11275_p3 }
  0x6e   : > { %p11281_p13 = pnand %p11279_p12, %p11276_p11 }
  0x70   : > { %11284 = shalt.err (!%p11281_p13)
}
  0x71   : > { %s11285_s16 = scalar_lea.vmem %s11714_s21, 96  ;;  %p11293_p7 = scmp.lt.s32.totalorder %s11714_s21, %s11714_s21 }
  0x72   : > { %p11286_p0 = scmp.ne.s32.totalorder %s11714_s21, %s11285_s16  ;;  %p11294_p9 = scmp.lt.s32.totalorder %s11285_s16, %s11285_s16 }
  0x74   : > { %p11288_p2 = pnand %p11286_p0, %p11667_p8  ;;  %p11295_p4 = por %p11294_p9, %p11293_p7 }
  0x76   : > { %p11289_p5 = pneg %p11288_p2 }
  0x78   : > { %p11296_p10 = pnand %p11295_p4, %p11289_p5 }
  0x7a   : > { %11299 = shalt.err (!%p11296_p10)
}
  0x7b   : > { %s11508_s20 = smov 48   ;;  %s11509_s11 = smov 3  }
  0x7c   : > { %10529 = dma.hbm_to_vmem [thread:$0]  (!%p11653_p6), %s12897_s3, 96, %s11714_s21, [#allocation7], %s11508_s20, %s11508_s20, %s11509_s11  }
  0x7d   : > { %s11510_s18 = smov [#allocation11]   ;;  %s11511_s13 = smov [#allocation14]  }
  0x7e   : > { %s469_s27 = sshll.u32 %s11510_s18, 4  ;;  %s495_s0 = sshll.u32 %s11511_s13, 4  ;;  %s470_s27 = int_to_ptr.vmem [resolvable:$true] %s469_s27  ;;  %s11760_s0 = int_to_ptr.vmem [resolvable:$true] %s495_s0 }
  0x7f   : > { %s11300_s12 = scalar_lea.hbm %s12853_s6, 32 }
  0x80   : > { %p11301_p1 = scmp.ne.s32.totalorder %s12853_s6, %s11300_s12  ;;  %p11307_p12 = scmp.lt.u32.totalorder %s11300_s12, %s12853_s6 }
  0x82   : > { %p11303_p3 = pnand %p11301_p1, %p11667_p8 }
  0x84   : > { %p11304_p11 = pneg %p11303_p3 }
  0x86   : > { %p11309_p13 = pnand %p11307_p12, %p11304_p11 }
  0x88   : > { %11312 = shalt.err (!%p11309_p13)
}
  0x89   : > { %s11313_s20 = scalar_lea.vmem %s470_s27, 32  ;;  %p11321_p7 = scmp.lt.s32.totalorder %s470_s27, %s470_s27 }
  0x8a   : > { %p11314_p0 = scmp.ne.s32.totalorder %s470_s27, %s11313_s20  ;;  %p11322_p9 = scmp.lt.s32.totalorder %s11313_s20, %s11313_s20 }
  0x8c   : > { %p11316_p2 = pnand %p11314_p0, %p11667_p8  ;;  %p11323_p4 = por %p11322_p9, %p11321_p7 }
  0x8e   : > { %p11317_p5 = pneg %p11316_p2 }
  0x90   : > { %p11324_p10 = pnand %p11323_p4, %p11317_p5 }
  0x92   : > { %11327 = shalt.err (!%p11324_p10)
}
  0x93   : > { %s12898_s2 = smov 1   ;;  %s12899_s19 = smov 16  }
  0x94   : > { %10535 = dma.hbm_to_vmem [thread:$0]  (!%p11653_p6), %s12853_s6, 32, %s470_s27, [#allocation10], %s12899_s19, %s12899_s19, %s12898_s2  }
  0x95   : > { %s11328_s13 = scalar_lea.hbm %s12855_s8, 32768 }
  0x96   : > { %p11329_p1 = scmp.ne.s32.totalorder %s12855_s8, %s11328_s13  ;;  %p11335_p12 = scmp.lt.u32.totalorder %s11328_s13, %s12855_s8 }
  0x98   : > { %p11331_p3 = pnand %p11329_p1, %p11667_p8 }
  0x9a   : > { %p11332_p11 = pneg %p11331_p3 }
  0x9c   : > { %p11337_p13 = pnand %p11335_p12, %p11332_p11 }
  0x9e   : > { %11340 = shalt.err (!%p11337_p13)
}
  0x9f   : > { %s11341_s27 = scalar_lea.vmem %s11760_s0, 32768  ;;  %p11349_p7 = scmp.lt.s32.totalorder %s11760_s0, %s11760_s0 }
  0xa0   : > { %p11342_p0 = scmp.ne.s32.totalorder %s11760_s0, %s11341_s27  ;;  %p11350_p9 = scmp.lt.s32.totalorder %s11341_s27, %s11341_s27 }
  0xa2   : > { %p11344_p2 = pnand %p11342_p0, %p11667_p8  ;;  %p11351_p4 = por %p11350_p9, %p11349_p7 }
  0xa4   : > { %p11345_p5 = pneg %p11344_p2 }
  0xa6   : > { %p11352_p10 = pnand %p11351_p4, %p11345_p5 }
  0xa8   : > { %11355 = shalt.err (!%p11352_p10)
}
  0xa9   : > { %s11512_s20 = smov 1024   ;;  %s12900_s2 = smov 64  }
  0xaa   : > { %10541 = dma.hbm_to_vmem [thread:$0]  (!%p11653_p6), %s12855_s8, 32768, %s11760_s0, [#allocation13], %s11512_s20, %s11512_s20, %s12900_s2  }
  0xab   : > { %s11513_s12 = smov [#allocation15]   ;;  %s11356_s14 = scalar_lea.hbm %s12857_s10, 32768 }
  0xac   : > { %s511_s30 = sshll.u32 %s11513_s12, 4  ;;  %p11357_p1 = scmp.ne.s32.totalorder %s12857_s10, %s11356_s14  ;;  %s512_s30 = int_to_ptr.vmem [resolvable:$true] %s511_s30 }
  0xad   : > { %p11363_p12 = scmp.lt.u32.totalorder %s11356_s14, %s12857_s10 }
  0xae   : > { %p11359_p3 = pnand %p11357_p1, %p11667_p8 }
  0xb0   : > { %p11360_p11 = pneg %p11359_p3 }
  0xb2   : > { %p11365_p13 = pnand %p11363_p12, %p11360_p11 }
  0xb4   : > { %11368 = shalt.err (!%p11365_p13)
}
  0xb5   : > { %s11369_s0 = scalar_lea.vmem %s512_s30, 32768  ;;  %p11377_p7 = scmp.lt.s32.totalorder %s512_s30, %s512_s30 }
  0xb6   : > { %p11370_p0 = scmp.ne.s32.totalorder %s512_s30, %s11369_s0  ;;  %p11378_p9 = scmp.lt.s32.totalorder %s11369_s0, %s11369_s0 }
  0xb8   : > { %p11372_p2 = pnand %p11370_p0, %p11667_p8  ;;  %p11379_p4 = por %p11378_p9, %p11377_p7 }
  0xba   : > { %p11373_p5 = pneg %p11372_p2 }
  0xbc   : > { %p11380_p10 = pnand %p11379_p4, %p11373_p5 }
  0xbe   : > { %11383 = shalt.err (!%p11380_p10)
}
  0xbf   : > { %s12901_s20 = smov 4   ;;  %s9106_s17 = sadd.s32 4294967294, %s11496_s26  }
  0xc0   : > { %10544 = dma.hbm_to_vmem [thread:$0]  (!%p11653_p6), %s12857_s10, 32768, %s512_s30, [#allocation16], %s12900_s2, %s12900_s2, %s12901_s20  }
  0xc1   : > { %s11830_s15 = sadd.s32 1, %s11496_s26   ;;  %s45_s18 = sadd.s32 1, %s11492_s25 }
  0xc2   : > { %s42_s12 = ssub.s32 %s11496_s26, %s11830_s15  ;;  %p52_p1 = scmp.ne.s32.totalorder %s11492_s25, %s11488_s24 }
  0xc3   : > { %p43_p8 = scmp.eq.s32.totalorder %s42_s12, 0  ;;  %p53_p3 = scmp.eq.s32.totalorder %s11496_s26, 0 }
  0xc4   : > { %p58_p11 = scmp.ne.s32.totalorder %s11488_s24, %s11484_s23  ;;  %p12903_p13 = scmp.eq.s32.totalorder %s11637_s28, 0 }
  0xc5   : > { %s11841_s13 = scalar_select %p43_p8, %s11492_s25, %s45_s18  }
  0xc6   : > { %p11843_p12 = por %p53_p3, %p52_p1  ;;  %p11849_p6 = por %p12903_p13, %p58_p11 }
  0xc7   : > { %p402_p0 = scmp.eq.s32.totalorder %s11637_s28, 1  ;;  %p408_p2 = scmp.eq.s32.totalorder %s9106_s17, 1 }
  0xc8   : > { %p10560_p5 = scmp.lt.s32.totalorder %s11496_s26, 2  ;;  %s540_s30 = sand.u32 1, %s11492_s25  }
  0xc9   : > { %p11856_p7 = por %p402_p0, %p52_p1  ;;  %p11860_p9 = por %p408_p2, %p58_p11 }
  0xca   : > { %s9116_s21 = sshll.u32 %s540_s30, 4  ;;  %s9758_s27 = sshll.u32 %s11496_s26, 8 }
  0xcb   : > { %s12905_s16 = scalar_select %p11856_p7, 1, 0 }
  0xcc   : > { %s12906_s22 = scalar_select %p11860_p9, 1, 0 }
  0xcd   : > { %s12907_s19 = sld [smem:[#allocation24_spill]]  ;;  %s544_s17 = scalar_lea.vmem [#allocation3], %s9116_s21 }
  0xce   : > { %s551_s12 = sshll.u32 %s544_s17, 4  ;;  %p11874_p4 = pnand %p10560_p5, %p11843_p12  ;;  %s11870_s12 = int_to_ptr.vmem [resolvable:$true] %s551_s12 }
  0xcf   : > { %s11878_s3 = scalar_lea.sflag [#allocation4], %s540_s30 }
  0xd0   : > { %p11386_p8 = pneg %p11874_p4 }
  0xd3   : > { %s11868_s11 = scalar_lea.hbm %s12907_s19, %s9758_s27  ;;  %s11389_s14 = scalar_lea.hbm %s12907_s19, 512 }
  0xd4   : > { %s11384_s0 = scalar_lea.hbm %s11868_s11, 256  ;;  %p11390_p11 = scmp.lt.u32.totalorder %s11868_s11, %s12907_s19 }
  0xd5   : > { %p11385_p10 = scmp.ne.s32.totalorder %s11868_s11, %s11384_s0  ;;  %p11391_p12 = scmp.lt.u32.totalorder %s11389_s14, %s11384_s0 }
  0xd6   : > { %p11393_p0 = scmp.lt.u32.totalorder %s11384_s0, %s11868_s11 }
  0xd7   : > { %p11387_p1 = pnand %p11386_p8, %p11385_p10  ;;  %p11392_p13 = por %p11391_p12, %p11390_p11 }
  0xd9   : > { %p11388_p3 = pneg %p11387_p1  ;;  %p11394_p2 = por %p11393_p0, %p11392_p13 }
  0xdb   : > { %p11395_p5 = pnand %p11394_p2, %p11388_p3 }
  0xdd   : > { %11398 = shalt.err (!%p11395_p5)
}
  0xde   : > { %s11399_s30 = scalar_lea.vmem %s11870_s12, 256  ;;  %s11514_s21 = smov [#allocation3]  }
  0xdf   : > { %p11400_p10 = scmp.ne.s32.totalorder %s11870_s12, %s11399_s30  ;;  %s11404_s27 = sshll.u32 %s11514_s21, 4  ;;  %s11405_s27 = int_to_ptr.vmem [resolvable:$false] %s11404_s27 }
  0xe0   : > { %s11406_s20 = scalar_lea.vmem %s11405_s27, 512  ;;  %p11407_p7 = scmp.lt.s32.totalorder %s11870_s12, %s11405_s27 }
  0xe1   : > { %p11402_p1 = pnand %p11400_p10, %p11386_p8  ;;  %p11408_p11 = scmp.lt.s32.totalorder %s11406_s20, %s11399_s30 }
  0xe3   : > { %p11403_p9 = pneg %p11402_p1  ;;  %p11409_p12 = por %p11408_p11, %p11407_p7 }
  0xe5   : > { %p11410_p13 = pnand %p11409_p12, %p11403_p9 }
  0xe7   : > { %11413 = shalt.err (!%p11410_p13)
}
  0xe8   : > { %s11515_s0 = smov 128   ;;  %s11516_s14 = smov 8  }
  0xe9   : > { %10548 = dma.hbm_to_vmem [thread:$0]  (!%p11874_p4), %s11868_s11, 256, %s11870_s12, %s11878_s3, %s11515_s0, %s11515_s0, %s11516_s14  }
  0xea   : > { %p12909_p8 = scmp.ne.s32.totalorder %s12893_s29, 0 }
  0xeb   : > { %s11909_s17 = sand.u32 (!%p12909_p8), 1, %s11488_s24  }
  0xec   : > { %569 = sbr.rel (%p12909_p8) target bundleno = 6352 (0x18d0), region = 84  ;;  %s9120_s30 = sshll.u32 (!%p12909_p8), %s11909_s17, 4 }
  0xed   : > { %s572_s21 = scalar_lea.sflag (!%p12909_p8), [#allocation4], %s11909_s17  ;;  %s11913_s27 = scalar_lea.vmem (!%p12909_p8), [#allocation3], %s9120_s30 }
  0xf3   : > { %11459 = dma.done.wait (%p11849_p6), %s572_s21, 256  }
  0xf4   : > { %11461 = vsyncadd (%p11849_p6), %s572_s21, 4294967040  ;;  %p12910_p7 = scmp.eq.s32.totalorder %s11637_s28, 0 }
  0xf6   : > { %11463 = dma.done.wait (%p12910_p7), [#allocation7], 6240   ;;  %p12911_p9 = pmov %p12910_p7 }
  0xf7   : > { %p12912_p4 = pmov %p12910_p7 }
  0xf8   : > { %11465 = vsyncadd (%p12911_p9), [#allocation7], 4294961056 }
  0xf9   : > { %11467 = dma.done.wait (%p12912_p4), [#allocation10], 2080   ;;  %p12913_p3 = pmov %p12912_p4 }
  0xfb   : > { %11469 = vsyncadd (%p12913_p3), [#allocation10], 4294965216  ;;  %p12914_p0 = pmov %p12913_p3 }
  0xfd   : > { %11471 = dma.done.wait (%p12914_p0), [#allocation13], 32800   ;;  %p12915_p2 = pmov %p12914_p0 }
  0xfe   : > { %p12916_p6 = pmov %p12914_p0 }
  0xff   : > { %11473 = vsyncadd (%p12915_p2), [#allocation13], 4294934496 }
 0x100   : > { %11475 = dma.done.wait (%p12916_p6), [#allocation16], 32768   ;;  %p12917_p5 = pmov %p12914_p0 }
 0x101   : > { %v11517_v1 = vmov 0   ;;  %v11518_v2 = vmov 0.0   ;;  %v10701_v3 = vld [vmem:[#allocation6 + $0x4] ss:$12 sps:$4 sm:$0xff]   ;;  %v10703_v4 = vld [vmem:[#allocation6] ss:$12 sps:$4 sm:$0xff]   ;;  %v696_v30 = vlaneseq }
 0x102   : > { %11477 = vsyncadd (%p12917_p5), [#allocation16], 4294934528  ;;  %871 = vmatprep.mubr.bf16.mxu0 %v11517_v1  ;;  %10213 = vmatprep.subr.bf16.mxu1 %v11518_v2  ;;  %v10704_v5 = vld [vmem:[#allocation6 + $0x1c] ss:$12 sps:$4 sm:$0xff]   ;;  %v10706_v6 = vld [vmem:[#allocation6 + $0x18] ss:$12 sps:$4 sm:$0xff]  }
 0x103   : > { %10699 = vset.pattern.permute.xlu1 %v11517_v1  ;;  %10700 = vset.pattern.permute.xlu0 %v11517_v1  ;;  %v10707_v7 = vld [vmem:[#allocation6 + $0x34] ss:$12 sps:$4 sm:$0xff]   ;;  %v10709_v8 = vld [vmem:[#allocation6 + $0x30] ss:$12 sps:$4 sm:$0xff]   ;;  %v10710_v9 = vld [vmem:[#allocation6 + $0x4c] ss:$12 sps:$4 sm:$0xff]  }
 0x104   : > { %839 = vmatprep.subr.bf16.mxu0 %v10701_v3  ;;  %v10712_v10 = vld [vmem:[#allocation6 + $0x48] ss:$12 sps:$4 sm:$0xff]   ;;  %v10713_v11 = vld [vmem:[#allocation6 + $0x64] ss:$12 sps:$4 sm:$0xff]   ;;  %v10726_v13 = vld [vmem:[#allocation6 + $0x20] ss:$12 sps:$4 sm:$0xff]  }
 0x105   : > { %840 = vmatpush1.bf16.msra.mxu0 %v10703_v4  ;;  %v10725_v12 = vld [vmem:[#allocation6 + $0x8] ss:$12 sps:$4 sm:$0xff]   ;;  %v10715_v14 = vld [vmem:[#allocation6 + $0x60] ss:$12 sps:$4 sm:$0xff]   ;;  %v10718_v16 = vld [vmem:[#allocation6 + $0x78] ss:$12 sps:$4 sm:$0xff]  }
 0x106   : > { %841 = vmatprep.subr.bf16.mxu0 %v10704_v5  ;;  %10214 = vmatpush3.bf16.msra.mxu1 %v10725_v12  ;;  %v10716_v15 = vld [vmem:[#allocation6 + $0x7c] ss:$12 sps:$4 sm:$0xff]   ;;  %v10719_v17 = vld [vmem:[#allocation6 + $0x94] ss:$12 sps:$4 sm:$0xff]   ;;  %v10727_v18 = vld [vmem:[#allocation6 + $0x38] ss:$12 sps:$4 sm:$0xff]  }
 0x107   : > { %10215 = vmatprep.subr.bf16.mxu1 %v11518_v2  ;;  %v10728_v19 = vld [vmem:[#allocation6 + $0x50] ss:$12 sps:$4 sm:$0xff]   ;;  %v10722_v21 = vld [vmem:[#allocation6 + $0xac] ss:$12 sps:$4 sm:$0xff]   ;;  %v10729_v22 = vld [vmem:[#allocation6 + $0x68] ss:$12 sps:$4 sm:$0xff]  }
 0x108   : > { %v10721_v20 = vld [vmem:[#allocation6 + $0x90] ss:$12 sps:$4 sm:$0xff]   ;;  %v10724_v23 = vld [vmem:[#allocation6 + $0xa8] ss:$12 sps:$4 sm:$0xff]   ;;  %v10730_v26 = vld [vmem:[#allocation6 + $0x80] ss:$12 sps:$4 sm:$0xff]  }
 0x109   : > { %842 = vmatpush1.bf16.msra.mxu0 %v10706_v6  ;;  %v658_v24 = vld [vmem:[%s11913_s27] sm:$0xff]  ;;  %v659_v25 = vld [vmem:[%s11913_s27 + $0x8] sm:$0xff]  ;;  %vm11519_vm0 = vmmov 0   ;;  %v11956_v31 = vshrl.u32 %v696_v30, 7  ;;  %vm934_vm1 = vcmask 130048   ;;  %s11520_s3 = smov 96  }
 0x10a   : > { %843 = vmatprep.subr.bf16.mxu0 %v10707_v7  ;;  %10216 = vmatpush3.bf16.msra.mxu1 %v10726_v13  ;;  %v693_v27 = vpack.c.bf16 %v659_v25, %v658_v24  ;;  %v10731_v28 = vld [vmem:[#allocation6 + $0x98] ss:$12 sps:$4 sm:$0xff]   ;;  %v10732_v29 = vld [vmem:[#allocation6 + $0xb0] ss:$12 sps:$4 sm:$0xff]   ;;  %v694_v33 = vld [vmem:[#allocation8] sm:$0x7] }
 0x10b   : > { %10217 = vmatprep.subr.bf16.mxu1 %v11518_v2  ;;  %10229 = vmatprep.mubr.msk.bf16.mxu1 %vm11519_vm0, %v11518_v2  ;;  %v11959_v32 = vsub.s32 0, %v11956_v31  ;;  %v11962_v34 = vsub.s32 1, %v11956_v31  ;;  %s11521_s29 = smov 112   ;;  %s11522_s2 = smov 80   ;;  %v11986_v50 = vsub.s32 2, %v11956_v31  ;;  %vm1957_vm2 = vcmask 261120  }
 0x10c   : > { %s11523_s11 = smov 64   ;;  %s12881_s12 = smov 48   ;;  %vm1960_vm3 = vcmask 392192   ;;  %vm1963_vm4 = vcmask 523264   ;;  %vm1966_vm5 = vcmask 654336   ;;  %vm1969_vm6 = vcmask 785408  }
 0x10d   : > { %844 = vmatpush1.bf16.msra.mxu0 %v10709_v8  ;;  %v699_v35 = vrot.slane %v694_v33, %v11959_v32  ;;  %v703_v37 = vrot.slane %v694_v33, %v11962_v34  ;;  %s12879_s18 = smov 32   ;;  %s12877_s20 = smov 16   ;;  %v707_v51 = vrot.slane %v694_v33, %v11986_v50  ;;  %vm1972_vm7 = vcmask 916480  }
 0x10e   : > { %845 = vmatprep.subr.bf16.mxu0 %v10710_v9  ;;  %10218 = vmatpush3.bf16.msra.mxu1 %v10727_v18  ;;  %p654_p10 = scmp.lt.s32.totalorder %s11637_s28, 1  ;;  %s12918_s1 = sld [smem:[#allocation25_spill]]  ;;  %vm8949_vm8 = vcmask 122880  }
 0x10f   : > { %10219 = vmatprep.subr.bf16.mxu1 %v11518_v2  ;;  %s12920_s30 = sld [smem:[#allocation29_spill]]  ;;  %s8952_s14 = scalar_lea.sflag [#allocation5], %s11909_s17 }
 0x110   : > { %s655_s0 = scalar_select %p654_p10, %s11637_s28, 1 }
 0x111   : > { %846 = vmatpush1.bf16.msra.mxu0 %v10712_v10  ;;  %p12927_p11 = scmp.ne.s32.totalorder %s12905_s16, 0 }
 0x112   : > { %847 = vmatprep.subr.bf16.mxu0 %v10713_v11  ;;  %10220 = vmatpush3.bf16.msra.mxu1 %v10728_v19 }
 0x113   : > { %10221 = vmatprep.subr.bf16.mxu1 %v11518_v2 }
 0x114   : > { %s12033_s21 = scalar_lea.vmem %s12918_s1, %s655_s0  ;;  %s12919_s0 = sld [smem:[#allocation28_spill]] }
 0x115   : > { %848 = vmatpush1.bf16.msra.mxu0 %v10715_v14  ;;  %v12036_v18 = vld [vmem:[%s12033_s21] ss:$0 sm:$0xff] }
 0x116   : > { %849 = vmatprep.subr.bf16.mxu0 %v10716_v15  ;;  %10222 = vmatpush3.bf16.msra.mxu1 %v10729_v22 }
 0x117   : > { %10223 = vmatprep.subr.bf16.mxu1 %v11518_v2 }
 0x119   : > { %850 = vmatpush1.bf16.msra.mxu0 %v10718_v16 }
 0x11a   : > { %851 = vmatprep.subr.bf16.mxu0 %v10719_v17  ;;  %10224 = vmatpush3.bf16.msra.mxu1 %v10730_v26 }
 0x11b   : > { %10225 = vmatprep.subr.bf16.mxu1 %v11518_v2 }
 0x11d   : > { %852 = vmatpush1.bf16.msra.mxu0 %v10721_v20 }
 0x11e   : > { %853 = vmatprep.subr.bf16.mxu0 %v10722_v21  ;;  %10226 = vmatpush3.bf16.msra.mxu1 %v10731_v28 }
 0x11f   : > { %10227 = vmatprep.subr.bf16.mxu1 %v11518_v2 }
 0x121   : > { %854 = vmatpush1.bf16.msra.mxu0 %v10724_v23 }
 0x122   : > { %10245 = vmatprep.subr.bf16.mxu0 %v11518_v2  ;;  %10228 = vmatpush3.bf16.msra.mxu1 %v10732_v29 }
 0x123   : > { %10233 = vmatprep.subr.bf16.mxu1 %v11518_v2 }
 0x124   : > { %872 = vmatmul.mubr.bf16.vlgmr.msra.gmra.mrb[0].mxu0 %v693_v27 }
 0x125   : > { %10247 = vmatprep.mubr.msk.bf16.mxu0 %vm11519_vm0, %v11518_v2  ;;  %10230 = vmatmul.mubr.bf16.vlgmr.msra.gmra.mrb[0].mxu1 %v693_v27 }
 0x126   : > { %10235 = vmatprep.mubr.msk.bf16.mxu1 %vm11519_vm0, %v11518_v2 }
 0x1f7   : > { %v873_v36 = vpop.f32.mrb[0].mxu0 }
 0x1f8   : > { %v874_v38 = vadd.f32 %v873_v36, %v699_v35  ;;  %v875_v39 = vpop.f32.mrb[1].mxu0  ;;  %v916_v52 = vpop.f32.mrb[0].mxu1 }
 0x1f9   : > { %v877_v40 = vpop.f32.mrb[2].mxu0  ;;  %v876_v43 = vadd.f32 %v875_v39, %v703_v37  ;;  %v917_v53 = vadd.f32 %v916_v52, %v707_v51  ;;  %v10231_v54 = vpop.f32.mrb[1].mxu1 }
 0x1fa   : > { %v878_v41 = vadd.f32 %v877_v40, %v699_v35  ;;  %v879_v42 = vpop.f32.mrb[3].mxu0  ;;  %v923_v45 = vmul.f32 0.25, %v874_v38  ;;  %v919_v55 = vpop.f32.mrb[2].mxu1 }
 0x1fb   : > { %v880_v44 = vadd.f32 %v879_v42, %v703_v37  ;;  %v920_v56 = vadd.f32 %v919_v55, %v707_v51  ;;  %v10232_v57 = vpop.f32.mrb[3].mxu1 }
 0x1fc   : > { %v924_v46 = vmul.f32 0.25, %v878_v41 }
 0x1fd   : > { %v926_v47 = vpack.c.bf16 %v880_v44, %v876_v43  ;;  %v11989_v58 = vpack.c.bf16 %v920_v56, %v917_v53 }
 0x1fe   : > { %v925_v48 = vpack.c.bf16 %v924_v46, %v923_v45 }
 0x1ff   : > { %1175 = vrot.lane.b32.xlu1 %v926_v47, %s11520_s3  ;;  %1053 = vrot.lane.b32.xlu0 %v926_v47, %s11521_s29  ;;  %v939_v49 = vsel %vm934_vm1, %v926_v47, 0 }
 0x200   : > { %10234 = vmatpush3.bf16.xpose.msra.mxu1 %v939_v49 }
 0x201   : > { %10239 = vmatprep.subr.bf16.mxu1 %v11518_v2 }
 0x203   : > { %1173 = vrot.lane.b32.xlu1 %v925_v48, %s11520_s3  ;;  %1050 = vrot.lane.b32.xlu0 %v925_v48, %s11521_s29 }
 0x207   : > { %1294 = vrot.lane.b32.xlu1 %v925_v48, %s11522_s2  ;;  %1296 = vrot.lane.b32.xlu0 %v926_v47, %s11522_s2 }
 0x208   : > { %10236 = vmatmul.mubr.msk.bf16.vlgmr.msra.gmra.mrb[4].mxu1 %vm934_vm1, %v925_v48 }
 0x209   : > { %10241 = vmatprep.mubr.msk.bf16.mxu1 %vm11519_vm0, %v11518_v2  ;;  %10240 = vmatpush3.bf16.msra.mxu1 %v11989_v58 }
 0x20a   : > { %10251 = vmatprep.subr.bf16.mxu1 %v11518_v2 }
 0x20b   : > { %1415 = vrot.lane.b32.xlu1 %v925_v48, %s11523_s11  ;;  %1417 = vrot.lane.b32.xlu0 %v926_v47, %s11523_s11 }
 0x20f   : > { %1536 = vrot.lane.b32.xlu1 %v925_v48, %s12881_s12  ;;  %1538 = vrot.lane.b32.xlu0 %v926_v47, %s12881_s12 }
 0x213   : > { %1657 = vrot.lane.b32.xlu1 %v925_v48, %s12879_s18  ;;  %1659 = vrot.lane.b32.xlu0 %v926_v47, %s12879_s18 }
 0x217   : > { %1778 = vrot.lane.b32.xlu1 %v925_v48, %s12877_s20  ;;  %1780 = vrot.lane.b32.xlu0 %v926_v47, %s12877_s20 }
 0x271   : > { %v1054_v59 = vpop.permute.xlu0 %1053  ;;  %v1176_v61 = vpop.permute.xlu1 %1175 }
 0x272   : > { %v1059_v60 = vsel %vm934_vm1, %v1054_v59, 0  ;;  %v1181_v63 = vsel %vm934_vm1, %v1176_v61, 0 }
 0x273   : > { %10246 = vmatpush3.bf16.xpose.msra.mxu0 %v1059_v60 }
 0x274   : > { %10257 = vmatprep.subr.bf16.mxu0 %v11518_v2 }
 0x275   : > { %v1051_v62 = vpop.permute.xlu0 %1050  ;;  %v1174_v3 = vpop.permute.xlu1 %1173 }
 0x279   : > { %v1297_v0 = vpop.permute.xlu0 %1296  ;;  %v1295_v6 = vpop.permute.xlu1 %1294 }
 0x27a   : > { %10248 = vmatmul.mubr.msk.bf16.vlgmr.msra.gmra.mrb[4].mxu0 %vm934_vm1, %v1051_v62  ;;  %v1302_v4 = vsel %vm934_vm1, %v1297_v0, 0 }
 0x27b   : > { %10258 = vmatpush3.bf16.xpose.msra.mxu0 %v1181_v63  ;;  %10259 = vmatprep.mubr.msk.bf16.mxu0 %vm11519_vm0, %v11518_v2 }
 0x27c   : > { %10269 = vmatprep.subr.bf16.mxu0 %v11518_v2 }
 0x27d   : > { %v1418_v5 = vpop.permute.xlu0 %1417  ;;  %v1416_v9 = vpop.permute.xlu1 %1415 }
 0x27e   : > { %v1423_v7 = vsel %vm934_vm1, %v1418_v5, 0 }
 0x281   : > { %v1539_v8 = vpop.permute.xlu0 %1538  ;;  %v1537_v12 = vpop.permute.xlu1 %1536 }
 0x282   : > { %10260 = vmatmul.mubr.msk.bf16.vlgmr.msra.gmra.mrb[8].mxu0 %vm934_vm1, %v1174_v3  ;;  %v1544_v10 = vsel %vm934_vm1, %v1539_v8, 0 }
 0x283   : > { %10270 = vmatpush3.bf16.xpose.msra.mxu0 %v1302_v4  ;;  %10271 = vmatprep.mubr.msk.bf16.mxu0 %vm11519_vm0, %v11518_v2 }
 0x284   : > { %10281 = vmatprep.subr.bf16.mxu0 %v11518_v2 }
 0x285   : > { %v1660_v11 = vpop.permute.xlu0 %1659  ;;  %v1658_v15 = vpop.permute.xlu1 %1657 }
 0x286   : > { %v1665_v13 = vsel %vm934_vm1, %v1660_v11, 0 }
 0x289   : > { %v1781_v14 = vpop.permute.xlu0 %1780  ;;  %v1779_v17 = vpop.permute.xlu1 %1778 }
 0x28a   : > { %10272 = vmatmul.mubr.msk.bf16.vlgmr.msra.gmra.mrb[12].mxu0 %vm934_vm1, %v1295_v6  ;;  %v1786_v16 = vsel %vm934_vm1, %v1781_v14, 0 }
 0x28b   : > { %10282 = vmatpush3.bf16.xpose.msra.mxu0 %v1423_v7  ;;  %10283 = vmatprep.mubr.msk.bf16.mxu0 %vm11519_vm0, %v11518_v2 }
 0x28c   : > { %10293 = vmatprep.subr.bf16.mxu0 %v11518_v2 }
 0x292   : > { %10284 = vmatmul.mubr.msk.bf16.vlgmr.msra.gmra.mrb[16].mxu0 %vm934_vm1, %v1416_v9 }
 0x293   : > { %10294 = vmatpush3.bf16.xpose.msra.mxu0 %v1544_v10  ;;  %10295 = vmatprep.mubr.msk.bf16.mxu0 %vm11519_vm0, %v11518_v2 }
 0x294   : > { %10305 = vmatprep.subr.bf16.mxu0 %v11518_v2 }
 0x29a   : > { %10296 = vmatmul.mubr.msk.bf16.vlgmr.msra.gmra.mrb[20].mxu0 %vm934_vm1, %v1537_v12 }
 0x29b   : > { %10306 = vmatpush3.bf16.xpose.msra.mxu0 %v1665_v13  ;;  %10307 = vmatprep.mubr.msk.bf16.mxu0 %vm11519_vm0, %v11518_v2 }
 0x29c   : > { %10317 = vmatprep.subr.bf16.mxu0 %v11518_v2 }
 0x2a2   : > { %10308 = vmatmul.mubr.msk.bf16.vlgmr.msra.gmra.mrb[24].mxu0 %vm934_vm1, %v1658_v15 }
 0x2a3   : > { %10318 = vmatpush3.bf16.xpose.msra.mxu0 %v1786_v16  ;;  %10319 = vmatprep.mubr.msk.bf16.mxu0 %vm11519_vm0, %v11518_v2 }
 0x2a4   : > { %10329 = vmatprep.subr.bf16.mxu0 %v11518_v2 }
 0x2aa   : > { %10320 = vmatmul.mubr.msk.bf16.vlgmr.msra.gmra.mrb[28].mxu0 %vm934_vm1, %v1779_v17 }
 0x2ab   : > { %10345 = vmatprep.mubr.msk.bf16.mxu0 %vm11519_vm0, %v11518_v2 }
 0x2db   : > { %v975_v19 = vpop.f32.mrb[4].mxu1 }
 0x2dc   : > { %v976_v20 = vadd.f32 %v12036_v18, %v975_v19  ;;  %v10237_v21 = vpop.f32.mrb[5].mxu1 }
 0x2dd   : > { %v978_v22 = vpop.f32.mrb[6].mxu1 }
 0x2de   : > { %v979_v23 = vadd.f32 %v12036_v18, %v978_v22  ;;  %v10238_v24 = vpop.f32.mrb[7].mxu1  ;;  %v982_v25 = vsel %vm934_vm1, %v976_v20, -inf }
 0x2df   : > { %983 = vmax.xlane.f32.xlu0 %v982_v25 }
 0x2e0   : > { %v985_v26 = vsel %vm934_vm1, %v979_v23, -inf }
 0x2e1   : > { %986 = vmax.xlane.f32.xlu1 %v985_v26 }
 0x2f2   : > { %1126 = vrot.lane.b32.xlu1 %v11989_v58, %s11521_s29 }
 0x34d   : > { %v1095_v27 = vpop.f32.mrb[4].mxu0 }
 0x34e   : > { %v12045_v28 = vadd.f32 %v12036_v18, %v1095_v27  ;;  %v10249_v29 = vpop.f32.mrb[5].mxu0 }
 0x34f   : > { %v1098_v30 = vpop.f32.mrb[6].mxu0 }
 0x350   : > { %v12048_v33 = vadd.f32 %v12036_v18, %v1098_v30  ;;  %v10250_v35 = vpop.f32.mrb[7].mxu0  ;;  %v1102_v36 = vsel %vm934_vm1, %v12045_v28, -inf }
 0x351   : > { %1103 = vmax.xlane.f32.xlu0 %v1102_v36 }
 0x352   : > { %v1105_v37 = vsel %vm934_vm1, %v12048_v33, -inf }
 0x355   : > { %v1217_v38 = vpop.f32.mrb[8].mxu0  ;;  %1106 = vmax.xlane.f32.xlu0 %v1105_v37 }
 0x356   : > { %v12055_v39 = vadd.f32 %v12036_v18, %v1217_v38  ;;  %v10261_v40 = vpop.f32.mrb[9].mxu0 }
 0x357   : > { %v1220_v41 = vpop.f32.mrb[10].mxu0 }
 0x358   : > { %v12058_v42 = vadd.f32 %v12036_v18, %v1220_v41  ;;  %v10262_v43 = vpop.f32.mrb[11].mxu0  ;;  %v1224_v44 = vsel %vm934_vm1, %v12055_v39, -inf }
 0x359   : > { %1225 = vmax.xlane.f32.xlu1 %v1224_v44 }
 0x35a   : > { %v1227_v45 = vsel %vm934_vm1, %v12058_v42, -inf }
 0x35b   : > { %1228 = vmax.xlane.f32.xlu0 %v1227_v45 }
 0x35d   : > { %v1338_v46 = vpop.f32.mrb[12].mxu0 }
 0x35e   : > { %v12065_v47 = vadd.f32 %v12036_v18, %v1338_v46  ;;  %v10273_v48 = vpop.f32.mrb[13].mxu0 }
 0x35f   : > { %v1341_v49 = vpop.f32.mrb[14].mxu0 }
 0x360   : > { %v12068_v51 = vadd.f32 %v12036_v18, %v1341_v49  ;;  %v10274_v52 = vpop.f32.mrb[15].mxu0  ;;  %v1345_v53 = vsel %vm934_vm1, %v12065_v47, -inf }
 0x361   : > { %1346 = vmax.xlane.f32.xlu1 %v1345_v53 }
 0x362   : > { %v1348_v54 = vsel %vm934_vm1, %v12068_v51, -inf }
 0x363   : > { %1349 = vmax.xlane.f32.xlu0 %v1348_v54 }
 0x365   : > { %v1459_v55 = vpop.f32.mrb[16].mxu0 }
 0x366   : > { %v12075_v56 = vadd.f32 %v12036_v18, %v1459_v55  ;;  %v10285_v57 = vpop.f32.mrb[17].mxu0 }
 0x367   : > { %v1462_v59 = vpop.f32.mrb[18].mxu0 }
 0x368   : > { %v12078_v60 = vadd.f32 %v12036_v18, %v1462_v59  ;;  %v10286_v61 = vpop.f32.mrb[19].mxu0  ;;  %v1466_v62 = vsel %vm934_vm1, %v12075_v56, -inf }
 0x369   : > { %1467 = vmax.xlane.f32.xlu1 %v1466_v62 }
 0x36a   : > { %v1469_v63 = vsel %vm934_vm1, %v12078_v60, -inf }
 0x36b   : > { %1470 = vmax.xlane.f32.xlu0 %v1469_v63 }
 0x36c   : > { %v984_v0 = vpop.xlane.xlu0 %983 }
 0x36d   : > { %v988_v3 = vsub.f32 %v976_v20, %v984_v0  ;;  %v1580_v4 = vpop.f32.mrb[20].mxu0 }
 0x36e   : > { %v12085_v5 = vadd.f32 %v12036_v18, %v1580_v4  ;;  %v987_v6 = vpop.xlane.xlu1 %986  ;;  %v10297_v7 = vpop.f32.mrb[21].mxu0 }
 0x36f   : > { %v990_v8 = vmul.f32 1.442695, %v988_v3  ;;  %v989_v9 = vsub.f32 %v979_v23, %v987_v6  ;;  %v1583_v10 = vpop.f32.mrb[22].mxu0 }
 0x370   : > { %v12088_v11 = vadd.f32 %v12036_v18, %v1583_v10  ;;  %v10298_v12 = vpop.f32.mrb[23].mxu0  ;;  %v1587_v13 = vsel %vm934_vm1, %v12085_v5, -inf }
 0x371   : > { %11037 = vpow2.f32 %v990_v8  ;;  %v992_v14 = vmul.f32 1.442695, %v989_v9  ;;  %1588 = vmax.xlane.f32.xlu1 %v1587_v13 }
 0x372   : > { %v1590_v15 = vsel %vm934_vm1, %v12088_v11, -inf  ;;  %v12127_v46 = vpop.permute.xlu1 %1126 }
 0x373   : > { %11039 = vpow2.f32 %v992_v14  ;;  %1591 = vmax.xlane.f32.xlu0 %v1590_v15 }
 0x375   : > { %v1701_v16 = vpop.f32.mrb[24].mxu0 }
 0x376   : > { %v12095_v17 = vadd.f32 %v12036_v18, %v1701_v16  ;;  %v10309_v19 = vpop.f32.mrb[25].mxu0 }
 0x377   : > { %v1704_v20 = vpop.f32.mrb[26].mxu0 }
 0x378   : > { %v12098_v21 = vadd.f32 %v12036_v18, %v1704_v20  ;;  %v10310_v22 = vpop.f32.mrb[27].mxu0  ;;  %v1708_v23 = vsel %vm934_vm1, %v12095_v17, -inf }
 0x379   : > { %1709 = vmax.xlane.f32.xlu1 %v1708_v23 }
 0x37a   : > { %v1711_v24 = vsel %vm934_vm1, %v12098_v21, -inf }
 0x37b   : > { %v12104_v25 = vpop.eup %11037  ;;  %1712 = vmax.xlane.f32.xlu0 %v1711_v24 }
 0x37c   : > { %v994_v26 = vsel %vm934_vm1, %v12104_v25, 0.0 }
 0x37d   : > { %v12108_v27 = vpop.eup %11039  ;;  %v1822_v29 = vpop.f32.mrb[28].mxu0  ;;  %995 = vadd.xlane.f32.xlu1 %v994_v26 }
 0x37e   : > { %v12111_v30 = vadd.f32 %v12036_v18, %v1822_v29  ;;  %v10321_v35 = vpop.f32.mrb[29].mxu0  ;;  %v997_v36 = vsel %vm934_vm1, %v12108_v27, 0.0 }
 0x37f   : > { %v1825_v37 = vpop.f32.mrb[30].mxu0  ;;  %998 = vadd.xlane.f32.xlu0 %v997_v36 }
 0x380   : > { %v12116_v38 = vadd.f32 %v12036_v18, %v1825_v37  ;;  %v10322_v40 = vpop.f32.mrb[31].mxu0  ;;  %v1829_v41 = vsel %vm934_vm1, %v12111_v30, -inf }
 0x381   : > { %1830 = vmax.xlane.f32.xlu1 %v1829_v41 }
 0x382   : > { %v1832_v43 = vsel %vm934_vm1, %v12116_v38, -inf }
 0x383   : > { %1833 = vmax.xlane.f32.xlu0 %v1832_v43 }
 0x392   : > { %1368 = vrot.lane.b32.xlu1 %v11989_v58, %s11522_s2 }
 0x399   : > { %1247 = vrot.lane.b32.xlu0 %v11989_v58, %s11520_s3 }
 0x3de   : > { %v1104_v44 = vpop.xlane.xlu0 %1103 }
 0x3df   : > { %v1108_v45 = vsub.f32 %v12045_v28, %v1104_v44 }
 0x3e1   : > { %v1110_v18 = vmul.f32 1.442695, %v1108_v45 }
 0x3e2   : > { %v1107_v48 = vpop.xlane.xlu0 %1106 }
 0x3e3   : > { %11041 = vpow2.f32 %v1110_v18  ;;  %v1109_v49 = vsub.f32 %v12048_v33, %v1107_v48 }
 0x3e5   : > { %v1112_v52 = vmul.f32 1.442695, %v1109_v49 }
 0x3e6   : > { %v1226_v53 = vpop.xlane.xlu1 %1225 }
 0x3e7   : > { %11043 = vpow2.f32 %v1112_v52  ;;  %v1230_v54 = vsub.f32 %v12055_v39, %v1226_v53 }
 0x3e8   : > { %v1229_v55 = vpop.xlane.xlu0 %1228 }
 0x3e9   : > { %v1232_v57 = vmul.f32 1.442695, %v1230_v54  ;;  %v1231_v59 = vsub.f32 %v12058_v42, %v1229_v55 }
 0x3eb   : > { %11045 = vpow2.f32 %v1232_v57  ;;  %v1234_v61 = vmul.f32 1.442695, %v1231_v59 }
 0x3ed   : > { %v12132_v62 = vpop.eup %11041  ;;  %11047 = vpow2.f32 %v1234_v61 }
 0x3ee   : > { %v1347_v28 = vpop.xlane.xlu1 %1346  ;;  %v1114_v63 = vsel %vm934_vm1, %v12132_v62, 0.0 }
 0x3ef   : > { %v1351_v33 = vsub.f32 %v12065_v47, %v1347_v28  ;;  %1115 = vadd.xlane.f32.xlu1 %v1114_v63 }
 0x3f0   : > { %v1350_v0 = vpop.xlane.xlu0 %1349 }
 0x3f1   : > { %v12137_v3 = vpop.eup %11043  ;;  %v1353_v39 = vmul.f32 1.442695, %v1351_v33  ;;  %v1352_v4 = vsub.f32 %v12068_v51, %v1350_v0 }
 0x3f2   : > { %v1117_v42 = vsel %vm934_vm1, %v12137_v3, 0.0 }
 0x3f3   : > { %11049 = vpow2.f32 %v1353_v39  ;;  %v1355_v6 = vmul.f32 1.442695, %v1352_v4  ;;  %1118 = vadd.xlane.f32.xlu0 %v1117_v42 }
 0x3f5   : > { %v12142_v7 = vpop.eup %11045  ;;  %11051 = vpow2.f32 %v1355_v6 }
 0x3f6   : > { %v1468_v8 = vpop.xlane.xlu1 %1467  ;;  %v1236_v47 = vsel %vm934_vm1, %v12142_v7, 0.0 }
 0x3f7   : > { %v12146_v9 = vpop.eup %11047  ;;  %v1472_v10 = vsub.f32 %v12075_v56, %v1468_v8  ;;  %1237 = vadd.xlane.f32.xlu1 %v1236_v47 }
 0x3f8   : > { %v1471_v12 = vpop.xlane.xlu0 %1470  ;;  %v1239_v51 = vsel %vm934_vm1, %v12146_v9, 0.0 }
 0x3f9   : > { %v1474_v13 = vmul.f32 1.442695, %v1472_v10  ;;  %v1473_v14 = vsub.f32 %v12078_v60, %v1471_v12  ;;  %1240 = vadd.xlane.f32.xlu0 %v1239_v51 }
 0x3fb   : > { %11053 = vpow2.f32 %v1474_v13  ;;  %v1476_v15 = vmul.f32 1.442695, %v1473_v14 }
 0x3fd   : > { %v12152_v16 = vpop.eup %11049  ;;  %11055 = vpow2.f32 %v1476_v15 }
 0x3fe   : > { %v1589_v19 = vpop.xlane.xlu1 %1588  ;;  %v1357_v20 = vsel %vm934_vm1, %v12152_v16, 0.0 }
 0x3ff   : > { %v12156_v22 = vpop.eup %11051  ;;  %v1593_v56 = vsub.f32 %v12085_v5, %v1589_v19  ;;  %1358 = vadd.xlane.f32.xlu1 %v1357_v20 }
 0x400   : > { %v1592_v23 = vpop.xlane.xlu0 %1591  ;;  %v1360_v24 = vsel %vm934_vm1, %v12156_v22, 0.0 }
 0x401   : > { %v1595_v60 = vmul.f32 1.442695, %v1593_v56  ;;  %v1594_v26 = vsub.f32 %v12088_v11, %v1592_v23  ;;  %1361 = vadd.xlane.f32.xlu0 %v1360_v24 }
 0x403   : > { %11057 = vpow2.f32 %v1595_v60  ;;  %v1597_v29 = vmul.f32 1.442695, %v1594_v26 }
 0x405   : > { %v12162_v35 = vpop.eup %11053  ;;  %11059 = vpow2.f32 %v1597_v29 }
 0x406   : > { %v1710_v36 = vpop.xlane.xlu1 %1709  ;;  %v1478_v37 = vsel %vm934_vm1, %v12162_v35, 0.0 }
 0x407   : > { %v12166_v40 = vpop.eup %11055  ;;  %1479 = vadd.xlane.f32.xlu1 %v1478_v37 }
 0x408   : > { %v1713_v5 = vpop.xlane.xlu0 %1712  ;;  %v1481_v41 = vsel %vm934_vm1, %v12166_v40, 0.0 }
 0x409   : > { %v1715_v43 = vsub.f32 %v12098_v21, %v1713_v5  ;;  %1482 = vadd.xlane.f32.xlu0 %v1481_v41 }
 0x40a   : > { %v996_v11 = vpop.xlane.xlu1 %995 }
 0x40b   : > { %v1718_v44 = vmul.f32 1.442695, %v1715_v43  ;;  %11061 = vrcp.f32 %v996_v11 }
 0x40c   : > { %v999_v45 = vpop.xlane.xlu0 %998 }
 0x40d   : > { %v12171_v18 = vpop.eup %11057  ;;  %11063 = vpow2.f32 %v1718_v44 }
 0x40e   : > { %11065 = vrcp.f32 %v999_v45  ;;  %v1831_v48 = vpop.xlane.xlu1 %1830  ;;  %v1599_v49 = vsel %vm934_vm1, %v12171_v18, 0.0 }
 0x40f   : > { %v12175_v52 = vpop.eup %11059  ;;  %v1835_v53 = vsub.f32 %v12111_v30, %v1831_v48  ;;  %1600 = vadd.xlane.f32.xlu0 %v1599_v49 }
 0x410   : > { %v1834_v54 = vpop.xlane.xlu0 %1833  ;;  %v1602_v57 = vsel %vm934_vm1, %v12175_v52, 0.0 }
 0x411   : > { %v1837_v21 = vmul.f32 1.442695, %v1835_v53  ;;  %v1836_v55 = vsub.f32 %v12116_v38, %v1834_v54 }
 0x412   : > { %v1369_v47 = vpop.permute.xlu1 %1368 }
 0x413   : > { %11067 = vpow2.f32 %v1837_v21  ;;  %v1839_v59 = vmul.f32 1.442695, %v1836_v55  ;;  %1603 = vadd.xlane.f32.xlu0 %v1602_v57 }
 0x414   : > { %v1248_v10 = vpop.permute.xlu0 %1247 }
 0x415   : > { %11069 = vpow2.f32 %v1839_v59  ;;  %v11062_v61 = vpop.eup %11061 }
 0x416   : > { %v1002_v33 = vmul.f32 %v11062_v61, %v12104_v25 }
 0x417   : > { %v12181_v28 = vpop.eup %11063 }
 0x418   : > { %v11066_v63 = vpop.eup %11065  ;;  %1489 = vrot.lane.b32.xlu1 %v11989_v58, %s11523_s11  ;;  %v1723_v30 = vsel %vm934_vm1, %v12181_v28, 0.0 }
 0x419   : > { %v1003_v38 = vmul.f32 %v11066_v63, %v12108_v27  ;;  %1724 = vadd.xlane.f32.xlu0 %v1723_v30  ;;  %v1714_v27 = vsub.f32 %v12095_v17, %v1710_v36 }
 0x41b   : > { %v1004_v0 = vpack.c.bf16 %v1003_v38, %v1002_v33  ;;  %v1716_v6 = vmul.f32 1.442695, %v1714_v27 }
 0x41d   : > { %v12189_v39 = vpop.eup %11067  ;;  %10242 = vmatmul.mubr.msk.bf16.vlgmr.msra.gmra.mrb[8].mxu1 %vm934_vm1, %v1004_v0  ;;  %11071 = vpow2.f32 %v1716_v6 }
 0x41e   : > { %10252 = vmatpush3.bf16.msra.mxu1 %v12127_v46  ;;  %v1841_v4 = vsel %vm934_vm1, %v12189_v39, 0.0  ;;  %10253 = vmatprep.mubr.msk.bf16.mxu1 %vm11519_vm0, %v11518_v2 }
 0x41f   : > { %v12197_v42 = vpop.eup %11069  ;;  %1842 = vadd.xlane.f32.xlu0 %v1841_v4  ;;  %10263 = vmatprep.subr.bf16.mxu1 %v11518_v2 }
 0x420   : > { %v1844_v25 = vsel %vm934_vm1, %v12197_v42, 0.0 }
 0x423   : > { %1845 = vadd.xlane.f32.xlu0 %v1844_v25 }
 0x427   : > { %v12203_v46 = vpop.eup %11071 }
 0x428   : > { %v1720_v8 = vsel %vm934_vm1, %v12203_v46, 0.0 }
 0x439   : > { %1610 = vrot.lane.b32.xlu0 %v11989_v58, %s12881_s12 }
 0x43c   : > { %1721 = vadd.xlane.f32.xlu1 %v1720_v8 }
 0x44d   : > { %1731 = vrot.lane.b32.xlu1 %v11989_v58, %s12879_s18 }
 0x451   : > { %1852 = vrot.lane.b32.xlu1 %v11989_v58, %s12877_s20 }
 0x47c   : > { %v1116_v17 = vpop.xlane.xlu1 %1115 }
 0x47d   : > { %11073 = vrcp.f32 %v1116_v17 }
 0x480   : > { %v1119_v12 = vpop.xlane.xlu0 %1118 }
 0x481   : > { %11075 = vrcp.f32 %v1119_v12 }
 0x484   : > { %v1238_v51 = vpop.xlane.xlu1 %1237 }
 0x485   : > { %11077 = vrcp.f32 %v1238_v51 }
 0x486   : > { %v1241_v13 = vpop.xlane.xlu0 %1240 }
 0x487   : > { %11079 = vrcp.f32 %v1241_v13  ;;  %v11074_v14 = vpop.eup %11073 }
 0x488   : > { %v1122_v19 = vmul.f32 %v11074_v14, %v12132_v62 }
 0x48b   : > { %v11076_v15 = vpop.eup %11075 }
 0x48c   : > { %v1123_v20 = vmul.f32 %v11076_v15, %v12137_v3  ;;  %v1359_v56 = vpop.xlane.xlu1 %1358 }
 0x48d   : > { %11081 = vrcp.f32 %v1359_v56 }
 0x48e   : > { %v1362_v23 = vpop.xlane.xlu0 %1361  ;;  %v1124_v58 = vpack.c.bf16 %v1123_v20, %v1122_v19 }
 0x48f   : > { %11083 = vrcp.f32 %v1362_v23  ;;  %v11078_v24 = vpop.eup %11077 }
 0x490   : > { %10254 = vmatmul.mubr.msk.bf16.vlgmr.msra.gmra.mrb[12].mxu1 %vm934_vm1, %v1124_v58  ;;  %v1244_v62 = vmul.f32 %v11078_v24, %v12142_v7 }
 0x491   : > { %v11080_v60 = vpop.eup %11079  ;;  %10264 = vmatpush3.bf16.msra.mxu1 %v1248_v10  ;;  %10265 = vmatprep.mubr.msk.bf16.mxu1 %vm11519_vm0, %v11518_v2 }
 0x492   : > { %v1245_v26 = vmul.f32 %v11080_v60, %v12146_v9  ;;  %10275 = vmatprep.subr.bf16.mxu1 %v11518_v2 }
 0x494   : > { %v1480_v3 = vpop.xlane.xlu1 %1479  ;;  %v1246_v36 = vpack.c.bf16 %v1245_v26, %v1244_v62 }
 0x495   : > { %11085 = vrcp.f32 %v1480_v3 }
 0x496   : > { %v1483_v29 = vpop.xlane.xlu0 %1482 }
 0x497   : > { %11087 = vrcp.f32 %v1483_v29  ;;  %v11082_v37 = vpop.eup %11081 }
 0x498   : > { %10266 = vmatmul.mubr.msk.bf16.vlgmr.msra.gmra.mrb[16].mxu1 %vm934_vm1, %v1246_v36  ;;  %v1365_v9 = vmul.f32 %v11082_v37, %v12152_v16  ;;  %v1490_v44 = vpop.permute.xlu1 %1489 }
 0x499   : > { %v11084_v5 = vpop.eup %11083  ;;  %10276 = vmatpush3.bf16.msra.mxu1 %v1369_v47  ;;  %10277 = vmatprep.mubr.msk.bf16.mxu1 %vm11519_vm0, %v11518_v2 }
 0x49a   : > { %v1366_v41 = vmul.f32 %v11084_v5, %v12156_v22  ;;  %10287 = vmatprep.subr.bf16.mxu1 %v11518_v2  ;;  %v10733_v5 = vld [vmem:[#allocation9] sm:$0xff]  }
 0x49b   : > { %10330 = vmatpush3.bf16.msra.mxu0 %v10733_v5 }
 0x49c   : > { %v1601_v7 = vpop.xlane.xlu0 %1600  ;;  %v1367_v43 = vpack.c.bf16 %v1366_v41, %v1365_v9  ;;  %v10734_v41 = vld [vmem:[#allocation9 + $0x8] sm:$0xff]   ;;  %10331 = vmatprep.subr.bf16.mxu0 %v11518_v2 }
 0x49f   : > { %v11086_v11 = vpop.eup %11085  ;;  %10332 = vmatpush3.bf16.msra.mxu0 %v10734_v41  ;;  %v9169_v41 = vld [vmem:[%s12852_s5] ss:$0 sm:$0xff] }
 0x4a0   : > { %10278 = vmatmul.mubr.msk.bf16.vlgmr.msra.gmra.mrb[20].mxu1 %vm934_vm1, %v1367_v43  ;;  %v1604_v49 = vpop.xlane.xlu0 %1603  ;;  %v1486_v22 = vmul.f32 %v11086_v11, %v12162_v35  ;;  %10333 = vmatprep.subr.bf16.mxu0 %v11518_v2 }
 0x4a1   : > { %v11088_v45 = vpop.eup %11087  ;;  %10288 = vmatpush3.bf16.msra.mxu1 %v1490_v44  ;;  %10289 = vmatprep.mubr.msk.bf16.mxu1 %vm11519_vm0, %v11518_v2  ;;  %11089 = vrcp.f32 %v1604_v49  ;;  %v10737_v49 = vld [vmem:[#allocation9 + $0x20] sm:$0xff]  }
 0x4a2   : > { %v1487_v48 = vmul.f32 %v11088_v45, %v12166_v40  ;;  %10299 = vmatprep.subr.bf16.mxu1 %v11518_v2  ;;  %11091 = vrcp.f32 %v1601_v7  ;;  %v10735_v7 = vld [vmem:[#allocation9 + $0x10] sm:$0xff]  }
 0x4a3   : > { %10334 = vmatpush3.bf16.msra.mxu0 %v10735_v7 }
 0x4a4   : > { %v1488_v16 = vpack.c.bf16 %v1487_v48, %v1486_v22  ;;  %v10736_v48 = vld [vmem:[#allocation9 + $0x18] sm:$0xff]   ;;  %10335 = vmatprep.subr.bf16.mxu0 %v11518_v2  ;;  %v10738_v22 = vld [vmem:[#allocation9 + $0x28] sm:$0xff]  }
 0x4a6   : > { %v1725_v53 = vpop.xlane.xlu0 %1724 }
 0x4a7   : > { %11093 = vrcp.f32 %v1725_v53  ;;  %10336 = vmatpush3.bf16.msra.mxu0 %v10736_v48  ;;  %v11185_v48 = vld [vmem:[%s11913_s27] sm:$0xff] }
 0x4a8   : > { %10290 = vmatmul.mubr.msk.bf16.vlgmr.msra.gmra.mrb[24].mxu1 %vm934_vm1, %v1488_v16  ;;  %10337 = vmatprep.subr.bf16.mxu0 %v11518_v2  ;;  %v10739_v16 = vld [vmem:[#allocation9 + $0x30] sm:$0xff]  }
 0x4a9   : > { %10301 = vmatprep.mubr.msk.bf16.mxu1 %vm11519_vm0, %v11518_v2 }
 0x4ab   : > { %v11090_v21 = vpop.eup %11089  ;;  %10338 = vmatpush3.bf16.msra.mxu0 %v10737_v49 }
 0x4ac   : > { %v1843_v54 = vpop.xlane.xlu0 %1842  ;;  %v11092_v57 = vpop.eup %11091  ;;  %v1608_v40 = vmul.f32 %v11090_v21, %v12175_v52  ;;  %10339 = vmatprep.subr.bf16.mxu0 %v11518_v2 }
 0x4ad   : > { %v1607_v59 = vmul.f32 %v11092_v57, %v12171_v18 }
 0x4af   : > { %v1609_v35 = vpack.c.bf16 %v1608_v40, %v1607_v59  ;;  %10340 = vmatpush3.bf16.msra.mxu0 %v10738_v22  ;;  %v11186_v22 = vld [vmem:[%s11913_s27 + $0x8] sm:$0xff]  ;;  %s12925_s27 = sld [smem:[#allocation31_spill]] }
 0x4b0   : > { %v1846_v55 = vpop.xlane.xlu0 %1845  ;;  %10341 = vmatprep.subr.bf16.mxu0 %v11518_v2 }
 0x4b1   : > { %v11094_v18 = vpop.eup %11093 }
 0x4b2   : > { %v1729_v33 = vmul.f32 %v11094_v18, %v12181_v28 }
 0x4b3   : > { %10342 = vmatpush3.bf16.msra.mxu0 %v10739_v16 }
 0x4b4   : > { %v1611_v61 = vpop.permute.xlu0 %1610  ;;  %10343 = vmatprep.subr.bf16.mxu0 %v11518_v2 }
 0x4b5   : > { %10300 = vmatpush3.bf16.msra.mxu1 %v1611_v61 }
 0x4b6   : > { %10311 = vmatprep.subr.bf16.mxu1 %v11518_v2 }
 0x4b8   : > { %10302 = vmatmul.mubr.msk.bf16.vlgmr.msra.gmra.mrb[28].mxu1 %vm934_vm1, %v1609_v35 }
 0x4b9   : > { %10313 = vmatprep.mubr.msk.bf16.mxu1 %vm11519_vm0, %v11518_v2 }
 0x4c9   : > { %v1722_v63 = vpop.xlane.xlu1 %1721 }
 0x4ca   : > { %11095 = vrcp.f32 %v1722_v63 }
 0x4cb   : > { %11097 = vrcp.f32 %v1846_v55  ;;  %v10740_v55 = vld [vmem:[#allocation9 + $0x38] sm:$0xff]  }
 0x4cc   : > { %11099 = vrcp.f32 %v1843_v54  ;;  %10344 = vmatpush3.bf16.msra.mxu0 %v10740_v55 }
 0x4cd   : > { %v1732_v30 = vpop.permute.xlu1 %1731 }
 0x4ce   : > { %10312 = vmatpush3.bf16.msra.mxu1 %v1732_v30 }
 0x4cf   : > { %10323 = vmatprep.subr.bf16.mxu1 %v11518_v2 }
 0x4d1   : > { %v1853_v25 = vpop.permute.xlu1 %1852 }
 0x4d4   : > { %v11096_v52 = vpop.eup %11095 }
 0x4d5   : > { %v1728_v38 = vmul.f32 %v11096_v52, %v12203_v46  ;;  %v11098_v4 = vpop.eup %11097 }
 0x4d6   : > { %v11100_v27 = vpop.eup %11099  ;;  %v1850_v6 = vmul.f32 %v11098_v4, %v12197_v42 }
 0x4d7   : > { %v1730_v0 = vpack.c.bf16 %v1729_v33, %v1728_v38  ;;  %v1849_v8 = vmul.f32 %v11100_v27, %v12189_v39 }
 0x4d9   : > { %10314 = vmatmul.mubr.msk.bf16.vlgmr.msra.gmra.mrb[32].mxu1 %vm934_vm1, %v1730_v0  ;;  %v1851_v47 = vpack.c.bf16 %v1850_v6, %v1849_v8 }
 0x4da   : > { %10324 = vmatpush3.bf16.msra.mxu1 %v1853_v25  ;;  %10325 = vmatprep.mubr.msk.bf16.mxu1 %vm11519_vm0, %v11518_v2 }
 0x4e1   : > { %10326 = vmatmul.mubr.msk.bf16.vlgmr.msra.gmra.mrb[36].mxu1 %vm934_vm1, %v1851_v47 }
 0x4e2   : > { %3016 = vmatprep.mubr.bf16.mxu1 %v11517_v1 }
 0x4f0   : > { %v12252_v28 = vpop.f32.mrb[8].mxu1 }
 0x4f1   : > { %v10243_v46 = vpop.f32.mrb[9].mxu1 }
 0x4f2   : > { %v12254_v10 = vpop.f32.mrb[10].mxu1 }
 0x4f3   : > { %v10244_v17 = vpop.f32.mrb[11].mxu1 }
 0x563   : > { %v1166_v12 = vpop.f32.mrb[12].mxu1 }
 0x564   : > { %v10255_v51 = vpop.f32.mrb[13].mxu1 }
 0x565   : > { %v1169_v13 = vpop.f32.mrb[14].mxu1 }
 0x566   : > { %v10629_v14 = vpack.i.bf16 %v1169_v13, %v1166_v12  ;;  %v10256_v15 = vpop.f32.mrb[15].mxu1 }
 0x568   : > { %10630 = vrot.lane.b32.xlu1 %v10629_v14, %s12877_s20  ;;  %s12923_s20 = smov 32  }
 0x56b   : > { %v1287_v42 = vpop.f32.mrb[16].mxu1 }
 0x56c   : > { %v10267_v39 = vpop.f32.mrb[17].mxu1 }
 0x56d   : > { %v1290_v19 = vpop.f32.mrb[18].mxu1 }
 0x56e   : > { %v10634_v20 = vpack.i.bf16 %v1290_v19, %v1287_v42  ;;  %v10268_v56 = vpop.f32.mrb[19].mxu1 }
 0x570   : > { %10635 = vrot.lane.b32.xlu1 %v10634_v20, %s12879_s18  ;;  %s12922_s18 = smov 48  }
 0x573   : > { %v1408_v23 = vpop.f32.mrb[20].mxu1 }
 0x574   : > { %v10279_v58 = vpop.f32.mrb[21].mxu1 }
 0x575   : > { %v1411_v24 = vpop.f32.mrb[22].mxu1 }
 0x576   : > { %v10639_v60 = vpack.i.bf16 %v1411_v24, %v1408_v23  ;;  %v10280_v26 = vpop.f32.mrb[23].mxu1 }
 0x578   : > { %10640 = vrot.lane.b32.xlu1 %v10639_v60, %s12881_s12  ;;  %s12921_s12 = sld [smem:[#allocation30_spill]] }
 0x57b   : > { %v1529_v62 = vpop.f32.mrb[24].mxu1 }
 0x57c   : > { %v10291_v3 = vpop.f32.mrb[25].mxu1 }
 0x57d   : > { %v1532_v29 = vpop.f32.mrb[26].mxu1 }
 0x57e   : > { %v10644_v36 = vpack.i.bf16 %v1532_v29, %v1529_v62  ;;  %v10292_v37 = vpop.f32.mrb[27].mxu1 }
 0x580   : > { %10645 = vrot.lane.b32.xlu0 %v10644_v36, %s11523_s11 }
 0x58b   : > { %v1650_v9 = vpop.f32.mrb[28].mxu1 }
 0x58c   : > { %v10303_v43 = vpop.f32.mrb[29].mxu1 }
 0x58d   : > { %v1653_v11 = vpop.f32.mrb[30].mxu1 }
 0x58e   : > { %v10649_v44 = vpack.i.bf16 %v1653_v11, %v1650_v9  ;;  %v10304_v45 = vpop.f32.mrb[31].mxu1 }
 0x590   : > { %10650 = vrot.lane.b32.xlu1 %v10649_v44, %s11522_s2 }
 0x5ac   : > { %v1771_v53 = vpop.f32.mrb[32].mxu1 }
 0x5ad   : > { %v10315_v54 = vpop.f32.mrb[33].mxu1 }
 0x5ae   : > { %v1774_v21 = vpop.f32.mrb[34].mxu1  ;;  %v2139_v54 = vld [vmem:[#allocation14 + $0x40] sm:$0xff] }
 0x5af   : > { %v10654_v57 = vpack.i.bf16 %v1774_v21, %v1771_v53  ;;  %v10316_v40 = vpop.f32.mrb[35].mxu1  ;;  %v2131_v53 = vld [vmem:[#allocation14] sm:$0xff]  ;;  %v2132_v21 = vld [vmem:[#allocation14 + $0x8] sm:$0xff] }
 0x5b0   : > { %v9180_v55 = vcombine.low %v2131_v53, %v2139_v54  ;;  %v2140_v40 = vld [vmem:[#allocation14 + $0x48] sm:$0xff] }
 0x5b1   : > { %10655 = vrot.lane.b32.xlu0 %v10654_v57, %s11520_s3  ;;  %v9181_v57 = vcombine.high %v2131_v53, %v2139_v54  ;;  %v2228_v53 = vld [vmem:[#allocation14 + $0x308] sm:$0xff] }
 0x5b3   : > { %2984 = vmatprep.subr.bf16.mxu1 %v9181_v57 }
 0x5b4   : > { %v1892_v59 = vpop.f32.mrb[36].mxu1  ;;  %2985 = vmatpush1.bf16.msra.mxu1 %v9180_v55 }
 0x5b5   : > { %v10327_v61 = vpop.f32.mrb[37].mxu1 }
 0x5b6   : > { %v1895_v35 = vpop.f32.mrb[38].mxu1  ;;  %v2155_v61 = vld [vmem:[#allocation14 + $0xc0] sm:$0xff] }
 0x5b7   : > { %v10659_v63 = vpack.i.bf16 %v1895_v35, %v1892_v59  ;;  %v10328_v30 = vpop.f32.mrb[39].mxu1  ;;  %v2147_v59 = vld [vmem:[#allocation14 + $0x80] sm:$0xff]  ;;  %v9182_v35 = vcombine.low %v2132_v21, %v2140_v40 }
 0x5b8   : > { %v9197_v30 = vcombine.high %v2147_v59, %v2155_v61 }
 0x5b9   : > { %10660 = vrot.lane.b32.xlu1 %v10659_v63, %s11521_s29  ;;  %v9183_v63 = vcombine.high %v2132_v21, %v2140_v40  ;;  %v2236_v21 = vld [vmem:[#allocation14 + $0x348] sm:$0xff] }
 0x5ba   : > { %2986 = vmatprep.subr.bf16.mxu1 %v9197_v30  ;;  %v9278_v57 = vcombine.low %v2228_v53, %v2236_v21  ;;  %v9279_v40 = vcombine.high %v2228_v53, %v2236_v21  ;;  %v2252_v30 = vld [vmem:[#allocation14 + $0x3c8] sm:$0xff] }
 0x5bb   : > { %3027 = vmatprep.subr.bf16.mxu0 %v9183_v63 }
 0x5da   : > { %v10631_v18 = vpop.permute.xlu1 %10630 }
 0x5db   : > { %v10633_v0 = vunpack.i.h.bf16 %v10631_v18  ;;  %v10632_v4 = vunpack.i.l.bf16 %v10631_v18  ;;  %v2148_v18 = vld [vmem:[#allocation14 + $0x88] sm:$0xff] }
 0x5dd   : > { %v1956_v51 = vsel %vm934_vm1, %v12254_v10, %v10633_v0  ;;  %v1955_v13 = vsel %vm934_vm1, %v12252_v28, %v10632_v4 }
 0x5e2   : > { %v10636_v52 = vpop.permute.xlu1 %10635 }
 0x5e3   : > { %v10638_v25 = vunpack.i.h.bf16 %v10636_v52  ;;  %v10637_v27 = vunpack.i.l.bf16 %v10636_v52  ;;  %v2156_v52 = vld [vmem:[#allocation14 + $0xc8] sm:$0xff] }
 0x5e4   : > { %v9198_v0 = vcombine.low %v2148_v18, %v2156_v52 }
 0x5e5   : > { %v1959_v42 = vsel %vm1957_vm2, %v1956_v51, %v10638_v25  ;;  %v1958_v39 = vsel %vm1957_vm2, %v1955_v13, %v10637_v27  ;;  %v2171_v51 = vld [vmem:[#allocation14 + $0x140] sm:$0xff]  ;;  %v2164_v13 = vld [vmem:[#allocation14 + $0x108] sm:$0xff] }
 0x5ea   : > { %v10641_v33 = vpop.permute.xlu1 %10640 }
 0x5eb   : > { %v10643_v8 = vunpack.i.h.bf16 %v10641_v33  ;;  %v10642_v47 = vunpack.i.l.bf16 %v10641_v33  ;;  %v9199_v33 = vcombine.high %v2148_v18, %v2156_v52 }
 0x5ed   : > { %v1962_v56 = vsel %vm1960_vm3, %v1959_v42, %v10643_v8  ;;  %v1961_v23 = vsel %vm1960_vm3, %v1958_v39, %v10642_v47 }
 0x5f2   : > { %v10646_v38 = vpop.permute.xlu0 %10645 }
 0x5f3   : > { %v10648_v17 = vunpack.i.h.bf16 %v10646_v38  ;;  %v10647_v12 = vunpack.i.l.bf16 %v10646_v38  ;;  %v9196_v38 = vcombine.low %v2147_v59, %v2155_v61  ;;  %v2243_v59 = vld [vmem:[#allocation14 + $0x380] sm:$0xff] }
 0x5f4   : > { %v2251_v61 = vld [vmem:[#allocation14 + $0x3c0] sm:$0xff] }
 0x5f5   : > { %v1965_v58 = vsel %vm1963_vm4, %v1962_v56, %v10648_v17  ;;  %v1964_v10 = vsel %vm1963_vm4, %v1961_v23, %v10647_v12  ;;  %2987 = vmatpush1.bf16.msra.mxu1 %v9196_v38  ;;  %v2163_v12 = vld [vmem:[#allocation14 + $0x100] sm:$0xff]  ;;  %v2180_v23 = vld [vmem:[#allocation14 + $0x188] sm:$0xff]  ;;  %v9293_v63 = vcombine.high %v2243_v59, %v2251_v61  ;;  %v9292_v18 = vcombine.low %v2243_v59, %v2251_v61  ;;  %v2133_v38 = vld [vmem:[#allocation14 + $0x10] sm:$0xff] }
 0x5f6   : > { %v9212_v42 = vcombine.low %v2163_v12, %v2171_v51  ;;  %v2187_v56 = vld [vmem:[#allocation14 + $0x1c0] sm:$0xff]  ;;  %v2206_v59 = vld [vmem:[#allocation14 + $0x258] sm:$0xff] }
 0x602   : > { %v10651_v6 = vpop.permute.xlu1 %10650 }
 0x603   : > { %v10653_v14 = vunpack.i.h.bf16 %v10651_v6  ;;  %v10652_v15 = vunpack.i.l.bf16 %v10651_v6 }
 0x605   : > { %v1968_v28 = vsel %vm1966_vm5, %v1965_v58, %v10653_v14  ;;  %v1967_v60 = vsel %vm1966_vm5, %v1964_v10, %v10652_v15  ;;  %v9213_v14 = vcombine.high %v2163_v12, %v2171_v51  ;;  %v2172_v15 = vld [vmem:[#allocation14 + $0x148] sm:$0xff] }
 0x606   : > { %v9214_v39 = vcombine.low %v2164_v13, %v2172_v15  ;;  %v2188_v10 = vld [vmem:[#allocation14 + $0x1c8] sm:$0xff] }
 0x607   : > { %2988 = vmatprep.subr.bf16.mxu1 %v9213_v14 }
 0x608   : > { %2989 = vmatpush1.bf16.msra.mxu1 %v9212_v42 }
 0x623   : > { %v10656_v46 = vpop.permute.xlu0 %10655 }
 0x624   : > { %v10658_v19 = vunpack.i.h.bf16 %v10656_v46  ;;  %v10657_v20 = vunpack.i.l.bf16 %v10656_v46 }
 0x626   : > { %v1971_v3 = vsel %vm1969_vm6, %v1968_v28, %v10658_v19  ;;  %v1970_v29 = vsel %vm1969_vm6, %v1967_v60, %v10657_v20  ;;  %v9215_v19 = vcombine.high %v2164_v13, %v2172_v15  ;;  %v2179_v20 = vld [vmem:[#allocation14 + $0x180] sm:$0xff]  ;;  %v9230_v28 = vcombine.low %v2180_v23, %v2188_v10 }
 0x627   : > { %v9229_v58 = vcombine.high %v2179_v20, %v2187_v56  ;;  %v9231_v60 = vcombine.high %v2180_v23, %v2188_v10  ;;  %v9179_v10 = vld [vmem:[#allocation12] ss:$0 sm:$0xff] }
 0x629   : > { %2990 = vmatprep.subr.bf16.mxu1 %v9229_v58 }
 0x62b   : > { %v10661_v24 = vpop.permute.xlu1 %10660 }
 0x62c   : > { %v10663_v26 = vunpack.i.h.bf16 %v10661_v24  ;;  %v10662_v62 = vunpack.i.l.bf16 %v10661_v24  ;;  %v9228_v24 = vcombine.low %v2179_v20, %v2187_v56  ;;  %v9178_v20 = vld [vmem:[#allocation11] ss:$0 sm:$0xff] }
 0x62e   : > { %v1974_v36 = vsel %vm1972_vm7, %v1971_v3, %v10663_v26  ;;  %v1973_v37 = vsel %vm1972_vm7, %v1970_v29, %v10662_v62  ;;  %2991 = vmatpush1.bf16.msra.mxu1 %v9228_v24  ;;  %v2195_v26 = vld [vmem:[#allocation14 + $0x200] sm:$0xff]  ;;  %v2196_v3 = vld [vmem:[#allocation14 + $0x208] sm:$0xff] }
 0x62f   : > { %v1991_v5 = vpack.c.bf16 %v1974_v36, %v1973_v37  ;;  %v2203_v62 = vld [vmem:[#allocation14 + $0x240] sm:$0xff]  ;;  %v2204_v36 = vld [vmem:[#allocation14 + $0x248] sm:$0xff] }
 0x630   : > { %v9245_v29 = vcombine.high %v2195_v26, %v2203_v62  ;;  %v9244_v37 = vcombine.low %v2195_v26, %v2203_v62  ;;  %v2150_v26 = vld [vmem:[#allocation14 + $0x98] sm:$0xff] }
 0x631   : > { %10346 = vmatmul.mubr.bf16.vlgmr.msra.gmra.mrb[32].mxu0 %v1991_v5  ;;  %v9246_v5 = vcombine.low %v2196_v3, %v2204_v36  ;;  %v2158_v62 = vld [vmem:[#allocation14 + $0xd8] sm:$0xff] }
 0x632   : > { %3059 = vmatprep.mubr.bf16.mxu0 %v11517_v1  ;;  %3028 = vmatpush1.bf16.msra.mxu0 %v9182_v35  ;;  %v2244_v35 = vld [vmem:[#allocation14 + $0x388] sm:$0xff] }
 0x633   : > { %3029 = vmatprep.subr.bf16.mxu0 %v9199_v33  ;;  %2992 = vmatprep.subr.bf16.mxu1 %v9245_v29  ;;  %v9294_v52 = vcombine.low %v2244_v35, %v2252_v30  ;;  %v9295_v33 = vcombine.high %v2244_v35, %v2252_v30 }
 0x634   : > { %2993 = vmatpush1.bf16.msra.mxu1 %v9244_v37  ;;  %v9203_v37 = vcombine.high %v2150_v26, %v2158_v62 }
 0x636   : > { %3030 = vmatpush1.bf16.msra.mxu0 %v9198_v0  ;;  %v2141_v0 = vld [vmem:[#allocation14 + $0x50] sm:$0xff] }
 0x637   : > { %3031 = vmatprep.subr.bf16.mxu0 %v9215_v19 }
 0x63a   : > { %3032 = vmatpush1.bf16.msra.mxu0 %v9214_v39 }
 0x63b   : > { %3033 = vmatprep.subr.bf16.mxu0 %v9231_v60  ;;  %v2157_v60 = vld [vmem:[#allocation14 + $0xd0] sm:$0xff] }
 0x63e   : > { %3034 = vmatpush1.bf16.msra.mxu0 %v9230_v28  ;;  %v2149_v28 = vld [vmem:[#allocation14 + $0x90] sm:$0xff] }
 0x704   : > { %v2081_v9 = vpop.f32.mrb[32].mxu0 }
 0x705   : > { %v2082_v7 = vadd.f32 %v9169_v41, %v2081_v9  ;;  %v10347_v43 = vpop.f32.mrb[33].mxu0  ;;  %v2211_v9 = vld [vmem:[#allocation14 + $0x280] sm:$0xff] }
 0x706   : > { %v2084_v11 = vpop.f32.mrb[34].mxu0  ;;  %v2212_v43 = vld [vmem:[#allocation14 + $0x288] sm:$0xff] }
 0x707   : > { %v2085_v44 = vadd.f32 %v9169_v41, %v2084_v11  ;;  %v10348_v45 = vpop.f32.mrb[35].mxu0  ;;  %v2088_v49 = vadd.f32 %v11185_v48, %v2082_v7  ;;  %v9247_v41 = vcombine.high %v2196_v3, %v2204_v36  ;;  %v2219_v7 = vld [vmem:[#allocation14 + $0x2c0] sm:$0xff] }
 0x708   : > { %v9261_v11 = vcombine.high %v2211_v9, %v2219_v7  ;;  %v9260_v45 = vcombine.low %v2211_v9, %v2219_v7  ;;  %v2166_v9 = vld [vmem:[#allocation14 + $0x118] sm:$0xff]  ;;  %v9200_v7 = vcombine.low %v2149_v28, %v2157_v60 }
 0x709   : > { %2092 = vadd.xlane.f32.xlu0 %v2088_v49  ;;  %v2089_v16 = vadd.f32 %v11186_v22, %v2085_v44  ;;  %3035 = vmatprep.subr.bf16.mxu0 %v9247_v41  ;;  %v2220_v44 = vld [vmem:[#allocation14 + $0x2c8] sm:$0xff]  ;;  %v2227_v22 = vld [vmem:[#allocation14 + $0x300] sm:$0xff]  ;;  %v2173_v41 = vld [vmem:[#allocation14 + $0x150] sm:$0xff] }
 0x70a   : > { %3036 = vmatpush1.bf16.msra.mxu0 %v9246_v5  ;;  %v9262_v48 = vcombine.low %v2212_v43, %v2220_v44  ;;  %2994 = vmatprep.subr.bf16.mxu1 %v9261_v11  ;;  %v2165_v5 = vld [vmem:[#allocation14 + $0x110] sm:$0xff] }
 0x70b   : > { %2094 = vadd.xlane.f32.xlu1 %v2089_v16  ;;  %2995 = vmatpush1.bf16.msra.mxu1 %v9260_v45  ;;  %v9217_v11 = vcombine.high %v2165_v5, %v2173_v41  ;;  %v2181_v45 = vld [vmem:[#allocation14 + $0x190] sm:$0xff] }
 0x796   : > { %v2093_v4 = vpop.xlane.xlu0 %2092 }
 0x797   : > { %v2097_v25 = vmul.f32 0.0078125, %v2093_v4  ;;  %v2134_v4 = vld [vmem:[#allocation14 + $0x18] sm:$0xff] }
 0x798   : > { %v2095_v27 = vpop.xlane.xlu1 %2094 }
 0x799   : > { %v12292_v6 = vsub.f32 %v2088_v49, %v2097_v25  ;;  %v2098_v8 = vmul.f32 0.0078125, %v2095_v27  ;;  %v9263_v49 = vcombine.high %v2212_v43, %v2220_v44  ;;  %v9184_v25 = vcombine.low %v2133_v38, %v2141_v0 }
 0x79a   : > { %v9185_v27 = vcombine.high %v2133_v38, %v2141_v0  ;;  %v9202_v43 = vcombine.low %v2150_v26, %v2158_v62  ;;  %v2222_v38 = vld [vmem:[#allocation14 + $0x2d8] sm:$0xff]  ;;  %v2144_v26 = vld [vmem:[#allocation14 + $0x68] sm:$0xff] }
 0x79b   : > { %v12294_v47 = vsub.f32 %v2089_v16, %v2098_v8  ;;  %v2101_v46 = vmul.f32 %v12292_v6, %v12292_v6  ;;  %3037 = vmatprep.subr.bf16.mxu0 %v9263_v49  ;;  %v2235_v16 = vld [vmem:[#allocation14 + $0x340] sm:$0xff]  ;;  %v2142_v8 = vld [vmem:[#allocation14 + $0x58] sm:$0xff] }
 0x79c   : > { %3038 = vmatpush1.bf16.msra.mxu0 %v9262_v48  ;;  %v9277_v54 = vcombine.high %v2227_v22, %v2235_v16  ;;  %v9276_v55 = vcombine.low %v2227_v22, %v2235_v16  ;;  %v2189_v48 = vld [vmem:[#allocation14 + $0x1d0] sm:$0xff]  ;;  %v2182_v49 = vld [vmem:[#allocation14 + $0x198] sm:$0xff]  ;;  %v9216_v16 = vcombine.low %v2165_v5, %v2173_v41  ;;  %v2151_v41 = vld [vmem:[#allocation14 + $0xa0] sm:$0xff] }
 0x79d   : > { %2103 = vadd.xlane.f32.xlu0 %v2101_v46  ;;  %v2102_v17 = vmul.f32 %v12294_v47, %v12294_v47  ;;  %3039 = vmatprep.subr.bf16.mxu0 %v9279_v40  ;;  %v9186_v46 = vcombine.low %v2134_v4, %v2142_v8  ;;  %v2190_v22 = vld [vmem:[#allocation14 + $0x1d8] sm:$0xff]  ;;  %v9232_v61 = vcombine.low %v2181_v45, %v2189_v48 }
 0x79e   : > { %2996 = vmatprep.subr.bf16.mxu1 %v9277_v54  ;;  %v9233_v54 = vcombine.high %v2181_v45, %v2189_v48  ;;  %v9235_v21 = vcombine.high %v2182_v49, %v2190_v22  ;;  %v2198_v40 = vld [vmem:[#allocation14 + $0x218] sm:$0xff]  ;;  %v9234_v35 = vcombine.low %v2182_v49, %v2190_v22  ;;  %v2167_v48 = vld [vmem:[#allocation14 + $0x120] sm:$0xff]  ;;  %v2168_v22 = vld [vmem:[#allocation14 + $0x128] sm:$0xff] }
 0x79f   : > { %2997 = vmatpush1.bf16.msra.mxu1 %v9276_v55  ;;  %v2197_v55 = vld [vmem:[#allocation14 + $0x210] sm:$0xff]  ;;  %v9251_v30 = vcombine.high %v2198_v40, %v2206_v59  ;;  %v2175_v49 = vld [vmem:[#allocation14 + $0x160] sm:$0xff] }
 0x7a0   : > { %3040 = vmatpush1.bf16.msra.mxu0 %v9278_v57  ;;  %2998 = vmatprep.subr.bf16.mxu1 %v9293_v63  ;;  %v2205_v57 = vld [vmem:[#allocation14 + $0x250] sm:$0xff] }
 0x7a1   : > { %2105 = vadd.xlane.f32.xlu0 %v2102_v17  ;;  %3041 = vmatprep.subr.bf16.mxu0 %v9295_v33  ;;  %v9187_v17 = vcombine.high %v2134_v4, %v2142_v8  ;;  %v9249_v63 = vcombine.high %v2197_v55, %v2205_v57  ;;  %v2214_v33 = vld [vmem:[#allocation14 + $0x298] sm:$0xff]  ;;  %v9248_v0 = vcombine.low %v2197_v55, %v2205_v57  ;;  %v2229_v8 = vld [vmem:[#allocation14 + $0x310] sm:$0xff]  ;;  %v2183_v57 = vld [vmem:[#allocation14 + $0x1a0] sm:$0xff] }
 0x7a2   : > { %v9250_v4 = vcombine.low %v2198_v40, %v2206_v59  ;;  %v2191_v40 = vld [vmem:[#allocation14 + $0x1e0] sm:$0xff]  ;;  %v2184_v59 = vld [vmem:[#allocation14 + $0x1a8] sm:$0xff] }
 0x7a3   : > { %2999 = vmatpush1.bf16.msra.mxu1 %v9292_v18  ;;  %v2213_v18 = vld [vmem:[#allocation14 + $0x290] sm:$0xff] }
 0x7a4   : > { %3042 = vmatpush1.bf16.msra.mxu0 %v9294_v52  ;;  %3070 = vmatprep.subr.bf16.mxu1 %v9185_v27  ;;  %v2221_v52 = vld [vmem:[#allocation14 + $0x2d0] sm:$0xff]  ;;  %v9267_v27 = vcombine.high %v2214_v33, %v2222_v38 }
 0x7a5   : > { %3113 = vmatprep.subr.bf16.mxu0 %v9187_v17  ;;  %v2230_v17 = vld [vmem:[#allocation14 + $0x318] sm:$0xff] }
 0x82a   : > { %v2104_v12 = vpop.xlane.xlu0 %2103 }
 0x82b   : > { %v2107_v51 = vmul.f32 0.0078125, %v2104_v12  ;;  %v2238_v12 = vld [vmem:[#allocation14 + $0x358] sm:$0xff] }
 0x82d   : > { %v2109_v13 = vadd.f32 1e-05, %v2107_v51  ;;  %v9264_v51 = vcombine.low %v2213_v18, %v2221_v52 }
 0x82e   : > { %v2106_v14 = vpop.xlane.xlu0 %2105 }
 0x82f   : > { %11101 = vrsqrt.f32 %v2109_v13  ;;  %v2108_v15 = vmul.f32 0.0078125, %v2106_v14  ;;  %v9266_v13 = vcombine.low %v2214_v33, %v2222_v38  ;;  %v2207_v33 = vld [vmem:[#allocation14 + $0x260] sm:$0xff]  ;;  %v2200_v38 = vld [vmem:[#allocation14 + $0x228] sm:$0xff] }
 0x831   : > { %v2110_v42 = vadd.f32 1e-05, %v2108_v15  ;;  %v9283_v15 = vcombine.high %v2230_v17, %v2238_v12 }
 0x833   : > { %11103 = vrsqrt.f32 %v2110_v42  ;;  %v2245_v42 = vld [vmem:[#allocation14 + $0x390] sm:$0xff] }
 0x839   : > { %v11102_v39 = vpop.eup %11101 }
 0x83a   : > { %v2113_v19 = vmul.f32 %v11102_v39, %v12292_v6  ;;  %v9201_v6 = vcombine.high %v2149_v28, %v2157_v60  ;;  %v2253_v39 = vld [vmem:[#allocation14 + $0x3d0] sm:$0xff]  ;;  %v2143_v28 = vld [vmem:[#allocation14 + $0x60] sm:$0xff]  ;;  %v2136_v60 = vld [vmem:[#allocation14 + $0x28] sm:$0xff] }
 0x83b   : > { %v9296_v62 = vcombine.low %v2245_v42, %v2253_v39  ;;  %v9191_v5 = vcombine.high %v2136_v60, %v2144_v26 }
 0x83c   : > { %v2121_v23 = vmul.f32 %v9178_v20, %v2113_v19  ;;  %v2246_v19 = vld [vmem:[#allocation14 + $0x398] sm:$0xff] }
 0x83d   : > { %v11104_v56 = vpop.eup %11103 }
 0x83e   : > { %v2114_v58 = vmul.f32 %v11104_v56, %v12294_v47  ;;  %v12302_v3 = vadd.f32 %v9179_v10, %v2121_v23  ;;  %v2174_v47 = vld [vmem:[#allocation14 + $0x158] sm:$0xff]  ;;  %v9282_v23 = vcombine.low %v2230_v17, %v2238_v12  ;;  %v2223_v17 = vld [vmem:[#allocation14 + $0x2e0] sm:$0xff]  ;;  %v2216_v12 = vld [vmem:[#allocation14 + $0x2a8] sm:$0xff] }
 0x83f   : > { %v9219_v44 = vcombine.high %v2166_v9, %v2174_v47  ;;  %v9218_v53 = vcombine.low %v2166_v9, %v2174_v47  ;;  %v2159_v9 = vld [vmem:[#allocation14 + $0xe0] sm:$0xff]  ;;  %v2152_v47 = vld [vmem:[#allocation14 + $0xa8] sm:$0xff] }
 0x840   : > { %v2122_v24 = vmul.f32 %v9178_v20, %v2114_v58  ;;  %v2254_v20 = vld [vmem:[#allocation14 + $0x3d8] sm:$0xff]  ;;  %v9297_v58 = vcombine.high %v2245_v42, %v2253_v39  ;;  %v2231_v39 = vld [vmem:[#allocation14 + $0x320] sm:$0xff] }
 0x842   : > { %v12304_v29 = vadd.f32 %v9179_v10, %v2122_v24  ;;  %v9299_v10 = vcombine.high %v2246_v19, %v2254_v20  ;;  %v2135_v24 = vld [vmem:[#allocation14 + $0x20] sm:$0xff] }
 0x844   : > { %v12308_v36 = vpack.c.bf16 %v12304_v29, %v12302_v3 }
 0x846   : > { %3017 = vmatmul.mubr.bf16.vlgmr.msra.gmra.mrb[40].mxu1 %v12308_v36  ;;  %3060 = vmatmul.mubr.bf16.vlgmr.msra.gmra.mrb[36].mxu0 %v12308_v36 }
 0x847   : > { %3071 = vmatpush1.bf16.msra.mxu1 %v9184_v25  ;;  %3114 = vmatpush1.bf16.msra.mxu0 %v9186_v46  ;;  %v9265_v25 = vcombine.high %v2213_v18, %v2221_v52  ;;  %v2237_v46 = vld [vmem:[#allocation14 + $0x350] sm:$0xff]  ;;  %v2199_v52 = vld [vmem:[#allocation14 + $0x220] sm:$0xff] }
 0x848   : > { %3072 = vmatprep.subr.bf16.mxu1 %v9201_v6  ;;  %3115 = vmatprep.subr.bf16.mxu0 %v9203_v37  ;;  %v9281_v14 = vcombine.high %v2229_v8, %v2237_v46  ;;  %v9280_v56 = vcombine.low %v2229_v8, %v2237_v46  ;;  %v9298_v6 = vcombine.low %v2246_v19, %v2254_v20  ;;  %v2215_v46 = vld [vmem:[#allocation14 + $0x2a0] sm:$0xff]  ;;  %v2232_v20 = vld [vmem:[#allocation14 + $0x328] sm:$0xff] }
 0x849   : > { %3102 = vmatprep.mubr.bf16.mxu1 %v11517_v1  ;;  %3145 = vmatprep.mubr.bf16.mxu0 %v11517_v1  ;;  %v9189_v37 = vcombine.high %v2135_v24, %v2143_v28  ;;  %v2239_v19 = vld [vmem:[#allocation14 + $0x360] sm:$0xff] }
 0x84b   : > { %3073 = vmatpush1.bf16.msra.mxu1 %v9200_v7  ;;  %3116 = vmatpush1.bf16.msra.mxu0 %v9202_v43  ;;  %v2160_v7 = vld [vmem:[#allocation14 + $0xe8] sm:$0xff]  ;;  %v9188_v43 = vcombine.low %v2135_v24, %v2143_v28  ;;  %v2247_v28 = vld [vmem:[#allocation14 + $0x3a0] sm:$0xff] }
 0x84c   : > { %3074 = vmatprep.subr.bf16.mxu1 %v9217_v11  ;;  %3117 = vmatprep.subr.bf16.mxu0 %v9219_v44  ;;  %v9190_v11 = vcombine.low %v2136_v60, %v2144_v26  ;;  %v9205_v44 = vcombine.high %v2151_v41, %v2159_v9  ;;  %v9207_v45 = vcombine.high %v2152_v47, %v2160_v7  ;;  %v2255_v60 = vld [vmem:[#allocation14 + $0x3e0] sm:$0xff]  ;;  %v2248_v26 = vld [vmem:[#allocation14 + $0x3a8] sm:$0xff] }
 0x84f   : > { %3075 = vmatpush1.bf16.msra.mxu1 %v9216_v16  ;;  %3118 = vmatpush1.bf16.msra.mxu0 %v9218_v53  ;;  %v2176_v16 = vld [vmem:[#allocation14 + $0x168] sm:$0xff]  ;;  %v9204_v53 = vcombine.low %v2151_v41, %v2159_v9  ;;  %v2137_v9 = vld [vmem:[#allocation14 + $0x30] sm:$0xff] }
 0x850   : > { %3076 = vmatprep.subr.bf16.mxu1 %v9233_v54  ;;  %3119 = vmatprep.subr.bf16.mxu0 %v9235_v21  ;;  %v9206_v54 = vcombine.low %v2152_v47, %v2160_v7  ;;  %v9221_v21 = vcombine.high %v2167_v48, %v2175_v49  ;;  %v9223_v55 = vcombine.high %v2168_v22, %v2176_v16  ;;  %v2145_v47 = vld [vmem:[#allocation14 + $0x70] sm:$0xff]  ;;  %v2138_v7 = vld [vmem:[#allocation14 + $0x38] sm:$0xff] }
 0x853   : > { %3077 = vmatpush1.bf16.msra.mxu1 %v9232_v61  ;;  %3120 = vmatpush1.bf16.msra.mxu0 %v9234_v35  ;;  %v2192_v61 = vld [vmem:[#allocation14 + $0x1e8] sm:$0xff]  ;;  %v9220_v35 = vcombine.low %v2167_v48, %v2175_v49  ;;  %v2153_v49 = vld [vmem:[#allocation14 + $0xb0] sm:$0xff] }
 0x854   : > { %3078 = vmatprep.subr.bf16.mxu1 %v9249_v63  ;;  %3121 = vmatprep.subr.bf16.mxu0 %v9251_v30  ;;  %v9222_v63 = vcombine.low %v2168_v22, %v2176_v16  ;;  %v9237_v30 = vcombine.high %v2183_v57, %v2191_v40  ;;  %v9239_v18 = vcombine.high %v2184_v59, %v2192_v61  ;;  %v2161_v22 = vld [vmem:[#allocation14 + $0xf0] sm:$0xff]  ;;  %v2154_v16 = vld [vmem:[#allocation14 + $0xb8] sm:$0xff] }
 0x857   : > { %3079 = vmatpush1.bf16.msra.mxu1 %v9248_v0  ;;  %3122 = vmatpush1.bf16.msra.mxu0 %v9250_v4  ;;  %v2208_v0 = vld [vmem:[#allocation14 + $0x268] sm:$0xff]  ;;  %v9236_v4 = vcombine.low %v2183_v57, %v2191_v40  ;;  %v2169_v40 = vld [vmem:[#allocation14 + $0x130] sm:$0xff] }
 0x858   : > { %3080 = vmatprep.subr.bf16.mxu1 %v9265_v25  ;;  %3123 = vmatprep.subr.bf16.mxu0 %v9267_v27  ;;  %v9238_v25 = vcombine.low %v2184_v59, %v2192_v61  ;;  %v9253_v27 = vcombine.high %v2199_v52, %v2207_v33  ;;  %v9255_v8 = vcombine.high %v2200_v38, %v2208_v0  ;;  %v2177_v59 = vld [vmem:[#allocation14 + $0x170] sm:$0xff]  ;;  %v2170_v61 = vld [vmem:[#allocation14 + $0x138] sm:$0xff] }
 0x85b   : > { %3081 = vmatpush1.bf16.msra.mxu1 %v9264_v51  ;;  %3124 = vmatpush1.bf16.msra.mxu0 %v9266_v13  ;;  %v2224_v51 = vld [vmem:[#allocation14 + $0x2e8] sm:$0xff]  ;;  %v9252_v13 = vcombine.low %v2199_v52, %v2207_v33  ;;  %v2185_v33 = vld [vmem:[#allocation14 + $0x1b0] sm:$0xff] }
 0x85c   : > { %3082 = vmatprep.subr.bf16.mxu1 %v9281_v14  ;;  %3125 = vmatprep.subr.bf16.mxu0 %v9283_v15  ;;  %v9254_v14 = vcombine.low %v2200_v38, %v2208_v0  ;;  %v9269_v15 = vcombine.high %v2215_v46, %v2223_v17  ;;  %v9271_v42 = vcombine.high %v2216_v12, %v2224_v51  ;;  %v2193_v38 = vld [vmem:[#allocation14 + $0x1f0] sm:$0xff]  ;;  %v2186_v0 = vld [vmem:[#allocation14 + $0x1b8] sm:$0xff] }
 0x85f   : > { %3083 = vmatpush1.bf16.msra.mxu1 %v9280_v56  ;;  %3126 = vmatpush1.bf16.msra.mxu0 %v9282_v23  ;;  %v2240_v56 = vld [vmem:[#allocation14 + $0x368] sm:$0xff]  ;;  %v9268_v23 = vcombine.low %v2215_v46, %v2223_v17  ;;  %v2201_v17 = vld [vmem:[#allocation14 + $0x230] sm:$0xff] }
 0x860   : > { %3084 = vmatprep.subr.bf16.mxu1 %v9297_v58  ;;  %3127 = vmatprep.subr.bf16.mxu0 %v9299_v10  ;;  %v9270_v58 = vcombine.low %v2216_v12, %v2224_v51  ;;  %v9285_v10 = vcombine.high %v2231_v39, %v2239_v19  ;;  %v9287_v24 = vcombine.high %v2232_v20, %v2240_v56  ;;  %v2209_v12 = vld [vmem:[#allocation14 + $0x270] sm:$0xff]  ;;  %v2202_v51 = vld [vmem:[#allocation14 + $0x238] sm:$0xff] }
 0x863   : > { %3085 = vmatpush1.bf16.msra.mxu1 %v9296_v62  ;;  %3128 = vmatpush1.bf16.msra.mxu0 %v9298_v6  ;;  %v2256_v62 = vld [vmem:[#allocation14 + $0x3e8] sm:$0xff]  ;;  %v9284_v6 = vcombine.low %v2231_v39, %v2239_v19  ;;  %v2217_v19 = vld [vmem:[#allocation14 + $0x2b0] sm:$0xff] }
 0x864   : > { %3156 = vmatprep.subr.bf16.mxu1 %v9189_v37  ;;  %3199 = vmatprep.subr.bf16.mxu0 %v9191_v5  ;;  %v9286_v37 = vcombine.low %v2232_v20, %v2240_v56  ;;  %v9301_v5 = vcombine.high %v2247_v28, %v2255_v60  ;;  %v9303_v41 = vcombine.high %v2248_v26, %v2256_v62  ;;  %v2225_v20 = vld [vmem:[#allocation14 + $0x2f0] sm:$0xff]  ;;  %v2218_v56 = vld [vmem:[#allocation14 + $0x2b8] sm:$0xff] }
 0x866   : > { %3103 = vmatmul.mubr.bf16.vlgmr.msra.gmra.mrb[44].mxu1 %v12308_v36  ;;  %3146 = vmatmul.mubr.bf16.vlgmr.msra.gmra.mrb[40].mxu0 %v12308_v36 }
 0x867   : > { %3157 = vmatpush1.bf16.msra.mxu1 %v9188_v43  ;;  %3200 = vmatpush1.bf16.msra.mxu0 %v9190_v11  ;;  %v2146_v43 = vld [vmem:[#allocation14 + $0x78] sm:$0xff]  ;;  %v9300_v11 = vcombine.low %v2247_v28, %v2255_v60  ;;  %v2233_v60 = vld [vmem:[#allocation14 + $0x330] sm:$0xff] }
 0x868   : > { %3158 = vmatprep.subr.bf16.mxu1 %v9205_v44  ;;  %3201 = vmatprep.subr.bf16.mxu0 %v9207_v45  ;;  %v9302_v44 = vcombine.low %v2248_v26, %v2256_v62  ;;  %v9193_v45 = vcombine.high %v2137_v9, %v2145_v47  ;;  %v9195_v48 = vcombine.high %v2138_v7, %v2146_v43  ;;  %v2241_v26 = vld [vmem:[#allocation14 + $0x370] sm:$0xff]  ;;  %v2234_v62 = vld [vmem:[#allocation14 + $0x338] sm:$0xff] }
 0x869   : > { %3188 = vmatprep.mubr.bf16.mxu1 %v11517_v1  ;;  %3231 = vmatprep.mubr.bf16.mxu0 %v11517_v1 }
 0x86b   : > { %3159 = vmatpush1.bf16.msra.mxu1 %v9204_v53  ;;  %3202 = vmatpush1.bf16.msra.mxu0 %v9206_v54  ;;  %v2162_v53 = vld [vmem:[#allocation14 + $0xf8] sm:$0xff]  ;;  %v9192_v54 = vcombine.low %v2137_v9, %v2145_v47  ;;  %v2249_v47 = vld [vmem:[#allocation14 + $0x3b0] sm:$0xff] }
 0x86c   : > { %3160 = vmatprep.subr.bf16.mxu1 %v9221_v21  ;;  %3203 = vmatprep.subr.bf16.mxu0 %v9223_v55  ;;  %v9194_v21 = vcombine.low %v2138_v7, %v2146_v43  ;;  %v9209_v55 = vcombine.high %v2153_v49, %v2161_v22  ;;  %v9211_v57 = vcombine.high %v2154_v16, %v2162_v53  ;;  %v2257_v7 = vld [vmem:[#allocation14 + $0x3f0] sm:$0xff]  ;;  %v2250_v43 = vld [vmem:[#allocation14 + $0x3b8] sm:$0xff] }
 0x86f   : > { %3161 = vmatpush1.bf16.msra.mxu1 %v9220_v35  ;;  %3204 = vmatpush1.bf16.msra.mxu0 %v9222_v63  ;;  %v2178_v35 = vld [vmem:[#allocation14 + $0x178] sm:$0xff]  ;;  %v9208_v63 = vcombine.low %v2153_v49, %v2161_v22  ;;  %v9304_v22 = vcombine.low %v2249_v47, %v2257_v7 }
 0x870   : > { %3162 = vmatprep.subr.bf16.mxu1 %v9237_v30  ;;  %3205 = vmatprep.subr.bf16.mxu0 %v9239_v18  ;;  %v9210_v30 = vcombine.low %v2154_v16, %v2162_v53  ;;  %v9225_v18 = vcombine.high %v2169_v40, %v2177_v59  ;;  %v9227_v52 = vcombine.high %v2170_v61, %v2178_v35  ;;  %v10741_v53 = vld [vmem:[#allocation15 + $0x40] sm:$0xff]  }
 0x873   : > { %3163 = vmatpush1.bf16.msra.mxu1 %v9236_v4  ;;  %3206 = vmatpush1.bf16.msra.mxu0 %v9238_v25  ;;  %v2194_v4 = vld [vmem:[#allocation14 + $0x1f8] sm:$0xff]  ;;  %v9224_v25 = vcombine.low %v2169_v40, %v2177_v59  ;;  %v10746_v40 = vld [vmem:[#allocation15 + $0xc8] sm:$0xff]  }
 0x874   : > { %3164 = vmatprep.subr.bf16.mxu1 %v9253_v27  ;;  %3207 = vmatprep.subr.bf16.mxu0 %v9255_v8  ;;  %v9226_v27 = vcombine.low %v2170_v61, %v2178_v35  ;;  %v9241_v8 = vcombine.high %v2185_v33, %v2193_v38  ;;  %v9243_v46 = vcombine.high %v2186_v0, %v2194_v4  ;;  %v10747_v59 = vld [vmem:[#allocation15 + $0x8] sm:$0xff]   ;;  %v10749_v35 = vld [vmem:[#allocation15 + $0x50] sm:$0xff]  }
 0x875   : > { %v10748_v61 = vld [vmem:[#allocation15 + $0x88] sm:$0xff]  }
 0x877   : > { %3165 = vmatpush1.bf16.msra.mxu1 %v9252_v13  ;;  %3208 = vmatpush1.bf16.msra.mxu0 %v9254_v14  ;;  %v2210_v13 = vld [vmem:[#allocation14 + $0x278] sm:$0xff]  ;;  %v9240_v14 = vcombine.low %v2185_v33, %v2193_v38 }
 0x878   : > { %3166 = vmatprep.subr.bf16.mxu1 %v9269_v15  ;;  %3209 = vmatprep.subr.bf16.mxu0 %v9271_v42  ;;  %v9242_v15 = vcombine.low %v2186_v0, %v2194_v4  ;;  %v9257_v42 = vcombine.high %v2201_v17, %v2209_v12  ;;  %v9259_v39 = vcombine.high %v2202_v51, %v2210_v13  ;;  %v10754_v33 = vld [vmem:[#allocation15 + $0xd8] sm:$0xff]   ;;  %v10757_v0 = vld [vmem:[#allocation15 + $0x60] sm:$0xff]  }
 0x879   : > { %v10755_v38 = vld [vmem:[#allocation15 + $0x18] sm:$0xff]   ;;  %v10758_v4 = vld [vmem:[#allocation15 + $0xe0] sm:$0xff]  }
 0x87b   : > { %3167 = vmatpush1.bf16.msra.mxu1 %v9268_v23  ;;  %3210 = vmatpush1.bf16.msra.mxu0 %v9270_v58  ;;  %v2226_v23 = vld [vmem:[#allocation14 + $0x2f8] sm:$0xff]  ;;  %v9256_v58 = vcombine.low %v2201_v17, %v2209_v12  ;;  %v10763_v17 = vld [vmem:[#allocation15 + $0x28] sm:$0xff]  }
 0x87c   : > { %3168 = vmatprep.subr.bf16.mxu1 %v9285_v10  ;;  %3211 = vmatprep.subr.bf16.mxu0 %v9287_v24  ;;  %v9258_v10 = vcombine.low %v2202_v51, %v2210_v13  ;;  %v9273_v24 = vcombine.high %v2217_v19, %v2225_v20  ;;  %v9275_v28 = vcombine.high %v2218_v56, %v2226_v23  ;;  %v10764_v12 = vld [vmem:[#allocation15 + $0xa8] sm:$0xff]   ;;  %v10765_v51 = vld [vmem:[#allocation15 + $0x70] sm:$0xff]  }
 0x87d   : > { %v10766_v13 = vld [vmem:[#allocation15 + $0xf0] sm:$0xff]  }
 0x87f   : > { %3169 = vmatpush1.bf16.msra.mxu1 %v9284_v6  ;;  %3212 = vmatpush1.bf16.msra.mxu0 %v9286_v37  ;;  %v2242_v6 = vld [vmem:[#allocation14 + $0x378] sm:$0xff]  ;;  %v9272_v37 = vcombine.low %v2217_v19, %v2225_v20 }
 0x880   : > { %3170 = vmatprep.subr.bf16.mxu1 %v9301_v5  ;;  %3213 = vmatprep.subr.bf16.mxu0 %v9303_v41  ;;  %v9274_v5 = vcombine.low %v2218_v56, %v2226_v23  ;;  %v9289_v41 = vcombine.high %v2233_v60, %v2241_v26  ;;  %v9291_v9 = vcombine.high %v2234_v62, %v2242_v6  ;;  %v10771_v19 = vld [vmem:[#allocation15 + $0x38] sm:$0xff]   ;;  %v10773_v56 = vld [vmem:[#allocation15 + $0x140] sm:$0xff]  }
 0x881   : > { %v10772_v20 = vld [vmem:[#allocation15 + $0xb8] sm:$0xff]   ;;  %v10774_v23 = vld [vmem:[#allocation15 + $0x1c0] sm:$0xff]  }
 0x883   : > { %3171 = vmatpush1.bf16.msra.mxu1 %v9300_v11  ;;  %3214 = vmatpush1.bf16.msra.mxu0 %v9302_v44  ;;  %v2258_v11 = vld [vmem:[#allocation14 + $0x3f8] sm:$0xff]  ;;  %v9288_v44 = vcombine.low %v2233_v60, %v2241_v26 }
 0x884   : > { %3242 = vmatprep.subr.bf16.mxu1 %v9193_v45  ;;  %3285 = vmatprep.subr.bf16.mxu0 %v9195_v48  ;;  %v9290_v45 = vcombine.low %v2234_v62, %v2242_v6  ;;  %v9305_v48 = vcombine.high %v2249_v47, %v2257_v7  ;;  %v9307_v49 = vcombine.high %v2250_v43, %v2258_v11 }
 0x885   : > { %v9306_v16 = vcombine.low %v2250_v43, %v2258_v11 }
 0x886   : > { %3189 = vmatmul.mubr.bf16.vlgmr.msra.gmra.mrb[48].mxu1 %v12308_v36  ;;  %3232 = vmatmul.mubr.bf16.vlgmr.msra.gmra.mrb[44].mxu0 %v12308_v36 }
 0x887   : > { %3243 = vmatpush1.bf16.msra.mxu1 %v9192_v54  ;;  %3286 = vmatpush1.bf16.msra.mxu0 %v9194_v21  ;;  %v10742_v54 = vld [vmem:[#allocation15 + $0xc0] sm:$0xff]  }
 0x888   : > { %3244 = vmatprep.subr.bf16.mxu1 %v9209_v55  ;;  %3287 = vmatprep.subr.bf16.mxu0 %v9211_v57  ;;  %v10743_v21 = vld [vmem:[#allocation15] sm:$0xff]   ;;  %v10745_v57 = vld [vmem:[#allocation15 + $0x48] sm:$0xff]  }
 0x889   : > { %3274 = vmatprep.mubr.bf16.mxu1 %v11517_v1  ;;  %3317 = vmatprep.mubr.bf16.mxu0 %v11517_v1  ;;  %v10744_v55 = vld [vmem:[#allocation15 + $0x80] sm:$0xff]  }
 0x88b   : > { %3245 = vmatpush1.bf16.msra.mxu1 %v9208_v63  ;;  %3288 = vmatpush1.bf16.msra.mxu0 %v9210_v30  ;;  %v10750_v63 = vld [vmem:[#allocation15 + $0xd0] sm:$0xff]  }
 0x88c   : > { %3246 = vmatprep.subr.bf16.mxu1 %v9225_v18  ;;  %3289 = vmatprep.subr.bf16.mxu0 %v9227_v52  ;;  %v10751_v30 = vld [vmem:[#allocation15 + $0x10] sm:$0xff]   ;;  %v10753_v52 = vld [vmem:[#allocation15 + $0x58] sm:$0xff]  }
 0x88d   : > { %v10752_v18 = vld [vmem:[#allocation15 + $0x90] sm:$0xff]  }
 0x88f   : > { %3247 = vmatpush1.bf16.msra.mxu1 %v9224_v25  ;;  %3290 = vmatpush1.bf16.msra.mxu0 %v9226_v27  ;;  %v10759_v25 = vld [vmem:[#allocation15 + $0x20] sm:$0xff]  }
 0x890   : > { %3248 = vmatprep.subr.bf16.mxu1 %v9241_v8  ;;  %3291 = vmatprep.subr.bf16.mxu0 %v9243_v46  ;;  %v10760_v27 = vld [vmem:[#allocation15 + $0xa0] sm:$0xff]   ;;  %v10761_v8 = vld [vmem:[#allocation15 + $0x68] sm:$0xff]  }
 0x891   : > { %v10762_v46 = vld [vmem:[#allocation15 + $0xe8] sm:$0xff]  }
 0x893   : > { %3249 = vmatpush1.bf16.msra.mxu1 %v9240_v14  ;;  %3292 = vmatpush1.bf16.msra.mxu0 %v9242_v15  ;;  %v10767_v14 = vld [vmem:[#allocation15 + $0x30] sm:$0xff]  }
 0x894   : > { %3250 = vmatprep.subr.bf16.mxu1 %v9257_v42  ;;  %3293 = vmatprep.subr.bf16.mxu0 %v9259_v39  ;;  %v10768_v15 = vld [vmem:[#allocation15 + $0xb0] sm:$0xff]   ;;  %v10769_v42 = vld [vmem:[#allocation15 + $0x78] sm:$0xff]  }
 0x895   : > { %v10770_v39 = vld [vmem:[#allocation15 + $0xf8] sm:$0xff]  }
 0x897   : > { %3251 = vmatpush1.bf16.msra.mxu1 %v9256_v58  ;;  %3294 = vmatpush1.bf16.msra.mxu0 %v9258_v10  ;;  %v12327_v58 = vld [vmem:[%s12856_s9] sm:$0xff]  ;;  %v12330_v10 = vsub.s32 3, %v11956_v31 }
 0x898   : > { %3252 = vmatprep.subr.bf16.mxu1 %v9273_v24  ;;  %3295 = vmatprep.subr.bf16.mxu0 %v9275_v28  ;;  %v2267_v24 = vrot.slane %v12327_v58, %v11959_v32  ;;  %v2275_v28 = vrot.slane %v12327_v58, %v11986_v50  ;;  %v2271_v60 = vrot.slane %v12327_v58, %v11962_v34 }
 0x899   : > { %v2279_v26 = vrot.slane %v12327_v58, %v12330_v10 }
 0x89b   : > { %3253 = vmatpush1.bf16.msra.mxu1 %v9272_v37  ;;  %3296 = vmatpush1.bf16.msra.mxu0 %v9274_v5 }
 0x89c   : > { %3254 = vmatprep.subr.bf16.mxu1 %v9289_v41  ;;  %3297 = vmatprep.subr.bf16.mxu0 %v9291_v9 }
 0x89f   : > { %3255 = vmatpush1.bf16.msra.mxu1 %v9288_v44  ;;  %3298 = vmatpush1.bf16.msra.mxu0 %v9290_v45 }
 0x8a0   : > { %3256 = vmatprep.subr.bf16.mxu1 %v9305_v48  ;;  %3299 = vmatprep.subr.bf16.mxu0 %v9307_v49 }
 0x8a3   : > { %3257 = vmatpush1.bf16.msra.mxu1 %v9304_v22  ;;  %3300 = vmatpush1.bf16.msra.mxu0 %v9306_v16 }
 0x8a4   : > { %9809 = vmatprep.subr.bf16.mxu1 %v10741_v53  ;;  %9831 = vmatprep.subr.bf16.mxu0 %v10742_v54 }
 0x8a6   : > { %3275 = vmatmul.mubr.bf16.vlgmr.msra.gmra.mrb[52].mxu1 %v12308_v36  ;;  %3318 = vmatmul.mubr.bf16.vlgmr.msra.gmra.mrb[48].mxu0 %v12308_v36  ;;  %v10756_v36 = vld [vmem:[#allocation15 + $0x98] sm:$0xff]  }
 0x8a7   : > { %9810 = vmatpush3.bf16.msra.mxu1 %v10743_v21  ;;  %9832 = vmatpush3.bf16.msra.mxu0 %v10744_v55 }
 0x8a8   : > { %9811 = vmatprep.subr.bf16.mxu1 %v10745_v57  ;;  %9833 = vmatprep.subr.bf16.mxu0 %v10746_v40 }
 0x8ab   : > { %9812 = vmatpush3.bf16.msra.mxu1 %v10747_v59  ;;  %9834 = vmatpush3.bf16.msra.mxu0 %v10748_v61 }
 0x8ac   : > { %9813 = vmatprep.subr.bf16.mxu1 %v10749_v35  ;;  %9835 = vmatprep.subr.bf16.mxu0 %v10750_v63 }
 0x8af   : > { %9814 = vmatpush3.bf16.msra.mxu1 %v10751_v30  ;;  %9836 = vmatpush3.bf16.msra.mxu0 %v10752_v18 }
 0x8b0   : > { %9815 = vmatprep.subr.bf16.mxu1 %v10753_v52  ;;  %9837 = vmatprep.subr.bf16.mxu0 %v10754_v33  ;;  %v10775_v52 = vld [vmem:[#allocation15 + $0x100] sm:$0xff]  }
 0x8b1   : > { %v10776_v33 = vld [vmem:[#allocation15 + $0x180] sm:$0xff]  }
 0x8b3   : > { %9816 = vmatpush3.bf16.msra.mxu1 %v10755_v38  ;;  %9838 = vmatpush3.bf16.msra.mxu0 %v10756_v36  ;;  %v10777_v38 = vld [vmem:[#allocation15 + $0x148] sm:$0xff]  }
 0x8b4   : > { %9817 = vmatprep.subr.bf16.mxu1 %v10757_v0  ;;  %9839 = vmatprep.subr.bf16.mxu0 %v10758_v4  ;;  %v10778_v36 = vld [vmem:[#allocation15 + $0x1c8] sm:$0xff]  }
 0x8b5   : > { %v10779_v0 = vld [vmem:[#allocation15 + $0x108] sm:$0xff]  }
 0x8b6   : > { %v10780_v4 = vld [vmem:[#allocation15 + $0x188] sm:$0xff]  }
 0x8b7   : > { %9818 = vmatpush3.bf16.msra.mxu1 %v10759_v25  ;;  %9840 = vmatpush3.bf16.msra.mxu0 %v10760_v27  ;;  %v10781_v25 = vld [vmem:[#allocation15 + $0x150] sm:$0xff]  }
 0x8b8   : > { %9819 = vmatprep.subr.bf16.mxu1 %v10761_v8  ;;  %9841 = vmatprep.subr.bf16.mxu0 %v10762_v46  ;;  %v10782_v27 = vld [vmem:[#allocation15 + $0x1d0] sm:$0xff]  }
 0x8b9   : > { %v10783_v8 = vld [vmem:[#allocation15 + $0x110] sm:$0xff]  }
 0x8ba   : > { %v10784_v46 = vld [vmem:[#allocation15 + $0x190] sm:$0xff]  }
 0x8bb   : > { %9820 = vmatpush3.bf16.msra.mxu1 %v10763_v17  ;;  %9842 = vmatpush3.bf16.msra.mxu0 %v10764_v12  ;;  %v10785_v17 = vld [vmem:[#allocation15 + $0x158] sm:$0xff]  }
 0x8bc   : > { %9821 = vmatprep.subr.bf16.mxu1 %v10765_v51  ;;  %9843 = vmatprep.subr.bf16.mxu0 %v10766_v13  ;;  %v10786_v12 = vld [vmem:[#allocation15 + $0x1d8] sm:$0xff]  }
 0x8bd   : > { %v10787_v51 = vld [vmem:[#allocation15 + $0x118] sm:$0xff]  }
 0x8be   : > { %v10788_v13 = vld [vmem:[#allocation15 + $0x198] sm:$0xff]  }
 0x8bf   : > { %9822 = vmatpush3.bf16.msra.mxu1 %v10767_v14  ;;  %9844 = vmatpush3.bf16.msra.mxu0 %v10768_v15  ;;  %v10789_v14 = vld [vmem:[#allocation15 + $0x160] sm:$0xff]  }
 0x8c0   : > { %9823 = vmatprep.subr.bf16.mxu1 %v10769_v42  ;;  %9845 = vmatprep.subr.bf16.mxu0 %v10770_v39  ;;  %v10790_v15 = vld [vmem:[#allocation15 + $0x1e0] sm:$0xff]  }
 0x8c1   : > { %v10791_v42 = vld [vmem:[#allocation15 + $0x120] sm:$0xff]  }
 0x8c2   : > { %v10792_v39 = vld [vmem:[#allocation15 + $0x1a0] sm:$0xff]  }
 0x8c3   : > { %9824 = vmatpush3.bf16.msra.mxu1 %v10771_v19  ;;  %9846 = vmatpush3.bf16.msra.mxu0 %v10772_v20  ;;  %v10793_v19 = vld [vmem:[#allocation15 + $0x168] sm:$0xff]  }
 0x8c4   : > { %9853 = vmatprep.subr.bf16.mxu1 %v10773_v56  ;;  %9875 = vmatprep.subr.bf16.mxu0 %v10774_v23  ;;  %v10794_v20 = vld [vmem:[#allocation15 + $0x1e8] sm:$0xff]   ;;  %v12341_v56 = vsub.s32 4, %v11956_v31  ;;  %v12344_v23 = vsub.s32 6, %v11956_v31 }
 0x919   : > { %v3018_v62 = vpop.f32.mrb[40].mxu1  ;;  %v3061_v6 = vpop.f32.mrb[36].mxu0 }
 0x91a   : > { %v3019_v37 = vadd.f32 %v3018_v62, %v2267_v24  ;;  %v3062_v5 = vadd.f32 %v3061_v6, %v2275_v28  ;;  %v3020_v41 = vpop.f32.mrb[41].mxu1  ;;  %v3063_v9 = vpop.f32.mrb[37].mxu0  ;;  %v2283_v62 = vrot.slane %v12327_v58, %v12341_v56  ;;  %v2291_v6 = vrot.slane %v12327_v58, %v12344_v23 }
 0x91b   : > { %v3021_v47 = vadd.f32 %v3020_v41, %v2271_v60  ;;  %v3064_v7 = vadd.f32 %v3063_v9, %v2279_v26  ;;  %v3022_v43 = vpop.f32.mrb[42].mxu1  ;;  %v3065_v11 = vpop.f32.mrb[38].mxu0 }
 0x91c   : > { %v3023_v44 = vadd.f32 %v3022_v43, %v2267_v24  ;;  %v3066_v45 = vadd.f32 %v3065_v11, %v2275_v28  ;;  %v3024_v48 = vpop.f32.mrb[43].mxu1  ;;  %v3067_v49 = vpop.f32.mrb[39].mxu0  ;;  %v3328_v53 = vmax.f32 %v3019_v37, 0.0  ;;  %v3330_v54 = vmax.f32 %v3062_v5, 0.0  ;;  %v10797_v37 = vld [vmem:[#allocation15 + $0x170] sm:$0xff]  }
 0x91d   : > { %v3025_v22 = vadd.f32 %v3024_v48, %v2271_v60  ;;  %v3068_v16 = vadd.f32 %v3067_v49, %v2279_v26  ;;  %v3329_v57 = vmax.f32 %v3021_v47, 0.0  ;;  %v3331_v40 = vmax.f32 %v3064_v7, 0.0  ;;  %v10795_v60 = vld [vmem:[#allocation15 + $0x128] sm:$0xff]   ;;  %v10798_v5 = vld [vmem:[#allocation15 + $0x1f0] sm:$0xff]   ;;  %v10801_v49 = vld [vmem:[#allocation15 + $0x178] sm:$0xff]  }
 0x91e   : > { %v3344_v21 = vmax.f32 %v3023_v44, 0.0  ;;  %v3346_v55 = vmax.f32 %v3066_v45, 0.0  ;;  %v12347_v24 = vsub.s32 5, %v11956_v31  ;;  %v12350_v28 = vsub.s32 7, %v11956_v31  ;;  %v10796_v26 = vld [vmem:[#allocation15 + $0x1a8] sm:$0xff]   ;;  %v10799_v7 = vld [vmem:[#allocation15 + $0x130] sm:$0xff]  }
 0x91f   : > { %v3345_v59 = vmax.f32 %v3025_v22, 0.0  ;;  %v3347_v61 = vmax.f32 %v3068_v16, 0.0  ;;  %v10800_v43 = vld [vmem:[#allocation15 + $0x1b0] sm:$0xff]   ;;  %v10802_v22 = vld [vmem:[#allocation15 + $0x1f8] sm:$0xff]  }
 0x920   : > { %v3616_v35 = vpack.c.bf16 %v3344_v21, %v3328_v53  ;;  %v3618_v63 = vpack.c.bf16 %v3346_v55, %v3330_v54  ;;  %v2287_v41 = vrot.slane %v12327_v58, %v12347_v24  ;;  %v2295_v31 = vrot.slane %v12327_v58, %v12350_v28 }
 0x921   : > { %v3617_v30 = vpack.c.bf16 %v3345_v59, %v3329_v57  ;;  %v3619_v18 = vpack.c.bf16 %v3347_v61, %v3331_v40 }
 0x923   : > { %4439 = vmatprep.mubr.bf16.mxu1 %v3617_v30  ;;  %4480 = vmatprep.mubr.bf16.mxu0 %v3619_v18 }
 0x924   : > { %4440 = vmatmul.mubr.bf16.vlgmr.msra.gmra.mrb[56].mxu1 %v3616_v35  ;;  %4481 = vmatmul.mubr.bf16.vlgmr.msra.gmra.mrb[52].mxu0 %v3618_v63  ;;  %v10803_v35 = vld [vmem:[#allocation15 + $0x138] sm:$0xff]  }
 0x925   : > { %9854 = vmatpush3.bf16.msra.mxu1 %v10775_v52  ;;  %9876 = vmatpush3.bf16.msra.mxu0 %v10776_v33  ;;  %v10804_v63 = vld [vmem:[#allocation15 + $0x1b8] sm:$0xff]  }
 0x926   : > { %9855 = vmatprep.subr.bf16.mxu1 %v10777_v38  ;;  %9877 = vmatprep.subr.bf16.mxu0 %v10778_v36  ;;  %v10805_v38 = vld [vmem:[#allocation15 + $0x240] sm:$0xff]  }
 0x927   : > { %v10806_v36 = vld [vmem:[#allocation15 + $0x2c0] sm:$0xff]  }
 0x929   : > { %9856 = vmatpush3.bf16.msra.mxu1 %v10779_v0  ;;  %9878 = vmatpush3.bf16.msra.mxu0 %v10780_v4 }
 0x92a   : > { %9857 = vmatprep.subr.bf16.mxu1 %v10781_v25  ;;  %9879 = vmatprep.subr.bf16.mxu0 %v10782_v27 }
 0x92d   : > { %9858 = vmatpush3.bf16.msra.mxu1 %v10783_v8  ;;  %9880 = vmatpush3.bf16.msra.mxu0 %v10784_v46 }
 0x92e   : > { %9859 = vmatprep.subr.bf16.mxu1 %v10785_v17  ;;  %9881 = vmatprep.subr.bf16.mxu0 %v10786_v12 }
 0x931   : > { %9860 = vmatpush3.bf16.msra.mxu1 %v10787_v51  ;;  %9882 = vmatpush3.bf16.msra.mxu0 %v10788_v13  ;;  %v10807_v51 = vld [vmem:[#allocation15 + $0x200] sm:$0xff]  }
 0x932   : > { %9861 = vmatprep.subr.bf16.mxu1 %v10789_v14  ;;  %9883 = vmatprep.subr.bf16.mxu0 %v10790_v15  ;;  %v10808_v13 = vld [vmem:[#allocation15 + $0x280] sm:$0xff]   ;;  %v10809_v14 = vld [vmem:[#allocation15 + $0x248] sm:$0xff]  }
 0x933   : > { %v10810_v15 = vld [vmem:[#allocation15 + $0x2c8] sm:$0xff]  }
 0x935   : > { %9862 = vmatpush3.bf16.msra.mxu1 %v10791_v42  ;;  %9884 = vmatpush3.bf16.msra.mxu0 %v10792_v39  ;;  %v10811_v42 = vld [vmem:[#allocation15 + $0x208] sm:$0xff]  }
 0x936   : > { %9863 = vmatprep.subr.bf16.mxu1 %v10793_v19  ;;  %9885 = vmatprep.subr.bf16.mxu0 %v10794_v20  ;;  %v10812_v39 = vld [vmem:[#allocation15 + $0x288] sm:$0xff]   ;;  %v10813_v19 = vld [vmem:[#allocation15 + $0x250] sm:$0xff]  }
 0x937   : > { %v10814_v20 = vld [vmem:[#allocation15 + $0x2d0] sm:$0xff]  }
 0x939   : > { %v3104_v9 = vpop.f32.mrb[44].mxu1  ;;  %v3147_v47 = vpop.f32.mrb[40].mxu0  ;;  %9864 = vmatpush3.bf16.msra.mxu1 %v10795_v60  ;;  %9886 = vmatpush3.bf16.msra.mxu0 %v10796_v26  ;;  %v10815_v60 = vld [vmem:[#allocation15 + $0x210] sm:$0xff]  }
 0x93a   : > { %v3105_v11 = vadd.f32 %v3104_v9, %v2283_v62  ;;  %v3148_v44 = vadd.f32 %v3147_v47, %v2291_v6  ;;  %v3106_v45 = vpop.f32.mrb[45].mxu1  ;;  %v3149_v48 = vpop.f32.mrb[41].mxu0  ;;  %9865 = vmatprep.subr.bf16.mxu1 %v10797_v37  ;;  %9887 = vmatprep.subr.bf16.mxu0 %v10798_v5  ;;  %v10816_v26 = vld [vmem:[#allocation15 + $0x290] sm:$0xff]   ;;  %v10819_v37 = vld [vmem:[#allocation15 + $0x218] sm:$0xff]   ;;  %v10823_v9 = vld [vmem:[#allocation15 + $0x220] sm:$0xff]  }
 0x93b   : > { %v3107_v16 = vadd.f32 %v3106_v45, %v2287_v41  ;;  %v3150_v53 = vadd.f32 %v3149_v48, %v2295_v31  ;;  %v3108_v54 = vpop.f32.mrb[46].mxu1  ;;  %v3151_v21 = vpop.f32.mrb[42].mxu0  ;;  %v10820_v5 = vld [vmem:[#allocation15 + $0x298] sm:$0xff]   ;;  %v10824_v47 = vld [vmem:[#allocation15 + $0x2a0] sm:$0xff]   ;;  %v10828_v45 = vld [vmem:[#allocation15 + $0x2a8] sm:$0xff]  }
 0x93c   : > { %v3109_v55 = vadd.f32 %v3108_v54, %v2283_v62  ;;  %v3152_v58 = vadd.f32 %v3151_v21, %v2291_v6  ;;  %v3110_v57 = vpop.f32.mrb[47].mxu1  ;;  %v3153_v40 = vpop.f32.mrb[43].mxu0  ;;  %v3332_v30 = vmax.f32 %v3105_v11, 0.0  ;;  %v3334_v18 = vmax.f32 %v3148_v44, 0.0  ;;  %v10817_v62 = vld [vmem:[#allocation15 + $0x258] sm:$0xff]   ;;  %v10827_v44 = vld [vmem:[#allocation15 + $0x228] sm:$0xff]  }
 0x93d   : > { %v3111_v59 = vadd.f32 %v3110_v57, %v2287_v41  ;;  %v3154_v61 = vadd.f32 %v3153_v40, %v2295_v31  ;;  %9866 = vmatpush3.bf16.msra.mxu1 %v10799_v7  ;;  %9888 = vmatpush3.bf16.msra.mxu0 %v10800_v43  ;;  %v3333_v0 = vmax.f32 %v3107_v16, 0.0  ;;  %v3335_v4 = vmax.f32 %v3150_v53, 0.0  ;;  %v10818_v6 = vld [vmem:[#allocation15 + $0x2d8] sm:$0xff]   ;;  %v10821_v41 = vld [vmem:[#allocation15 + $0x260] sm:$0xff]   ;;  %v10825_v7 = vld [vmem:[#allocation15 + $0x268] sm:$0xff]  }
 0x93e   : > { %v3348_v52 = vmax.f32 %v3109_v55, 0.0  ;;  %v3350_v33 = vmax.f32 %v3152_v58, 0.0  ;;  %9867 = vmatprep.subr.bf16.mxu1 %v10801_v49  ;;  %9889 = vmatprep.subr.bf16.mxu0 %v10802_v22  ;;  %v10822_v31 = vld [vmem:[#allocation15 + $0x2e0] sm:$0xff]   ;;  %v10826_v43 = vld [vmem:[#allocation15 + $0x2e8] sm:$0xff]   ;;  %v10829_v22 = vld [vmem:[#allocation15 + $0x270] sm:$0xff]  }
 0x93f   : > { %v3349_v25 = vmax.f32 %v3111_v59, 0.0  ;;  %v3351_v27 = vmax.f32 %v3154_v61, 0.0  ;;  %v12363_v11 = vld [vmem:[%s12856_s9 + $0x8] sm:$0xff]  ;;  %v10830_v16 = vld [vmem:[#allocation15 + $0x2f0] sm:$0xff]  }
 0x940   : > { %v3620_v8 = vpack.c.bf16 %v3348_v52, %v3332_v30  ;;  %v3622_v46 = vpack.c.bf16 %v3350_v33, %v3334_v18  ;;  %v2299_v48 = vrot.slane %v12363_v11, %v11959_v32  ;;  %v2307_v49 = vrot.slane %v12363_v11, %v11986_v50  ;;  %v10831_v58 = vld [vmem:[#allocation15 + $0x230] sm:$0xff]   ;;  %v10834_v30 = vld [vmem:[#allocation15 + $0x2f8] sm:$0xff]  }
 0x941   : > { %v3621_v17 = vpack.c.bf16 %v3349_v25, %v3333_v0  ;;  %v3623_v12 = vpack.c.bf16 %v3351_v27, %v3335_v4  ;;  %9868 = vmatpush3.bf16.msra.mxu1 %v10803_v35  ;;  %9890 = vmatpush3.bf16.msra.mxu0 %v10804_v63  ;;  %v2303_v53 = vrot.slane %v12363_v11, %v11962_v34  ;;  %v10832_v57 = vld [vmem:[#allocation15 + $0x2b0] sm:$0xff]   ;;  %v10833_v63 = vld [vmem:[#allocation15 + $0x278] sm:$0xff]  }
 0x942   : > { %9897 = vmatprep.subr.bf16.mxu1 %v10805_v38  ;;  %9919 = vmatprep.subr.bf16.mxu0 %v10806_v36  ;;  %v2311_v54 = vrot.slane %v12363_v11, %v12330_v10 }
 0x943   : > { %4521 = vmatprep.mubr.bf16.mxu1 %v3621_v17  ;;  %4562 = vmatprep.mubr.bf16.mxu0 %v3623_v12  ;;  %v10836_v17 = vld [vmem:[#allocation15 + $0x2b8] sm:$0xff]  }
 0x944   : > { %4522 = vmatmul.mubr.bf16.vlgmr.msra.gmra.mrb[60].mxu1 %v3620_v8  ;;  %4563 = vmatmul.mubr.bf16.vlgmr.msra.gmra.mrb[56].mxu0 %v3622_v46  ;;  %v10835_v46 = vld [vmem:[#allocation15 + $0x238] sm:$0xff]  }
 0x945   : > { %9898 = vmatpush3.bf16.msra.mxu1 %v10807_v51  ;;  %9920 = vmatpush3.bf16.msra.mxu0 %v10808_v13 }
 0x946   : > { %9899 = vmatprep.subr.bf16.mxu1 %v10809_v14  ;;  %9921 = vmatprep.subr.bf16.mxu0 %v10810_v15  ;;  %v10837_v15 = vld [vmem:[#allocation15 + $0x340] sm:$0xff]  }
 0x949   : > { %9900 = vmatpush3.bf16.msra.mxu1 %v10811_v42  ;;  %9922 = vmatpush3.bf16.msra.mxu0 %v10812_v39  ;;  %v10838_v42 = vld [vmem:[#allocation15 + $0x3c0] sm:$0xff]  }
 0x94a   : > { %9901 = vmatprep.subr.bf16.mxu1 %v10813_v19  ;;  %9923 = vmatprep.subr.bf16.mxu0 %v10814_v20 }
 0x94d   : > { %9902 = vmatpush3.bf16.msra.mxu1 %v10815_v60  ;;  %9924 = vmatpush3.bf16.msra.mxu0 %v10816_v26 }
 0x94e   : > { %9903 = vmatprep.subr.bf16.mxu1 %v10817_v62  ;;  %9925 = vmatprep.subr.bf16.mxu0 %v10818_v6 }
 0x951   : > { %9904 = vmatpush3.bf16.msra.mxu1 %v10819_v37  ;;  %9926 = vmatpush3.bf16.msra.mxu0 %v10820_v5  ;;  %v10839_v5 = vld [vmem:[#allocation15 + $0x300] sm:$0xff]  }
 0x952   : > { %9905 = vmatprep.subr.bf16.mxu1 %v10821_v41  ;;  %9927 = vmatprep.subr.bf16.mxu0 %v10822_v31  ;;  %v10840_v41 = vld [vmem:[#allocation15 + $0x380] sm:$0xff]   ;;  %v10841_v31 = vld [vmem:[#allocation15 + $0x348] sm:$0xff]  }
 0x955   : > { %9906 = vmatpush3.bf16.msra.mxu1 %v10823_v9  ;;  %9928 = vmatpush3.bf16.msra.mxu0 %v10824_v47  ;;  %v10842_v9 = vld [vmem:[#allocation15 + $0x3c8] sm:$0xff]  }
 0x956   : > { %9907 = vmatprep.subr.bf16.mxu1 %v10825_v7  ;;  %9929 = vmatprep.subr.bf16.mxu0 %v10826_v43  ;;  %v10843_v47 = vld [vmem:[#allocation15 + $0x308] sm:$0xff]   ;;  %v10845_v43 = vld [vmem:[#allocation15 + $0x350] sm:$0xff]  }
 0x957   : > { %v10844_v7 = vld [vmem:[#allocation15 + $0x388] sm:$0xff]  }
 0x959   : > { %v3190_v21 = vpop.f32.mrb[48].mxu1  ;;  %v3233_v55 = vpop.f32.mrb[44].mxu0  ;;  %9908 = vmatpush3.bf16.msra.mxu1 %v10827_v44  ;;  %9930 = vmatpush3.bf16.msra.mxu0 %v10828_v45  ;;  %v10846_v44 = vld [vmem:[#allocation15 + $0x3d0] sm:$0xff]  }
 0x95a   : > { %v3191_v40 = vadd.f32 %v3190_v21, %v2299_v48  ;;  %v3234_v59 = vadd.f32 %v3233_v55, %v2307_v49  ;;  %v3192_v61 = vpop.f32.mrb[49].mxu1  ;;  %v3235_v35 = vpop.f32.mrb[45].mxu0  ;;  %9909 = vmatprep.subr.bf16.mxu1 %v10829_v22  ;;  %9931 = vmatprep.subr.bf16.mxu0 %v10830_v16  ;;  %v10847_v45 = vld [vmem:[#allocation15 + $0x310] sm:$0xff]   ;;  %v10850_v22 = vld [vmem:[#allocation15 + $0x3d8] sm:$0xff]   ;;  %v10854_v21 = vld [vmem:[#allocation15 + $0x3e0] sm:$0xff]  }
 0x95b   : > { %v3193_v18 = vadd.f32 %v3192_v61, %v2303_v53  ;;  %v3236_v52 = vadd.f32 %v3235_v35, %v2311_v54  ;;  %v3194_v33 = vpop.f32.mrb[50].mxu1  ;;  %v3237_v38 = vpop.f32.mrb[46].mxu0  ;;  %v10851_v16 = vld [vmem:[#allocation15 + $0x318] sm:$0xff]   ;;  %v10855_v55 = vld [vmem:[#allocation15 + $0x320] sm:$0xff]   ;;  %v10860_v61 = vld [vmem:[#allocation15 + $0x3a8] sm:$0xff]   ;;  %v2315_v35 = vrot.slane %v12363_v11, %v12341_v56 }
 0x95c   : > { %v3195_v36 = vadd.f32 %v3194_v33, %v2299_v48  ;;  %v3238_v0 = vadd.f32 %v3237_v38, %v2307_v49  ;;  %v3196_v4 = vpop.f32.mrb[51].mxu1  ;;  %v3239_v25 = vpop.f32.mrb[47].mxu0  ;;  %v3336_v12 = vmax.f32 %v3191_v40, 0.0  ;;  %v3338_v51 = vmax.f32 %v3234_v59, 0.0  ;;  %v10848_v48 = vld [vmem:[#allocation15 + $0x390] sm:$0xff]   ;;  %v10849_v49 = vld [vmem:[#allocation15 + $0x358] sm:$0xff]  }
 0x95d   : > { %v3197_v27 = vadd.f32 %v3196_v4, %v2303_v53  ;;  %v3240_v8 = vadd.f32 %v3239_v25, %v2311_v54  ;;  %9910 = vmatpush3.bf16.msra.mxu1 %v10831_v58  ;;  %9932 = vmatpush3.bf16.msra.mxu0 %v10832_v57  ;;  %v3337_v39 = vmax.f32 %v3193_v18, 0.0  ;;  %v3339_v19 = vmax.f32 %v3236_v52, 0.0  ;;  %v10852_v53 = vld [vmem:[#allocation15 + $0x398] sm:$0xff]   ;;  %v10853_v54 = vld [vmem:[#allocation15 + $0x360] sm:$0xff]   ;;  %v10857_v57 = vld [vmem:[#allocation15 + $0x368] sm:$0xff]  }
 0x95e   : > { %v3352_v13 = vmax.f32 %v3195_v36, 0.0  ;;  %v3354_v14 = vmax.f32 %v3238_v0, 0.0  ;;  %9911 = vmatprep.subr.bf16.mxu1 %v10833_v63  ;;  %9933 = vmatprep.subr.bf16.mxu0 %v10834_v30  ;;  %v10856_v58 = vld [vmem:[#allocation15 + $0x3a0] sm:$0xff]   ;;  %v10858_v40 = vld [vmem:[#allocation15 + $0x3e8] sm:$0xff]   ;;  %v2323_v63 = vrot.slane %v12363_v11, %v12344_v23  ;;  %v10861_v30 = vld [vmem:[#allocation15 + $0x370] sm:$0xff]   ;;  %v2319_v52 = vrot.slane %v12363_v11, %v12347_v24 }
 0x95f   : > { %v3353_v20 = vmax.f32 %v3197_v27, 0.0  ;;  %v3355_v60 = vmax.f32 %v3240_v8, 0.0  ;;  %v10859_v59 = vld [vmem:[#allocation15 + $0x328] sm:$0xff]   ;;  %v10862_v18 = vld [vmem:[#allocation15 + $0x3f0] sm:$0xff]   ;;  %v2327_v33 = vrot.slane %v12363_v11, %v12350_v28 }
 0x960   : > { %v3624_v26 = vpack.c.bf16 %v3352_v13, %v3336_v12  ;;  %v3626_v62 = vpack.c.bf16 %v3354_v14, %v3338_v51  ;;  %v10863_v0 = vld [vmem:[#allocation15 + $0x330] sm:$0xff]   ;;  %v10866_v12 = vld [vmem:[#allocation15 + $0x3f8] sm:$0xff]  }
 0x961   : > { %v3625_v6 = vpack.c.bf16 %v3353_v20, %v3337_v39  ;;  %v3627_v37 = vpack.c.bf16 %v3355_v60, %v3339_v19  ;;  %9912 = vmatpush3.bf16.msra.mxu1 %v10835_v46  ;;  %9934 = vmatpush3.bf16.msra.mxu0 %v10836_v17  ;;  %v10864_v4 = vld [vmem:[#allocation15 + $0x3b0] sm:$0xff]   ;;  %v10865_v17 = vld [vmem:[#allocation15 + $0x378] sm:$0xff]  }
 0x962   : > { %9941 = vmatprep.subr.bf16.mxu1 %v10837_v15  ;;  %9963 = vmatprep.subr.bf16.mxu0 %v10838_v42 }
 0x963   : > { %4603 = vmatprep.mubr.bf16.mxu1 %v3625_v6  ;;  %4644 = vmatprep.mubr.bf16.mxu0 %v3627_v37 }
 0x964   : > { %4604 = vmatmul.mubr.bf16.vlgmr.msra.gmra.mrb[64].mxu1 %v3624_v26  ;;  %4645 = vmatmul.mubr.bf16.vlgmr.msra.gmra.mrb[60].mxu0 %v3626_v62  ;;  %v10867_v26 = vld [vmem:[#allocation15 + $0x338] sm:$0xff]  }
 0x965   : > { %9942 = vmatpush3.bf16.msra.mxu1 %v10839_v5  ;;  %9964 = vmatpush3.bf16.msra.mxu0 %v10840_v41  ;;  %v10868_v62 = vld [vmem:[#allocation15 + $0x3b8] sm:$0xff]  }
 0x966   : > { %9943 = vmatprep.subr.bf16.mxu1 %v10841_v31  ;;  %9965 = vmatprep.subr.bf16.mxu0 %v10842_v9 }
 0x969   : > { %9944 = vmatpush3.bf16.msra.mxu1 %v10843_v47  ;;  %9966 = vmatpush3.bf16.msra.mxu0 %v10844_v7 }
 0x96a   : > { %9945 = vmatprep.subr.bf16.mxu1 %v10845_v43  ;;  %9967 = vmatprep.subr.bf16.mxu0 %v10846_v44 }
 0x96d   : > { %9946 = vmatpush3.bf16.msra.mxu1 %v10847_v45  ;;  %9968 = vmatpush3.bf16.msra.mxu0 %v10848_v48 }
 0x96e   : > { %9947 = vmatprep.subr.bf16.mxu1 %v10849_v49  ;;  %9969 = vmatprep.subr.bf16.mxu0 %v10850_v22 }
 0x971   : > { %9948 = vmatpush3.bf16.msra.mxu1 %v10851_v16  ;;  %9970 = vmatpush3.bf16.msra.mxu0 %v10852_v53  ;;  %v9308_v16 = vld [vmem:[%s12919_s0] ss:$0 sm:$0xff] }
 0x972   : > { %9949 = vmatprep.subr.bf16.mxu1 %v10853_v54  ;;  %9971 = vmatprep.subr.bf16.mxu0 %v10854_v21 }
 0x975   : > { %9950 = vmatpush3.bf16.msra.mxu1 %v10855_v55  ;;  %9972 = vmatpush3.bf16.msra.mxu0 %v10856_v58 }
 0x976   : > { %9951 = vmatprep.subr.bf16.mxu1 %v10857_v57  ;;  %9973 = vmatprep.subr.bf16.mxu0 %v10858_v40 }
 0x979   : > { %v3276_v38 = vpop.f32.mrb[52].mxu1  ;;  %v3319_v36 = vpop.f32.mrb[48].mxu0  ;;  %9952 = vmatpush3.bf16.msra.mxu1 %v10859_v59  ;;  %9974 = vmatpush3.bf16.msra.mxu0 %v10860_v61 }
 0x97a   : > { %v3277_v25 = vadd.f32 %v3276_v38, %v2315_v35  ;;  %v3320_v27 = vadd.f32 %v3319_v36, %v2323_v63  ;;  %v3278_v8 = vpop.f32.mrb[53].mxu1  ;;  %v3321_v46 = vpop.f32.mrb[49].mxu0  ;;  %9953 = vmatprep.subr.bf16.mxu1 %v10861_v30  ;;  %9975 = vmatprep.subr.bf16.mxu0 %v10862_v18 }
 0x97b   : > { %v3279_v51 = vadd.f32 %v3278_v8, %v2319_v52  ;;  %v3322_v13 = vadd.f32 %v3321_v46, %v2327_v33  ;;  %v3280_v14 = vpop.f32.mrb[54].mxu1  ;;  %v3323_v15 = vpop.f32.mrb[50].mxu0 }
 0x97c   : > { %v3281_v42 = vadd.f32 %v3280_v14, %v2315_v35  ;;  %v3324_v11 = vadd.f32 %v3323_v15, %v2323_v63  ;;  %v3282_v39 = vpop.f32.mrb[55].mxu1  ;;  %v3325_v19 = vpop.f32.mrb[51].mxu0  ;;  %v3340_v6 = vmax.f32 %v3277_v25, 0.0  ;;  %v3342_v37 = vmax.f32 %v3320_v27, 0.0 }
 0x97d   : > { %v3283_v20 = vadd.f32 %v3282_v39, %v2319_v52  ;;  %v3326_v60 = vadd.f32 %v3325_v19, %v2327_v33  ;;  %9954 = vmatpush3.bf16.msra.mxu1 %v10863_v0  ;;  %9976 = vmatpush3.bf16.msra.mxu0 %v10864_v4  ;;  %v3341_v31 = vmax.f32 %v3279_v51, 0.0  ;;  %v3343_v9 = vmax.f32 %v3322_v13, 0.0 }
 0x97e   : > { %v3356_v5 = vmax.f32 %v3281_v42, 0.0  ;;  %v3358_v41 = vmax.f32 %v3324_v11, 0.0  ;;  %9955 = vmatprep.subr.bf16.mxu1 %v10865_v17  ;;  %9977 = vmatprep.subr.bf16.mxu0 %v10866_v12 }
 0x97f   : > { %v3357_v47 = vmax.f32 %v3283_v20, 0.0  ;;  %v3359_v7 = vmax.f32 %v3326_v60, 0.0 }
 0x980   : > { %v3628_v43 = vpack.c.bf16 %v3356_v5, %v3340_v6  ;;  %v3630_v44 = vpack.c.bf16 %v3358_v41, %v3342_v37 }
 0x981   : > { %v3629_v45 = vpack.c.bf16 %v3357_v47, %v3341_v31  ;;  %v3631_v48 = vpack.c.bf16 %v3359_v7, %v3343_v9  ;;  %9956 = vmatpush3.bf16.msra.mxu1 %v10867_v26  ;;  %9978 = vmatpush3.bf16.msra.mxu0 %v10868_v62 }
 0x982   : > { %10349 = vmatprep.subr.bf16.mxu0 %v11518_v2 }
 0x983   : > { %4685 = vmatprep.mubr.bf16.mxu1 %v3629_v45  ;;  %4726 = vmatprep.mubr.bf16.mxu0 %v3631_v48 }
 0x984   : > { %4686 = vmatmul.mubr.bf16.vlgmr.msra.gmra.mrb[68].mxu1 %v3628_v43  ;;  %4727 = vmatmul.mubr.bf16.vlgmr.msra.gmra.mrb[64].mxu0 %v3630_v44 }
 0x985   : > { %4989 = vmatprep.mubr.bf16.mxu1 %v11517_v1  ;;  %10365 = vmatprep.mubr.msk.bf16.mxu0 %vm11519_vm0, %v11518_v2 }
 0x9f7   : > { %v9825_v49 = vpop.f32.mrb[56].mxu1  ;;  %v9847_v22 = vpop.f32.mrb[52].mxu0 }
 0x9f8   : > { %v9826_v53 = vpop.f32.mrb[57].mxu1  ;;  %v9848_v54 = vpop.f32.mrb[53].mxu0 }
 0x9f9   : > { %v9827_v21 = vadd.f32 %v9826_v53, %v9825_v49  ;;  %v9849_v55 = vadd.f32 %v9848_v54, %v9847_v22  ;;  %v9828_v58 = vpop.f32.mrb[58].mxu1  ;;  %v9850_v57 = vpop.f32.mrb[54].mxu0 }
 0x9fa   : > { %v9829_v40 = vpop.f32.mrb[59].mxu1  ;;  %v9851_v59 = vpop.f32.mrb[55].mxu0 }
 0x9fb   : > { %v4442_v61 = vadd.f32 %v9827_v21, %v9308_v16  ;;  %v9830_v35 = vadd.f32 %v9829_v40, %v9828_v58  ;;  %v9852_v63 = vadd.f32 %v9851_v59, %v9850_v57 }
 0x9fd   : > { %v4483_v30 = vadd.f32 %v9849_v55, %v4442_v61  ;;  %v4445_v18 = vadd.f32 %v9830_v35, %v9308_v16 }
 0x9ff   : > { %v4486_v52 = vadd.f32 %v9852_v63, %v4445_v18  ;;  %v10869_v18 = vld [vmem:[#allocation6 + $0xc0] ss:$12 sps:$4 sm:$0xff]  }
 0xa17   : > { %v9869_v33 = vpop.f32.mrb[60].mxu1  ;;  %v9891_v38 = vpop.f32.mrb[56].mxu0 }
 0xa18   : > { %v9870_v36 = vpop.f32.mrb[61].mxu1  ;;  %v9892_v0 = vpop.f32.mrb[57].mxu0 }
 0xa19   : > { %v9871_v4 = vadd.f32 %v9870_v36, %v9869_v33  ;;  %v9893_v25 = vadd.f32 %v9892_v0, %v9891_v38  ;;  %v9872_v27 = vpop.f32.mrb[62].mxu1  ;;  %v9894_v8 = vpop.f32.mrb[58].mxu0  ;;  %v10872_v33 = vld [vmem:[#allocation6 + $0xc8] ss:$12 sps:$4 sm:$0xff]   ;;  %v10876_v36 = vld [vmem:[#allocation6 + $0xe0] ss:$12 sps:$4 sm:$0xff]  }
 0xa1a   : > { %v9873_v46 = vpop.f32.mrb[63].mxu1  ;;  %v9895_v17 = vpop.f32.mrb[59].mxu0  ;;  %v10875_v38 = vld [vmem:[#allocation6 + $0xdc] ss:$12 sps:$4 sm:$0xff]   ;;  %10350 = vmatpush3.bf16.msra.mxu0 %v10872_v33  ;;  %v10873_v0 = vld [vmem:[#allocation6 + $0xd8] ss:$12 sps:$4 sm:$0xff]  }
 0xa1b   : > { %v4524_v12 = vadd.f32 %v9871_v4, %v4483_v30  ;;  %v9874_v51 = vadd.f32 %v9873_v46, %v9872_v27  ;;  %v9896_v13 = vadd.f32 %v9895_v17, %v9894_v8  ;;  %10351 = vmatprep.subr.bf16.mxu0 %v11518_v2 }
 0xa1d   : > { %v4565_v14 = vadd.f32 %v9893_v25, %v4524_v12  ;;  %v4527_v15 = vadd.f32 %v9874_v51, %v4486_v52  ;;  %v10871_v52 = vld [vmem:[#allocation6 + $0xc4] ss:$12 sps:$4 sm:$0xff]   ;;  %v10879_v12 = vld [vmem:[#allocation6 + $0xf4] ss:$12 sps:$4 sm:$0xff]  }
 0xa1e   : > { %4957 = vmatprep.subr.bf16.mxu1 %v10871_v52  ;;  %10352 = vmatpush3.bf16.msra.mxu0 %v10876_v36  ;;  %v10877_v51 = vld [vmem:[#allocation6 + $0xf0] ss:$12 sps:$4 sm:$0xff]  }
 0xa1f   : > { %v4568_v42 = vadd.f32 %v9896_v13, %v4527_v15  ;;  %4958 = vmatpush1.bf16.msra.mxu1 %v10869_v18  ;;  %10353 = vmatprep.subr.bf16.mxu0 %v11518_v2  ;;  %v10880_v13 = vld [vmem:[#allocation6 + $0xf8] ss:$12 sps:$4 sm:$0xff]   ;;  %v10881_v15 = vld [vmem:[#allocation6 + $0x108] ss:$12 sps:$4 sm:$0xff]  }
 0xa20   : > { %4959 = vmatprep.subr.bf16.mxu1 %v10875_v38 }
 0xa22   : > { %10354 = vmatpush3.bf16.msra.mxu0 %v10880_v13 }
 0xa23   : > { %4960 = vmatpush1.bf16.msra.mxu1 %v10873_v0  ;;  %10355 = vmatprep.subr.bf16.mxu0 %v11518_v2 }
 0xa24   : > { %4961 = vmatprep.subr.bf16.mxu1 %v10879_v12 }
 0xa27   : > { %4962 = vmatpush1.bf16.msra.mxu1 %v10877_v51 }
 0xa37   : > { %v9913_v11 = vpop.f32.mrb[64].mxu1  ;;  %v9935_v39 = vpop.f32.mrb[60].mxu0 }
 0xa38   : > { %v9914_v19 = vpop.f32.mrb[65].mxu1  ;;  %v9936_v20 = vpop.f32.mrb[61].mxu0 }
 0xa39   : > { %v9915_v60 = vadd.f32 %v9914_v19, %v9913_v11  ;;  %v9937_v26 = vadd.f32 %v9936_v20, %v9935_v39  ;;  %v9916_v62 = vpop.f32.mrb[66].mxu1  ;;  %v9938_v6 = vpop.f32.mrb[62].mxu0  ;;  %v10887_v11 = vld [vmem:[#allocation6 + $0x124] ss:$12 sps:$4 sm:$0xff]   ;;  %v10885_v39 = vld [vmem:[#allocation6 + $0x120] ss:$12 sps:$4 sm:$0xff]  }
 0xa3a   : > { %v9917_v37 = vpop.f32.mrb[67].mxu1  ;;  %v9939_v5 = vpop.f32.mrb[63].mxu0  ;;  %v10888_v19 = vld [vmem:[#allocation6 + $0x128] ss:$12 sps:$4 sm:$0xff]  }
 0xa3b   : > { %v4606_v41 = vadd.f32 %v9915_v60, %v4565_v14  ;;  %v9918_v31 = vadd.f32 %v9917_v37, %v9916_v62  ;;  %v9940_v9 = vadd.f32 %v9939_v5, %v9938_v6  ;;  %v10883_v14 = vld [vmem:[#allocation6 + $0x10c] ss:$12 sps:$4 sm:$0xff]   ;;  %v10891_v20 = vld [vmem:[#allocation6 + $0x13c] ss:$12 sps:$4 sm:$0xff]   ;;  %v10895_v62 = vld [vmem:[#allocation6 + $0x154] ss:$12 sps:$4 sm:$0xff]  }
 0xa3c   : > { %4963 = vmatprep.subr.bf16.mxu1 %v10883_v14  ;;  %v10889_v60 = vld [vmem:[#allocation6 + $0x138] ss:$12 sps:$4 sm:$0xff]   ;;  %v10893_v6 = vld [vmem:[#allocation6 + $0x150] ss:$12 sps:$4 sm:$0xff]  }
 0xa3d   : > { %v4647_v47 = vadd.f32 %v9937_v26, %v4606_v41  ;;  %v4609_v7 = vadd.f32 %v9918_v31, %v4568_v42  ;;  %v10884_v42 = vld [vmem:[#allocation6 + $0x110] ss:$12 sps:$4 sm:$0xff]   ;;  %4964 = vmatpush1.bf16.msra.mxu1 %v10881_v15  ;;  %v10892_v26 = vld [vmem:[#allocation6 + $0x140] ss:$12 sps:$4 sm:$0xff]   ;;  %v10896_v37 = vld [vmem:[#allocation6 + $0x158] ss:$12 sps:$4 sm:$0xff]  }
 0xa3e   : > { %10356 = vmatpush3.bf16.msra.mxu0 %v10884_v42  ;;  %4965 = vmatprep.subr.bf16.mxu1 %v10887_v11  ;;  %v10899_v5 = vld [vmem:[#allocation6 + $0x16c] ss:$12 sps:$4 sm:$0xff]   ;;  %v10897_v41 = vld [vmem:[#allocation6 + $0x168] ss:$12 sps:$4 sm:$0xff]   ;;  %v10900_v31 = vld [vmem:[#allocation6 + $0x170] ss:$12 sps:$4 sm:$0xff]  }
 0xa3f   : > { %v4650_v43 = vadd.f32 %v9940_v9, %v4609_v7  ;;  %10357 = vmatprep.subr.bf16.mxu0 %v11518_v2  ;;  %v12428_v11 = vld [vmem:[%s12033_s21] ss:$0 sm:$0xff]  ;;  %s12924_s21 = smov 16  }
 0xa41   : > { %4966 = vmatpush1.bf16.msra.mxu1 %v10885_v39 }
 0xa42   : > { %10358 = vmatpush3.bf16.msra.mxu0 %v10888_v19  ;;  %4967 = vmatprep.subr.bf16.mxu1 %v10891_v20 }
 0xa43   : > { %10359 = vmatprep.subr.bf16.mxu0 %v11518_v2 }
 0xa45   : > { %4968 = vmatpush1.bf16.msra.mxu1 %v10889_v60 }
 0xa46   : > { %10360 = vmatpush3.bf16.msra.mxu0 %v10892_v26  ;;  %4969 = vmatprep.subr.bf16.mxu1 %v10895_v62 }
 0xa47   : > { %10361 = vmatprep.subr.bf16.mxu0 %v11518_v2 }
 0xa49   : > { %4970 = vmatpush1.bf16.msra.mxu1 %v10893_v6 }
 0xa4a   : > { %10362 = vmatpush3.bf16.msra.mxu0 %v10896_v37  ;;  %4971 = vmatprep.subr.bf16.mxu1 %v10899_v5 }
 0xa4b   : > { %10363 = vmatprep.subr.bf16.mxu0 %v11518_v2 }
 0xa4d   : > { %4972 = vmatpush1.bf16.msra.mxu1 %v10897_v41 }
 0xa4e   : > { %10364 = vmatpush3.bf16.msra.mxu0 %v10900_v31  ;;  %10369 = vmatprep.subr.bf16.mxu1 %v11518_v2 }
 0xa4f   : > { %10393 = vmatprep.subr.bf16.mxu0 %v11518_v2 }
 0xa57   : > { %v9957_v44 = vpop.f32.mrb[68].mxu1  ;;  %v9979_v45 = vpop.f32.mrb[64].mxu0 }
 0xa58   : > { %v9958_v48 = vpop.f32.mrb[69].mxu1  ;;  %v9980_v49 = vpop.f32.mrb[65].mxu0 }
 0xa59   : > { %v9959_v22 = vadd.f32 %v9958_v48, %v9957_v44  ;;  %v9981_v16 = vadd.f32 %v9980_v49, %v9979_v45  ;;  %v9960_v53 = vpop.f32.mrb[70].mxu1  ;;  %v9982_v54 = vpop.f32.mrb[66].mxu0  ;;  %v9437_v49 = vld [vmem:[%s12920_s30] ss:$0 sm:$0xff] }
 0xa5a   : > { %v9961_v21 = vpop.f32.mrb[71].mxu1  ;;  %v9983_v55 = vpop.f32.mrb[67].mxu0 }
 0xa5b   : > { %v4688_v58 = vadd.f32 %v9959_v22, %v4647_v47  ;;  %v9962_v57 = vadd.f32 %v9961_v21, %v9960_v53  ;;  %v9984_v40 = vadd.f32 %v9983_v55, %v9982_v54  ;;  %v9438_v21 = vld [vmem:[%s12921_s12] ss:$0 sm:$0xff] }
 0xa5d   : > { %v4729_v59 = vadd.f32 %v9981_v16, %v4688_v58  ;;  %v4691_v61 = vadd.f32 %v9962_v57, %v4650_v43 }
 0xa5f   : > { %v4732_v35 = vadd.f32 %v9984_v40, %v4691_v61  ;;  %v4735_v63 = vadd.f32 %v4729_v59, %v12302_v3  ;;  %v4812_v59 = vld [vmem:[#allocation8 + $0x3] sm:$0x7] }
 0xa60   : > { %v4817_v61 = vrot.slane %v4812_v59, %v11959_v32  ;;  %v4821_v18 = vrot.slane %v4812_v59, %v11962_v34 }
 0xa61   : > { %4739 = vadd.xlane.f32.xlu1 %v4735_v63  ;;  %v4736_v30 = vadd.f32 %v4732_v35, %v12304_v29  ;;  %v4825_v35 = vrot.slane %v4812_v59, %v11986_v50 }
 0xa63   : > { %4741 = vadd.xlane.f32.xlu0 %v4736_v30 }
 0xaee   : > { %v4740_v3 = vpop.xlane.xlu1 %4739 }
 0xaef   : > { %v4743_v4 = vmul.f32 0.0078125, %v4740_v3 }
 0xaf0   : > { %v4742_v29 = vpop.xlane.xlu0 %4741 }
 0xaf1   : > { %v4745_v25 = vsub.f32 %v4735_v63, %v4743_v4  ;;  %v4744_v27 = vmul.f32 0.0078125, %v4742_v29 }
 0xaf3   : > { %v4746_v8 = vsub.f32 %v4736_v30, %v4744_v27  ;;  %v4747_v46 = vmul.f32 %v4745_v25, %v4745_v25 }
 0xaf5   : > { %4749 = vadd.xlane.f32.xlu1 %v4747_v46  ;;  %v4748_v17 = vmul.f32 %v4746_v8, %v4746_v8 }
 0xaf7   : > { %4751 = vadd.xlane.f32.xlu0 %v4748_v17 }
 0xb82   : > { %v4750_v9 = vpop.xlane.xlu1 %4749 }
 0xb83   : > { %v4753_v47 = vmul.f32 0.0078125, %v4750_v9 }
 0xb84   : > { %v4752_v7 = vpop.xlane.xlu0 %4751 }
 0xb85   : > { %v4755_v43 = vadd.f32 1e-05, %v4753_v47  ;;  %v4754_v44 = vmul.f32 0.0078125, %v4752_v7 }
 0xb87   : > { %11105 = vrsqrt.f32 %v4755_v43  ;;  %v4756_v45 = vadd.f32 1e-05, %v4754_v44 }
 0xb89   : > { %11107 = vrsqrt.f32 %v4756_v45 }
 0xb91   : > { %v11106_v48 = vpop.eup %11105 }
 0xb92   : > { %v4759_v22 = vmul.f32 %v11106_v48, %v4745_v25 }
 0xb93   : > { %v11108_v16 = vpop.eup %11107 }
 0xb94   : > { %v4760_v53 = vmul.f32 %v11108_v16, %v4746_v8  ;;  %v4767_v54 = vmul.f32 %v9437_v49, %v4759_v22 }
 0xb96   : > { %v4768_v55 = vmul.f32 %v9437_v49, %v4760_v53  ;;  %v12405_v58 = vadd.f32 %v9438_v21, %v4767_v54 }
 0xb98   : > { %v12407_v57 = vadd.f32 %v9438_v21, %v4768_v55 }
 0xb9a   : > { %v4810_v40 = vpack.c.bf16 %v12407_v57, %v12405_v58 }
 0xb9c   : > { %4990 = vmatmul.mubr.bf16.vlgmr.msra.gmra.mrb[72].mxu1 %v4810_v40  ;;  %10366 = vmatmul.mubr.bf16.vlgmr.msra.gmra.mrb[68].mxu0 %v4810_v40 }
 0xb9d   : > { %10371 = vmatprep.mubr.msk.bf16.mxu1 %vm11519_vm0, %v11518_v2  ;;  %10395 = vmatprep.mubr.msk.bf16.mxu0 %vm11519_vm0, %v11518_v2 }
 0xc6f   : > { %v4991_v63 = vpop.f32.mrb[72].mxu1  ;;  %v5034_v30 = vpop.f32.mrb[68].mxu0 }
 0xc70   : > { %v4992_v52 = vadd.f32 %v4991_v63, %v4817_v61  ;;  %v4993_v33 = vpop.f32.mrb[73].mxu1  ;;  %v10367_v38 = vpop.f32.mrb[69].mxu0  ;;  %v5035_v3 = vadd.f32 %v5034_v30, %v4825_v35 }
 0xc71   : > { %v4995_v36 = vpop.f32.mrb[74].mxu1  ;;  %v5037_v0 = vpop.f32.mrb[70].mxu0  ;;  %v4994_v8 = vadd.f32 %v4993_v33, %v4821_v18 }
 0xc72   : > { %v4996_v4 = vadd.f32 %v4995_v36, %v4817_v61  ;;  %v5038_v29 = vadd.f32 %v5037_v0, %v4825_v35  ;;  %v4997_v25 = vpop.f32.mrb[75].mxu1  ;;  %v10368_v27 = vpop.f32.mrb[71].mxu0  ;;  %v5041_v17 = vmul.f32 0.25, %v4992_v52 }
 0xc73   : > { %v4998_v46 = vadd.f32 %v4997_v25, %v4821_v18 }
 0xc74   : > { %v5042_v12 = vmul.f32 0.25, %v4996_v4  ;;  %v12418_v51 = vpack.c.bf16 %v5038_v29, %v5035_v3 }
 0xc75   : > { %v5044_v13 = vpack.c.bf16 %v4998_v46, %v4994_v8 }
 0xc76   : > { %v5043_v14 = vpack.c.bf16 %v5042_v12, %v5041_v17 }
 0xc77   : > { %v5050_v15 = vsel %vm934_vm1, %v5044_v13, 0 }
 0xc78   : > { %10370 = vmatpush3.bf16.xpose.msra.mxu1 %v5050_v15 }
 0xc79   : > { %10375 = vmatprep.subr.bf16.mxu1 %v11518_v2 }
 0xc7f   : > { %10372 = vmatmul.mubr.msk.bf16.vlgmr.msra.gmra.mrb[76].mxu1 %vm934_vm1, %v5043_v14 }
 0xc80   : > { %10376 = vmatpush3.bf16.msra.mxu1 %v12418_v51  ;;  %10377 = vmatprep.mubr.msk.bf16.mxu1 %vm11519_vm0, %v11518_v2 }
 0xc81   : > { %10381 = vmatprep.subr.bf16.mxu1 %v11518_v2 }
 0xd52   : > { %v5086_v42 = vpop.f32.mrb[76].mxu1 }
 0xd53   : > { %v5087_v39 = vadd.f32 %v12428_v11, %v5086_v42  ;;  %v10373_v19 = vpop.f32.mrb[77].mxu1 }
 0xd54   : > { %v5089_v20 = vpop.f32.mrb[78].mxu1 }
 0xd55   : > { %v5090_v60 = vadd.f32 %v12428_v11, %v5089_v20  ;;  %v10374_v26 = vpop.f32.mrb[79].mxu1  ;;  %v5093_v62 = vsel %vm934_vm1, %v5087_v39, -inf }
 0xd56   : > { %5094 = vmax.xlane.f32.xlu1 %v5093_v62 }
 0xd57   : > { %v5096_v6 = vsel %vm934_vm1, %v5090_v60, -inf }
 0xd58   : > { %5097 = vmax.xlane.f32.xlu0 %v5096_v6 }
 0xde3   : > { %v5095_v37 = vpop.xlane.xlu1 %5094 }
 0xde4   : > { %v5099_v5 = vsub.f32 %v5087_v39, %v5095_v37 }
 0xde5   : > { %v5098_v41 = vpop.xlane.xlu0 %5097 }
 0xde6   : > { %v5101_v31 = vmul.f32 1.442695, %v5099_v5  ;;  %v5100_v9 = vsub.f32 %v5090_v60, %v5098_v41 }
 0xde8   : > { %11109 = vpow2.f32 %v5101_v31  ;;  %v5103_v47 = vmul.f32 1.442695, %v5100_v9 }
 0xdea   : > { %11111 = vpow2.f32 %v5103_v47 }
 0xdf2   : > { %v11110_v7 = vpop.eup %11109 }
 0xdf3   : > { %v5105_v43 = vsel %vm934_vm1, %v11110_v7, 0.0 }
 0xdf4   : > { %v11112_v44 = vpop.eup %11111  ;;  %5106 = vadd.xlane.f32.xlu1 %v5105_v43 }
 0xdf5   : > { %v5108_v45 = vsel %vm934_vm1, %v11112_v44, 0.0 }
 0xdf6   : > { %5109 = vadd.xlane.f32.xlu0 %v5108_v45 }
 0xe05   : > { %5164 = vrot.lane.b32.xlu1 %v5044_v13, %s11521_s29 }
 0xe09   : > { %5286 = vrot.lane.b32.xlu1 %v5044_v13, %s11520_s3 }
 0xe0c   : > { %5161 = vrot.lane.b32.xlu0 %v5043_v14, %s11521_s29 }
 0xe0d   : > { %5284 = vrot.lane.b32.xlu1 %v5043_v14, %s11520_s3 }
 0xe10   : > { %5407 = vrot.lane.b32.xlu0 %v5044_v13, %s11522_s2 }
 0xe11   : > { %5405 = vrot.lane.b32.xlu1 %v5043_v14, %s11522_s2 }
 0xe14   : > { %5528 = vrot.lane.b32.xlu0 %v5044_v13, %s11523_s11 }
 0xe15   : > { %5526 = vrot.lane.b32.xlu1 %v5043_v14, %s11523_s11 }
 0xe18   : > { %5649 = vrot.lane.b32.xlu0 %v5044_v13, %s12922_s18 }
 0xe19   : > { %5647 = vrot.lane.b32.xlu1 %v5043_v14, %s12922_s18 }
 0xe1c   : > { %5770 = vrot.lane.b32.xlu0 %v5044_v13, %s12923_s20 }
 0xe1d   : > { %5768 = vrot.lane.b32.xlu1 %v5043_v14, %s12923_s20 }
 0xe20   : > { %5891 = vrot.lane.b32.xlu0 %v5044_v13, %s12924_s21 }
 0xe21   : > { %5889 = vrot.lane.b32.xlu1 %v5043_v14, %s12924_s21 }
 0xe81   : > { %v5107_v48 = vpop.xlane.xlu1 %5106 }
 0xe82   : > { %11113 = vrcp.f32 %v5107_v48 }
 0xe83   : > { %v5110_v49 = vpop.xlane.xlu0 %5109 }
 0xe84   : > { %11115 = vrcp.f32 %v5110_v49 }
 0xe85   : > { %v5165_v22 = vpop.permute.xlu1 %5164 }
 0xe86   : > { %v5170_v18 = vsel %vm934_vm1, %v5165_v22, 0 }
 0xe87   : > { %v5162_v16 = vpop.permute.xlu0 %5161 }
 0xe89   : > { %v5287_v53 = vpop.permute.xlu1 %5286 }
 0xe8a   : > { %v5292_v54 = vsel %vm934_vm1, %v5287_v53, 0 }
 0xe8b   : > { %10394 = vmatpush3.bf16.xpose.msra.mxu0 %v5292_v54  ;;  %v5408_v61 = vpop.permute.xlu0 %5407 }
 0xe8c   : > { %v11114_v21 = vpop.eup %11113  ;;  %10405 = vmatprep.subr.bf16.mxu0 %v11518_v2  ;;  %v5413_v30 = vsel %vm934_vm1, %v5408_v61, 0 }
 0xe8d   : > { %v5113_v40 = vmul.f32 %v11114_v21, %v11110_v7  ;;  %v5285_v35 = vpop.permute.xlu1 %5284 }
 0xe8e   : > { %v11116_v55 = vpop.eup %11115 }
 0xe8f   : > { %v5114_v59 = vmul.f32 %v11116_v55, %v11112_v44  ;;  %v5529_v52 = vpop.permute.xlu0 %5528 }
 0xe90   : > { %v5534_v38 = vsel %vm934_vm1, %v5529_v52, 0 }
 0xe91   : > { %v5115_v63 = vpack.c.bf16 %v5114_v59, %v5113_v40  ;;  %v5406_v33 = vpop.permute.xlu1 %5405 }
 0xe92   : > { %10396 = vmatmul.mubr.msk.bf16.vlgmr.msra.gmra.mrb[72].mxu0 %vm934_vm1, %v5285_v35 }
 0xe93   : > { %10378 = vmatmul.mubr.msk.bf16.vlgmr.msra.gmra.mrb[80].mxu1 %vm934_vm1, %v5115_v63  ;;  %10406 = vmatpush3.bf16.xpose.msra.mxu0 %v5413_v30  ;;  %v5650_v36 = vpop.permute.xlu0 %5649 }
 0xe94   : > { %10382 = vmatpush3.bf16.xpose.msra.mxu1 %v5170_v18  ;;  %10407 = vmatprep.mubr.msk.bf16.mxu0 %vm11519_vm0, %v11518_v2  ;;  %v5655_v3 = vsel %vm934_vm1, %v5650_v36, 0 }
 0xe95   : > { %10383 = vmatprep.mubr.msk.bf16.mxu1 %vm11519_vm0, %v11518_v2  ;;  %10417 = vmatprep.subr.bf16.mxu0 %v11518_v2  ;;  %v5527_v0 = vpop.permute.xlu1 %5526 }
 0xe96   : > { %10387 = vmatprep.subr.bf16.mxu1 %v11518_v2 }
 0xe97   : > { %v5771_v4 = vpop.permute.xlu0 %5770 }
 0xe98   : > { %v5776_v25 = vsel %vm934_vm1, %v5771_v4, 0 }
 0xe99   : > { %v5648_v29 = vpop.permute.xlu1 %5647 }
 0xe9a   : > { %10408 = vmatmul.mubr.msk.bf16.vlgmr.msra.gmra.mrb[76].mxu0 %vm934_vm1, %v5406_v33 }
 0xe9b   : > { %10384 = vmatmul.mubr.msk.bf16.vlgmr.msra.gmra.mrb[84].mxu1 %vm934_vm1, %v5162_v16  ;;  %10418 = vmatpush3.bf16.xpose.msra.mxu0 %v5534_v38  ;;  %v5892_v27 = vpop.permute.xlu0 %5891 }
 0xe9c   : > { %10419 = vmatprep.mubr.msk.bf16.mxu0 %vm11519_vm0, %v11518_v2  ;;  %10429 = vmatprep.subr.bf16.mxu0 %v11518_v2  ;;  %v5897_v46 = vsel %vm934_vm1, %v5892_v27, 0 }
 0xe9d   : > { %10389 = vmatprep.mubr.msk.bf16.mxu1 %vm11519_vm0, %v11518_v2  ;;  %v5769_v8 = vpop.permute.xlu1 %5768 }
 0xea1   : > { %v5890_v17 = vpop.permute.xlu1 %5889 }
 0xea2   : > { %10420 = vmatmul.mubr.msk.bf16.vlgmr.msra.gmra.mrb[80].mxu0 %vm934_vm1, %v5527_v0 }
 0xea3   : > { %10430 = vmatpush3.bf16.xpose.msra.mxu0 %v5655_v3  ;;  %10431 = vmatprep.mubr.msk.bf16.mxu0 %vm11519_vm0, %v11518_v2 }
 0xea4   : > { %10441 = vmatprep.subr.bf16.mxu0 %v11518_v2 }
 0xeaa   : > { %10432 = vmatmul.mubr.msk.bf16.vlgmr.msra.gmra.mrb[84].mxu0 %vm934_vm1, %v5648_v29 }
 0xeab   : > { %10442 = vmatpush3.bf16.xpose.msra.mxu0 %v5776_v25  ;;  %10443 = vmatprep.mubr.msk.bf16.mxu0 %vm11519_vm0, %v11518_v2 }
 0xeac   : > { %10453 = vmatprep.subr.bf16.mxu0 %v11518_v2 }
 0xeb2   : > { %10444 = vmatmul.mubr.msk.bf16.vlgmr.msra.gmra.mrb[88].mxu0 %vm934_vm1, %v5769_v8 }
 0xeb3   : > { %10454 = vmatpush3.bf16.xpose.msra.mxu0 %v5897_v46  ;;  %10455 = vmatprep.mubr.msk.bf16.mxu0 %vm11519_vm0, %v11518_v2 }
 0xeb4   : > { %10465 = vmatprep.subr.bf16.mxu0 %v11518_v2 }
 0xeba   : > { %10456 = vmatmul.mubr.msk.bf16.vlgmr.msra.gmra.mrb[92].mxu0 %vm934_vm1, %v5890_v17 }
 0xebb   : > { %10481 = vmatprep.mubr.msk.bf16.mxu0 %vm11519_vm0, %v11518_v2 }
 0xf65   : > { %v5328_v12 = vpop.f32.mrb[72].mxu0 }
 0xf66   : > { %v12488_v13 = vpop.f32.mrb[80].mxu1  ;;  %v10397_v14 = vpop.f32.mrb[73].mxu0  ;;  %v12496_v9 = vadd.f32 %v12428_v11, %v5328_v12 }
 0xf67   : > { %v10379_v15 = vpop.f32.mrb[81].mxu1  ;;  %v5331_v42 = vpop.f32.mrb[74].mxu0 }
 0xf68   : > { %v12490_v39 = vpop.f32.mrb[82].mxu1  ;;  %v10398_v19 = vpop.f32.mrb[75].mxu0  ;;  %v12507_v48 = vadd.f32 %v12428_v11, %v5331_v42  ;;  %v5335_v22 = vsel %vm934_vm1, %v12496_v9, -inf }
 0xf69   : > { %v10380_v20 = vpop.f32.mrb[83].mxu1 }
 0xf6a   : > { %v5338_v59 = vsel %vm934_vm1, %v12507_v48, -inf }
 0xf6d   : > { %v5449_v60 = vpop.f32.mrb[76].mxu0 }
 0xf6e   : > { %v5206_v26 = vpop.f32.mrb[84].mxu1  ;;  %v10409_v62 = vpop.f32.mrb[77].mxu0  ;;  %v5450_v44 = vadd.f32 %v12428_v11, %v5449_v60 }
 0xf6f   : > { %v12493_v6 = vadd.f32 %v12428_v11, %v5206_v26  ;;  %v10385_v37 = vpop.f32.mrb[85].mxu1  ;;  %v5452_v5 = vpop.f32.mrb[78].mxu0 }
 0xf70   : > { %v5209_v41 = vpop.f32.mrb[86].mxu1  ;;  %v10410_v31 = vpop.f32.mrb[79].mxu0  ;;  %v5456_v21 = vsel %vm934_vm1, %v5450_v44, -inf  ;;  %v5453_v40 = vadd.f32 %v12428_v11, %v5452_v5 }
 0xf71   : > { %v12499_v47 = vadd.f32 %v12428_v11, %v5209_v41  ;;  %v10386_v7 = vpop.f32.mrb[87].mxu1  ;;  %v5213_v43 = vsel %vm934_vm1, %v12493_v6, -inf }
 0xf72   : > { %5214 = vmax.xlane.f32.xlu0 %v5213_v43  ;;  %v5459_v30 = vsel %vm934_vm1, %v5453_v40, -inf }
 0xf73   : > { %v5216_v45 = vsel %vm934_vm1, %v12499_v47, -inf }
 0xf74   : > { %5217 = vmax.xlane.f32.xlu1 %v5216_v45 }
 0xf75   : > { %v5570_v49 = vpop.f32.mrb[80].mxu0 }
 0xf76   : > { %v10421_v16 = vpop.f32.mrb[81].mxu0  ;;  %5336 = vmax.xlane.f32.xlu0 %v5335_v22  ;;  %v12512_v53 = vadd.f32 %v12428_v11, %v5570_v49 }
 0xf77   : > { %v5573_v54 = vpop.f32.mrb[82].mxu0 }
 0xf78   : > { %v10422_v55 = vpop.f32.mrb[83].mxu0  ;;  %5457 = vmax.xlane.f32.xlu1 %v5456_v21  ;;  %v5577_v61 = vsel %vm934_vm1, %v12512_v53, -inf  ;;  %v12521_v35 = vadd.f32 %v12428_v11, %v5573_v54 }
 0xf7a   : > { %5339 = vmax.xlane.f32.xlu0 %v5338_v59  ;;  %v5580_v3 = vsel %vm934_vm1, %v12521_v35, -inf }
 0xf7c   : > { %5578 = vmax.xlane.f32.xlu1 %v5577_v61 }
 0xf7d   : > { %v5691_v63 = vpop.f32.mrb[84].mxu0 }
 0xf7e   : > { %v5692_v18 = vadd.f32 %v12428_v11, %v5691_v63  ;;  %v10433_v52 = vpop.f32.mrb[85].mxu0  ;;  %5460 = vmax.xlane.f32.xlu0 %v5459_v30 }
 0xf7f   : > { %v5694_v33 = vpop.f32.mrb[86].mxu0 }
 0xf80   : > { %v10434_v38 = vpop.f32.mrb[87].mxu0  ;;  %v5698_v36 = vsel %vm934_vm1, %v5692_v18, -inf  ;;  %v12527_v0 = vadd.f32 %v12428_v11, %v5694_v33 }
 0xf81   : > { %5699 = vmax.xlane.f32.xlu1 %v5698_v36 }
 0xf82   : > { %5581 = vmax.xlane.f32.xlu0 %v5580_v3  ;;  %v5701_v29 = vsel %vm934_vm1, %v12527_v0, -inf }
 0xf85   : > { %v5812_v4 = vpop.f32.mrb[88].mxu0 }
 0xf86   : > { %v12534_v25 = vadd.f32 %v12428_v11, %v5812_v4  ;;  %v10445_v27 = vpop.f32.mrb[89].mxu0  ;;  %5702 = vmax.xlane.f32.xlu0 %v5701_v29 }
 0xf87   : > { %v5815_v8 = vpop.f32.mrb[90].mxu0 }
 0xf88   : > { %v12537_v46 = vadd.f32 %v12428_v11, %v5815_v8  ;;  %v10446_v17 = vpop.f32.mrb[91].mxu0  ;;  %v5819_v12 = vsel %vm934_vm1, %v12534_v25, -inf }
 0xf89   : > { %5820 = vmax.xlane.f32.xlu1 %v5819_v12 }
 0xf8a   : > { %v5822_v14 = vsel %vm934_vm1, %v12537_v46, -inf }
 0xf8b   : > { %5823 = vmax.xlane.f32.xlu0 %v5822_v14 }
 0xf8d   : > { %v5933_v15 = vpop.f32.mrb[92].mxu0 }
 0xf8e   : > { %v12544_v42 = vadd.f32 %v12428_v11, %v5933_v15  ;;  %v10457_v19 = vpop.f32.mrb[93].mxu0 }
 0xf8f   : > { %v5936_v20 = vpop.f32.mrb[94].mxu0 }
 0xf90   : > { %v12547_v60 = vadd.f32 %v12428_v11, %v5936_v20  ;;  %v10458_v26 = vpop.f32.mrb[95].mxu0  ;;  %v5940_v62 = vsel %vm934_vm1, %v12544_v42, -inf }
 0xf91   : > { %5941 = vmax.xlane.f32.xlu1 %v5940_v62 }
 0xf92   : > { %v5943_v37 = vsel %vm934_vm1, %v12547_v60, -inf }
 0xf93   : > { %5944 = vmax.xlane.f32.xlu0 %v5943_v37 }
 0xfff   : > { %v5215_v5 = vpop.xlane.xlu0 %5214 }
0x1000   : > { %v5219_v21 = vsub.f32 %v12493_v6, %v5215_v5 }
0x1001   : > { %v5218_v41 = vpop.xlane.xlu1 %5217 }
0x1002   : > { %v5220_v27 = vsub.f32 %v12499_v47, %v5218_v41 }
0x1003   : > { %v5337_v31 = vpop.xlane.xlu0 %5336 }
0x1004   : > { %v5341_v7 = vsub.f32 %v12496_v9, %v5337_v31  ;;  %v5221_v9 = vmul.f32 1.442695, %v5219_v21 }
0x1005   : > { %v5458_v43 = vpop.xlane.xlu1 %5457 }
0x1006   : > { %v5343_v45 = vmul.f32 1.442695, %v5341_v7  ;;  %v5462_v49 = vsub.f32 %v5450_v44, %v5458_v43 }
0x1007   : > { %v5340_v22 = vpop.xlane.xlu0 %5339 }
0x1008   : > { %11117 = vpow2.f32 %v5343_v45  ;;  %v5464_v11 = vmul.f32 1.442695, %v5462_v49  ;;  %v5342_v16 = vsub.f32 %v12507_v48, %v5340_v22 }
0x1009   : > { %v5579_v54 = vpop.xlane.xlu1 %5578 }
0x100a   : > { %11119 = vpow2.f32 %v5464_v11  ;;  %v5345_v55 = vmul.f32 1.442695, %v5342_v16  ;;  %v5583_v59 = vsub.f32 %v12512_v53, %v5579_v54 }
0x100b   : > { %v5461_v61 = vpop.xlane.xlu0 %5460 }
0x100c   : > { %11121 = vpow2.f32 %v5345_v55  ;;  %v5585_v63 = vmul.f32 1.442695, %v5583_v59  ;;  %v5463_v30 = vsub.f32 %v5453_v40, %v5461_v61 }
0x100e   : > { %11123 = vpow2.f32 %v5585_v63  ;;  %v5466_v52 = vmul.f32 1.442695, %v5463_v30  ;;  %v5700_v44 = vpop.xlane.xlu1 %5699 }
0x100f   : > { %v5704_v33 = vsub.f32 %v5692_v18, %v5700_v44  ;;  %v5582_v38 = vpop.xlane.xlu0 %5581 }
0x1010   : > { %11125 = vpow2.f32 %v5466_v52  ;;  %v5584_v48 = vsub.f32 %v12521_v35, %v5582_v38 }
0x1011   : > { %11127 = vpow2.f32 %v5221_v9  ;;  %v5706_v6 = vmul.f32 1.442695, %v5704_v33 }
0x1012   : > { %v12558_v36 = vpop.eup %11117  ;;  %v5587_v3 = vmul.f32 1.442695, %v5584_v48 }
0x1013   : > { %v5703_v4 = vpop.xlane.xlu0 %5702  ;;  %v5347_v53 = vsel %vm934_vm1, %v12558_v36, 0.0 }
0x1014   : > { %v12562_v29 = vpop.eup %11119  ;;  %11129 = vpow2.f32 %v5587_v3  ;;  %v5705_v40 = vsub.f32 %v12527_v0, %v5703_v4  ;;  %5348 = vadd.xlane.f32.xlu1 %v5347_v53  ;;  %v5223_v0 = vmul.f32 1.442695, %v5220_v27 }
0x1015   : > { %11131 = vpow2.f32 %v5706_v6  ;;  %v5468_v17 = vsel %vm934_vm1, %v12562_v29, 0.0 }
0x1016   : > { %v12565_v18 = vpop.eup %11121  ;;  %v5708_v35 = vmul.f32 1.442695, %v5705_v40  ;;  %v5821_v45 = vpop.xlane.xlu1 %5820 }
0x1017   : > { %v5350_v8 = vsel %vm934_vm1, %v12565_v18, 0.0  ;;  %v5825_v49 = vsub.f32 %v12534_v25, %v5821_v45 }
0x1018   : > { %v12572_v12 = vpop.eup %11123  ;;  %5351 = vadd.xlane.f32.xlu0 %v5350_v8  ;;  %5469 = vadd.xlane.f32.xlu1 %v5468_v17  ;;  %11133 = vpow2.f32 %v5708_v35  ;;  %v5824_v11 = vpop.xlane.xlu0 %5823 }
0x1019   : > { %v5589_v47 = vsel %vm934_vm1, %v12572_v12, 0.0  ;;  %11135 = vpow2.f32 %v5223_v0  ;;  %v5827_v22 = vmul.f32 1.442695, %v5825_v49  ;;  %v5826_v16 = vsub.f32 %v12537_v46, %v5824_v11 }
0x101a   : > { %v12574_v14 = vpop.eup %11125 }
0x101b   : > { %v5471_v15 = vsel %vm934_vm1, %v12574_v14, 0.0  ;;  %v12580_v19 = vpop.eup %11127  ;;  %11137 = vpow2.f32 %v5827_v22  ;;  %v5829_v21 = vmul.f32 1.442695, %v5826_v16 }
0x101c   : > { %5472 = vadd.xlane.f32.xlu0 %v5471_v15  ;;  %5590 = vadd.xlane.f32.xlu1 %v5589_v47  ;;  %v5225_v62 = vsel %vm934_vm1, %v12580_v19, 0.0 }
0x101d   : > { %11139 = vpow2.f32 %v5829_v21 }
0x101e   : > { %v12582_v20 = vpop.eup %11129  ;;  %v5942_v54 = vpop.xlane.xlu1 %5941 }
0x101f   : > { %v5592_v26 = vsel %vm934_vm1, %v12582_v20, 0.0  ;;  %v12588_v37 = vpop.eup %11131  ;;  %v5946_v55 = vsub.f32 %v12544_v42, %v5942_v54 }
0x1020   : > { %5593 = vadd.xlane.f32.xlu0 %v5592_v26  ;;  %5226 = vadd.xlane.f32.xlu1 %v5225_v62  ;;  %v5710_v5 = vsel %vm934_vm1, %v12588_v37, 0.0  ;;  %v5945_v59 = vpop.xlane.xlu0 %5944 }
0x1021   : > { %v5948_v63 = vmul.f32 1.442695, %v5946_v55  ;;  %v5947_v30 = vsub.f32 %v12547_v60, %v5945_v59 }
0x1022   : > { %v12592_v41 = vpop.eup %11133 }
0x1023   : > { %v5713_v31 = vsel %vm934_vm1, %v12592_v41, 0.0  ;;  %v11136_v7 = vpop.eup %11135  ;;  %11141 = vpow2.f32 %v5948_v63  ;;  %v5950_v9 = vmul.f32 1.442695, %v5947_v30 }
0x1024   : > { %5711 = vadd.xlane.f32.xlu0 %v5710_v5  ;;  %v5228_v43 = vsel %vm934_vm1, %v11136_v7, 0.0 }
0x1025   : > { %v12604_v61 = vpop.eup %11137  ;;  %11143 = vpow2.f32 %v5950_v9 }
0x1026   : > { %v5831_v25 = vsel %vm934_vm1, %v12604_v61, 0.0 }
0x1027   : > { %v12609_v52 = vpop.eup %11139 }
0x1028   : > { %5714 = vadd.xlane.f32.xlu0 %v5713_v31  ;;  %v5834_v46 = vsel %vm934_vm1, %v12609_v52, 0.0 }
0x102c   : > { %5229 = vadd.xlane.f32.xlu0 %v5228_v43 }
0x102d   : > { %v12613_v42 = vpop.eup %11141 }
0x102e   : > { %v5952_v44 = vsel %vm934_vm1, %v12613_v42, 0.0 }
0x102f   : > { %v12617_v33 = vpop.eup %11143 }
0x1030   : > { %v5955_v60 = vsel %vm934_vm1, %v12617_v33, 0.0 }
0x1031   : > { %5237 = vrot.lane.b32.xlu1 %v12418_v51, %s11521_s29 }
0x1042   : > { %5358 = vrot.lane.b32.xlu0 %v12418_v51, %s11520_s3 }
0x1055   : > { %5832 = vadd.xlane.f32.xlu1 %v5831_v25 }
0x1061   : > { %5835 = vadd.xlane.f32.xlu0 %v5834_v46 }
0x1065   : > { %5953 = vadd.xlane.f32.xlu0 %v5952_v44 }
0x1066   : > { %5479 = vrot.lane.b32.xlu1 %v12418_v51, %s11522_s2 }
0x1069   : > { %5956 = vadd.xlane.f32.xlu0 %v5955_v60 }
0x106a   : > { %5600 = vrot.lane.b32.xlu1 %v12418_v51, %s11523_s11 }
0x106e   : > { %5842 = vrot.lane.b32.xlu1 %v12418_v51, %s12923_s20 }
0x1072   : > { %5963 = vrot.lane.b32.xlu1 %v12418_v51, %s12924_s21 }
0x107f   : > { %5721 = vrot.lane.b32.xlu0 %v12418_v51, %s12922_s18 }
0x10a1   : > { %v5349_v38 = vpop.xlane.xlu1 %5348 }
0x10a5   : > { %v5352_v48 = vpop.xlane.xlu0 %5351  ;;  %v5470_v6 = vpop.xlane.xlu1 %5469 }
0x10a9   : > { %v5473_v3 = vpop.xlane.xlu0 %5472  ;;  %v5591_v4 = vpop.xlane.xlu1 %5590 }
0x10ad   : > { %v5594_v53 = vpop.xlane.xlu0 %5593  ;;  %v5227_v40 = vpop.xlane.xlu1 %5226 }
0x10ae   : > { %11145 = vrcp.f32 %v5227_v40 }
0x10b1   : > { %v5712_v27 = vpop.xlane.xlu0 %5711  ;;  %v5238_v35 = vpop.permute.xlu1 %5237 }
0x10b2   : > { %10388 = vmatpush3.bf16.msra.mxu1 %v5238_v35 }
0x10b3   : > { %10399 = vmatprep.subr.bf16.mxu1 %v11518_v2 }
0x10b5   : > { %v5715_v8 = vpop.xlane.xlu0 %5714 }
0x10b8   : > { %v11146_v0 = vpop.eup %11145 }
0x10b9   : > { %v5230_v17 = vpop.xlane.xlu0 %5229  ;;  %v5233_v15 = vmul.f32 %v11146_v0, %v12580_v19 }
0x10ba   : > { %11147 = vrcp.f32 %v5230_v17 }
0x10bb   : > { %11149 = vrcp.f32 %v5352_v48 }
0x10bc   : > { %11151 = vrcp.f32 %v5349_v38 }
0x10bd   : > { %v5359_v5 = vpop.permute.xlu0 %5358  ;;  %11153 = vrcp.f32 %v5473_v3 }
0x10be   : > { %11155 = vrcp.f32 %v5470_v6 }
0x10bf   : > { %11157 = vrcp.f32 %v5594_v53 }
0x10c0   : > { %11159 = vrcp.f32 %v5591_v4 }
0x10c1   : > { %11161 = vrcp.f32 %v5715_v8 }
0x10c2   : > { %11163 = vrcp.f32 %v5712_v27 }
0x10c4   : > { %v11148_v51 = vpop.eup %11147 }
0x10c5   : > { %v5234_v47 = vmul.f32 %v11148_v51, %v11136_v7  ;;  %v11150_v62 = vpop.eup %11149 }
0x10c6   : > { %v11152_v31 = vpop.eup %11151  ;;  %v5356_v43 = vmul.f32 %v11150_v62, %v12565_v18 }
0x10c7   : > { %v5235_v26 = vpack.c.bf16 %v5234_v47, %v5233_v15  ;;  %v5355_v45 = vmul.f32 %v11152_v31, %v12558_v36  ;;  %v11154_v19 = vpop.eup %11153  ;;  %v10901_v31 = vld [vmem:[#allocation9 + $0x40] sm:$0xff]  }
0x10c8   : > { %v11156_v22 = vpop.eup %11155  ;;  %v5477_v11 = vmul.f32 %v11154_v19, %v12574_v14  ;;  %10466 = vmatpush3.bf16.msra.mxu0 %v10901_v31  ;;  %v10902_v19 = vld [vmem:[#allocation9 + $0x48] sm:$0xff]  }
0x10c9   : > { %10390 = vmatmul.mubr.msk.bf16.vlgmr.msra.gmra.mrb[88].mxu1 %vm934_vm1, %v5235_v26  ;;  %v5357_v49 = vpack.c.bf16 %v5356_v43, %v5355_v45  ;;  %v5476_v18 = vmul.f32 %v11156_v22, %v12562_v29  ;;  %v11158_v54 = vpop.eup %11157  ;;  %10467 = vmatprep.subr.bf16.mxu0 %v11518_v2 }
0x10ca   : > { %10400 = vmatpush3.bf16.msra.mxu1 %v5359_v5  ;;  %10401 = vmatprep.mubr.msk.bf16.mxu1 %vm11519_vm0, %v11518_v2  ;;  %v11160_v55 = vpop.eup %11159  ;;  %v5598_v59 = vmul.f32 %v11158_v54, %v12582_v20  ;;  %v10904_v54 = vld [vmem:[#allocation9 + $0x58] sm:$0xff]  }
0x10cb   : > { %10411 = vmatprep.subr.bf16.mxu1 %v11518_v2  ;;  %v5478_v36 = vpack.c.bf16 %v5477_v11, %v5476_v18  ;;  %v5597_v29 = vmul.f32 %v11160_v55, %v12572_v12  ;;  %v11162_v25 = vpop.eup %11161 }
0x10cc   : > { %v11164_v46 = vpop.eup %11163  ;;  %v5719_v20 = vmul.f32 %v11162_v25, %v12592_v41  ;;  %10468 = vmatpush3.bf16.msra.mxu0 %v10902_v19  ;;  %v10907_v25 = vld [vmem:[#allocation9 + $0x70] sm:$0xff]  }
0x10cd   : > { %v5599_v63 = vpack.c.bf16 %v5598_v59, %v5597_v29  ;;  %v5718_v44 = vmul.f32 %v11164_v46, %v12588_v37  ;;  %10469 = vmatprep.subr.bf16.mxu0 %v11518_v2  ;;  %v10906_v29 = vld [vmem:[#allocation9 + $0x68] sm:$0xff]  }
0x10cf   : > { %v5720_v12 = vpack.c.bf16 %v5719_v20, %v5718_v44  ;;  %v10908_v20 = vld [vmem:[#allocation9 + $0x78] sm:$0xff]  }
0x10d1   : > { %10402 = vmatmul.mubr.msk.bf16.vlgmr.msra.gmra.mrb[92].mxu1 %vm934_vm1, %v5357_v49 }
0x10d2   : > { %10413 = vmatprep.mubr.msk.bf16.mxu1 %vm11519_vm0, %v11518_v2 }
0x10e2   : > { %v5833_v7 = vpop.xlane.xlu1 %5832 }
0x10e6   : > { %v5480_v16 = vpop.permute.xlu1 %5479 }
0x10e7   : > { %10412 = vmatpush3.bf16.msra.mxu1 %v5480_v16 }
0x10e8   : > { %10423 = vmatprep.subr.bf16.mxu1 %v11518_v2 }
0x10ea   : > { %10414 = vmatmul.mubr.msk.bf16.vlgmr.msra.gmra.mrb[96].mxu1 %vm934_vm1, %v5478_v36  ;;  %v5601_v21 = vpop.permute.xlu1 %5600 }
0x10eb   : > { %10424 = vmatpush3.bf16.msra.mxu1 %v5601_v21  ;;  %10425 = vmatprep.mubr.msk.bf16.mxu1 %vm11519_vm0, %v11518_v2  ;;  %v10905_v21 = vld [vmem:[#allocation9 + $0x60] sm:$0xff]  }
0x10ec   : > { %10435 = vmatprep.subr.bf16.mxu1 %v11518_v2 }
0x10ee   : > { %v5836_v14 = vpop.xlane.xlu0 %5835  ;;  %v5843_v48 = vpop.permute.xlu1 %5842 }
0x10ef   : > { %11165 = vrcp.f32 %v5836_v14 }
0x10f0   : > { %11167 = vrcp.f32 %v5833_v7  ;;  %v10903_v7 = vld [vmem:[#allocation9 + $0x50] sm:$0xff]  }
0x10f1   : > { %10470 = vmatpush3.bf16.msra.mxu0 %v10903_v7 }
0x10f2   : > { %v5954_v30 = vpop.xlane.xlu0 %5953  ;;  %10426 = vmatmul.mubr.msk.bf16.vlgmr.msra.gmra.mrb[100].mxu1 %vm934_vm1, %v5599_v63  ;;  %v5964_v53 = vpop.permute.xlu1 %5963  ;;  %10471 = vmatprep.subr.bf16.mxu0 %v11518_v2 }
0x10f3   : > { %10437 = vmatprep.mubr.msk.bf16.mxu1 %vm11519_vm0, %v11518_v2 }
0x10f5   : > { %10472 = vmatpush3.bf16.msra.mxu0 %v10904_v54 }
0x10f6   : > { %v5957_v9 = vpop.xlane.xlu0 %5956  ;;  %10473 = vmatprep.subr.bf16.mxu0 %v11518_v2 }
0x10f7   : > { %11169 = vrcp.f32 %v5957_v9 }
0x10f8   : > { %11171 = vrcp.f32 %v5954_v30 }
0x10f9   : > { %v11166_v38 = vpop.eup %11165  ;;  %10474 = vmatpush3.bf16.msra.mxu0 %v10905_v21 }
0x10fa   : > { %v5722_v60 = vpop.permute.xlu0 %5721  ;;  %v11168_v6 = vpop.eup %11167  ;;  %v5840_v41 = vmul.f32 %v11166_v38, %v12609_v52  ;;  %10475 = vmatprep.subr.bf16.mxu0 %v11518_v2 }
0x10fb   : > { %10436 = vmatpush3.bf16.msra.mxu1 %v5722_v60  ;;  %v5839_v37 = vmul.f32 %v11168_v6, %v12604_v61 }
0x10fc   : > { %10447 = vmatprep.subr.bf16.mxu1 %v11518_v2 }
0x10fd   : > { %v5841_v3 = vpack.c.bf16 %v5840_v41, %v5839_v37  ;;  %10476 = vmatpush3.bf16.msra.mxu0 %v10906_v29  ;;  %v9480_v29 = vld [vmem:[%s12852_s5 + $0x1] ss:$0 sm:$0xff] }
0x10fe   : > { %10438 = vmatmul.mubr.msk.bf16.vlgmr.msra.gmra.mrb[104].mxu1 %vm934_vm1, %v5720_v12  ;;  %10477 = vmatprep.subr.bf16.mxu0 %v11518_v2 }
0x10ff   : > { %10448 = vmatpush3.bf16.msra.mxu1 %v5843_v48  ;;  %10449 = vmatprep.mubr.msk.bf16.mxu1 %vm11519_vm0, %v11518_v2 }
0x1100   : > { %10459 = vmatprep.subr.bf16.mxu1 %v11518_v2 }
0x1101   : > { %v11170_v4 = vpop.eup %11169  ;;  %10478 = vmatpush3.bf16.msra.mxu0 %v10907_v25 }
0x1102   : > { %v11172_v40 = vpop.eup %11171  ;;  %v5961_v27 = vmul.f32 %v11170_v4, %v12617_v33  ;;  %10479 = vmatprep.subr.bf16.mxu0 %v11518_v2 }
0x1103   : > { %v5960_v35 = vmul.f32 %v11172_v40, %v12613_v42 }
0x1105   : > { %v5962_v8 = vpack.c.bf16 %v5961_v27, %v5960_v35  ;;  %10480 = vmatpush3.bf16.msra.mxu0 %v10908_v20 }
0x1106   : > { %10450 = vmatmul.mubr.msk.bf16.vlgmr.msra.gmra.mrb[108].mxu1 %vm934_vm1, %v5841_v3 }
0x1107   : > { %10460 = vmatpush3.bf16.msra.mxu1 %v5964_v53  ;;  %10461 = vmatprep.mubr.msk.bf16.mxu1 %vm11519_vm0, %v11518_v2 }
0x110e   : > { %10462 = vmatmul.mubr.msk.bf16.vlgmr.msra.gmra.mrb[112].mxu1 %vm934_vm1, %v5962_v8 }
0x110f   : > { %7126 = vmatprep.mubr.bf16.mxu1 %v11517_v1 }
0x119c   : > { %v5277_v61 = vpop.f32.mrb[88].mxu1 }
0x119d   : > { %v10391_v52 = vpop.f32.mrb[89].mxu1 }
0x119e   : > { %v5280_v17 = vpop.f32.mrb[90].mxu1 }
0x119f   : > { %v10664_v0 = vpack.i.bf16 %v5280_v17, %v5277_v61  ;;  %v10392_v51 = vpop.f32.mrb[91].mxu1 }
0x11a1   : > { %10665 = vrot.lane.b32.xlu1 %v10664_v0, %s12924_s21 }
0x11a4   : > { %v5398_v15 = vpop.f32.mrb[92].mxu1 }
0x11a5   : > { %v10403_v47 = vpop.f32.mrb[93].mxu1 }
0x11a6   : > { %v5401_v26 = vpop.f32.mrb[94].mxu1 }
0x11a7   : > { %v10669_v62 = vpack.i.bf16 %v5401_v26, %v5398_v15  ;;  %v10404_v5 = vpop.f32.mrb[95].mxu1 }
0x11a9   : > { %10670 = vrot.lane.b32.xlu1 %v10669_v62, %s12923_s20  ;;  %s653_s20 = scalar_lea.vmem [#allocation17], %s11909_s17 }
0x11aa   : > { %s8964_s21 = sshll.u32 %s653_s20, 4  ;;  %s12805_s21 = int_to_ptr.vmem [resolvable:$true] %s8964_s21 }
0x11bd   : > { %v5519_v42 = vpop.f32.mrb[96].mxu1 }
0x11be   : > { %v10415_v33 = vpop.f32.mrb[97].mxu1 }
0x11bf   : > { %v5522_v43 = vpop.f32.mrb[98].mxu1 }
0x11c0   : > { %v10674_v45 = vpack.i.bf16 %v5522_v43, %v5519_v42  ;;  %v10416_v49 = vpop.f32.mrb[99].mxu1 }
0x11c2   : > { %10675 = vrot.lane.b32.xlu1 %v10674_v45, %s12922_s18  ;;  %s9755_s18 = sshll.u32 %s11637_s28, 4  ;;  %s11527_s28 = smov [#allocation17]  }
0x11c5   : > { %v5640_v22 = vpop.f32.mrb[100].mxu1 }
0x11c6   : > { %v10427_v11 = vpop.f32.mrb[101].mxu1 }
0x11c7   : > { %v5643_v18 = vpop.f32.mrb[102].mxu1 }
0x11c8   : > { %v10679_v16 = vpack.i.bf16 %v5643_v18, %v5640_v22  ;;  %v10428_v36 = vpop.f32.mrb[103].mxu1 }
0x11ca   : > { %10680 = vrot.lane.b32.xlu0 %v10679_v16, %s11523_s11 }
0x11d1   : > { %v5761_v55 = vpop.f32.mrb[104].mxu1 }
0x11d2   : > { %v10439_v59 = vpop.f32.mrb[105].mxu1 }
0x11d3   : > { %v5764_v14 = vpop.f32.mrb[106].mxu1 }
0x11d4   : > { %v10684_v63 = vpack.i.bf16 %v5764_v14, %v5761_v55  ;;  %v10440_v30 = vpop.f32.mrb[107].mxu1 }
0x11d6   : > { %10685 = vrot.lane.b32.xlu1 %v10684_v63, %s11522_s2  ;;  %s12926_s2 = sld [smem:[#allocation32_spill]] }
0x11d9   : > { %v5882_v9 = vpop.f32.mrb[108].mxu1 }
0x11da   : > { %v10451_v46 = vpop.f32.mrb[109].mxu1 }
0x11db   : > { %v5885_v44 = vpop.f32.mrb[110].mxu1 }
0x11dc   : > { %v10689_v60 = vpack.i.bf16 %v5885_v44, %v5882_v9  ;;  %v10452_v12 = vpop.f32.mrb[111].mxu1  ;;  %s12803_s11 = scalar_lea.hbm %s12926_s2, %s9755_s18 }
0x11dd   : > { %v6248_v12 = vld [vmem:[#allocation14 + $0x440] sm:$0xff] }
0x11de   : > { %10690 = vrot.lane.b32.xlu0 %v10689_v60, %s11520_s3  ;;  %v6240_v60 = vld [vmem:[#allocation14 + $0x400] sm:$0xff] }
0x11e1   : > { %v6003_v38 = vpop.f32.mrb[112].mxu1 }
0x11e2   : > { %v10463_v48 = vpop.f32.mrb[113].mxu1 }
0x11e3   : > { %v6006_v6 = vpop.f32.mrb[114].mxu1  ;;  %v9493_v48 = vcombine.low %v6240_v60, %v6248_v12 }
0x11e4   : > { %v10694_v41 = vpack.i.bf16 %v6006_v6, %v6003_v38  ;;  %v10464_v37 = vpop.f32.mrb[115].mxu1  ;;  %v6241_v38 = vld [vmem:[#allocation14 + $0x408] sm:$0xff]  ;;  %v9494_v6 = vcombine.high %v6240_v60, %v6248_v12 }
0x11e5   : > { %v6256_v37 = vld [vmem:[#allocation14 + $0x480] sm:$0xff] }
0x11e6   : > { %10695 = vrot.lane.b32.xlu1 %v10694_v41, %s11521_s29  ;;  %v6249_v41 = vld [vmem:[#allocation14 + $0x448] sm:$0xff]  ;;  %7094 = vmatprep.subr.bf16.mxu1 %v9494_v6 }
0x11e7   : > { %7095 = vmatpush1.bf16.msra.mxu1 %v9493_v48  ;;  %v6344_v48 = vld [vmem:[#allocation14 + $0x740] sm:$0xff]  ;;  %v6337_v6 = vld [vmem:[#allocation14 + $0x708] sm:$0xff] }
0x1213   : > { %v10666_v3 = vpop.permute.xlu1 %10665 }
0x1214   : > { %v10668_v27 = vunpack.i.h.bf16 %v10666_v3  ;;  %v10667_v35 = vunpack.i.l.bf16 %v10666_v3  ;;  %v6264_v3 = vld [vmem:[#allocation14 + $0x4c0] sm:$0xff] }
0x1216   : > { %v6067_v26 = vsel %vm934_vm1, %v12490_v39, %v10668_v27  ;;  %v6066_v62 = vsel %vm934_vm1, %v12488_v13, %v10667_v35  ;;  %v6257_v27 = vld [vmem:[#allocation14 + $0x488] sm:$0xff] }
0x1217   : > { %v6265_v35 = vld [vmem:[#allocation14 + $0x4c8] sm:$0xff] }
0x121b   : > { %v10671_v4 = vpop.permute.xlu1 %10670 }
0x121c   : > { %v10673_v8 = vunpack.i.h.bf16 %v10671_v4  ;;  %v10672_v61 = vunpack.i.l.bf16 %v10671_v4  ;;  %v9495_v4 = vcombine.low %v6241_v38, %v6249_v41 }
0x121e   : > { %v6069_v33 = vsel %vm1957_vm2, %v6067_v26, %v10673_v8  ;;  %v6068_v31 = vsel %vm1957_vm2, %v6066_v62, %v10672_v61  ;;  %v9511_v8 = vcombine.low %v6257_v27, %v6265_v35  ;;  %v6272_v62 = vld [vmem:[#allocation14 + $0x500] sm:$0xff] }
0x1234   : > { %v10676_v53 = vpop.permute.xlu1 %10675 }
0x1235   : > { %v10678_v17 = vunpack.i.h.bf16 %v10676_v53  ;;  %v10677_v0 = vunpack.i.l.bf16 %v10676_v53  ;;  %v9496_v53 = vcombine.high %v6241_v38, %v6249_v41  ;;  %v6336_v38 = vld [vmem:[#allocation14 + $0x700] sm:$0xff] }
0x1236   : > { %v9590_v41 = vcombine.high %v6336_v38, %v6344_v48 }
0x1237   : > { %v6071_v49 = vsel %vm1960_vm3, %v6069_v33, %v10678_v17  ;;  %v6070_v19 = vsel %vm1960_vm3, %v6068_v31, %v10677_v0  ;;  %7137 = vmatprep.subr.bf16.mxu0 %v9496_v53  ;;  %v6281_v31 = vld [vmem:[#allocation14 + $0x548] sm:$0xff] }
0x123c   : > { %v10681_v40 = vpop.permute.xlu0 %10680 }
0x123d   : > { %v10683_v15 = vunpack.i.h.bf16 %v10681_v40  ;;  %v10682_v47 = vunpack.i.l.bf16 %v10681_v40  ;;  %v9510_v40 = vcombine.high %v6256_v37, %v6264_v3 }
0x123f   : > { %v6073_v7 = vsel %vm1963_vm4, %v6071_v49, %v10683_v15  ;;  %v6072_v22 = vsel %vm1963_vm4, %v6070_v19, %v10682_v47  ;;  %7096 = vmatprep.subr.bf16.mxu1 %v9510_v40  ;;  %v6288_v19 = vld [vmem:[#allocation14 + $0x580] sm:$0xff] }
0x1240   : > { %v6352_v40 = vld [vmem:[#allocation14 + $0x780] sm:$0xff] }
0x1248   : > { %v10686_v52 = vpop.permute.xlu1 %10685 }
0x1249   : > { %v10688_v5 = vunpack.i.h.bf16 %v10686_v52  ;;  %v10687_v42 = vunpack.i.l.bf16 %v10686_v52 }
0x124b   : > { %v6075_v11 = vsel %vm1966_vm5, %v6073_v7, %v10688_v5  ;;  %v6074_v13 = vsel %vm1966_vm5, %v6072_v22, %v10687_v42  ;;  %v6280_v5 = vld [vmem:[#allocation14 + $0x540] sm:$0xff]  ;;  %v6273_v42 = vld [vmem:[#allocation14 + $0x508] sm:$0xff] }
0x124c   : > { %v9526_v33 = vcombine.high %v6272_v62, %v6280_v5  ;;  %v9528_v49 = vcombine.high %v6273_v42, %v6281_v31  ;;  %v6296_v7 = vld [vmem:[#allocation14 + $0x5c0] sm:$0xff]  ;;  %v6289_v22 = vld [vmem:[#allocation14 + $0x588] sm:$0xff] }
0x1250   : > { %v10691_v51 = vpop.permute.xlu0 %10690 }
0x1251   : > { %v10693_v43 = vunpack.i.h.bf16 %v10691_v51  ;;  %v10692_v45 = vunpack.i.l.bf16 %v10691_v51 }
0x1253   : > { %v6077_v36 = vsel %vm1969_vm6, %v6075_v11, %v10693_v43  ;;  %v6076_v54 = vsel %vm1969_vm6, %v6074_v13, %v10692_v45  ;;  %v9525_v43 = vcombine.low %v6272_v62, %v6280_v5  ;;  %v9527_v45 = vcombine.low %v6273_v42, %v6281_v31  ;;  %v6297_v11 = vld [vmem:[#allocation14 + $0x5c8] sm:$0xff]  ;;  %v6251_v5 = vld [vmem:[#allocation14 + $0x458] sm:$0xff] }
0x1254   : > { %v9541_v13 = vcombine.low %v6288_v19, %v6296_v7 }
0x1258   : > { %v10696_v39 = vpop.permute.xlu1 %10695 }
0x1259   : > { %v10698_v18 = vunpack.i.h.bf16 %v10696_v39  ;;  %v10697_v16 = vunpack.i.l.bf16 %v10696_v39  ;;  %v9542_v39 = vcombine.high %v6288_v19, %v6296_v7 }
0x125b   : > { %v6079_v21 = vsel %vm1972_vm7, %v6077_v36, %v10698_v18  ;;  %v6078_v55 = vsel %vm1972_vm7, %v6076_v54, %v10697_v16  ;;  %v9543_v18 = vcombine.low %v6289_v22, %v6297_v11  ;;  %v9544_v16 = vcombine.high %v6289_v22, %v6297_v11  ;;  %v6304_v36 = vld [vmem:[#allocation14 + $0x600] sm:$0xff]  ;;  %v9489_v11 = vld [vmem:[#allocation11 + $0x1] ss:$0 sm:$0xff] }
0x125c   : > { %v6097_v59 = vpack.c.bf16 %v6079_v21, %v6078_v55  ;;  %v6312_v54 = vld [vmem:[#allocation14 + $0x640] sm:$0xff]  ;;  %v6305_v21 = vld [vmem:[#allocation14 + $0x608] sm:$0xff] }
0x125d   : > { %v9558_v55 = vcombine.high %v6304_v36, %v6312_v54 }
0x125e   : > { %10482 = vmatmul.mubr.bf16.vlgmr.msra.gmra.mrb[96].mxu0 %v6097_v59  ;;  %v6313_v59 = vld [vmem:[#allocation14 + $0x648] sm:$0xff] }
0x125f   : > { %7169 = vmatprep.mubr.bf16.mxu0 %v11517_v1  ;;  %7138 = vmatpush1.bf16.msra.mxu0 %v9495_v4 }
0x1331   : > { %v6188_v14 = vpop.f32.mrb[96].mxu0 }
0x1332   : > { %v6189_v63 = vadd.f32 %v9480_v29, %v6188_v14  ;;  %v10483_v30 = vpop.f32.mrb[97].mxu0  ;;  %v9559_v14 = vcombine.low %v6305_v21, %v6313_v59 }
0x1333   : > { %v6191_v25 = vpop.f32.mrb[98].mxu0  ;;  %v6320_v30 = vld [vmem:[#allocation14 + $0x680] sm:$0xff] }
0x1334   : > { %v6195_v9 = vadd.f32 %v6189_v63, %v12405_v58  ;;  %v6192_v46 = vadd.f32 %v9480_v29, %v6191_v25  ;;  %v10484_v20 = vpop.f32.mrb[99].mxu0  ;;  %v9512_v58 = vcombine.high %v6257_v27, %v6265_v35  ;;  %v9557_v29 = vcombine.low %v6304_v36, %v6312_v54  ;;  %v6328_v25 = vld [vmem:[#allocation14 + $0x6c0] sm:$0xff]  ;;  %v6353_v35 = vld [vmem:[#allocation14 + $0x788] sm:$0xff]  ;;  %v9490_v36 = vld [vmem:[#allocation12 + $0x1] ss:$0 sm:$0xff] }
0x1335   : > { %v9560_v63 = vcombine.high %v6305_v21, %v6313_v59  ;;  %v6329_v20 = vld [vmem:[#allocation14 + $0x6c8] sm:$0xff]  ;;  %v6360_v27 = vld [vmem:[#allocation14 + $0x7c0] sm:$0xff]  ;;  %v6258_v21 = vld [vmem:[#allocation14 + $0x490] sm:$0xff] }
0x1336   : > { %v6196_v44 = vadd.f32 %v6192_v46, %v12407_v57  ;;  %6201 = vadd.xlane.f32.xlu0 %v6195_v9  ;;  %v9509_v57 = vcombine.low %v6256_v37, %v6264_v3  ;;  %7139 = vmatprep.subr.bf16.mxu0 %v9512_v58  ;;  %v9574_v46 = vcombine.high %v6320_v30, %v6328_v25  ;;  %v6345_v37 = vld [vmem:[#allocation14 + $0x748] sm:$0xff]  ;;  %v6259_v59 = vld [vmem:[#allocation14 + $0x498] sm:$0xff] }
0x1337   : > { %7140 = vmatpush1.bf16.msra.mxu0 %v9511_v8  ;;  %v9589_v3 = vcombine.low %v6336_v38, %v6344_v48  ;;  %v9591_v4 = vcombine.low %v6337_v6, %v6345_v37  ;;  %v9592_v53 = vcombine.high %v6337_v6, %v6345_v37  ;;  %v9606_v58 = vcombine.high %v6352_v40, %v6360_v27  ;;  %v6290_v48 = vld [vmem:[#allocation14 + $0x590] sm:$0xff]  ;;  %v6299_v37 = vld [vmem:[#allocation14 + $0x5d8] sm:$0xff] }
0x1338   : > { %6203 = vadd.xlane.f32.xlu1 %v6196_v44  ;;  %7097 = vmatpush1.bf16.msra.mxu1 %v9509_v57  ;;  %v6361_v57 = vld [vmem:[#allocation14 + $0x7c8] sm:$0xff]  ;;  %v9605_v8 = vcombine.low %v6352_v40, %v6360_v27  ;;  %v6298_v6 = vld [vmem:[#allocation14 + $0x5d0] sm:$0xff] }
0x1339   : > { %7098 = vmatprep.subr.bf16.mxu1 %v9526_v33  ;;  %7141 = vmatprep.subr.bf16.mxu0 %v9528_v49  ;;  %v6306_v27 = vld [vmem:[#allocation14 + $0x610] sm:$0xff] }
0x133b   : > { %7142 = vmatpush1.bf16.msra.mxu0 %v9527_v45 }
0x133c   : > { %7099 = vmatpush1.bf16.msra.mxu1 %v9525_v43  ;;  %7143 = vmatprep.subr.bf16.mxu0 %v9544_v16 }
0x133d   : > { %7100 = vmatprep.subr.bf16.mxu1 %v9542_v39 }
0x133f   : > { %7144 = vmatpush1.bf16.msra.mxu0 %v9543_v18 }
0x1340   : > { %7101 = vmatpush1.bf16.msra.mxu1 %v9541_v13  ;;  %7145 = vmatprep.subr.bf16.mxu0 %v9560_v63 }
0x1341   : > { %7102 = vmatprep.subr.bf16.mxu1 %v9558_v55  ;;  %v6266_v55 = vld [vmem:[#allocation14 + $0x4d0] sm:$0xff] }
0x1343   : > { %7146 = vmatpush1.bf16.msra.mxu0 %v9559_v14 }
0x1344   : > { %7103 = vmatpush1.bf16.msra.mxu1 %v9557_v29  ;;  %v6267_v29 = vld [vmem:[#allocation14 + $0x4d8] sm:$0xff] }
0x1345   : > { %7104 = vmatprep.subr.bf16.mxu1 %v9574_v46  ;;  %v6282_v46 = vld [vmem:[#allocation14 + $0x550] sm:$0xff] }
0x13c3   : > { %v6202_v61 = vpop.xlane.xlu0 %6201 }
0x13c4   : > { %v6205_v52 = vmul.f32 0.0078125, %v6202_v61  ;;  %v9607_v61 = vcombine.low %v6353_v35, %v6361_v57 }
0x13c5   : > { %v6204_v17 = vpop.xlane.xlu1 %6203 }
0x13c6   : > { %v12706_v0 = vsub.f32 %v6195_v9, %v6205_v52  ;;  %v6206_v51 = vmul.f32 0.0078125, %v6204_v17  ;;  %v6321_v9 = vld [vmem:[#allocation14 + $0x688] sm:$0xff]  ;;  %v9608_v52 = vcombine.high %v6353_v35, %v6361_v57  ;;  %v6242_v17 = vld [vmem:[#allocation14 + $0x410] sm:$0xff]  ;;  %v6315_v57 = vld [vmem:[#allocation14 + $0x658] sm:$0xff] }
0x13c7   : > { %v9575_v60 = vcombine.low %v6321_v9, %v6329_v20  ;;  %v9576_v12 = vcombine.high %v6321_v9, %v6329_v20  ;;  %v6274_v9 = vld [vmem:[#allocation14 + $0x510] sm:$0xff]  ;;  %v6275_v20 = vld [vmem:[#allocation14 + $0x518] sm:$0xff] }
0x13c8   : > { %v12708_v15 = vsub.f32 %v6196_v44, %v6206_v51  ;;  %v6209_v47 = vmul.f32 %v12706_v0, %v12706_v0  ;;  %v9573_v44 = vcombine.low %v6320_v30, %v6328_v25  ;;  %v6250_v51 = vld [vmem:[#allocation14 + $0x450] sm:$0xff]  ;;  %v9516_v25 = vcombine.high %v6259_v59, %v6267_v29 }
0x13c9   : > { %7147 = vmatprep.subr.bf16.mxu0 %v9576_v12  ;;  %v9498_v62 = vcombine.high %v6242_v17, %v6250_v51  ;;  %v9530_v12 = vcombine.high %v6274_v9, %v6282_v46  ;;  %v6314_v35 = vld [vmem:[#allocation14 + $0x650] sm:$0xff] }
0x13ca   : > { %6211 = vadd.xlane.f32.xlu0 %v6209_v47  ;;  %v6210_v26 = vmul.f32 %v12708_v15, %v12708_v15  ;;  %7105 = vmatpush1.bf16.msra.mxu1 %v9573_v44  ;;  %v6243_v47 = vld [vmem:[#allocation14 + $0x418] sm:$0xff]  ;;  %v9513_v44 = vcombine.low %v6258_v21, %v6266_v55 }
0x13cb   : > { %7148 = vmatpush1.bf16.msra.mxu0 %v9575_v60  ;;  %7106 = vmatprep.subr.bf16.mxu1 %v9590_v41  ;;  %v9499_v42 = vcombine.low %v6243_v47, %v6251_v5  ;;  %v9500_v33 = vcombine.high %v6243_v47, %v6251_v5  ;;  %v9515_v60 = vcombine.low %v6259_v59, %v6267_v29  ;;  %v6291_v41 = vld [vmem:[#allocation14 + $0x598] sm:$0xff]  ;;  %v6330_v47 = vld [vmem:[#allocation14 + $0x6d0] sm:$0xff]  ;;  %v6244_v29 = vld [vmem:[#allocation14 + $0x420] sm:$0xff] }
0x13cc   : > { %7149 = vmatprep.subr.bf16.mxu0 %v9592_v53  ;;  %v9546_v53 = vcombine.high %v6290_v48, %v6298_v6  ;;  %v9548_v40 = vcombine.high %v6291_v41, %v6299_v37  ;;  %v9561_v5 = vcombine.low %v6306_v27, %v6314_v35 }
0x13ce   : > { %6213 = vadd.xlane.f32.xlu0 %v6210_v26  ;;  %7107 = vmatpush1.bf16.msra.mxu1 %v9589_v3  ;;  %v9497_v26 = vcombine.low %v6242_v17, %v6250_v51  ;;  %v9529_v3 = vcombine.low %v6274_v9, %v6282_v46  ;;  %v6322_v51 = vld [vmem:[#allocation14 + $0x690] sm:$0xff]  ;;  %v6253_v9 = vld [vmem:[#allocation14 + $0x468] sm:$0xff] }
0x13cf   : > { %7150 = vmatpush1.bf16.msra.mxu0 %v9591_v4  ;;  %7108 = vmatprep.subr.bf16.mxu1 %v9606_v58  ;;  %v6307_v58 = vld [vmem:[#allocation14 + $0x618] sm:$0xff] }
0x13d0   : > { %7151 = vmatprep.subr.bf16.mxu0 %v9608_v52  ;;  %v9562_v52 = vcombine.high %v6306_v27, %v6314_v35  ;;  %v9564_v17 = vcombine.high %v6307_v58, %v6315_v57  ;;  %v6285_v27 = vld [vmem:[#allocation14 + $0x568] sm:$0xff] }
0x13d2   : > { %7109 = vmatpush1.bf16.msra.mxu1 %v9605_v8  ;;  %v9545_v8 = vcombine.low %v6290_v48, %v6298_v6  ;;  %v6269_v48 = vld [vmem:[#allocation14 + $0x4e8] sm:$0xff] }
0x13d3   : > { %7152 = vmatpush1.bf16.msra.mxu0 %v9607_v61  ;;  %7180 = vmatprep.subr.bf16.mxu1 %v9498_v62  ;;  %v9547_v61 = vcombine.low %v6291_v41, %v6299_v37  ;;  %v6331_v62 = vld [vmem:[#allocation14 + $0x6d8] sm:$0xff] }
0x13d4   : > { %7223 = vmatprep.subr.bf16.mxu0 %v9500_v33  ;;  %v9578_v33 = vcombine.high %v6322_v51, %v6330_v47 }
0x1457   : > { %v6212_v31 = vpop.xlane.xlu0 %6211 }
0x1458   : > { %v6215_v43 = vmul.f32 0.0078125, %v6212_v31 }
0x145a   : > { %v6217_v45 = vadd.f32 1e-05, %v6215_v43  ;;  %v6338_v43 = vld [vmem:[#allocation14 + $0x710] sm:$0xff] }
0x145b   : > { %v6214_v49 = vpop.xlane.xlu0 %6213 }
0x145c   : > { %11173 = vrsqrt.f32 %v6217_v45  ;;  %v6216_v19 = vmul.f32 0.0078125, %v6214_v49  ;;  %v6346_v45 = vld [vmem:[#allocation14 + $0x750] sm:$0xff]  ;;  %v6339_v49 = vld [vmem:[#allocation14 + $0x718] sm:$0xff] }
0x145e   : > { %v6218_v7 = vadd.f32 1e-05, %v6216_v19  ;;  %v6347_v19 = vld [vmem:[#allocation14 + $0x758] sm:$0xff] }
0x1460   : > { %11175 = vrsqrt.f32 %v6218_v7  ;;  %v9577_v7 = vcombine.low %v6322_v51, %v6330_v47  ;;  %v6301_v51 = vld [vmem:[#allocation14 + $0x5e8] sm:$0xff] }
0x1466   : > { %v11174_v22 = vpop.eup %11173 }
0x1467   : > { %v6221_v39 = vmul.f32 %v11174_v22, %v12706_v0  ;;  %v9514_v0 = vcombine.high %v6258_v21, %v6266_v55  ;;  %v9595_v21 = vcombine.low %v6339_v49, %v6347_v19 }
0x1469   : > { %v6229_v18 = vmul.f32 %v9489_v11, %v6221_v39  ;;  %v9594_v39 = vcombine.high %v6338_v43, %v6346_v45 }
0x146a   : > { %v11176_v13 = vpop.eup %11175 }
0x146b   : > { %v6222_v16 = vmul.f32 %v11176_v13, %v12708_v15  ;;  %v12716_v14 = vadd.f32 %v9490_v36, %v6229_v18  ;;  %v6283_v15 = vld [vmem:[#allocation14 + $0x558] sm:$0xff]  ;;  %v6354_v13 = vld [vmem:[#allocation14 + $0x790] sm:$0xff] }
0x146c   : > { %v9532_v38 = vcombine.high %v6275_v20, %v6283_v15  ;;  %v9531_v4 = vcombine.low %v6275_v20, %v6283_v15  ;;  %v6362_v18 = vld [vmem:[#allocation14 + $0x7d0] sm:$0xff] }
0x146d   : > { %v6230_v54 = vmul.f32 %v9489_v11, %v6222_v16  ;;  %v9596_v11 = vcombine.high %v6339_v49, %v6347_v19  ;;  %v6355_v16 = vld [vmem:[#allocation14 + $0x798] sm:$0xff]  ;;  %v9610_v55 = vcombine.high %v6354_v13, %v6362_v18  ;;  %v9609_v46 = vcombine.low %v6354_v13, %v6362_v18  ;;  %v6333_v13 = vld [vmem:[#allocation14 + $0x6e8] sm:$0xff] }
0x146f   : > { %v12718_v63 = vadd.f32 %v9490_v36, %v6230_v54  ;;  %v6363_v36 = vld [vmem:[#allocation14 + $0x7d8] sm:$0xff]  ;;  %v9593_v54 = vcombine.low %v6338_v43, %v6346_v45  ;;  %v6317_v43 = vld [vmem:[#allocation14 + $0x668] sm:$0xff] }
0x1470   : > { %v9612_v59 = vcombine.high %v6355_v16, %v6363_v36  ;;  %v9611_v20 = vcombine.low %v6355_v16, %v6363_v36 }
0x1471   : > { %v12722_v30 = vpack.c.bf16 %v12718_v63, %v12716_v14 }
0x1473   : > { %7127 = vmatmul.mubr.bf16.vlgmr.msra.gmra.mrb[116].mxu1 %v12722_v30  ;;  %7170 = vmatmul.mubr.bf16.vlgmr.msra.gmra.mrb[100].mxu0 %v12722_v30 }
0x1474   : > { %7181 = vmatpush1.bf16.msra.mxu1 %v9497_v26  ;;  %7224 = vmatpush1.bf16.msra.mxu0 %v9499_v42  ;;  %v6323_v26 = vld [vmem:[#allocation14 + $0x698] sm:$0xff]  ;;  %v9563_v42 = vcombine.low %v6307_v58, %v6315_v57 }
0x1475   : > { %7182 = vmatprep.subr.bf16.mxu1 %v9514_v0  ;;  %7225 = vmatprep.subr.bf16.mxu0 %v9516_v25  ;;  %v9580_v31 = vcombine.high %v6323_v26, %v6331_v62  ;;  %v9579_v22 = vcombine.low %v6323_v26, %v6331_v62  ;;  %v6252_v0 = vld [vmem:[#allocation14 + $0x460] sm:$0xff]  ;;  %v6245_v25 = vld [vmem:[#allocation14 + $0x428] sm:$0xff] }
0x1476   : > { %7212 = vmatprep.mubr.bf16.mxu1 %v11517_v1  ;;  %7255 = vmatprep.mubr.bf16.mxu0 %v11517_v1  ;;  %v9502_v15 = vcombine.high %v6244_v29, %v6252_v0  ;;  %v9501_v6 = vcombine.low %v6244_v29, %v6252_v0  ;;  %v9503_v41 = vcombine.low %v6245_v25, %v6253_v9  ;;  %v6349_v29 = vld [vmem:[#allocation14 + $0x768] sm:$0xff] }
0x1478   : > { %7183 = vmatpush1.bf16.msra.mxu1 %v9513_v44  ;;  %7226 = vmatpush1.bf16.msra.mxu0 %v9515_v60  ;;  %v9504_v44 = vcombine.high %v6245_v25, %v6253_v9  ;;  %v6260_v60 = vld [vmem:[#allocation14 + $0x4a0] sm:$0xff] }
0x1479   : > { %7184 = vmatprep.subr.bf16.mxu1 %v9530_v12  ;;  %7227 = vmatprep.subr.bf16.mxu0 %v9532_v38  ;;  %v6268_v12 = vld [vmem:[#allocation14 + $0x4e0] sm:$0xff]  ;;  %v6261_v38 = vld [vmem:[#allocation14 + $0x4a8] sm:$0xff] }
0x147a   : > { %v9518_v37 = vcombine.high %v6260_v60, %v6268_v12  ;;  %v9517_v35 = vcombine.low %v6260_v60, %v6268_v12  ;;  %v9519_v58 = vcombine.low %v6261_v38, %v6269_v48  ;;  %v6365_v60 = vld [vmem:[#allocation14 + $0x7e8] sm:$0xff] }
0x147c   : > { %7185 = vmatpush1.bf16.msra.mxu1 %v9529_v3  ;;  %7228 = vmatpush1.bf16.msra.mxu0 %v9531_v4  ;;  %v9520_v3 = vcombine.high %v6261_v38, %v6269_v48  ;;  %v6276_v4 = vld [vmem:[#allocation14 + $0x520] sm:$0xff] }
0x147d   : > { %7186 = vmatprep.subr.bf16.mxu1 %v9546_v53  ;;  %7229 = vmatprep.subr.bf16.mxu0 %v9548_v40  ;;  %v6284_v53 = vld [vmem:[#allocation14 + $0x560] sm:$0xff]  ;;  %v6277_v40 = vld [vmem:[#allocation14 + $0x528] sm:$0xff] }
0x147e   : > { %v9534_v57 = vcombine.high %v6276_v4, %v6284_v53  ;;  %v9533_v47 = vcombine.low %v6276_v4, %v6284_v53  ;;  %v9535_v26 = vcombine.low %v6277_v40, %v6285_v27  ;;  %v6255_v4 = vld [vmem:[#allocation14 + $0x478] sm:$0xff] }
0x1480   : > { %7187 = vmatpush1.bf16.msra.mxu1 %v9545_v8  ;;  %7230 = vmatpush1.bf16.msra.mxu0 %v9547_v61  ;;  %v9536_v8 = vcombine.high %v6277_v40, %v6285_v27  ;;  %v6292_v61 = vld [vmem:[#allocation14 + $0x5a0] sm:$0xff] }
0x1481   : > { %7188 = vmatprep.subr.bf16.mxu1 %v9562_v52  ;;  %7231 = vmatprep.subr.bf16.mxu0 %v9564_v17  ;;  %v6300_v52 = vld [vmem:[#allocation14 + $0x5e0] sm:$0xff]  ;;  %v6293_v17 = vld [vmem:[#allocation14 + $0x5a8] sm:$0xff] }
0x1482   : > { %v9550_v62 = vcombine.high %v6292_v61, %v6300_v52  ;;  %v9549_v45 = vcombine.low %v6292_v61, %v6300_v52  ;;  %v9551_v49 = vcombine.low %v6293_v17, %v6301_v51  ;;  %v6271_v61 = vld [vmem:[#allocation14 + $0x4f8] sm:$0xff] }
0x1484   : > { %7189 = vmatpush1.bf16.msra.mxu1 %v9561_v5  ;;  %7232 = vmatpush1.bf16.msra.mxu0 %v9563_v42  ;;  %v9552_v5 = vcombine.high %v6293_v17, %v6301_v51  ;;  %v6308_v42 = vld [vmem:[#allocation14 + $0x620] sm:$0xff] }
0x1485   : > { %7190 = vmatprep.subr.bf16.mxu1 %v9578_v33  ;;  %7233 = vmatprep.subr.bf16.mxu0 %v9580_v31  ;;  %v6316_v33 = vld [vmem:[#allocation14 + $0x660] sm:$0xff]  ;;  %v6309_v31 = vld [vmem:[#allocation14 + $0x628] sm:$0xff] }
0x1486   : > { %v9566_v19 = vcombine.high %v6308_v42, %v6316_v33  ;;  %v9565_v18 = vcombine.low %v6308_v42, %v6316_v33  ;;  %v9567_v16 = vcombine.low %v6309_v31, %v6317_v43  ;;  %v6287_v42 = vld [vmem:[#allocation14 + $0x578] sm:$0xff] }
0x1488   : > { %7191 = vmatpush1.bf16.msra.mxu1 %v9577_v7  ;;  %7234 = vmatpush1.bf16.msra.mxu0 %v9579_v22  ;;  %v9568_v7 = vcombine.high %v6309_v31, %v6317_v43  ;;  %v6324_v22 = vld [vmem:[#allocation14 + $0x6a0] sm:$0xff] }
0x1489   : > { %7192 = vmatprep.subr.bf16.mxu1 %v9594_v39  ;;  %7235 = vmatprep.subr.bf16.mxu0 %v9596_v11  ;;  %v6332_v39 = vld [vmem:[#allocation14 + $0x6e0] sm:$0xff]  ;;  %v6325_v11 = vld [vmem:[#allocation14 + $0x6a8] sm:$0xff] }
0x148a   : > { %v9582_v36 = vcombine.high %v6324_v22, %v6332_v39  ;;  %v9581_v0 = vcombine.low %v6324_v22, %v6332_v39  ;;  %v9583_v25 = vcombine.low %v6325_v11, %v6333_v13  ;;  %v6303_v22 = vld [vmem:[#allocation14 + $0x5f8] sm:$0xff] }
0x148c   : > { %7193 = vmatpush1.bf16.msra.mxu1 %v9593_v54  ;;  %7236 = vmatpush1.bf16.msra.mxu0 %v9595_v21  ;;  %v9584_v54 = vcombine.high %v6325_v11, %v6333_v13  ;;  %v6340_v21 = vld [vmem:[#allocation14 + $0x720] sm:$0xff] }
0x148d   : > { %7194 = vmatprep.subr.bf16.mxu1 %v9610_v55  ;;  %7237 = vmatprep.subr.bf16.mxu0 %v9612_v59  ;;  %v6348_v55 = vld [vmem:[#allocation14 + $0x760] sm:$0xff]  ;;  %v6341_v59 = vld [vmem:[#allocation14 + $0x728] sm:$0xff] }
0x148e   : > { %v9598_v9 = vcombine.high %v6340_v21, %v6348_v55  ;;  %v9597_v12 = vcombine.low %v6340_v21, %v6348_v55  ;;  %v9599_v38 = vcombine.low %v6341_v59, %v6349_v29  ;;  %v6319_v21 = vld [vmem:[#allocation14 + $0x678] sm:$0xff] }
0x1490   : > { %7195 = vmatpush1.bf16.msra.mxu1 %v9609_v46  ;;  %7238 = vmatpush1.bf16.msra.mxu0 %v9611_v20  ;;  %v9600_v46 = vcombine.high %v6341_v59, %v6349_v29  ;;  %v6356_v20 = vld [vmem:[#allocation14 + $0x7a0] sm:$0xff] }
0x1491   : > { %7266 = vmatprep.subr.bf16.mxu1 %v9502_v15  ;;  %7309 = vmatprep.subr.bf16.mxu0 %v9504_v44  ;;  %v6364_v15 = vld [vmem:[#allocation14 + $0x7e0] sm:$0xff]  ;;  %v6357_v44 = vld [vmem:[#allocation14 + $0x7a8] sm:$0xff] }
0x1492   : > { %v9614_v48 = vcombine.high %v6356_v20, %v6364_v15  ;;  %v9613_v53 = vcombine.low %v6356_v20, %v6364_v15  ;;  %v9615_v40 = vcombine.low %v6357_v44, %v6365_v60 }
0x1493   : > { %7213 = vmatmul.mubr.bf16.vlgmr.msra.gmra.mrb[120].mxu1 %v12722_v30  ;;  %7256 = vmatmul.mubr.bf16.vlgmr.msra.gmra.mrb[104].mxu0 %v12722_v30 }
0x1494   : > { %7267 = vmatpush1.bf16.msra.mxu1 %v9501_v6  ;;  %7310 = vmatpush1.bf16.msra.mxu0 %v9503_v41  ;;  %v9616_v6 = vcombine.high %v6357_v44, %v6365_v60  ;;  %v6246_v41 = vld [vmem:[#allocation14 + $0x430] sm:$0xff] }
0x1495   : > { %7268 = vmatprep.subr.bf16.mxu1 %v9518_v37  ;;  %7311 = vmatprep.subr.bf16.mxu0 %v9520_v3  ;;  %v6254_v37 = vld [vmem:[#allocation14 + $0x470] sm:$0xff]  ;;  %v6247_v3 = vld [vmem:[#allocation14 + $0x438] sm:$0xff] }
0x1496   : > { %7298 = vmatprep.mubr.bf16.mxu1 %v11517_v1  ;;  %7341 = vmatprep.mubr.bf16.mxu0 %v11517_v1  ;;  %v9506_v27 = vcombine.high %v6246_v41, %v6254_v37  ;;  %v9505_v52 = vcombine.low %v6246_v41, %v6254_v37  ;;  %v9507_v17 = vcombine.low %v6247_v3, %v6255_v4 }
0x1498   : > { %7269 = vmatpush1.bf16.msra.mxu1 %v9517_v35  ;;  %7312 = vmatpush1.bf16.msra.mxu0 %v9519_v58  ;;  %v9508_v35 = vcombine.high %v6247_v3, %v6255_v4  ;;  %v6262_v58 = vld [vmem:[#allocation14 + $0x4b0] sm:$0xff] }
0x1499   : > { %7270 = vmatprep.subr.bf16.mxu1 %v9534_v57  ;;  %7313 = vmatprep.subr.bf16.mxu0 %v9536_v8  ;;  %v6270_v57 = vld [vmem:[#allocation14 + $0x4f0] sm:$0xff]  ;;  %v6263_v8 = vld [vmem:[#allocation14 + $0x4b8] sm:$0xff] }
0x149a   : > { %v9522_v51 = vcombine.high %v6262_v58, %v6270_v57  ;;  %v9521_v33 = vcombine.low %v6262_v58, %v6270_v57  ;;  %v9523_v31 = vcombine.low %v6263_v8, %v6271_v61 }
0x149c   : > { %7271 = vmatpush1.bf16.msra.mxu1 %v9533_v47  ;;  %7314 = vmatpush1.bf16.msra.mxu0 %v9535_v26  ;;  %v9524_v47 = vcombine.high %v6263_v8, %v6271_v61  ;;  %v6278_v26 = vld [vmem:[#allocation14 + $0x530] sm:$0xff] }
0x149d   : > { %7272 = vmatprep.subr.bf16.mxu1 %v9550_v62  ;;  %7315 = vmatprep.subr.bf16.mxu0 %v9552_v5  ;;  %v6286_v62 = vld [vmem:[#allocation14 + $0x570] sm:$0xff]  ;;  %v6279_v5 = vld [vmem:[#allocation14 + $0x538] sm:$0xff] }
0x149e   : > { %v9538_v43 = vcombine.high %v6278_v26, %v6286_v62  ;;  %v9537_v39 = vcombine.low %v6278_v26, %v6286_v62  ;;  %v9539_v11 = vcombine.low %v6279_v5, %v6287_v42  ;;  %v10911_v26 = vld [vmem:[#allocation15 + $0x400] sm:$0xff]  }
0x149f   : > { %v10912_v62 = vld [vmem:[#allocation15 + $0x480] sm:$0xff]  }
0x14a0   : > { %7273 = vmatpush1.bf16.msra.mxu1 %v9549_v45  ;;  %7316 = vmatpush1.bf16.msra.mxu0 %v9551_v49  ;;  %v9540_v45 = vcombine.high %v6279_v5, %v6287_v42  ;;  %v6294_v49 = vld [vmem:[#allocation14 + $0x5b0] sm:$0xff]  ;;  %v10913_v5 = vld [vmem:[#allocation15 + $0x448] sm:$0xff]  }
0x14a1   : > { %7274 = vmatprep.subr.bf16.mxu1 %v9566_v19  ;;  %7317 = vmatprep.subr.bf16.mxu0 %v9568_v7  ;;  %v6302_v19 = vld [vmem:[#allocation14 + $0x5f0] sm:$0xff]  ;;  %v6295_v7 = vld [vmem:[#allocation14 + $0x5b8] sm:$0xff]  ;;  %v10914_v42 = vld [vmem:[#allocation15 + $0x4c8] sm:$0xff]  }
0x14a2   : > { %v9554_v13 = vcombine.high %v6294_v49, %v6302_v19  ;;  %v9553_v55 = vcombine.low %v6294_v49, %v6302_v19  ;;  %v9555_v59 = vcombine.low %v6295_v7, %v6303_v22  ;;  %v10919_v49 = vld [vmem:[#allocation15 + $0x410] sm:$0xff]  }
0x14a3   : > { %v10920_v19 = vld [vmem:[#allocation15 + $0x490] sm:$0xff]  }
0x14a4   : > { %7275 = vmatpush1.bf16.msra.mxu1 %v9565_v18  ;;  %7318 = vmatpush1.bf16.msra.mxu0 %v9567_v16  ;;  %v9556_v18 = vcombine.high %v6295_v7, %v6303_v22  ;;  %v6310_v16 = vld [vmem:[#allocation14 + $0x630] sm:$0xff]  ;;  %v10921_v7 = vld [vmem:[#allocation15 + $0x458] sm:$0xff]  }
0x14a5   : > { %7276 = vmatprep.subr.bf16.mxu1 %v9582_v36  ;;  %7319 = vmatprep.subr.bf16.mxu0 %v9584_v54  ;;  %v6318_v36 = vld [vmem:[#allocation14 + $0x670] sm:$0xff]  ;;  %v6311_v54 = vld [vmem:[#allocation14 + $0x638] sm:$0xff] }
0x14a6   : > { %v9570_v29 = vcombine.high %v6310_v16, %v6318_v36  ;;  %v9569_v20 = vcombine.low %v6310_v16, %v6318_v36  ;;  %v9571_v15 = vcombine.low %v6311_v54, %v6319_v21  ;;  %v10922_v22 = vld [vmem:[#allocation15 + $0x4d8] sm:$0xff]   ;;  %v10928_v16 = vld [vmem:[#allocation15 + $0x4a0] sm:$0xff]   ;;  %v10929_v36 = vld [vmem:[#allocation15 + $0x468] sm:$0xff]  }
0x14a8   : > { %7277 = vmatpush1.bf16.msra.mxu1 %v9581_v0  ;;  %7320 = vmatpush1.bf16.msra.mxu0 %v9583_v25  ;;  %v6326_v0 = vld [vmem:[#allocation14 + $0x6b0] sm:$0xff] }
0x14a9   : > { %7278 = vmatprep.subr.bf16.mxu1 %v9598_v9  ;;  %7321 = vmatprep.subr.bf16.mxu0 %v9600_v46  ;;  %v6334_v25 = vld [vmem:[#allocation14 + $0x6f0] sm:$0xff]  ;;  %v6327_v9 = vld [vmem:[#allocation14 + $0x6b8] sm:$0xff] }
0x14aa   : > { %v6335_v46 = vld [vmem:[#allocation14 + $0x6f8] sm:$0xff]  ;;  %v9586_v44 = vcombine.high %v6326_v0, %v6334_v25  ;;  %v9585_v41 = vcombine.low %v6326_v0, %v6334_v25  ;;  %v10936_v0 = vld [vmem:[#allocation15 + $0x4b0] sm:$0xff]  }
0x14ab   : > { %v9588_v60 = vcombine.high %v6327_v9, %v6335_v46  ;;  %v9587_v37 = vcombine.low %v6327_v9, %v6335_v46  ;;  %v10937_v25 = vld [vmem:[#allocation15 + $0x478] sm:$0xff]  }
0x14ac   : > { %7279 = vmatpush1.bf16.msra.mxu1 %v9597_v12  ;;  %7322 = vmatpush1.bf16.msra.mxu0 %v9599_v38  ;;  %v6342_v12 = vld [vmem:[#allocation14 + $0x730] sm:$0xff]  ;;  %v10938_v9 = vld [vmem:[#allocation15 + $0x4f8] sm:$0xff]  }
0x14ad   : > { %7280 = vmatprep.subr.bf16.mxu1 %v9614_v48  ;;  %7323 = vmatprep.subr.bf16.mxu0 %v9616_v6  ;;  %v6350_v38 = vld [vmem:[#allocation14 + $0x770] sm:$0xff]  ;;  %v6343_v48 = vld [vmem:[#allocation14 + $0x738] sm:$0xff] }
0x14ae   : > { %v6351_v6 = vld [vmem:[#allocation14 + $0x778] sm:$0xff]  ;;  %v9602_v3 = vcombine.high %v6342_v12, %v6350_v38  ;;  %v9601_v58 = vcombine.low %v6342_v12, %v6350_v38 }
0x14af   : > { %v9604_v4 = vcombine.high %v6343_v48, %v6351_v6  ;;  %v9603_v57 = vcombine.low %v6343_v48, %v6351_v6  ;;  %v10939_v46 = vld [vmem:[#allocation15 + $0x438] sm:$0xff]  }
0x14b0   : > { %7281 = vmatpush1.bf16.msra.mxu1 %v9613_v53  ;;  %7324 = vmatpush1.bf16.msra.mxu0 %v9615_v40  ;;  %v6358_v53 = vld [vmem:[#allocation14 + $0x7b0] sm:$0xff] }
0x14b1   : > { %7352 = vmatprep.subr.bf16.mxu1 %v9506_v27  ;;  %7395 = vmatprep.subr.bf16.mxu0 %v9508_v35  ;;  %v6366_v40 = vld [vmem:[#allocation14 + $0x7f0] sm:$0xff]  ;;  %v6359_v27 = vld [vmem:[#allocation14 + $0x7b8] sm:$0xff] }
0x14b2   : > { %v6367_v35 = vld [vmem:[#allocation14 + $0x7f8] sm:$0xff]  ;;  %v9618_v8 = vcombine.high %v6358_v53, %v6366_v40 }
0x14b3   : > { %7299 = vmatmul.mubr.bf16.vlgmr.msra.gmra.mrb[124].mxu1 %v12722_v30  ;;  %7342 = vmatmul.mubr.bf16.vlgmr.msra.gmra.mrb[108].mxu0 %v12722_v30  ;;  %v9620_v61 = vcombine.high %v6359_v27, %v6367_v35 }
0x14b4   : > { %7353 = vmatpush1.bf16.msra.mxu1 %v9505_v52  ;;  %7396 = vmatpush1.bf16.msra.mxu0 %v9507_v17  ;;  %v9617_v52 = vcombine.low %v6358_v53, %v6366_v40  ;;  %v9619_v17 = vcombine.low %v6359_v27, %v6367_v35 }
0x14b5   : > { %7354 = vmatprep.subr.bf16.mxu1 %v9522_v51  ;;  %7397 = vmatprep.subr.bf16.mxu0 %v9524_v47  ;;  %v10909_v51 = vld [vmem:[#allocation15 + $0x440] sm:$0xff]  }
0x14b6   : > { %7384 = vmatprep.mubr.bf16.mxu1 %v11517_v1  ;;  %7427 = vmatprep.mubr.bf16.mxu0 %v11517_v1  ;;  %v9572_v1 = vcombine.high %v6311_v54, %v6319_v21  ;;  %v10910_v47 = vld [vmem:[#allocation15 + $0x4c0] sm:$0xff]   ;;  %v10930_v54 = vld [vmem:[#allocation15 + $0x4e8] sm:$0xff]  }
0x14b7   : > { %v10931_v21 = vld [vmem:[#allocation15 + $0x428] sm:$0xff]  }
0x14b8   : > { %7355 = vmatpush1.bf16.msra.mxu1 %v9521_v33  ;;  %7398 = vmatpush1.bf16.msra.mxu0 %v9523_v31  ;;  %v10915_v33 = vld [vmem:[#allocation15 + $0x408] sm:$0xff]  }
0x14b9   : > { %7356 = vmatprep.subr.bf16.mxu1 %v9538_v43  ;;  %7399 = vmatprep.subr.bf16.mxu0 %v9540_v45  ;;  %v10916_v31 = vld [vmem:[#allocation15 + $0x488] sm:$0xff]   ;;  %v10917_v43 = vld [vmem:[#allocation15 + $0x450] sm:$0xff]  }
0x14ba   : > { %v10918_v45 = vld [vmem:[#allocation15 + $0x4d0] sm:$0xff]  }
0x14bc   : > { %7357 = vmatpush1.bf16.msra.mxu1 %v9537_v39  ;;  %7400 = vmatpush1.bf16.msra.mxu0 %v9539_v11  ;;  %v10923_v39 = vld [vmem:[#allocation15 + $0x418] sm:$0xff]   ;;  %v10925_v11 = vld [vmem:[#allocation15 + $0x460] sm:$0xff]  }
0x14bd   : > { %7358 = vmatprep.subr.bf16.mxu1 %v9554_v13  ;;  %7401 = vmatprep.subr.bf16.mxu0 %v9556_v18  ;;  %v10926_v13 = vld [vmem:[#allocation15 + $0x4e0] sm:$0xff]  }
0x14be   : > { %v10927_v18 = vld [vmem:[#allocation15 + $0x420] sm:$0xff]  }
0x14c0   : > { %7359 = vmatpush1.bf16.msra.mxu1 %v9553_v55  ;;  %7402 = vmatpush1.bf16.msra.mxu0 %v9555_v59  ;;  %v10932_v55 = vld [vmem:[#allocation15 + $0x4a8] sm:$0xff]   ;;  %v10933_v59 = vld [vmem:[#allocation15 + $0x470] sm:$0xff]  }
0x14c1   : > { %7360 = vmatprep.subr.bf16.mxu1 %v9570_v29  ;;  %7403 = vmatprep.subr.bf16.mxu0 %v9572_v1  ;;  %v10934_v29 = vld [vmem:[#allocation15 + $0x4f0] sm:$0xff]  }
0x14c2   : > { %v10935_v1 = vld [vmem:[#allocation15 + $0x430] sm:$0xff]  }
0x14c4   : > { %7361 = vmatpush1.bf16.msra.mxu1 %v9569_v20  ;;  %7404 = vmatpush1.bf16.msra.mxu0 %v9571_v15  ;;  %v10940_v20 = vld [vmem:[#allocation15 + $0x4b8] sm:$0xff]   ;;  %v10941_v15 = vld [vmem:[#allocation15 + $0x540] sm:$0xff]  }
0x14c5   : > { %7362 = vmatprep.subr.bf16.mxu1 %v9586_v44  ;;  %7405 = vmatprep.subr.bf16.mxu0 %v9588_v60  ;;  %v10942_v44 = vld [vmem:[#allocation15 + $0x5c0] sm:$0xff]  }
0x14c6   : > { %v12741_v60 = vld [vmem:[%s12856_s9 + $0x10] sm:$0xff] }
0x14c7   : > { %v6377_v12 = vrot.slane %v12741_v60, %v11959_v32  ;;  %v6385_v38 = vrot.slane %v12741_v60, %v11986_v50  ;;  %v6381_v48 = vrot.slane %v12741_v60, %v11962_v34  ;;  %v6389_v6 = vrot.slane %v12741_v60, %v12330_v10 }
0x14c8   : > { %7363 = vmatpush1.bf16.msra.mxu1 %v9585_v41  ;;  %7406 = vmatpush1.bf16.msra.mxu0 %v9587_v37 }
0x14c9   : > { %7364 = vmatprep.subr.bf16.mxu1 %v9602_v3  ;;  %7407 = vmatprep.subr.bf16.mxu0 %v9604_v4 }
0x14cc   : > { %7365 = vmatpush1.bf16.msra.mxu1 %v9601_v58  ;;  %7408 = vmatpush1.bf16.msra.mxu0 %v9603_v57 }
0x14cd   : > { %7366 = vmatprep.subr.bf16.mxu1 %v9618_v8  ;;  %7409 = vmatprep.subr.bf16.mxu0 %v9620_v61 }
0x14d0   : > { %7367 = vmatpush1.bf16.msra.mxu1 %v9617_v52  ;;  %7410 = vmatpush1.bf16.msra.mxu0 %v9619_v17 }
0x14d1   : > { %10035 = vmatprep.subr.bf16.mxu1 %v10909_v51  ;;  %10057 = vmatprep.subr.bf16.mxu0 %v10910_v47 }
0x14d3   : > { %7385 = vmatmul.mubr.bf16.vlgmr.msra.gmra.mrb[128].mxu1 %v12722_v30  ;;  %7428 = vmatmul.mubr.bf16.vlgmr.msra.gmra.mrb[112].mxu0 %v12722_v30  ;;  %v10924_v30 = vld [vmem:[#allocation15 + $0x498] sm:$0xff]  }
0x14d4   : > { %10036 = vmatpush3.bf16.msra.mxu1 %v10911_v26  ;;  %10058 = vmatpush3.bf16.msra.mxu0 %v10912_v62 }
0x14d5   : > { %10037 = vmatprep.subr.bf16.mxu1 %v10913_v5  ;;  %10059 = vmatprep.subr.bf16.mxu0 %v10914_v42 }
0x14d8   : > { %10038 = vmatpush3.bf16.msra.mxu1 %v10915_v33  ;;  %10060 = vmatpush3.bf16.msra.mxu0 %v10916_v31 }
0x14d9   : > { %10039 = vmatprep.subr.bf16.mxu1 %v10917_v43  ;;  %10061 = vmatprep.subr.bf16.mxu0 %v10918_v45 }
0x14dc   : > { %10040 = vmatpush3.bf16.msra.mxu1 %v10919_v49  ;;  %10062 = vmatpush3.bf16.msra.mxu0 %v10920_v19 }
0x14dd   : > { %10041 = vmatprep.subr.bf16.mxu1 %v10921_v7  ;;  %10063 = vmatprep.subr.bf16.mxu0 %v10922_v22 }
0x14e0   : > { %10042 = vmatpush3.bf16.msra.mxu1 %v10923_v39  ;;  %10064 = vmatpush3.bf16.msra.mxu0 %v10924_v30  ;;  %v10943_v39 = vld [vmem:[#allocation15 + $0x500] sm:$0xff]  }
0x14e1   : > { %10043 = vmatprep.subr.bf16.mxu1 %v10925_v11  ;;  %10065 = vmatprep.subr.bf16.mxu0 %v10926_v13  ;;  %v10944_v30 = vld [vmem:[#allocation15 + $0x580] sm:$0xff]   ;;  %v10945_v11 = vld [vmem:[#allocation15 + $0x548] sm:$0xff]  }
0x14e2   : > { %v10946_v13 = vld [vmem:[#allocation15 + $0x5c8] sm:$0xff]  }
0x14e4   : > { %10044 = vmatpush3.bf16.msra.mxu1 %v10927_v18  ;;  %10066 = vmatpush3.bf16.msra.mxu0 %v10928_v16  ;;  %v10947_v18 = vld [vmem:[#allocation15 + $0x508] sm:$0xff]  }
0x14e5   : > { %10045 = vmatprep.subr.bf16.mxu1 %v10929_v36  ;;  %10067 = vmatprep.subr.bf16.mxu0 %v10930_v54  ;;  %v10948_v16 = vld [vmem:[#allocation15 + $0x588] sm:$0xff]   ;;  %v10949_v36 = vld [vmem:[#allocation15 + $0x550] sm:$0xff]  }
0x14e6   : > { %v10950_v54 = vld [vmem:[#allocation15 + $0x5d0] sm:$0xff]  }
0x14e8   : > { %10046 = vmatpush3.bf16.msra.mxu1 %v10931_v21  ;;  %10068 = vmatpush3.bf16.msra.mxu0 %v10932_v55  ;;  %v10951_v21 = vld [vmem:[#allocation15 + $0x510] sm:$0xff]  }
0x14e9   : > { %10047 = vmatprep.subr.bf16.mxu1 %v10933_v59  ;;  %10069 = vmatprep.subr.bf16.mxu0 %v10934_v29  ;;  %v10952_v55 = vld [vmem:[#allocation15 + $0x590] sm:$0xff]   ;;  %v10953_v59 = vld [vmem:[#allocation15 + $0x558] sm:$0xff]  }
0x14ea   : > { %v10954_v29 = vld [vmem:[#allocation15 + $0x5d8] sm:$0xff]  }
0x14ec   : > { %10048 = vmatpush3.bf16.msra.mxu1 %v10935_v1  ;;  %10070 = vmatpush3.bf16.msra.mxu0 %v10936_v0  ;;  %v10955_v1 = vld [vmem:[#allocation15 + $0x518] sm:$0xff]  }
0x14ed   : > { %10049 = vmatprep.subr.bf16.mxu1 %v10937_v25  ;;  %10071 = vmatprep.subr.bf16.mxu0 %v10938_v9  ;;  %v10956_v0 = vld [vmem:[#allocation15 + $0x598] sm:$0xff]   ;;  %v10957_v25 = vld [vmem:[#allocation15 + $0x560] sm:$0xff]  }
0x14ee   : > { %v10958_v9 = vld [vmem:[#allocation15 + $0x5e0] sm:$0xff]  }
0x14f0   : > { %10050 = vmatpush3.bf16.msra.mxu1 %v10939_v46  ;;  %10072 = vmatpush3.bf16.msra.mxu0 %v10940_v20  ;;  %v10959_v46 = vld [vmem:[#allocation15 + $0x520] sm:$0xff]  }
0x14f1   : > { %10079 = vmatprep.subr.bf16.mxu1 %v10941_v15  ;;  %10101 = vmatprep.subr.bf16.mxu0 %v10942_v44  ;;  %v10960_v20 = vld [vmem:[#allocation15 + $0x5a0] sm:$0xff]   ;;  %v10961_v15 = vld [vmem:[#allocation15 + $0x568] sm:$0xff]  }
0x14f2   : > { %v10962_v44 = vld [vmem:[#allocation15 + $0x5e8] sm:$0xff]  }
0x1546   : > { %v7128_v41 = vpop.f32.mrb[116].mxu1  ;;  %v7171_v37 = vpop.f32.mrb[100].mxu0 }
0x1547   : > { %v7129_v3 = vadd.f32 %v7128_v41, %v6377_v12  ;;  %v7172_v4 = vadd.f32 %v7171_v37, %v6385_v38  ;;  %v7130_v53 = vpop.f32.mrb[117].mxu1  ;;  %v7173_v40 = vpop.f32.mrb[101].mxu0  ;;  %v10965_v41 = vld [vmem:[#allocation15 + $0x570] sm:$0xff]  }
0x1548   : > { %v7131_v27 = vadd.f32 %v7130_v53, %v6381_v48  ;;  %v7174_v35 = vadd.f32 %v7173_v40, %v6389_v6  ;;  %v7132_v58 = vpop.f32.mrb[118].mxu1  ;;  %v7175_v57 = vpop.f32.mrb[102].mxu0  ;;  %v10966_v37 = vld [vmem:[#allocation15 + $0x5f0] sm:$0xff]  }
0x1549   : > { %v7133_v8 = vadd.f32 %v7132_v58, %v6377_v12  ;;  %v7176_v61 = vadd.f32 %v7175_v57, %v6385_v38  ;;  %v7134_v52 = vpop.f32.mrb[119].mxu1  ;;  %v7177_v17 = vpop.f32.mrb[103].mxu0  ;;  %v7438_v26 = vmax.f32 %v7129_v3, 0.0  ;;  %v7440_v62 = vmax.f32 %v7172_v4, 0.0  ;;  %v10963_v12 = vld [vmem:[#allocation15 + $0x528] sm:$0xff]  }
0x154a   : > { %v7135_v51 = vadd.f32 %v7134_v52, %v6381_v48  ;;  %v7178_v47 = vadd.f32 %v7177_v17, %v6389_v6  ;;  %v7439_v33 = vmax.f32 %v7131_v27, 0.0  ;;  %v7441_v31 = vmax.f32 %v7174_v35, 0.0  ;;  %v10964_v38 = vld [vmem:[#allocation15 + $0x5a8] sm:$0xff]   ;;  %v10967_v27 = vld [vmem:[#allocation15 + $0x530] sm:$0xff]   ;;  %v10969_v52 = vld [vmem:[#allocation15 + $0x578] sm:$0xff]  }
0x154b   : > { %v7454_v5 = vmax.f32 %v7133_v8, 0.0  ;;  %v7456_v42 = vmax.f32 %v7176_v61, 0.0  ;;  %v6393_v48 = vrot.slane %v12741_v60, %v12341_v56  ;;  %v6401_v6 = vrot.slane %v12741_v60, %v12344_v23  ;;  %v10968_v35 = vld [vmem:[#allocation15 + $0x5b0] sm:$0xff]   ;;  %v10970_v17 = vld [vmem:[#allocation15 + $0x5f8] sm:$0xff]  }
0x154c   : > { %v7455_v43 = vmax.f32 %v7135_v51, 0.0  ;;  %v7457_v45 = vmax.f32 %v7178_v47, 0.0  ;;  %v6397_v3 = vrot.slane %v12741_v60, %v12347_v24  ;;  %v6405_v4 = vrot.slane %v12741_v60, %v12350_v28 }
0x154d   : > { %v7727_v49 = vpack.c.bf16 %v7454_v5, %v7438_v26  ;;  %v7729_v19 = vpack.c.bf16 %v7456_v42, %v7440_v62 }
0x154e   : > { %v7728_v7 = vpack.c.bf16 %v7455_v43, %v7439_v33  ;;  %v7730_v22 = vpack.c.bf16 %v7457_v45, %v7441_v31  ;;  %v10971_v45 = vld [vmem:[#allocation15 + $0x538] sm:$0xff]  }
0x1550   : > { %8551 = vmatprep.mubr.bf16.mxu1 %v7728_v7  ;;  %8592 = vmatprep.mubr.bf16.mxu0 %v7730_v22 }
0x1551   : > { %8552 = vmatmul.mubr.bf16.vlgmr.msra.gmra.mrb[132].mxu1 %v7727_v49  ;;  %8593 = vmatmul.mubr.bf16.vlgmr.msra.gmra.mrb[116].mxu0 %v7729_v19  ;;  %v10972_v49 = vld [vmem:[#allocation15 + $0x5b8] sm:$0xff]  }
0x1552   : > { %10080 = vmatpush3.bf16.msra.mxu1 %v10943_v39  ;;  %10102 = vmatpush3.bf16.msra.mxu0 %v10944_v30  ;;  %v10973_v30 = vld [vmem:[#allocation15 + $0x640] sm:$0xff]  }
0x1553   : > { %10081 = vmatprep.subr.bf16.mxu1 %v10945_v11  ;;  %10103 = vmatprep.subr.bf16.mxu0 %v10946_v13  ;;  %v10974_v11 = vld [vmem:[#allocation15 + $0x6c0] sm:$0xff]  }
0x1556   : > { %10082 = vmatpush3.bf16.msra.mxu1 %v10947_v18  ;;  %10104 = vmatpush3.bf16.msra.mxu0 %v10948_v16 }
0x1557   : > { %10083 = vmatprep.subr.bf16.mxu1 %v10949_v36  ;;  %10105 = vmatprep.subr.bf16.mxu0 %v10950_v54 }
0x155a   : > { %10084 = vmatpush3.bf16.msra.mxu1 %v10951_v21  ;;  %10106 = vmatpush3.bf16.msra.mxu0 %v10952_v55 }
0x155b   : > { %10085 = vmatprep.subr.bf16.mxu1 %v10953_v59  ;;  %10107 = vmatprep.subr.bf16.mxu0 %v10954_v29  ;;  %v10975_v29 = vld [vmem:[#allocation15 + $0x600] sm:$0xff]  }
0x155e   : > { %10086 = vmatpush3.bf16.msra.mxu1 %v10955_v1  ;;  %10108 = vmatpush3.bf16.msra.mxu0 %v10956_v0  ;;  %v10976_v1 = vld [vmem:[#allocation15 + $0x680] sm:$0xff]   ;;  %v10977_v0 = vld [vmem:[#allocation15 + $0x648] sm:$0xff]  }
0x155f   : > { %10087 = vmatprep.subr.bf16.mxu1 %v10957_v25  ;;  %10109 = vmatprep.subr.bf16.mxu0 %v10958_v9  ;;  %v10978_v25 = vld [vmem:[#allocation15 + $0x6c8] sm:$0xff]  }
0x1560   : > { %v10979_v9 = vld [vmem:[#allocation15 + $0x608] sm:$0xff]  }
0x1562   : > { %10088 = vmatpush3.bf16.msra.mxu1 %v10959_v46  ;;  %10110 = vmatpush3.bf16.msra.mxu0 %v10960_v20  ;;  %v10980_v46 = vld [vmem:[#allocation15 + $0x688] sm:$0xff]   ;;  %v10981_v20 = vld [vmem:[#allocation15 + $0x650] sm:$0xff]  }
0x1563   : > { %10089 = vmatprep.subr.bf16.mxu1 %v10961_v15  ;;  %10111 = vmatprep.subr.bf16.mxu0 %v10962_v44  ;;  %v10982_v15 = vld [vmem:[#allocation15 + $0x6d0] sm:$0xff]  }
0x1564   : > { %v10983_v44 = vld [vmem:[#allocation15 + $0x610] sm:$0xff]  }
0x1566   : > { %v7214_v53 = vpop.f32.mrb[120].mxu1  ;;  %v7257_v40 = vpop.f32.mrb[104].mxu0  ;;  %10090 = vmatpush3.bf16.msra.mxu1 %v10963_v12  ;;  %10112 = vmatpush3.bf16.msra.mxu0 %v10964_v38  ;;  %v10984_v12 = vld [vmem:[#allocation15 + $0x690] sm:$0xff]   ;;  %v10985_v38 = vld [vmem:[#allocation15 + $0x658] sm:$0xff]  }
0x1567   : > { %v7215_v58 = vadd.f32 %v7214_v53, %v6393_v48  ;;  %v7258_v57 = vadd.f32 %v7257_v40, %v6401_v6  ;;  %v7216_v8 = vpop.f32.mrb[121].mxu1  ;;  %v7259_v61 = vpop.f32.mrb[105].mxu0  ;;  %10091 = vmatprep.subr.bf16.mxu1 %v10965_v41  ;;  %10113 = vmatprep.subr.bf16.mxu0 %v10966_v37  ;;  %v10988_v41 = vld [vmem:[#allocation15 + $0x698] sm:$0xff]   ;;  %v10989_v37 = vld [vmem:[#allocation15 + $0x660] sm:$0xff]   ;;  %v10993_v40 = vld [vmem:[#allocation15 + $0x668] sm:$0xff]  }
0x1568   : > { %v7217_v51 = vadd.f32 %v7216_v8, %v6397_v3  ;;  %v7260_v47 = vadd.f32 %v7259_v61, %v6405_v4  ;;  %v7218_v26 = vpop.f32.mrb[122].mxu1  ;;  %v7261_v62 = vpop.f32.mrb[106].mxu0  ;;  %v10992_v53 = vld [vmem:[#allocation15 + $0x6a0] sm:$0xff]  }
0x1569   : > { %v7219_v5 = vadd.f32 %v7218_v26, %v6393_v48  ;;  %v7262_v60 = vadd.f32 %v7261_v62, %v6401_v6  ;;  %v7220_v42 = vpop.f32.mrb[123].mxu1  ;;  %v7263_v33 = vpop.f32.mrb[107].mxu0  ;;  %v7442_v19 = vmax.f32 %v7215_v58, 0.0  ;;  %v7444_v7 = vmax.f32 %v7258_v57, 0.0  ;;  %v10986_v48 = vld [vmem:[#allocation15 + $0x6d8] sm:$0xff]   ;;  %v10995_v58 = vld [vmem:[#allocation15 + $0x628] sm:$0xff]  }
0x156a   : > { %v7221_v31 = vadd.f32 %v7220_v42, %v6397_v3  ;;  %v7264_v43 = vadd.f32 %v7263_v33, %v6405_v4  ;;  %10092 = vmatpush3.bf16.msra.mxu1 %v10967_v27  ;;  %10114 = vmatpush3.bf16.msra.mxu0 %v10968_v35  ;;  %v7443_v13 = vmax.f32 %v7217_v51, 0.0  ;;  %v7445_v18 = vmax.f32 %v7260_v47, 0.0  ;;  %v10987_v6 = vld [vmem:[#allocation15 + $0x618] sm:$0xff]   ;;  %v10990_v3 = vld [vmem:[#allocation15 + $0x6e0] sm:$0xff]   ;;  %v10994_v27 = vld [vmem:[#allocation15 + $0x6e8] sm:$0xff]  }
0x156b   : > { %v7458_v22 = vmax.f32 %v7219_v5, 0.0  ;;  %v7460_v39 = vmax.f32 %v7262_v60, 0.0  ;;  %10093 = vmatprep.subr.bf16.mxu1 %v10969_v52  ;;  %10115 = vmatprep.subr.bf16.mxu0 %v10970_v17  ;;  %v10991_v4 = vld [vmem:[#allocation15 + $0x620] sm:$0xff]   ;;  %v12762_v35 = vld [vmem:[%s12856_s9 + $0x18] sm:$0xff] }
0x156c   : > { %v7459_v16 = vmax.f32 %v7221_v31, 0.0  ;;  %v7461_v36 = vmax.f32 %v7264_v43, 0.0  ;;  %v10996_v57 = vld [vmem:[#allocation15 + $0x6a8] sm:$0xff]   ;;  %v6409_v8 = vrot.slane %v12762_v35, %v11959_v32  ;;  %v6417_v61 = vrot.slane %v12762_v35, %v11986_v50  ;;  %v10997_v52 = vld [vmem:[#allocation15 + $0x670] sm:$0xff]   ;;  %v11001_v50 = vld [vmem:[#allocation15 + $0x678] sm:$0xff]  }
0x156d   : > { %v7731_v54 = vpack.c.bf16 %v7458_v22, %v7442_v19  ;;  %v7733_v21 = vpack.c.bf16 %v7460_v39, %v7444_v7  ;;  %v10998_v17 = vld [vmem:[#allocation15 + $0x6f0] sm:$0xff]   ;;  %v6413_v51 = vrot.slane %v12762_v35, %v11962_v34  ;;  %v6421_v47 = vrot.slane %v12762_v35, %v12330_v10 }
0x156e   : > { %v7732_v55 = vpack.c.bf16 %v7459_v16, %v7443_v13  ;;  %v7734_v59 = vpack.c.bf16 %v7461_v36, %v7445_v18  ;;  %10094 = vmatpush3.bf16.msra.mxu1 %v10971_v45  ;;  %10116 = vmatpush3.bf16.msra.mxu0 %v10972_v49  ;;  %v10999_v5 = vld [vmem:[#allocation15 + $0x630] sm:$0xff]   ;;  %v11002_v45 = vld [vmem:[#allocation15 + $0x6f8] sm:$0xff]  }
0x156f   : > { %10123 = vmatprep.subr.bf16.mxu1 %v10973_v30  ;;  %10145 = vmatprep.subr.bf16.mxu0 %v10974_v11  ;;  %v11000_v60 = vld [vmem:[#allocation15 + $0x6b0] sm:$0xff]   ;;  %v11003_v18 = vld [vmem:[#allocation15 + $0x638] sm:$0xff]  }
0x1570   : > { %8633 = vmatprep.mubr.bf16.mxu1 %v7732_v55  ;;  %8674 = vmatprep.mubr.bf16.mxu0 %v7734_v59  ;;  %v11004_v16 = vld [vmem:[#allocation15 + $0x6b8] sm:$0xff]   ;;  %v11005_v59 = vld [vmem:[#allocation15 + $0x740] sm:$0xff]  }
0x1571   : > { %8634 = vmatmul.mubr.bf16.vlgmr.msra.gmra.mrb[136].mxu1 %v7731_v54  ;;  %8675 = vmatmul.mubr.bf16.vlgmr.msra.gmra.mrb[120].mxu0 %v7733_v21 }
0x1572   : > { %10124 = vmatpush3.bf16.msra.mxu1 %v10975_v29  ;;  %10146 = vmatpush3.bf16.msra.mxu0 %v10976_v1  ;;  %v11006_v29 = vld [vmem:[#allocation15 + $0x7c0] sm:$0xff]  }
0x1573   : > { %10125 = vmatprep.subr.bf16.mxu1 %v10977_v0  ;;  %10147 = vmatprep.subr.bf16.mxu0 %v10978_v25 }
0x1576   : > { %10126 = vmatpush3.bf16.msra.mxu1 %v10979_v9  ;;  %10148 = vmatpush3.bf16.msra.mxu0 %v10980_v46 }
0x1577   : > { %10127 = vmatprep.subr.bf16.mxu1 %v10981_v20  ;;  %10149 = vmatprep.subr.bf16.mxu0 %v10982_v15 }
0x157a   : > { %10128 = vmatpush3.bf16.msra.mxu1 %v10983_v44  ;;  %10150 = vmatpush3.bf16.msra.mxu0 %v10984_v12  ;;  %v11007_v12 = vld [vmem:[#allocation15 + $0x700] sm:$0xff]  }
0x157b   : > { %10129 = vmatprep.subr.bf16.mxu1 %v10985_v38  ;;  %10151 = vmatprep.subr.bf16.mxu0 %v10986_v48  ;;  %v11008_v38 = vld [vmem:[#allocation15 + $0x780] sm:$0xff]   ;;  %v11009_v48 = vld [vmem:[#allocation15 + $0x748] sm:$0xff]  }
0x157e   : > { %10130 = vmatpush3.bf16.msra.mxu1 %v10987_v6  ;;  %10152 = vmatpush3.bf16.msra.mxu0 %v10988_v41  ;;  %v11010_v6 = vld [vmem:[#allocation15 + $0x7c8] sm:$0xff]  }
0x157f   : > { %10131 = vmatprep.subr.bf16.mxu1 %v10989_v37  ;;  %10153 = vmatprep.subr.bf16.mxu0 %v10990_v3  ;;  %v11011_v41 = vld [vmem:[#allocation15 + $0x708] sm:$0xff]   ;;  %v11013_v3 = vld [vmem:[#allocation15 + $0x750] sm:$0xff]  }
0x1580   : > { %v11012_v37 = vld [vmem:[#allocation15 + $0x788] sm:$0xff]  }
0x1582   : > { %10132 = vmatpush3.bf16.msra.mxu1 %v10991_v4  ;;  %10154 = vmatpush3.bf16.msra.mxu0 %v10992_v53  ;;  %v11014_v4 = vld [vmem:[#allocation15 + $0x7d0] sm:$0xff]  }
0x1583   : > { %10133 = vmatprep.subr.bf16.mxu1 %v10993_v40  ;;  %10155 = vmatprep.subr.bf16.mxu0 %v10994_v27  ;;  %v11015_v53 = vld [vmem:[#allocation15 + $0x710] sm:$0xff]   ;;  %v11017_v27 = vld [vmem:[#allocation15 + $0x758] sm:$0xff]  }
0x1584   : > { %v11016_v40 = vld [vmem:[#allocation15 + $0x790] sm:$0xff]  }
0x1586   : > { %v7300_v26 = vpop.f32.mrb[124].mxu1  ;;  %v7343_v62 = vpop.f32.mrb[108].mxu0  ;;  %10134 = vmatpush3.bf16.msra.mxu1 %v10995_v58  ;;  %10156 = vmatpush3.bf16.msra.mxu0 %v10996_v57  ;;  %v11018_v58 = vld [vmem:[#allocation15 + $0x7d8] sm:$0xff]  }
0x1587   : > { %v7301_v42 = vadd.f32 %v7300_v26, %v6409_v8  ;;  %v7344_v33 = vadd.f32 %v7343_v62, %v6417_v61  ;;  %v7302_v31 = vpop.f32.mrb[125].mxu1  ;;  %v7345_v43 = vpop.f32.mrb[109].mxu0  ;;  %10135 = vmatprep.subr.bf16.mxu1 %v10997_v52  ;;  %10157 = vmatprep.subr.bf16.mxu0 %v10998_v17  ;;  %v11019_v57 = vld [vmem:[#allocation15 + $0x718] sm:$0xff]   ;;  %v11022_v52 = vld [vmem:[#allocation15 + $0x7e0] sm:$0xff]   ;;  %v11026_v26 = vld [vmem:[#allocation15 + $0x7e8] sm:$0xff]  }
0x1588   : > { %v7303_v49 = vadd.f32 %v7302_v31, %v6413_v51  ;;  %v7346_v19 = vadd.f32 %v7345_v43, %v6421_v47  ;;  %v7304_v34 = vpop.f32.mrb[126].mxu1  ;;  %v7347_v7 = vpop.f32.mrb[110].mxu0  ;;  %v11023_v17 = vld [vmem:[#allocation15 + $0x720] sm:$0xff]   ;;  %v11027_v62 = vld [vmem:[#allocation15 + $0x728] sm:$0xff]   ;;  %v11030_v31 = vld [vmem:[#allocation15 + $0x7f0] sm:$0xff]   ;;  %v6429_v43 = vrot.slane %v12762_v35, %v12347_v24 }
0x1589   : > { %v7305_v22 = vadd.f32 %v7304_v34, %v6409_v8  ;;  %v7348_v10 = vadd.f32 %v7347_v7, %v6417_v61  ;;  %v7306_v39 = vpop.f32.mrb[127].mxu1  ;;  %v7349_v30 = vpop.f32.mrb[111].mxu0  ;;  %v7446_v36 = vmax.f32 %v7301_v42, 0.0  ;;  %v7448_v54 = vmax.f32 %v7344_v33, 0.0  ;;  %v11020_v8 = vld [vmem:[#allocation15 + $0x798] sm:$0xff]   ;;  %v11021_v61 = vld [vmem:[#allocation15 + $0x760] sm:$0xff]  }
0x158a   : > { %v7307_v11 = vadd.f32 %v7306_v39, %v6413_v51  ;;  %v7350_v13 = vadd.f32 %v7349_v30, %v6421_v47  ;;  %10136 = vmatpush3.bf16.msra.mxu1 %v10999_v5  ;;  %10158 = vmatpush3.bf16.msra.mxu0 %v11000_v60  ;;  %v7447_v1 = vmax.f32 %v7303_v49, 0.0  ;;  %v7449_v0 = vmax.f32 %v7346_v19, 0.0  ;;  %v11024_v51 = vld [vmem:[#allocation15 + $0x7a0] sm:$0xff]   ;;  %v11025_v47 = vld [vmem:[#allocation15 + $0x768] sm:$0xff]   ;;  %v11029_v33 = vld [vmem:[#allocation15 + $0x770] sm:$0xff]  }
0x158b   : > { %v7462_v21 = vmax.f32 %v7305_v22, 0.0  ;;  %v7464_v55 = vmax.f32 %v7348_v10, 0.0  ;;  %10137 = vmatprep.subr.bf16.mxu1 %v11001_v50  ;;  %10159 = vmatprep.subr.bf16.mxu0 %v11002_v45  ;;  %v11028_v5 = vld [vmem:[#allocation15 + $0x7a8] sm:$0xff]   ;;  %v6425_v60 = vrot.slane %v12762_v35, %v12341_v56  ;;  %v6433_v42 = vrot.slane %v12762_v35, %v12344_v23  ;;  %v11031_v19 = vld [vmem:[#allocation15 + $0x730] sm:$0xff]   ;;  %v11033_v23 = vld [vmem:[#allocation15 + $0x778] sm:$0xff]  }
0x158c   : > { %v7463_v25 = vmax.f32 %v7307_v11, 0.0  ;;  %v7465_v9 = vmax.f32 %v7350_v13, 0.0  ;;  %v6437_v50 = vrot.slane %v12762_v35, %v12350_v28  ;;  %v11032_v34 = vld [vmem:[#allocation15 + $0x7b0] sm:$0xff]   ;;  %v11034_v39 = vld [vmem:[#allocation15 + $0x7f8] sm:$0xff]  }
0x158d   : > { %v7735_v46 = vpack.c.bf16 %v7462_v21, %v7446_v36  ;;  %v7737_v20 = vpack.c.bf16 %v7464_v55, %v7448_v54  ;;  %v11035_v21 = vld [vmem:[#allocation15 + $0x738] sm:$0xff]  }
0x158e   : > { %v7736_v15 = vpack.c.bf16 %v7463_v25, %v7447_v1  ;;  %v7738_v44 = vpack.c.bf16 %v7465_v9, %v7449_v0  ;;  %10138 = vmatpush3.bf16.msra.mxu1 %v11003_v18  ;;  %10160 = vmatpush3.bf16.msra.mxu0 %v11004_v16  ;;  %v11036_v55 = vld [vmem:[#allocation15 + $0x7b8] sm:$0xff]  }
0x158f   : > { %10167 = vmatprep.subr.bf16.mxu1 %v11005_v59  ;;  %10189 = vmatprep.subr.bf16.mxu0 %v11006_v29 }
0x1590   : > { %8715 = vmatprep.mubr.bf16.mxu1 %v7736_v15  ;;  %8756 = vmatprep.mubr.bf16.mxu0 %v7738_v44 }
0x1591   : > { %8716 = vmatmul.mubr.bf16.vlgmr.msra.gmra.mrb[140].mxu1 %v7735_v46  ;;  %8757 = vmatmul.mubr.bf16.vlgmr.msra.gmra.mrb[124].mxu0 %v7737_v20 }
0x1592   : > { %10168 = vmatpush3.bf16.msra.mxu1 %v11007_v12  ;;  %10190 = vmatpush3.bf16.msra.mxu0 %v11008_v38 }
0x1593   : > { %10169 = vmatprep.subr.bf16.mxu1 %v11009_v48  ;;  %10191 = vmatprep.subr.bf16.mxu0 %v11010_v6 }
0x1596   : > { %10170 = vmatpush3.bf16.msra.mxu1 %v11011_v41  ;;  %10192 = vmatpush3.bf16.msra.mxu0 %v11012_v37  ;;  %v9622_v41 = vld [vmem:[%s12919_s0 + $0x1] ss:$0 sm:$0xff]  ;;  %s11418_s0 = sshll.u32 %s11527_s28, 4  ;;  %s11419_s0 = int_to_ptr.vmem [resolvable:$false] %s11418_s0 }
0x1597   : > { %10171 = vmatprep.subr.bf16.mxu1 %v11013_v3  ;;  %10193 = vmatprep.subr.bf16.mxu0 %v11014_v4  ;;  %s11420_s1 = scalar_lea.vmem %s11419_s0, 32  ;;  %p11421_p8 = scmp.lt.s32.totalorder %s12805_s21, %s11419_s0 }
0x159a   : > { %10172 = vmatpush3.bf16.msra.mxu1 %v11015_v53  ;;  %10194 = vmatpush3.bf16.msra.mxu0 %v11016_v40 }
0x159b   : > { %10173 = vmatprep.subr.bf16.mxu1 %v11017_v27  ;;  %10195 = vmatprep.subr.bf16.mxu0 %v11018_v58 }
0x159e   : > { %10174 = vmatpush3.bf16.msra.mxu1 %v11019_v57  ;;  %10196 = vmatpush3.bf16.msra.mxu0 %v11020_v8 }
0x159f   : > { %10175 = vmatprep.subr.bf16.mxu1 %v11021_v61  ;;  %10197 = vmatprep.subr.bf16.mxu0 %v11022_v52 }
0x15a2   : > { %10176 = vmatpush3.bf16.msra.mxu1 %v11023_v17  ;;  %10198 = vmatpush3.bf16.msra.mxu0 %v11024_v51 }
0x15a3   : > { %10177 = vmatprep.subr.bf16.mxu1 %v11025_v47  ;;  %10199 = vmatprep.subr.bf16.mxu0 %v11026_v26 }
0x15a6   : > { %v7386_v45 = vpop.f32.mrb[128].mxu1  ;;  %v7429_v49 = vpop.f32.mrb[112].mxu0  ;;  %10178 = vmatpush3.bf16.msra.mxu1 %v11027_v62  ;;  %10200 = vmatpush3.bf16.msra.mxu0 %v11028_v5 }
0x15a7   : > { %v7387_v7 = vadd.f32 %v7386_v45, %v6425_v60  ;;  %v7430_v22 = vadd.f32 %v7429_v49, %v6433_v42  ;;  %v7388_v56 = vpop.f32.mrb[129].mxu1  ;;  %v7431_v10 = vpop.f32.mrb[113].mxu0  ;;  %10179 = vmatprep.subr.bf16.mxu1 %v11029_v33  ;;  %10201 = vmatprep.subr.bf16.mxu0 %v11030_v31 }
0x15a8   : > { %v7389_v30 = vadd.f32 %v7388_v56, %v6429_v43  ;;  %v7432_v11 = vadd.f32 %v7431_v10, %v6437_v50  ;;  %v7390_v24 = vpop.f32.mrb[130].mxu1  ;;  %v7433_v13 = vpop.f32.mrb[114].mxu0 }
0x15a9   : > { %v7391_v18 = vadd.f32 %v7390_v24, %v6425_v60  ;;  %v7434_v28 = vadd.f32 %v7433_v13, %v6433_v42  ;;  %v7392_v35 = vpop.f32.mrb[131].mxu1  ;;  %v7435_v16 = vpop.f32.mrb[115].mxu0  ;;  %v7450_v59 = vmax.f32 %v7387_v7, 0.0  ;;  %v7452_v29 = vmax.f32 %v7430_v22, 0.0 }
0x15aa   : > { %v7393_v36 = vadd.f32 %v7392_v35, %v6429_v43  ;;  %v7436_v54 = vadd.f32 %v7435_v16, %v6437_v50  ;;  %10180 = vmatpush3.bf16.msra.mxu1 %v11031_v19  ;;  %10202 = vmatpush3.bf16.msra.mxu0 %v11032_v34  ;;  %v7451_v25 = vmax.f32 %v7389_v30, 0.0  ;;  %v7453_v9 = vmax.f32 %v7432_v11, 0.0 }
0x15ab   : > { %v7466_v1 = vmax.f32 %v7391_v18, 0.0  ;;  %v7468_v0 = vmax.f32 %v7434_v28, 0.0  ;;  %10181 = vmatprep.subr.bf16.mxu1 %v11033_v23  ;;  %10203 = vmatprep.subr.bf16.mxu0 %v11034_v39 }
0x15ac   : > { %v7467_v46 = vmax.f32 %v7393_v36, 0.0  ;;  %v7469_v20 = vmax.f32 %v7436_v54, 0.0 }
0x15ad   : > { %v7739_v15 = vpack.c.bf16 %v7466_v1, %v7450_v59  ;;  %v7741_v44 = vpack.c.bf16 %v7468_v0, %v7452_v29 }
0x15ae   : > { %v7740_v12 = vpack.c.bf16 %v7467_v46, %v7451_v25  ;;  %v7742_v38 = vpack.c.bf16 %v7469_v20, %v7453_v9  ;;  %10182 = vmatpush3.bf16.msra.mxu1 %v11035_v21  ;;  %10204 = vmatpush3.bf16.msra.mxu0 %v11036_v55 }
0x15af   : > { %10485 = vmatprep.subr.bf16.mxu1 %v11518_v2 }
0x15b0   : > { %8797 = vmatprep.mubr.bf16.mxu1 %v7740_v12  ;;  %8838 = vmatprep.mubr.bf16.mxu0 %v7742_v38 }
0x15b1   : > { %8798 = vmatmul.mubr.bf16.vlgmr.msra.gmra.mrb[144].mxu1 %v7739_v15  ;;  %8839 = vmatmul.mubr.bf16.vlgmr.msra.gmra.mrb[128].mxu0 %v7741_v44 }
0x15b2   : > { %10487 = vmatprep.mubr.msk.bf16.mxu1 %vm11519_vm0, %v11518_v2 }
0x1624   : > { %v10051_v48 = vpop.f32.mrb[132].mxu1  ;;  %v10073_v6 = vpop.f32.mrb[116].mxu0 }
0x1625   : > { %v10052_v37 = vpop.f32.mrb[133].mxu1  ;;  %v10074_v3 = vpop.f32.mrb[117].mxu0 }
0x1626   : > { %v10053_v4 = vadd.f32 %v10052_v37, %v10051_v48  ;;  %v10075_v53 = vadd.f32 %v10074_v3, %v10073_v6  ;;  %v10054_v40 = vpop.f32.mrb[134].mxu1  ;;  %v10076_v27 = vpop.f32.mrb[118].mxu0 }
0x1627   : > { %v10055_v58 = vpop.f32.mrb[135].mxu1  ;;  %v10077_v57 = vpop.f32.mrb[119].mxu0 }
0x1628   : > { %v8554_v8 = vadd.f32 %v10053_v4, %v9622_v41  ;;  %v10056_v61 = vadd.f32 %v10055_v58, %v10054_v40  ;;  %v10078_v52 = vadd.f32 %v10077_v57, %v10076_v27 }
0x162a   : > { %v8595_v17 = vadd.f32 %v10075_v53, %v8554_v8  ;;  %v8557_v51 = vadd.f32 %v10056_v61, %v9622_v41 }
0x162c   : > { %v8598_v2 = vadd.f32 %v10078_v52, %v8557_v51 }
0x1644   : > { %v10095_v47 = vpop.f32.mrb[136].mxu1  ;;  %v10117_v26 = vpop.f32.mrb[120].mxu0 }
0x1645   : > { %v10096_v62 = vpop.f32.mrb[137].mxu1  ;;  %v10118_v5 = vpop.f32.mrb[121].mxu0 }
0x1646   : > { %v10097_v60 = vadd.f32 %v10096_v62, %v10095_v47  ;;  %v10119_v42 = vadd.f32 %v10118_v5, %v10117_v26  ;;  %v10098_v33 = vpop.f32.mrb[138].mxu1  ;;  %v10120_v31 = vpop.f32.mrb[122].mxu0  ;;  %v9753_v5 = vld [vmem:[%s12920_s30 + $0x1] ss:$0 sm:$0xff] }
0x1647   : > { %v10099_v43 = vpop.f32.mrb[139].mxu1  ;;  %v10121_v50 = vpop.f32.mrb[123].mxu0 }
0x1648   : > { %v8636_v45 = vadd.f32 %v10097_v60, %v8595_v17  ;;  %v10100_v49 = vadd.f32 %v10099_v43, %v10098_v33  ;;  %v10122_v19 = vadd.f32 %v10121_v50, %v10120_v31  ;;  %v8893_v17 = vld [vmem:[#allocation2] sm:$0x1]  ;;  %v9754_v43 = vld [vmem:[%s12921_s12 + $0x1] ss:$0 sm:$0xff] }
0x164a   : > { %v8677_v34 = vadd.f32 %v10119_v42, %v8636_v45  ;;  %v8639_v7 = vadd.f32 %v10100_v49, %v8598_v2 }
0x164c   : > { %v8680_v22 = vadd.f32 %v10122_v19, %v8639_v7 }
0x1664   : > { %v10139_v56 = vpop.f32.mrb[140].mxu1  ;;  %v10161_v10 = vpop.f32.mrb[124].mxu0 }
0x1665   : > { %v10140_v23 = vpop.f32.mrb[141].mxu1  ;;  %v10162_v39 = vpop.f32.mrb[125].mxu0 }
0x1666   : > { %v10141_v30 = vadd.f32 %v10140_v23, %v10139_v56  ;;  %v10163_v11 = vadd.f32 %v10162_v39, %v10161_v10  ;;  %v10142_v24 = vpop.f32.mrb[142].mxu1  ;;  %v10164_v13 = vpop.f32.mrb[126].mxu0 }
0x1667   : > { %v10143_v18 = vpop.f32.mrb[143].mxu1  ;;  %v10165_v28 = vpop.f32.mrb[127].mxu0 }
0x1668   : > { %v8718_v35 = vadd.f32 %v10141_v30, %v8677_v34  ;;  %v10144_v16 = vadd.f32 %v10143_v18, %v10142_v24  ;;  %v10166_v36 = vadd.f32 %v10165_v28, %v10164_v13  ;;  %v8891_v34 = vld [vmem:[%s12925_s27] sm:$0x1]  ;;  %s11414_s27 = scalar_lea.vmem %s12805_s21, 16 }
0x1669   : > { %p11415_p1 = scmp.ne.s32.totalorder %s12805_s21, %s11414_s27  ;;  %p11422_p7 = scmp.lt.s32.totalorder %s11420_s1, %s11414_s27 }
0x166a   : > { %v8759_v54 = vadd.f32 %v10163_v11, %v8718_v35  ;;  %v8721_v21 = vadd.f32 %v10144_v16, %v8680_v22 }
0x166b   : > { %p11416_p12 = pnand %p11415_p1, %p12927_p11  ;;  %p11423_p9 = por %p11422_p7, %p11421_p8 }
0x166c   : > { %v8762_v55 = vadd.f32 %v10166_v36, %v8721_v21 }
0x166d   : > { %p11417_p13 = pneg %p11416_p12 }
0x166f   : > { %p11424_p4 = pnand %p11423_p9, %p11417_p13 }
0x1684   : > { %v10183_v59 = vpop.f32.mrb[144].mxu1  ;;  %v10205_v29 = vpop.f32.mrb[128].mxu0 }
0x1685   : > { %v10184_v1 = vpop.f32.mrb[145].mxu1  ;;  %v10206_v0 = vpop.f32.mrb[129].mxu0 }
0x1686   : > { %v10185_v25 = vadd.f32 %v10184_v1, %v10183_v59  ;;  %v10207_v9 = vadd.f32 %v10206_v0, %v10205_v29  ;;  %v10186_v46 = vpop.f32.mrb[146].mxu1  ;;  %v10208_v20 = vpop.f32.mrb[130].mxu0 }
0x1687   : > { %v10187_v15 = vpop.f32.mrb[147].mxu1  ;;  %v10209_v44 = vpop.f32.mrb[131].mxu0 }
0x1688   : > { %v8800_v12 = vadd.f32 %v10185_v25, %v8759_v54  ;;  %v10188_v38 = vadd.f32 %v10187_v15, %v10186_v46  ;;  %v10210_v48 = vadd.f32 %v10209_v44, %v10208_v20 }
0x168a   : > { %v8841_v6 = vadd.f32 %v10207_v9, %v8800_v12  ;;  %v8803_v41 = vadd.f32 %v10188_v38, %v8762_v55 }
0x168c   : > { %v8844_v37 = vadd.f32 %v10210_v48, %v8803_v41  ;;  %v8847_v3 = vadd.f32 %v8841_v6, %v12716_v14 }
0x168e   : > { %8853 = vadd.xlane.f32.xlu1 %v8847_v3  ;;  %v8848_v4 = vadd.f32 %v8844_v37, %v12718_v63 }
0x1690   : > { %8855 = vadd.xlane.f32.xlu0 %v8848_v4 }
0x171b   : > { %v8854_v53 = vpop.xlane.xlu1 %8853 }
0x171c   : > { %v8857_v40 = vmul.f32 0.0078125, %v8854_v53 }
0x171d   : > { %v8856_v27 = vpop.xlane.xlu0 %8855 }
0x171e   : > { %v8859_v58 = vsub.f32 %v8847_v3, %v8857_v40  ;;  %v8858_v57 = vmul.f32 0.0078125, %v8856_v27 }
0x1720   : > { %v8860_v8 = vsub.f32 %v8848_v4, %v8858_v57  ;;  %v8861_v61 = vmul.f32 %v8859_v58, %v8859_v58 }
0x1722   : > { %8863 = vadd.xlane.f32.xlu1 %v8861_v61  ;;  %v8862_v52 = vmul.f32 %v8860_v8, %v8860_v8 }
0x1724   : > { %8865 = vadd.xlane.f32.xlu0 %v8862_v52 }
0x1733   : > { %8896 = vperm.xlu1 %10699, %v8893_v17  }
0x17af   : > { %v8864_v51 = vpop.xlane.xlu1 %8863 }
0x17b0   : > { %v8867_v2 = vmul.f32 0.0078125, %v8864_v51 }
0x17b1   : > { %v8866_v47 = vpop.xlane.xlu0 %8865 }
0x17b2   : > { %v8869_v14 = vadd.f32 1e-05, %v8867_v2  ;;  %v8868_v26 = vmul.f32 0.0078125, %v8866_v47 }
0x17b3   : > { %v8897_v7 = vpop.permute.xlu1 %8896 }
0x17b4   : > { %11177 = vrsqrt.f32 %v8869_v14  ;;  %v8870_v63 = vadd.f32 1e-05, %v8868_v26  ;;  %v8902_v22 = vrot.slane %v8897_v7, %v11959_v32 }
0x17b6   : > { %11179 = vrsqrt.f32 %v8870_v63 }
0x17be   : > { %v11178_v62 = vpop.eup %11177 }
0x17bf   : > { %v8873_v60 = vmul.f32 %v11178_v62, %v8859_v58 }
0x17c0   : > { %v11180_v42 = vpop.eup %11179 }
0x17c1   : > { %v8874_v33 = vmul.f32 %v11180_v42, %v8860_v8  ;;  %v8881_v31 = vmul.f32 %v9753_v5, %v8873_v60 }
0x17c3   : > { %v8882_v50 = vmul.f32 %v9753_v5, %v8874_v33  ;;  %v8889_v45 = vadd.f32 %v9754_v43, %v8881_v31 }
0x17c5   : > { %v8890_v49 = vadd.f32 %v9754_v43, %v8882_v50 }
0x17c7   : > { %v8892_v19 = vpack.c.bf16 %v8890_v49, %v8889_v45 }
0x17c9   : > { %10486 = vmatpush3.bf16.xpose.msra.mxu1 %v8892_v19 }
0x17d0   : > { %10488 = vmatmul.mubr.bf16.vlgmr.msra.gmra.mrb[148].mxu1 %v8891_v34 }
0x18a3   : > { %v8937_v56 = vpop.f32.mrb[148].mxu1 }
0x18a4   : > { %v10489_v10 = vpop.f32.mrb[149].mxu1  ;;  %v8938_v23 = vadd.f32 %v8937_v56, %v8902_v22 }
0x18a5   : > { %v8940_v39 = vpop.f32.mrb[150].mxu1 }
0x18a6   : > { %v8943_v30 = vsub.f32 0.0, %v8938_v23  ;;  %v10490_v11 = vpop.f32.mrb[151].mxu1 }
0x18a8   : > { %v8944_v24 = vmul.f32 1.442695, %v8943_v30 }
0x18aa   : > { %11181 = vpow2.f32 %v8944_v24 }
0x18b4   : > { %v11182_v13 = vpop.eup %11181 }
0x18b5   : > { %v8946_v18 = vadd.f32 1.0, %v11182_v13 }
0x18b7   : > { %11183 = vrcp.f32 %v8946_v18 }
0x18c1   : > { %v11184_v32 = vpop.eup %11183 }
0x18c2   : > { %8950 = vst.msk [vmem:[%s653_s20] sm:$0x1] %vm8949_vm8, %v11184_v32 }
0x18c3   : > { %11427 = shalt.err (!%p11424_p4)
}
0x18c4   : > { %s11428_s17 = scalar_lea.hbm %s12803_s11, 16  ;;  %s11432_s3 = scalar_lea.hbm %s12926_s2, 32 }
0x18c5   : > { %p11429_p3 = scmp.ne.s32.totalorder %s12803_s11, %s11428_s17  ;;  %p11433_p6 = scmp.lt.u32.totalorder %s12803_s11, %s12926_s2 }
0x18c6   : > { %p11434_p5 = scmp.lt.u32.totalorder %s11432_s3, %s11428_s17  ;;  %p11436_p1 = scmp.lt.u32.totalorder %s11428_s17, %s12803_s11 }
0x18c7   : > { %p11430_p0 = pnand %p11429_p3, %p12927_p11 }
0x18c8   : > { %p11435_p10 = por %p11434_p5, %p11433_p6 }
0x18c9   : > { %p11431_p2 = pneg %p11430_p0 }
0x18ca   : > { %p11437_p12 = por %p11436_p1, %p11435_p10 }
0x18cc   : > { %p11438_p13 = pnand %p11437_p12, %p11431_p2 }
0x18ce   : > { %11441 = shalt.err (!%p11438_p13)
}
0x18cf   : > { %10521 = dma.vmem_to_hbm [thread:$0]  (%p12927_p11), %s12805_s21, 16, %s12803_s11, %s8952_s14  }
0x18d0 PF: > { %s8976_s1 = sand.u32 1, %s11484_s23   ;;  %p12928_p8 = scmp.ne.s32.totalorder %s12906_s22, 0 }
0x18d1   : > { %p12929_p7 = scmp.ge.s32.totalorder %s11496_s26, 2  ;;  %s8977_s27 = scalar_lea.sflag [#allocation5], %s8976_s1 }
0x18d3   : > { %p10550_p9 = pnand %p12929_p7, %p12928_p8 }
0x18d5   : > { %11479 = dma.done.wait (!%p10550_p9), %s8977_s27, 16  }
0x18d6   : > { %11481 = vsyncadd (!%p10550_p9), %s8977_s27, 4294967280  ;;  %p35_p4 = scmp.ge.s32.totalorder %s11830_s15, 4   ;;  %s12930_s23 = smov %s11488_s24 }
0x18d7   : > { %s12931_s24 = smov %s11492_s25  ;;  %s12932_s25 = smov %s11841_s13 }
0x18d8   : > { %s12933_s26 = smov %s11830_s15  ;;  %37 = sbr.rel (!%p35_p4) target bundleno = 19 (0x13), region = 172 }
0x18df   :  { %8981 = vsyncpa [#allocation4], 1 }
0x18e0   :  { %8983 = vsyncpa [#allocation4 + $0x1], 1 }
0x18e1   :  { %8984 = vsyncpa [#allocation7], 1 }
0x18e2   :  { %8985 = vsyncpa [#allocation10], 1 }
0x18e3   :  { %8986 = vsyncpa [#allocation13], 1 }
0x18e4   :  { %8987 = vsyncpa [#allocation16], 1 }
0x18e5   :  { %8988 = vsyncpa [#allocation5], 1 }
0x18e6   :  { %8990 = vsyncpa [#allocation5 + $0x1], 1 }

</bundles_post_ra>
